<compile_context>
chip_gen: v7x
topology: tpu7x:2x2x1
jax: 0.10.0
libtpu: 0.0.40
codegen_flags: <defaults>
</compile_context>

<pallas_src>
import functools

import jax
import jax.numpy as jnp
from jax.experimental import pallas as pl
from jax.experimental.pallas import tpu as pltpu


def _round_up(x, m):
    return ((x + m - 1) // m) * m


_VMEM_LIMIT = 32 * 1024 * 1024   # = scoped default on v6e/v7x, safe raise on v5e


# ----------------------------------------------------------------------------
# Kernel 1: fused 3x3x3 conv, stride 1, padding 1.
#   x{kd}_ref : (Cin, L_in)  bf16  -- padded depth-plane d+kd, H*W flattened
#   w_ref     : (27, Cout, Cin) bf16
#   b_ref     : (Cout, 1) f32
#   o_ref     : (Cout, L_out)      -- padded-width plane, garbage cols sliced
#                                     off in the wrapper
# ----------------------------------------------------------------------------
def _conv_s1_kernel(x0_ref, x1_ref, x2_ref, w_ref, b_ref, o_ref, *,
                    wp, l_out, neg_slope):
    planes = (x0_ref, x1_ref, x2_ref)
    cout = o_ref.shape[0]
    acc = jnp.zeros((cout, l_out), jnp.float32)
    for kd in range(3):
        xplane = planes[kd]
        for kh in range(3):
            for kw in range(3):
                t = (kd * 3 + kh) * 3 + kw
                off = kh * wp + kw
                acc = acc + jnp.dot(w_ref[t], xplane[:, off:off + l_out],
                                    preferred_element_type=jnp.float32)
    acc = acc + b_ref[...]
    if neg_slope is not None:
        acc = jnp.where(acc >= 0, acc, jnp.float32(neg_slope) * acc)
    o_ref[...] = acc.astype(o_ref.dtype)


def conv3d_k3_s1(x, w, b, neg_slope=0.2):
    """x: (N, D, C, H, W); w: (Cout, Cin, 3, 3, 3) torch layout; b: (Cout,)."""
    N, D, C, H, W = x.shape
    Cout = w.shape[0]
    Dp, Hp, Wp = D + 2, H + 2, W + 2
    l_out = _round_up(H * Wp, 128)               # lane-dense output width
    l_in = _round_up(l_out + 2 * Wp + 2, 128)    # slack for max tap offset

    xp = jnp.pad(x.astype(jnp.bfloat16),
                 ((0, 0), (1, 1), (0, 0), (1, 1), (1, 1)))
    xp = xp.reshape(N, Dp, C, Hp * Wp)
    xp = jnp.pad(xp, ((0, 0), (0, 0), (0, 0), (0, l_in - Hp * Wp)))

    w27 = jnp.transpose(w, (2, 3, 4, 0, 1)).reshape(27, Cout, C)
    w27 = w27.astype(jnp.bfloat16)
    b2 = b.reshape(Cout, 1).astype(jnp.float32)

    def plane_spec(kd):
        return pl.BlockSpec((None, None, C, l_in),
                            lambda n, d, _kd=kd: (n, d + _kd, 0, 0))

    kern = functools.partial(_conv_s1_kernel, wp=Wp, l_out=l_out,
                             neg_slope=neg_slope)
    flops = 2 * N * D * 27 * C * Cout * l_out
    bytes_acc = 3 * N * D * C * l_in * 2 + N * D * Cout * l_out * 2 + w27.size * 2
    out = pl.pallas_call(
        kern,
        out_shape=jax.ShapeDtypeStruct((N, D, Cout, l_out), jnp.bfloat16),
        grid_spec=pltpu.PrefetchScalarGridSpec(
            num_scalar_prefetch=0,
            grid=(N, D),
            in_specs=[
                plane_spec(0), plane_spec(1), plane_spec(2),
                pl.BlockSpec((27, Cout, C), lambda n, d: (0, 0, 0)),
                pl.BlockSpec((Cout, 1), lambda n, d: (0, 0)),
            ],
            out_specs=pl.BlockSpec((None, None, Cout, l_out),
                                   lambda n, d: (n, d, 0, 0)),
        ),
        compiler_params=pltpu.CompilerParams(
            dimension_semantics=("parallel", "parallel"),
            vmem_limit_bytes=_VMEM_LIMIT),
        cost_estimate=pl.CostEstimate(flops=flops, transcendentals=0,
                                      bytes_accessed=bytes_acc),
    )(xp, xp, xp, w27, b2)

    out = out[..., :H * Wp].reshape(N, D, Cout, H, Wp)[..., :W]
    return out


# ----------------------------------------------------------------------------
# Kernel 2: fused 3x3x3 conv, stride 2, padding 1, via 8-way parity planes.
#   x{od}_ref : (8, Cin, L_in) bf16 -- parity planes at half-depth d+od
#   w_ref     : (27, Cout, Cin) bf16 ; b_ref: (Cout, 1) f32
#   o_ref     : (Cout, L_out)
# ----------------------------------------------------------------------------
def _conv_s2_kernel(x0_ref, x1_ref, w_ref, b_ref, o_ref, *,
                    wh, l_out, neg_slope):
    cout = o_ref.shape[0]
    acc = jnp.zeros((cout, l_out), jnp.float32)
    for kd in range(3):
        xref = x0_ref if kd < 2 else x1_ref          # half-depth index d + kd//2
        for kh in range(3):
            for kw in range(3):
                t = (kd * 3 + kh) * 3 + kw
                p = (kd % 2) * 4 + (kh % 2) * 2 + (kw % 2)
                off = (kh // 2) * wh + (kw // 2)
                acc = acc + jnp.dot(w_ref[t], xref[p, :, off:off + l_out],
                                    preferred_element_type=jnp.float32)
    acc = acc + b_ref[...]
    if neg_slope is not None:
        acc = jnp.where(acc >= 0, acc, jnp.float32(neg_slope) * acc)
    o_ref[...] = acc.astype(o_ref.dtype)


def conv3d_k3_s2(x, w, b, neg_slope=0.2):
    """Stride-2 3x3x3 conv, padding 1, on (N, D, C, H, W)."""
    N, D, C, H, W = x.shape
    assert D % 2 == 0 and H % 2 == 0 and W % 2 == 0, "stride-2 conv needs even dims"
    Cout = w.shape[0]
    Do, Ho, Wo = D // 2, H // 2, W // 2
    Dh, Hh, Wh = (D + 2) // 2, (H + 2) // 2, (W + 2) // 2
    l_out = _round_up(Ho * Wh, 128)
    l_in = _round_up(l_out + Wh + 1, 128)

    xpad = jnp.pad(x.astype(jnp.bfloat16),
                   ((0, 0), (1, 1), (0, 0), (1, 1), (1, 1)))
    parts = []
    for pd in range(2):
        for ph in range(2):
            for pw in range(2):
                parts.append(
                    xpad[:, pd::2, :, ph::2, pw::2].reshape(N, Dh, C, Hh * Wh))
    xpar = jnp.stack(parts, axis=2)                       # (N, Dh, 8, C, Hh*Wh)
    xpar = jnp.pad(xpar, ((0, 0), (0, 0), (0, 0), (0, 0),
                          (0, l_in - Hh * Wh)))

    w27 = jnp.transpose(w, (2, 3, 4, 0, 1)).reshape(27, Cout, C)
    w27 = w27.astype(jnp.bfloat16)
    b2 = b.reshape(Cout, 1).astype(jnp.float32)

    def par_spec(od):
        return pl.BlockSpec((None, None, 8, C, l_in),
                            lambda n, d, _od=od: (n, d + _od, 0, 0, 0))

    kern = functools.partial(_conv_s2_kernel, wh=Wh, l_out=l_out,
                             neg_slope=neg_slope)
    flops = 2 * N * Do * 27 * C * Cout * l_out
    bytes_acc = 2 * N * Do * 8 * C * l_in * 2 + N * Do * Cout * l_out * 2
    out = pl.pallas_call(
        kern,
        out_shape=jax.ShapeDtypeStruct((N, Do, Cout, l_out), jnp.bfloat16),
        grid_spec=pltpu.PrefetchScalarGridSpec(
            num_scalar_prefetch=0,
            grid=(N, Do),
            in_specs=[
                par_spec(0), par_spec(1),
                pl.BlockSpec((27, Cout, C), lambda n, d: (0, 0, 0)),
                pl.BlockSpec((Cout, 1), lambda n, d: (0, 0)),
            ],
            out_specs=pl.BlockSpec((None, None, Cout, l_out),
                                   lambda n, d: (n, d, 0, 0)),
        ),
        compiler_params=pltpu.CompilerParams(
            dimension_semantics=("parallel", "parallel"),
            vmem_limit_bytes=_VMEM_LIMIT),
        cost_estimate=pl.CostEstimate(flops=flops, transcendentals=0,
                                      bytes_accessed=bytes_acc),
    )(xpar, xpar, w27, b2)

    out = out[..., :Ho * Wh].reshape(N, Do, Cout, Ho, Wh)[..., :Wo]
    return out


# ----------------------------------------------------------------------------
# Kernel 3: 1x1x1 conv (lastconv_dn*), no activation.
# ----------------------------------------------------------------------------
def _conv_1x1_kernel(x_ref, w_ref, b_ref, o_ref):
    acc = jnp.dot(w_ref[...], x_ref[...], preferred_element_type=jnp.float32)
    acc = acc + b_ref[...]
    o_ref[...] = acc.astype(o_ref.dtype)


def conv3d_1x1(x, w, b):
    N, D, C, H, W = x.shape
    Cout = w.shape[0]
    hw = H * W
    xr = x.astype(jnp.bfloat16).reshape(N * D, C, hw)
    w2 = w.reshape(Cout, C).astype(jnp.bfloat16)
    b2 = b.reshape(Cout, 1).astype(jnp.float32)
    out = pl.pallas_call(
        _conv_1x1_kernel,
        out_shape=jax.ShapeDtypeStruct((N * D, Cout, hw), jnp.float32),
        grid_spec=pltpu.PrefetchScalarGridSpec(
            num_scalar_prefetch=0,
            grid=(N * D,),
            in_specs=[
                pl.BlockSpec((None, C, hw), lambda i: (i, 0, 0)),
                pl.BlockSpec((Cout, C), lambda i: (0, 0)),
                pl.BlockSpec((Cout, 1), lambda i: (0, 0)),
            ],
            out_specs=pl.BlockSpec((None, Cout, hw), lambda i: (i, 0, 0)),
        ),
        compiler_params=pltpu.CompilerParams(
            dimension_semantics=("parallel",),
            vmem_limit_bytes=_VMEM_LIMIT),
    )(xr, w2, b2)
    return out.reshape(N, D, Cout, H, W)


# ----------------------------------------------------------------------------
# Glue ops (plain JAX).
# ----------------------------------------------------------------------------
def upsample_nearest2(x):
    """nn.Upsample(scale_factor=2, mode='nearest') on (N, D, C, H, W)."""
    # TODO(synk): fuse upsample + skip-concat into the following conv's plane
    # gather to avoid materializing the 8x tensor in HBM.
    x = jnp.repeat(x, 2, axis=1)
    x = jnp.repeat(x, 2, axis=3)
    x = jnp.repeat(x, 2, axis=4)
    return x


# ----------------------------------------------------------------------------
# Parameter initialization (deterministic, mirrors nn.Conv3d shapes).
# ----------------------------------------------------------------------------
def init_conv3d(key, cin, cout, k=3):
    kw, kb = jax.random.split(key)
    fan_in = cin * k * k * k
    bound = 1.0 / (fan_in ** 0.5)
    w = jax.random.uniform(kw, (cout, cin, k, k, k), jnp.float32, -bound, bound)
    b = jax.random.uniform(kb, (cout,), jnp.float32, -bound, bound)
    return w, b


def init_params(key, enc_nf, dec_nf_dn, dec_nf_motion):
    keys = iter(jax.random.split(key, 128))
    p = {}
    for arm in ("downarm_dn1", "downarm_dn2"):
        prev, layers = 1, []
        for nf in enc_nf:
            layers.append(init_conv3d(next(keys), prev, nf, 3))
            prev = nf
        p[arm] = layers
    enc_hist = list(reversed(enc_nf))
    for arm in ("uparm_dn1", "uparm_dn2"):
        prev, layers = enc_nf[-1], []
        for i, nf in enumerate(dec_nf_dn[:len(enc_nf)]):
            cin = prev + enc_hist[i] if i > 0 else prev
            layers.append(init_conv3d(next(keys), cin, nf, 3))
            prev = nf
        p[arm] = layers
    last_in = dec_nf_dn[:len(enc_nf)][-1] + 1
    p["lastconv_dn1"] = init_conv3d(next(keys), last_in, 1, 1)
    p["lastconv_dn2"] = init_conv3d(next(keys), last_in, 1, 1)
    dec_hist = list(dec_nf_dn)
    layers, prev = [], None
    for i, nf in enumerate(dec_nf_motion[:len(dec_nf_dn)]):
        layers.append(init_conv3d(next(keys), dec_hist[i], nf, 3))
        prev = nf
    p["uparm_motion"] = layers
    layers = []
    for nf in dec_nf_motion[len(enc_nf):]:
        layers.append(init_conv3d(next(keys), prev, nf, 3))
        prev = nf
    p["extras"] = layers
    return p


# ----------------------------------------------------------------------------
# Forward pass (mirrors DPConvLSTMnet.forward, use_lstm=False branch).
# ----------------------------------------------------------------------------
def dpconvlstm_forward(params, x_mov, x_fix):
    B, T = x_mov.shape[0], x_mov.shape[1]

    def to_internal(x):      # (B,T,C,D,H,W) -> (B*T, D, C, H, W)
        s = x.shape
        x = x.reshape((s[0] * s[1],) + s[2:])
        return jnp.transpose(x, (0, 2, 1, 3, 4))

    def from_internal(y):    # (B*T, D, C, H, W) -> (B,T,C,D,H,W) f32
        N, D, C, H, W = y.shape
        y = jnp.transpose(y, (0, 2, 1, 3, 4)).reshape(B, T, C, D, H, W)
        return y.astype(jnp.float32)

    def conv_block(x, wb, stride):   # ConvBlock = Conv3d(k3,p1) + LeakyReLU(0.2)
        w, b = wb
        if stride == 2:
            return conv3d_k3_s2(x, w, b, neg_slope=0.2)
        return conv3d_k3_s1(x, w, b, neg_slope=0.2)

    xm, xf = to_internal(x_mov), to_internal(x_fix)

    x_enc_dn1 = [xm]
    for wb in params["downarm_dn1"]:
        x_enc_dn1.append(conv_block(x_enc_dn1[-1], wb, 2))
    x_enc_dn2 = [xf]
    for wb in params["downarm_dn2"]:
        x_enc_dn2.append(conv_block(x_enc_dn2[-1], wb, 2))

    x_dn1 = x_enc_dn1.pop()
    x_dec_dn1_motion = []
    for wb in params["uparm_dn1"]:
        x_dn1 = conv_block(x_dn1, wb, 1)
        x_dec_dn1_motion.append(x_dn1)
        x_dn1 = upsample_nearest2(x_dn1)
        skip = x_enc_dn1.pop()
        x_dn1 = jnp.concatenate([x_dn1, skip.astype(x_dn1.dtype)], axis=2)
    x_dn1 = conv3d_1x1(x_dn1, *params["lastconv_dn1"])

    x_dn2 = x_enc_dn2.pop()
    x_dec_dn2_motion = []
    for wb in params["uparm_dn2"]:
        x_dn2 = conv_block(x_dn2, wb, 1)
        x_dec_dn2_motion.append(x_dn2)
        x_dn2 = upsample_nearest2(x_dn2)
        skip = x_enc_dn2.pop()
        x_dn2 = jnp.concatenate([x_dn2, skip.astype(x_dn2.dtype)], axis=2)
    x_dn2 = conv3d_1x1(x_dn2, *params["lastconv_dn2"])

    x_dec_dn1_motion.reverse()
    x_dec_dn2_motion.reverse()
    x_motion = x_dec_dn1_motion.pop() + x_dec_dn2_motion.pop()
    n_motion = len(params["uparm_motion"])
    for i, wb in enumerate(params["uparm_motion"]):
        x_motion = conv_block(x_motion, wb, 1)
        x_motion = upsample_nearest2(x_motion)
        if i < n_motion - 1:
            x_motion = x_motion + x_dec_dn1_motion.pop() + x_dec_dn2_motion.pop()
    for wb in params["extras"]:
        x_motion = conv_block(x_motion, wb, 1)

    # TODO(synk): Conv3dLSTM class source is not provided in the reference;
    # this implements the use_lstm=False branch of DPConvLSTMnet.forward.
    return from_internal(x_motion), from_internal(x_dn1), from_internal(x_dn2)


# ----------------------------------------------------------------------------
if __name__ == "__main__":
    key = jax.random.PRNGKey(0)
    B, T, S = 2, 2, 8                          # (B, T, 1, S, S, S) inputs
    enc_nf = [4, 8]                            # small stand-in for [16,32,32,32]
    dec_nf_dn = [8, 4]                         # small stand-in for [32,32,32,16,1]
    dec_nf_motion = [4, 8, 4]                  # small stand-in for [32,...,16,16]

    pkey, k1, k2 = jax.random.split(key, 3)
    params = init_params(pkey, enc_nf, dec_nf_dn, dec_nf_motion)
    x_mov = jax.random.normal(k1, (B, T, 1, S, S, S), jnp.float32)
    x_fix = jax.random.normal(k2, (B, T, 1, S, S, S), jnp.float32)

    fwd = jax.jit(dpconvlstm_forward)
    x_motion, x_dn1, x_dn2 = fwd(params, x_mov, x_fix)
    jax.block_until_ready(x_motion)
    jax.block_until_ready(x_dn1)
    jax.block_until_ready(x_dn2)

    assert x_motion.shape == (B, T, dec_nf_motion[-1], S, S, S), x_motion.shape
    assert x_dn1.shape == (B, T, 1, S, S, S), x_dn1.shape
    assert x_dn2.shape == (B, T, 1, S, S, S), x_dn2.shape
    assert x_motion.dtype == jnp.float32
    print("KERNEL_OK")
</pallas_src>

<mosaic_0001>
module attributes {stable_mosaic.version = 11 : i64} {
  func.func @_conv_s2_kernel(%arg0: i32, %arg1: i32, %arg2: memref<1x1x8x1x256xbf16, #tpu.memory_space<vmem>>, %arg3: memref<1x1x8x1x256xbf16, #tpu.memory_space<vmem>>, %arg4: memref<27x4x1xbf16, #tpu.memory_space<vmem>>, %arg5: memref<4x1xf32, #tpu.memory_space<vmem>>, %arg6: memref<1x1x4x128xbf16, #tpu.memory_space<vmem>>) attributes {dimension_semantics = [#tpu.dimension_semantics<parallel>, #tpu.dimension_semantics<parallel>], iteration_bounds = array<i64: 4, 4>, scalar_prefetch = 0 : i64, scratch_operands = 0 : i64, tpu.core_type = #tpu.core_type<tc>, window_params = [{transform_indices = @transform_0, window_bounds = array<i64: 1, 1, 8, 1, 256>}, {transform_indices = @transform_1, window_bounds = array<i64: 1, 1, 8, 1, 256>}, {pipeline_mode = #tpu.pipeline_mode<synchronous>, transform_indices = @transform_2, window_bounds = array<i64: 27, 4, 1>}, {pipeline_mode = #tpu.pipeline_mode<synchronous>, transform_indices = @transform_3, window_bounds = array<i64: 4, 1>}, {transform_indices = @transform_4, window_bounds = array<i64: 1, 1, 4, 128>}]} {
    %cst = arith.constant 0.000000e+00 : f32
    %0 = vector.broadcast %cst : f32 to vector<4x128xf32>
    %c0 = arith.constant 0 : index
    %c0_0 = arith.constant 0 : index
    %c0_1 = arith.constant 0 : index
    %1 = vector.load %arg4[%c0, %c0_0, %c0_1] : memref<27x4x1xbf16, #tpu.memory_space<vmem>>, vector<1x4x1xbf16>
    %2 = vector.shape_cast %1 : vector<1x4x1xbf16> to vector<4x1xbf16>
    %c0_2 = arith.constant 0 : index
    %c0_3 = arith.constant 0 : index
    %c0_4 = arith.constant 0 : index
    %c0_5 = arith.constant 0 : index
    %c0_6 = arith.constant 0 : index
    %3 = vector.load %arg2[%c0_2, %c0_3, %c0_4, %c0_5, %c0_6] : memref<1x1x8x1x256xbf16, #tpu.memory_space<vmem>>, vector<1x1x1x1x128xbf16>
    %4 = vector.shape_cast %3 : vector<1x1x1x1x128xbf16> to vector<1x128xbf16>
    %cst_7 = arith.constant dense<0.000000e+00> : vector<4x128xf32>
    %5 = tpu.matmul %2, %4, %cst_7 {dimension_numbers = #tpu.dot_dimension_numbers<[1], [0], [0], [1], [0, 0, 1, 1], [], []>} : vector<4x1xbf16>, vector<1x128xbf16>, vector<4x128xf32> -> vector<4x128xf32>
    %6 = arith.addf %0, %5 : vector<4x128xf32>
    %c1 = arith.constant 1 : index
    %c0_8 = arith.constant 0 : index
    %c0_9 = arith.constant 0 : index
    %7 = vector.load %arg4[%c1, %c0_8, %c0_9] : memref<27x4x1xbf16, #tpu.memory_space<vmem>>, vector<1x4x1xbf16>
    %8 = vector.shape_cast %7 : vector<1x4x1xbf16> to vector<4x1xbf16>
    %c0_10 = arith.constant 0 : index
    %c0_11 = arith.constant 0 : index
    %c1_12 = arith.constant 1 : index
    %c0_13 = arith.constant 0 : index
    %c0_14 = arith.constant 0 : index
    %9 = vector.load %arg2[%c0_10, %c0_11, %c1_12, %c0_13, %c0_14] : memref<1x1x8x1x256xbf16, #tpu.memory_space<vmem>>, vector<1x1x1x1x128xbf16>
    %10 = vector.shape_cast %9 : vector<1x1x1x1x128xbf16> to vector<1x128xbf16>
    %cst_15 = arith.constant dense<0.000000e+00> : vector<4x128xf32>
    %11 = tpu.matmul %8, %10, %cst_15 {dimension_numbers = #tpu.dot_dimension_numbers<[1], [0], [0], [1], [0, 0, 1, 1], [], []>} : vector<4x1xbf16>, vector<1x128xbf16>, vector<4x128xf32> -> vector<4x128xf32>
    %12 = arith.addf %6, %11 : vector<4x128xf32>
    %c2 = arith.constant 2 : index
    %c0_16 = arith.constant 0 : index
    %c0_17 = arith.constant 0 : index
    %13 = vector.load %arg4[%c2, %c0_16, %c0_17] : memref<27x4x1xbf16, #tpu.memory_space<vmem>>, vector<1x4x1xbf16>
    %14 = vector.shape_cast %13 : vector<1x4x1xbf16> to vector<4x1xbf16>
    %c0_18 = arith.constant 0 : index
    %c0_19 = arith.constant 0 : index
    %c0_20 = arith.constant 0 : index
    %c0_21 = arith.constant 0 : index
    %c1_22 = arith.constant 1 : index
    %15 = vector.load %arg2[%c0_18, %c0_19, %c0_20, %c0_21, %c1_22] : memref<1x1x8x1x256xbf16, #tpu.memory_space<vmem>>, vector<1x1x1x1x128xbf16>
    %16 = vector.shape_cast %15 : vector<1x1x1x1x128xbf16> to vector<1x128xbf16>
    %cst_23 = arith.constant dense<0.000000e+00> : vector<4x128xf32>
    %17 = tpu.matmul %14, %16, %cst_23 {dimension_numbers = #tpu.dot_dimension_numbers<[1], [0], [0], [1], [0, 0, 1, 1], [], []>} : vector<4x1xbf16>, vector<1x128xbf16>, vector<4x128xf32> -> vector<4x128xf32>
    %18 = arith.addf %12, %17 : vector<4x128xf32>
    %c3 = arith.constant 3 : index
    %c0_24 = arith.constant 0 : index
    %c0_25 = arith.constant 0 : index
    %19 = vector.load %arg4[%c3, %c0_24, %c0_25] : memref<27x4x1xbf16, #tpu.memory_space<vmem>>, vector<1x4x1xbf16>
    %20 = vector.shape_cast %19 : vector<1x4x1xbf16> to vector<4x1xbf16>
    %c0_26 = arith.constant 0 : index
    %c0_27 = arith.constant 0 : index
    %c2_28 = arith.constant 2 : index
    %c0_29 = arith.constant 0 : index
    %c0_30 = arith.constant 0 : index
    %21 = vector.load %arg2[%c0_26, %c0_27, %c2_28, %c0_29, %c0_30] : memref<1x1x8x1x256xbf16, #tpu.memory_space<vmem>>, vector<1x1x1x1x128xbf16>
    %22 = vector.shape_cast %21 : vector<1x1x1x1x128xbf16> to vector<1x128xbf16>
    %cst_31 = arith.constant dense<0.000000e+00> : vector<4x128xf32>
    %23 = tpu.matmul %20, %22, %cst_31 {dimension_numbers = #tpu.dot_dimension_numbers<[1], [0], [0], [1], [0, 0, 1, 1], [], []>} : vector<4x1xbf16>, vector<1x128xbf16>, vector<4x128xf32> -> vector<4x128xf32>
    %24 = arith.addf %18, %23 : vector<4x128xf32>
    %c4 = arith.constant 4 : index
    %c0_32 = arith.constant 0 : index
    %c0_33 = arith.constant 0 : index
    %25 = vector.load %arg4[%c4, %c0_32, %c0_33] : memref<27x4x1xbf16, #tpu.memory_space<vmem>>, vector<1x4x1xbf16>
    %26 = vector.shape_cast %25 : vector<1x4x1xbf16> to vector<4x1xbf16>
    %c0_34 = arith.constant 0 : index
    %c0_35 = arith.constant 0 : index
    %c3_36 = arith.constant 3 : index
    %c0_37 = arith.constant 0 : index
    %c0_38 = arith.constant 0 : index
    %27 = vector.load %arg2[%c0_34, %c0_35, %c3_36, %c0_37, %c0_38] : memref<1x1x8x1x256xbf16, #tpu.memory_space<vmem>>, vector<1x1x1x1x128xbf16>
    %28 = vector.shape_cast %27 : vector<1x1x1x1x128xbf16> to vector<1x128xbf16>
    %cst_39 = arith.constant dense<0.000000e+00> : vector<4x128xf32>
    %29 = tpu.matmul %26, %28, %cst_39 {dimension_numbers = #tpu.dot_dimension_numbers<[1], [0], [0], [1], [0, 0, 1, 1], [], []>} : vector<4x1xbf16>, vector<1x128xbf16>, vector<4x128xf32> -> vector<4x128xf32>
    %30 = arith.addf %24, %29 : vector<4x128xf32>
    %c5 = arith.constant 5 : index
    %c0_40 = arith.constant 0 : index
    %c0_41 = arith.constant 0 : index
    %31 = vector.load %arg4[%c5, %c0_40, %c0_41] : memref<27x4x1xbf16, #tpu.memory_space<vmem>>, vector<1x4x1xbf16>
    %32 = vector.shape_cast %31 : vector<1x4x1xbf16> to vector<4x1xbf16>
    %c0_42 = arith.constant 0 : index
    %c0_43 = arith.constant 0 : index
    %c2_44 = arith.constant 2 : index
    %c0_45 = arith.constant 0 : index
    %c1_46 = arith.constant 1 : index
    %33 = vector.load %arg2[%c0_42, %c0_43, %c2_44, %c0_45, %c1_46] : memref<1x1x8x1x256xbf16, #tpu.memory_space<vmem>>, vector<1x1x1x1x128xbf16>
    %34 = vector.shape_cast %33 : vector<1x1x1x1x128xbf16> to vector<1x128xbf16>
    %cst_47 = arith.constant dense<0.000000e+00> : vector<4x128xf32>
    %35 = tpu.matmul %32, %34, %cst_47 {dimension_numbers = #tpu.dot_dimension_numbers<[1], [0], [0], [1], [0, 0, 1, 1], [], []>} : vector<4x1xbf16>, vector<1x128xbf16>, vector<4x128xf32> -> vector<4x128xf32>
    %36 = arith.addf %30, %35 : vector<4x128xf32>
    %c6 = arith.constant 6 : index
    %c0_48 = arith.constant 0 : index
    %c0_49 = arith.constant 0 : index
    %37 = vector.load %arg4[%c6, %c0_48, %c0_49] : memref<27x4x1xbf16, #tpu.memory_space<vmem>>, vector<1x4x1xbf16>
    %38 = vector.shape_cast %37 : vector<1x4x1xbf16> to vector<4x1xbf16>
    %c0_50 = arith.constant 0 : index
    %c0_51 = arith.constant 0 : index
    %c0_52 = arith.constant 0 : index
    %c0_53 = arith.constant 0 : index
    %c5_54 = arith.constant 5 : index
    %39 = vector.load %arg2[%c0_50, %c0_51, %c0_52, %c0_53, %c5_54] : memref<1x1x8x1x256xbf16, #tpu.memory_space<vmem>>, vector<1x1x1x1x128xbf16>
    %40 = vector.shape_cast %39 : vector<1x1x1x1x128xbf16> to vector<1x128xbf16>
    %cst_55 = arith.constant dense<0.000000e+00> : vector<4x128xf32>
    %41 = tpu.matmul %38, %40, %cst_55 {dimension_numbers = #tpu.dot_dimension_numbers<[1], [0], [0], [1], [0, 0, 1, 1], [], []>} : vector<4x1xbf16>, vector<1x128xbf16>, vector<4x128xf32> -> vector<4x128xf32>
    %42 = arith.addf %36, %41 : vector<4x128xf32>
    %c7 = arith.constant 7 : index
    %c0_56 = arith.constant 0 : index
    %c0_57 = arith.constant 0 : index
    %43 = vector.load %arg4[%c7, %c0_56, %c0_57] : memref<27x4x1xbf16, #tpu.memory_space<vmem>>, vector<1x4x1xbf16>
    %44 = vector.shape_cast %43 : vector<1x4x1xbf16> to vector<4x1xbf16>
    %c0_58 = arith.constant 0 : index
    %c0_59 = arith.constant 0 : index
    %c1_60 = arith.constant 1 : index
    %c0_61 = arith.constant 0 : index
    %c5_62 = arith.constant 5 : index
    %45 = vector.load %arg2[%c0_58, %c0_59, %c1_60, %c0_61, %c5_62] : memref<1x1x8x1x256xbf16, #tpu.memory_space<vmem>>, vector<1x1x1x1x128xbf16>
    %46 = vector.shape_cast %45 : vector<1x1x1x1x128xbf16> to vector<1x128xbf16>
    %cst_63 = arith.constant dense<0.000000e+00> : vector<4x128xf32>
    %47 = tpu.matmul %44, %46, %cst_63 {dimension_numbers = #tpu.dot_dimension_numbers<[1], [0], [0], [1], [0, 0, 1, 1], [], []>} : vector<4x1xbf16>, vector<1x128xbf16>, vector<4x128xf32> -> vector<4x128xf32>
    %48 = arith.addf %42, %47 : vector<4x128xf32>
    %c8 = arith.constant 8 : index
    %c0_64 = arith.constant 0 : index
    %c0_65 = arith.constant 0 : index
    %49 = vector.load %arg4[%c8, %c0_64, %c0_65] : memref<27x4x1xbf16, #tpu.memory_space<vmem>>, vector<1x4x1xbf16>
    %50 = vector.shape_cast %49 : vector<1x4x1xbf16> to vector<4x1xbf16>
    %c0_66 = arith.constant 0 : index
    %c0_67 = arith.constant 0 : index
    %c0_68 = arith.constant 0 : index
    %c0_69 = arith.constant 0 : index
    %c6_70 = arith.constant 6 : index
    %51 = vector.load %arg2[%c0_66, %c0_67, %c0_68, %c0_69, %c6_70] : memref<1x1x8x1x256xbf16, #tpu.memory_space<vmem>>, vector<1x1x1x1x128xbf16>
    %52 = vector.shape_cast %51 : vector<1x1x1x1x128xbf16> to vector<1x128xbf16>
    %cst_71 = arith.constant dense<0.000000e+00> : vector<4x128xf32>
    %53 = tpu.matmul %50, %52, %cst_71 {dimension_numbers = #tpu.dot_dimension_numbers<[1], [0], [0], [1], [0, 0, 1, 1], [], []>} : vector<4x1xbf16>, vector<1x128xbf16>, vector<4x128xf32> -> vector<4x128xf32>
    %54 = arith.addf %48, %53 : vector<4x128xf32>
    %c9 = arith.constant 9 : index
    %c0_72 = arith.constant 0 : index
    %c0_73 = arith.constant 0 : index
    %55 = vector.load %arg4[%c9, %c0_72, %c0_73] : memref<27x4x1xbf16, #tpu.memory_space<vmem>>, vector<1x4x1xbf16>
    %56 = vector.shape_cast %55 : vector<1x4x1xbf16> to vector<4x1xbf16>
    %c0_74 = arith.constant 0 : index
    %c0_75 = arith.constant 0 : index
    %c4_76 = arith.constant 4 : index
    %c0_77 = arith.constant 0 : index
    %c0_78 = arith.constant 0 : index
    %57 = vector.load %arg2[%c0_74, %c0_75, %c4_76, %c0_77, %c0_78] : memref<1x1x8x1x256xbf16, #tpu.memory_space<vmem>>, vector<1x1x1x1x128xbf16>
    %58 = vector.shape_cast %57 : vector<1x1x1x1x128xbf16> to vector<1x128xbf16>
    %cst_79 = arith.constant dense<0.000000e+00> : vector<4x128xf32>
    %59 = tpu.matmul %56, %58, %cst_79 {dimension_numbers = #tpu.dot_dimension_numbers<[1], [0], [0], [1], [0, 0, 1, 1], [], []>} : vector<4x1xbf16>, vector<1x128xbf16>, vector<4x128xf32> -> vector<4x128xf32>
    %60 = arith.addf %54, %59 : vector<4x128xf32>
    %c10 = arith.constant 10 : index
    %c0_80 = arith.constant 0 : index
    %c0_81 = arith.constant 0 : index
    %61 = vector.load %arg4[%c10, %c0_80, %c0_81] : memref<27x4x1xbf16, #tpu.memory_space<vmem>>, vector<1x4x1xbf16>
    %62 = vector.shape_cast %61 : vector<1x4x1xbf16> to vector<4x1xbf16>
    %c0_82 = arith.constant 0 : index
    %c0_83 = arith.constant 0 : index
    %c5_84 = arith.constant 5 : index
    %c0_85 = arith.constant 0 : index
    %c0_86 = arith.constant 0 : index
    %63 = vector.load %arg2[%c0_82, %c0_83, %c5_84, %c0_85, %c0_86] : memref<1x1x8x1x256xbf16, #tpu.memory_space<vmem>>, vector<1x1x1x1x128xbf16>
    %64 = vector.shape_cast %63 : vector<1x1x1x1x128xbf16> to vector<1x128xbf16>
    %cst_87 = arith.constant dense<0.000000e+00> : vector<4x128xf32>
    %65 = tpu.matmul %62, %64, %cst_87 {dimension_numbers = #tpu.dot_dimension_numbers<[1], [0], [0], [1], [0, 0, 1, 1], [], []>} : vector<4x1xbf16>, vector<1x128xbf16>, vector<4x128xf32> -> vector<4x128xf32>
    %66 = arith.addf %60, %65 : vector<4x128xf32>
    %c11 = arith.constant 11 : index
    %c0_88 = arith.constant 0 : index
    %c0_89 = arith.constant 0 : index
    %67 = vector.load %arg4[%c11, %c0_88, %c0_89] : memref<27x4x1xbf16, #tpu.memory_space<vmem>>, vector<1x4x1xbf16>
    %68 = vector.shape_cast %67 : vector<1x4x1xbf16> to vector<4x1xbf16>
    %c0_90 = arith.constant 0 : index
    %c0_91 = arith.constant 0 : index
    %c4_92 = arith.constant 4 : index
    %c0_93 = arith.constant 0 : index
    %c1_94 = arith.constant 1 : index
    %69 = vector.load %arg2[%c0_90, %c0_91, %c4_92, %c0_93, %c1_94] : memref<1x1x8x1x256xbf16, #tpu.memory_space<vmem>>, vector<1x1x1x1x128xbf16>
    %70 = vector.shape_cast %69 : vector<1x1x1x1x128xbf16> to vector<1x128xbf16>
    %cst_95 = arith.constant dense<0.000000e+00> : vector<4x128xf32>
    %71 = tpu.matmul %68, %70, %cst_95 {dimension_numbers = #tpu.dot_dimension_numbers<[1], [0], [0], [1], [0, 0, 1, 1], [], []>} : vector<4x1xbf16>, vector<1x128xbf16>, vector<4x128xf32> -> vector<4x128xf32>
    %72 = arith.addf %66, %71 : vector<4x128xf32>
    %c12 = arith.constant 12 : index
    %c0_96 = arith.constant 0 : index
    %c0_97 = arith.constant 0 : index
    %73 = vector.load %arg4[%c12, %c0_96, %c0_97] : memref<27x4x1xbf16, #tpu.memory_space<vmem>>, vector<1x4x1xbf16>
    %74 = vector.shape_cast %73 : vector<1x4x1xbf16> to vector<4x1xbf16>
    %c0_98 = arith.constant 0 : index
    %c0_99 = arith.constant 0 : index
    %c6_100 = arith.constant 6 : index
    %c0_101 = arith.constant 0 : index
    %c0_102 = arith.constant 0 : index
    %75 = vector.load %arg2[%c0_98, %c0_99, %c6_100, %c0_101, %c0_102] : memref<1x1x8x1x256xbf16, #tpu.memory_space<vmem>>, vector<1x1x1x1x128xbf16>
    %76 = vector.shape_cast %75 : vector<1x1x1x1x128xbf16> to vector<1x128xbf16>
    %cst_103 = arith.constant dense<0.000000e+00> : vector<4x128xf32>
    %77 = tpu.matmul %74, %76, %cst_103 {dimension_numbers = #tpu.dot_dimension_numbers<[1], [0], [0], [1], [0, 0, 1, 1], [], []>} : vector<4x1xbf16>, vector<1x128xbf16>, vector<4x128xf32> -> vector<4x128xf32>
    %78 = arith.addf %72, %77 : vector<4x128xf32>
    %c13 = arith.constant 13 : index
    %c0_104 = arith.constant 0 : index
    %c0_105 = arith.constant 0 : index
    %79 = vector.load %arg4[%c13, %c0_104, %c0_105] : memref<27x4x1xbf16, #tpu.memory_space<vmem>>, vector<1x4x1xbf16>
    %80 = vector.shape_cast %79 : vector<1x4x1xbf16> to vector<4x1xbf16>
    %c0_106 = arith.constant 0 : index
    %c0_107 = arith.constant 0 : index
    %c7_108 = arith.constant 7 : index
    %c0_109 = arith.constant 0 : index
    %c0_110 = arith.constant 0 : index
    %81 = vector.load %arg2[%c0_106, %c0_107, %c7_108, %c0_109, %c0_110] : memref<1x1x8x1x256xbf16, #tpu.memory_space<vmem>>, vector<1x1x1x1x128xbf16>
    %82 = vector.shape_cast %81 : vector<1x1x1x1x128xbf16> to vector<1x128xbf16>
    %cst_111 = arith.constant dense<0.000000e+00> : vector<4x128xf32>
    %83 = tpu.matmul %80, %82, %cst_111 {dimension_numbers = #tpu.dot_dimension_numbers<[1], [0], [0], [1], [0, 0, 1, 1], [], []>} : vector<4x1xbf16>, vector<1x128xbf16>, vector<4x128xf32> -> vector<4x128xf32>
    %84 = arith.addf %78, %83 : vector<4x128xf32>
    %c14 = arith.constant 14 : index
    %c0_112 = arith.constant 0 : index
    %c0_113 = arith.constant 0 : index
    %85 = vector.load %arg4[%c14, %c0_112, %c0_113] : memref<27x4x1xbf16, #tpu.memory_space<vmem>>, vector<1x4x1xbf16>
    %86 = vector.shape_cast %85 : vector<1x4x1xbf16> to vector<4x1xbf16>
    %c0_114 = arith.constant 0 : index
    %c0_115 = arith.constant 0 : index
    %c6_116 = arith.constant 6 : index
    %c0_117 = arith.constant 0 : index
    %c1_118 = arith.constant 1 : index
    %87 = vector.load %arg2[%c0_114, %c0_115, %c6_116, %c0_117, %c1_118] : memref<1x1x8x1x256xbf16, #tpu.memory_space<vmem>>, vector<1x1x1x1x128xbf16>
    %88 = vector.shape_cast %87 : vector<1x1x1x1x128xbf16> to vector<1x128xbf16>
    %cst_119 = arith.constant dense<0.000000e+00> : vector<4x128xf32>
    %89 = tpu.matmul %86, %88, %cst_119 {dimension_numbers = #tpu.dot_dimension_numbers<[1], [0], [0], [1], [0, 0, 1, 1], [], []>} : vector<4x1xbf16>, vector<1x128xbf16>, vector<4x128xf32> -> vector<4x128xf32>
    %90 = arith.addf %84, %89 : vector<4x128xf32>
    %c15 = arith.constant 15 : index
    %c0_120 = arith.constant 0 : index
    %c0_121 = arith.constant 0 : index
    %91 = vector.load %arg4[%c15, %c0_120, %c0_121] : memref<27x4x1xbf16, #tpu.memory_space<vmem>>, vector<1x4x1xbf16>
    %92 = vector.shape_cast %91 : vector<1x4x1xbf16> to vector<4x1xbf16>
    %c0_122 = arith.constant 0 : index
    %c0_123 = arith.constant 0 : index
    %c4_124 = arith.constant 4 : index
    %c0_125 = arith.constant 0 : index
    %c5_126 = arith.constant 5 : index
    %93 = vector.load %arg2[%c0_122, %c0_123, %c4_124, %c0_125, %c5_126] : memref<1x1x8x1x256xbf16, #tpu.memory_space<vmem>>, vector<1x1x1x1x128xbf16>
    %94 = vector.shape_cast %93 : vector<1x1x1x1x128xbf16> to vector<1x128xbf16>
    %cst_127 = arith.constant dense<0.000000e+00> : vector<4x128xf32>
    %95 = tpu.matmul %92, %94, %cst_127 {dimension_numbers = #tpu.dot_dimension_numbers<[1], [0], [0], [1], [0, 0, 1, 1], [], []>} : vector<4x1xbf16>, vector<1x128xbf16>, vector<4x128xf32> -> vector<4x128xf32>
    %96 = arith.addf %90, %95 : vector<4x128xf32>
    %c16 = arith.constant 16 : index
    %c0_128 = arith.constant 0 : index
    %c0_129 = arith.constant 0 : index
    %97 = vector.load %arg4[%c16, %c0_128, %c0_129] : memref<27x4x1xbf16, #tpu.memory_space<vmem>>, vector<1x4x1xbf16>
    %98 = vector.shape_cast %97 : vector<1x4x1xbf16> to vector<4x1xbf16>
    %c0_130 = arith.constant 0 : index
    %c0_131 = arith.constant 0 : index
    %c5_132 = arith.constant 5 : index
    %c0_133 = arith.constant 0 : index
    %c5_134 = arith.constant 5 : index
    %99 = vector.load %arg2[%c0_130, %c0_131, %c5_132, %c0_133, %c5_134] : memref<1x1x8x1x256xbf16, #tpu.memory_space<vmem>>, vector<1x1x1x1x128xbf16>
    %100 = vector.shape_cast %99 : vector<1x1x1x1x128xbf16> to vector<1x128xbf16>
    %cst_135 = arith.constant dense<0.000000e+00> : vector<4x128xf32>
    %101 = tpu.matmul %98, %100, %cst_135 {dimension_numbers = #tpu.dot_dimension_numbers<[1], [0], [0], [1], [0, 0, 1, 1], [], []>} : vector<4x1xbf16>, vector<1x128xbf16>, vector<4x128xf32> -> vector<4x128xf32>
    %102 = arith.addf %96, %101 : vector<4x128xf32>
    %c17 = arith.constant 17 : index
    %c0_136 = arith.constant 0 : index
    %c0_137 = arith.constant 0 : index
    %103 = vector.load %arg4[%c17, %c0_136, %c0_137] : memref<27x4x1xbf16, #tpu.memory_space<vmem>>, vector<1x4x1xbf16>
    %104 = vector.shape_cast %103 : vector<1x4x1xbf16> to vector<4x1xbf16>
    %c0_138 = arith.constant 0 : index
    %c0_139 = arith.constant 0 : index
    %c4_140 = arith.constant 4 : index
    %c0_141 = arith.constant 0 : index
    %c6_142 = arith.constant 6 : index
    %105 = vector.load %arg2[%c0_138, %c0_139, %c4_140, %c0_141, %c6_142] : memref<1x1x8x1x256xbf16, #tpu.memory_space<vmem>>, vector<1x1x1x1x128xbf16>
    %106 = vector.shape_cast %105 : vector<1x1x1x1x128xbf16> to vector<1x128xbf16>
    %cst_143 = arith.constant dense<0.000000e+00> : vector<4x128xf32>
    %107 = tpu.matmul %104, %106, %cst_143 {dimension_numbers = #tpu.dot_dimension_numbers<[1], [0], [0], [1], [0, 0, 1, 1], [], []>} : vector<4x1xbf16>, vector<1x128xbf16>, vector<4x128xf32> -> vector<4x128xf32>
    %108 = arith.addf %102, %107 : vector<4x128xf32>
    %c18 = arith.constant 18 : index
    %c0_144 = arith.constant 0 : index
    %c0_145 = arith.constant 0 : index
    %109 = vector.load %arg4[%c18, %c0_144, %c0_145] : memref<27x4x1xbf16, #tpu.memory_space<vmem>>, vector<1x4x1xbf16>
    %110 = vector.shape_cast %109 : vector<1x4x1xbf16> to vector<4x1xbf16>
    %c0_146 = arith.constant 0 : index
    %c0_147 = arith.constant 0 : index
    %c0_148 = arith.constant 0 : index
    %c0_149 = arith.constant 0 : index
    %c0_150 = arith.constant 0 : index
    %111 = vector.load %arg3[%c0_146, %c0_147, %c0_148, %c0_149, %c0_150] : memref<1x1x8x1x256xbf16, #tpu.memory_space<vmem>>, vector<1x1x1x1x128xbf16>
    %112 = vector.shape_cast %111 : vector<1x1x1x1x128xbf16> to vector<1x128xbf16>
    %cst_151 = arith.constant dense<0.000000e+00> : vector<4x128xf32>
    %113 = tpu.matmul %110, %112, %cst_151 {dimension_numbers = #tpu.dot_dimension_numbers<[1], [0], [0], [1], [0, 0, 1, 1], [], []>} : vector<4x1xbf16>, vector<1x128xbf16>, vector<4x128xf32> -> vector<4x128xf32>
    %114 = arith.addf %108, %113 : vector<4x128xf32>
    %c19 = arith.constant 19 : index
    %c0_152 = arith.constant 0 : index
    %c0_153 = arith.constant 0 : index
    %115 = vector.load %arg4[%c19, %c0_152, %c0_153] : memref<27x4x1xbf16, #tpu.memory_space<vmem>>, vector<1x4x1xbf16>
    %116 = vector.shape_cast %115 : vector<1x4x1xbf16> to vector<4x1xbf16>
    %c0_154 = arith.constant 0 : index
    %c0_155 = arith.constant 0 : index
    %c1_156 = arith.constant 1 : index
    %c0_157 = arith.constant 0 : index
    %c0_158 = arith.constant 0 : index
    %117 = vector.load %arg3[%c0_154, %c0_155, %c1_156, %c0_157, %c0_158] : memref<1x1x8x1x256xbf16, #tpu.memory_space<vmem>>, vector<1x1x1x1x128xbf16>
    %118 = vector.shape_cast %117 : vector<1x1x1x1x128xbf16> to vector<1x128xbf16>
    %cst_159 = arith.constant dense<0.000000e+00> : vector<4x128xf32>
    %119 = tpu.matmul %116, %118, %cst_159 {dimension_numbers = #tpu.dot_dimension_numbers<[1], [0], [0], [1], [0, 0, 1, 1], [], []>} : vector<4x1xbf16>, vector<1x128xbf16>, vector<4x128xf32> -> vector<4x128xf32>
    %120 = arith.addf %114, %119 : vector<4x128xf32>
    %c20 = arith.constant 20 : index
    %c0_160 = arith.constant 0 : index
    %c0_161 = arith.constant 0 : index
    %121 = vector.load %arg4[%c20, %c0_160, %c0_161] : memref<27x4x1xbf16, #tpu.memory_space<vmem>>, vector<1x4x1xbf16>
    %122 = vector.shape_cast %121 : vector<1x4x1xbf16> to vector<4x1xbf16>
    %c0_162 = arith.constant 0 : index
    %c0_163 = arith.constant 0 : index
    %c0_164 = arith.constant 0 : index
    %c0_165 = arith.constant 0 : index
    %c1_166 = arith.constant 1 : index
    %123 = vector.load %arg3[%c0_162, %c0_163, %c0_164, %c0_165, %c1_166] : memref<1x1x8x1x256xbf16, #tpu.memory_space<vmem>>, vector<1x1x1x1x128xbf16>
    %124 = vector.shape_cast %123 : vector<1x1x1x1x128xbf16> to vector<1x128xbf16>
    %cst_167 = arith.constant dense<0.000000e+00> : vector<4x128xf32>
    %125 = tpu.matmul %122, %124, %cst_167 {dimension_numbers = #tpu.dot_dimension_numbers<[1], [0], [0], [1], [0, 0, 1, 1], [], []>} : vector<4x1xbf16>, vector<1x128xbf16>, vector<4x128xf32> -> vector<4x128xf32>
    %126 = arith.addf %120, %125 : vector<4x128xf32>
    %c21 = arith.constant 21 : index
    %c0_168 = arith.constant 0 : index
    %c0_169 = arith.constant 0 : index
    %127 = vector.load %arg4[%c21, %c0_168, %c0_169] : memref<27x4x1xbf16, #tpu.memory_space<vmem>>, vector<1x4x1xbf16>
    %128 = vector.shape_cast %127 : vector<1x4x1xbf16> to vector<4x1xbf16>
    %c0_170 = arith.constant 0 : index
    %c0_171 = arith.constant 0 : index
    %c2_172 = arith.constant 2 : index
    %c0_173 = arith.constant 0 : index
    %c0_174 = arith.constant 0 : index
    %129 = vector.load %arg3[%c0_170, %c0_171, %c2_172, %c0_173, %c0_174] : memref<1x1x8x1x256xbf16, #tpu.memory_space<vmem>>, vector<1x1x1x1x128xbf16>
    %130 = vector.shape_cast %129 : vector<1x1x1x1x128xbf16> to vector<1x128xbf16>
    %cst_175 = arith.constant dense<0.000000e+00> : vector<4x128xf32>
    %131 = tpu.matmul %128, %130, %cst_175 {dimension_numbers = #tpu.dot_dimension_numbers<[1], [0], [0], [1], [0, 0, 1, 1], [], []>} : vector<4x1xbf16>, vector<1x128xbf16>, vector<4x128xf32> -> vector<4x128xf32>
    %132 = arith.addf %126, %131 : vector<4x128xf32>
    %c22 = arith.constant 22 : index
    %c0_176 = arith.constant 0 : index
    %c0_177 = arith.constant 0 : index
    %133 = vector.load %arg4[%c22, %c0_176, %c0_177] : memref<27x4x1xbf16, #tpu.memory_space<vmem>>, vector<1x4x1xbf16>
    %134 = vector.shape_cast %133 : vector<1x4x1xbf16> to vector<4x1xbf16>
    %c0_178 = arith.constant 0 : index
    %c0_179 = arith.constant 0 : index
    %c3_180 = arith.constant 3 : index
    %c0_181 = arith.constant 0 : index
    %c0_182 = arith.constant 0 : index
    %135 = vector.load %arg3[%c0_178, %c0_179, %c3_180, %c0_181, %c0_182] : memref<1x1x8x1x256xbf16, #tpu.memory_space<vmem>>, vector<1x1x1x1x128xbf16>
    %136 = vector.shape_cast %135 : vector<1x1x1x1x128xbf16> to vector<1x128xbf16>
    %cst_183 = arith.constant dense<0.000000e+00> : vector<4x128xf32>
    %137 = tpu.matmul %134, %136, %cst_183 {dimension_numbers = #tpu.dot_dimension_numbers<[1], [0], [0], [1], [0, 0, 1, 1], [], []>} : vector<4x1xbf16>, vector<1x128xbf16>, vector<4x128xf32> -> vector<4x128xf32>
    %138 = arith.addf %132, %137 : vector<4x128xf32>
    %c23 = arith.constant 23 : index
    %c0_184 = arith.constant 0 : index
    %c0_185 = arith.constant 0 : index
    %139 = vector.load %arg4[%c23, %c0_184, %c0_185] : memref<27x4x1xbf16, #tpu.memory_space<vmem>>, vector<1x4x1xbf16>
    %140 = vector.shape_cast %139 : vector<1x4x1xbf16> to vector<4x1xbf16>
    %c0_186 = arith.constant 0 : index
    %c0_187 = arith.constant 0 : index
    %c2_188 = arith.constant 2 : index
    %c0_189 = arith.constant 0 : index
    %c1_190 = arith.constant 1 : index
    %141 = vector.load %arg3[%c0_186, %c0_187, %c2_188, %c0_189, %c1_190] : memref<1x1x8x1x256xbf16, #tpu.memory_space<vmem>>, vector<1x1x1x1x128xbf16>
    %142 = vector.shape_cast %141 : vector<1x1x1x1x128xbf16> to vector<1x128xbf16>
    %cst_191 = arith.constant dense<0.000000e+00> : vector<4x128xf32>
    %143 = tpu.matmul %140, %142, %cst_191 {dimension_numbers = #tpu.dot_dimension_numbers<[1], [0], [0], [1], [0, 0, 1, 1], [], []>} : vector<4x1xbf16>, vector<1x128xbf16>, vector<4x128xf32> -> vector<4x128xf32>
    %144 = arith.addf %138, %143 : vector<4x128xf32>
    %c24 = arith.constant 24 : index
    %c0_192 = arith.constant 0 : index
    %c0_193 = arith.constant 0 : index
    %145 = vector.load %arg4[%c24, %c0_192, %c0_193] : memref<27x4x1xbf16, #tpu.memory_space<vmem>>, vector<1x4x1xbf16>
    %146 = vector.shape_cast %145 : vector<1x4x1xbf16> to vector<4x1xbf16>
    %c0_194 = arith.constant 0 : index
    %c0_195 = arith.constant 0 : index
    %c0_196 = arith.constant 0 : index
    %c0_197 = arith.constant 0 : index
    %c5_198 = arith.constant 5 : index
    %147 = vector.load %arg3[%c0_194, %c0_195, %c0_196, %c0_197, %c5_198] : memref<1x1x8x1x256xbf16, #tpu.memory_space<vmem>>, vector<1x1x1x1x128xbf16>
    %148 = vector.shape_cast %147 : vector<1x1x1x1x128xbf16> to vector<1x128xbf16>
    %cst_199 = arith.constant dense<0.000000e+00> : vector<4x128xf32>
    %149 = tpu.matmul %146, %148, %cst_199 {dimension_numbers = #tpu.dot_dimension_numbers<[1], [0], [0], [1], [0, 0, 1, 1], [], []>} : vector<4x1xbf16>, vector<1x128xbf16>, vector<4x128xf32> -> vector<4x128xf32>
    %150 = arith.addf %144, %149 : vector<4x128xf32>
    %c25 = arith.constant 25 : index
    %c0_200 = arith.constant 0 : index
    %c0_201 = arith.constant 0 : index
    %151 = vector.load %arg4[%c25, %c0_200, %c0_201] : memref<27x4x1xbf16, #tpu.memory_space<vmem>>, vector<1x4x1xbf16>
    %152 = vector.shape_cast %151 : vector<1x4x1xbf16> to vector<4x1xbf16>
    %c0_202 = arith.constant 0 : index
    %c0_203 = arith.constant 0 : index
    %c1_204 = arith.constant 1 : index
    %c0_205 = arith.constant 0 : index
    %c5_206 = arith.constant 5 : index
    %153 = vector.load %arg3[%c0_202, %c0_203, %c1_204, %c0_205, %c5_206] : memref<1x1x8x1x256xbf16, #tpu.memory_space<vmem>>, vector<1x1x1x1x128xbf16>
    %154 = vector.shape_cast %153 : vector<1x1x1x1x128xbf16> to vector<1x128xbf16>
    %cst_207 = arith.constant dense<0.000000e+00> : vector<4x128xf32>
    %155 = tpu.matmul %152, %154, %cst_207 {dimension_numbers = #tpu.dot_dimension_numbers<[1], [0], [0], [1], [0, 0, 1, 1], [], []>} : vector<4x1xbf16>, vector<1x128xbf16>, vector<4x128xf32> -> vector<4x128xf32>
    %156 = arith.addf %150, %155 : vector<4x128xf32>
    %c26 = arith.constant 26 : index
    %c0_208 = arith.constant 0 : index
    %c0_209 = arith.constant 0 : index
    %157 = vector.load %arg4[%c26, %c0_208, %c0_209] : memref<27x4x1xbf16, #tpu.memory_space<vmem>>, vector<1x4x1xbf16>
    %158 = vector.shape_cast %157 : vector<1x4x1xbf16> to vector<4x1xbf16>
    %c0_210 = arith.constant 0 : index
    %c0_211 = arith.constant 0 : index
    %c0_212 = arith.constant 0 : index
    %c0_213 = arith.constant 0 : index
    %c6_214 = arith.constant 6 : index
    %159 = vector.load %arg3[%c0_210, %c0_211, %c0_212, %c0_213, %c6_214] : memref<1x1x8x1x256xbf16, #tpu.memory_space<vmem>>, vector<1x1x1x1x128xbf16>
    %160 = vector.shape_cast %159 : vector<1x1x1x1x128xbf16> to vector<1x128xbf16>
    %cst_215 = arith.constant dense<0.000000e+00> : vector<4x128xf32>
    %161 = tpu.matmul %158, %160, %cst_215 {dimension_numbers = #tpu.dot_dimension_numbers<[1], [0], [0], [1], [0, 0, 1, 1], [], []>} : vector<4x1xbf16>, vector<1x128xbf16>, vector<4x128xf32> -> vector<4x128xf32>
    %162 = arith.addf %156, %161 : vector<4x128xf32>
    %c0_216 = arith.constant 0 : index
    %c0_217 = arith.constant 0 : index
    %163 = vector.load %arg5[%c0_216, %c0_217] : memref<4x1xf32, #tpu.memory_space<vmem>>, vector<4x1xf32>
    %164 = vector.broadcast %163 : vector<4x1xf32> to vector<4x128xf32>
    %165 = arith.addf %162, %164 : vector<4x128xf32>
    %cst_218 = arith.constant 0.000000e+00 : f32
    %166 = vector.broadcast %cst_218 : f32 to vector<4x128xf32>
    %167 = arith.cmpf oge, %165, %166 : vector<4x128xf32>
    %cst_219 = arith.constant 2.000000e-01 : f32
    %168 = vector.broadcast %cst_219 : f32 to vector<4x128xf32>
    %169 = arith.mulf %168, %165 : vector<4x128xf32>
    %170 = arith.select %167, %165, %169 : vector<4x128xi1>, vector<4x128xf32>
    %171 = arith.truncf %170 : vector<4x128xf32> to vector<4x128xbf16>
    %c0_220 = arith.constant 0 : index
    %c0_221 = arith.constant 0 : index
    %c0_222 = arith.constant 0 : index
    %c0_223 = arith.constant 0 : index
    %172 = vector.load %arg6[%c0_220, %c0_221, %c0_222, %c0_223] : memref<1x1x4x128xbf16, #tpu.memory_space<vmem>>, vector<1x1x4x128xbf16>
    %173 = vector.shape_cast %172 : vector<1x1x4x128xbf16> to vector<4x128xbf16>
    %174 = vector.shape_cast %171 : vector<4x128xbf16> to vector<1x1x4x128xbf16>
    tpu.vector_store %arg6[%c0_220, %c0_221, %c0_222, %c0_223], %174 {strides = array<i32>} : memref<1x1x4x128xbf16, #tpu.memory_space<vmem>>, vector<1x1x4x128xbf16>,
    return
  }
  func.func @transform_0(%arg0: i32, %arg1: i32) -> (i32, i32, i32, i32, i32) {
    %c0_i32 = arith.constant 0 : i32
    %0 = arith.addi %arg1, %c0_i32 : i32
    %c0_i32_0 = arith.constant 0 : i32
    %c0_i32_1 = arith.constant 0 : i32
    %c0_i32_2 = arith.constant 0 : i32
    %c0_i32_3 = arith.constant 0 : i32
    return %arg0, %0, %c0_i32_0, %c0_i32_1, %c0_i32_2 : i32, i32, i32, i32, i32
  }
  func.func @transform_1(%arg0: i32, %arg1: i32) -> (i32, i32, i32, i32, i32) {
    %c1_i32 = arith.constant 1 : i32
    %0 = arith.addi %arg1, %c1_i32 : i32
    %c0_i32 = arith.constant 0 : i32
    %c0_i32_0 = arith.constant 0 : i32
    %c0_i32_1 = arith.constant 0 : i32
    %c0_i32_2 = arith.constant 0 : i32
    return %arg0, %0, %c0_i32, %c0_i32_0, %c0_i32_1 : i32, i32, i32, i32, i32
  }
  func.func @transform_2(%arg0: i32, %arg1: i32) -> (i32, i32, i32) {
    %c0_i32 = arith.constant 0 : i32
    %c0_i32_0 = arith.constant 0 : i32
    %c0_i32_1 = arith.constant 0 : i32
    %c0_i32_2 = arith.constant 0 : i32
    return %c0_i32, %c0_i32_0, %c0_i32_1 : i32, i32, i32
  }
  func.func @transform_3(%arg0: i32, %arg1: i32) -> (i32, i32) {
    %c0_i32 = arith.constant 0 : i32
    %c0_i32_0 = arith.constant 0 : i32
    %c0_i32_1 = arith.constant 0 : i32
    return %c0_i32, %c0_i32_0 : i32, i32
  }
  func.func @transform_4(%arg0: i32, %arg1: i32) -> (i32, i32, i32, i32) {
    %c0_i32 = arith.constant 0 : i32
    %c0_i32_0 = arith.constant 0 : i32
    %c0_i32_1 = arith.constant 0 : i32
    return %arg0, %arg1, %c0_i32, %c0_i32_0 : i32, i32, i32, i32
  }
}

module attributes {stable_mosaic.version = 11 : i64} {
  func.func @_conv_s2_kernel(%arg0: i32, %arg1: i32, %arg2: memref<1x1x8x4x256xbf16, #tpu.memory_space<vmem>>, %arg3: memref<1x1x8x4x256xbf16, #tpu.memory_space<vmem>>, %arg4: memref<27x8x4xbf16, #tpu.memory_space<vmem>>, %arg5: memref<8x1xf32, #tpu.memory_space<vmem>>, %arg6: memref<1x1x8x128xbf16, #tpu.memory_space<vmem>>) attributes {dimension_semantics = [#tpu.dimension_semantics<parallel>, #tpu.dimension_semantics<parallel>], iteration_bounds = array<i64: 4, 2>, scalar_prefetch = 0 : i64, scratch_operands = 0 : i64, tpu.core_type = #tpu.core_type<tc>, window_params = [{transform_indices = @transform_0, window_bounds = array<i64: 1, 1, 8, 4, 256>}, {transform_indices = @transform_1, window_bounds = array<i64: 1, 1, 8, 4, 256>}, {pipeline_mode = #tpu.pipeline_mode<synchronous>, transform_indices = @transform_2, window_bounds = array<i64: 27, 8, 4>}, {pipeline_mode = #tpu.pipeline_mode<synchronous>, transform_indices = @transform_3, window_bounds = array<i64: 8, 1>}, {transform_indices = @transform_4, window_bounds = array<i64: 1, 1, 8, 128>}]} {
    %cst = arith.constant 0.000000e+00 : f32
    %0 = vector.broadcast %cst : f32 to vector<8x128xf32>
    %c0 = arith.constant 0 : index
    %c0_0 = arith.constant 0 : index
    %c0_1 = arith.constant 0 : index
    %1 = vector.load %arg4[%c0, %c0_0, %c0_1] : memref<27x8x4xbf16, #tpu.memory_space<vmem>>, vector<1x8x4xbf16>
    %2 = vector.shape_cast %1 : vector<1x8x4xbf16> to vector<8x4xbf16>
    %c0_2 = arith.constant 0 : index
    %c0_3 = arith.constant 0 : index
    %c0_4 = arith.constant 0 : index
    %c0_5 = arith.constant 0 : index
    %c0_6 = arith.constant 0 : index
    %3 = vector.load %arg2[%c0_2, %c0_3, %c0_4, %c0_5, %c0_6] : memref<1x1x8x4x256xbf16, #tpu.memory_space<vmem>>, vector<1x1x1x4x128xbf16>
    %4 = vector.shape_cast %3 : vector<1x1x1x4x128xbf16> to vector<4x128xbf16>
    %cst_7 = arith.constant dense<0.000000e+00> : vector<8x128xf32>
    %5 = tpu.matmul %2, %4, %cst_7 {dimension_numbers = #tpu.dot_dimension_numbers<[1], [0], [0], [1], [0, 0, 1, 1], [], []>} : vector<8x4xbf16>, vector<4x128xbf16>, vector<8x128xf32> -> vector<8x128xf32>
    %6 = arith.addf %0, %5 : vector<8x128xf32>
    %c1 = arith.constant 1 : index
    %c0_8 = arith.constant 0 : index
    %c0_9 = arith.constant 0 : index
    %7 = vector.load %arg4[%c1, %c0_8, %c0_9] : memref<27x8x4xbf16, #tpu.memory_space<vmem>>, vector<1x8x4xbf16>
    %8 = vector.shape_cast %7 : vector<1x8x4xbf16> to vector<8x4xbf16>
    %c0_10 = arith.constant 0 : index
    %c0_11 = arith.constant 0 : index
    %c1_12 = arith.constant 1 : index
    %c0_13 = arith.constant 0 : index
    %c0_14 = arith.constant 0 : index
    %9 = vector.load %arg2[%c0_10, %c0_11, %c1_12, %c0_13, %c0_14] : memref<1x1x8x4x256xbf16, #tpu.memory_space<vmem>>, vector<1x1x1x4x128xbf16>
    %10 = vector.shape_cast %9 : vector<1x1x1x4x128xbf16> to vector<4x128xbf16>
    %cst_15 = arith.constant dense<0.000000e+00> : vector<8x128xf32>
    %11 = tpu.matmul %8, %10, %cst_15 {dimension_numbers = #tpu.dot_dimension_numbers<[1], [0], [0], [1], [0, 0, 1, 1], [], []>} : vector<8x4xbf16>, vector<4x128xbf16>, vector<8x128xf32> -> vector<8x128xf32>
    %12 = arith.addf %6, %11 : vector<8x128xf32>
    %c2 = arith.constant 2 : index
    %c0_16 = arith.constant 0 : index
    %c0_17 = arith.constant 0 : index
    %13 = vector.load %arg4[%c2, %c0_16, %c0_17] : memref<27x8x4xbf16, #tpu.memory_space<vmem>>, vector<1x8x4xbf16>
    %14 = vector.shape_cast %13 : vector<1x8x4xbf16> to vector<8x4xbf16>
    %c0_18 = arith.constant 0 : index
    %c0_19 = arith.constant 0 : index
    %c0_20 = arith.constant 0 : index
    %c0_21 = arith.constant 0 : index
    %c1_22 = arith.constant 1 : index
    %15 = vector.load %arg2[%c0_18, %c0_19, %c0_20, %c0_21, %c1_22] : memref<1x1x8x4x256xbf16, #tpu.memory_space<vmem>>, vector<1x1x1x4x128xbf16>
    %16 = vector.shape_cast %15 : vector<1x1x1x4x128xbf16> to vector<4x128xbf16>
    %cst_23 = arith.constant dense<0.000000e+00> : vector<8x128xf32>
    %17 = tpu.matmul %14, %16, %cst_23 {dimension_numbers = #tpu.dot_dimension_numbers<[1], [0], [0], [1], [0, 0, 1, 1], [], []>} : vector<8x4xbf16>, vector<4x128xbf16>, vector<8x128xf32> -> vector<8x128xf32>
    %18 = arith.addf %12, %17 : vector<8x128xf32>
    %c3 = arith.constant 3 : index
    %c0_24 = arith.constant 0 : index
    %c0_25 = arith.constant 0 : index
    %19 = vector.load %arg4[%c3, %c0_24, %c0_25] : memref<27x8x4xbf16, #tpu.memory_space<vmem>>, vector<1x8x4xbf16>
    %20 = vector.shape_cast %19 : vector<1x8x4xbf16> to vector<8x4xbf16>
    %c0_26 = arith.constant 0 : index
    %c0_27 = arith.constant 0 : index
    %c2_28 = arith.constant 2 : index
    %c0_29 = arith.constant 0 : index
    %c0_30 = arith.constant 0 : index
    %21 = vector.load %arg2[%c0_26, %c0_27, %c2_28, %c0_29, %c0_30] : memref<1x1x8x4x256xbf16, #tpu.memory_space<vmem>>, vector<1x1x1x4x128xbf16>
    %22 = vector.shape_cast %21 : vector<1x1x1x4x128xbf16> to vector<4x128xbf16>
    %cst_31 = arith.constant dense<0.000000e+00> : vector<8x128xf32>
    %23 = tpu.matmul %20, %22, %cst_31 {dimension_numbers = #tpu.dot_dimension_numbers<[1], [0], [0], [1], [0, 0, 1, 1], [], []>} : vector<8x4xbf16>, vector<4x128xbf16>, vector<8x128xf32> -> vector<8x128xf32>
    %24 = arith.addf %18, %23 : vector<8x128xf32>
    %c4 = arith.constant 4 : index
    %c0_32 = arith.constant 0 : index
    %c0_33 = arith.constant 0 : index
    %25 = vector.load %arg4[%c4, %c0_32, %c0_33] : memref<27x8x4xbf16, #tpu.memory_space<vmem>>, vector<1x8x4xbf16>
    %26 = vector.shape_cast %25 : vector<1x8x4xbf16> to vector<8x4xbf16>
    %c0_34 = arith.constant 0 : index
    %c0_35 = arith.constant 0 : index
    %c3_36 = arith.constant 3 : index
    %c0_37 = arith.constant 0 : index
    %c0_38 = arith.constant 0 : index
    %27 = vector.load %arg2[%c0_34, %c0_35, %c3_36, %c0_37, %c0_38] : memref<1x1x8x4x256xbf16, #tpu.memory_space<vmem>>, vector<1x1x1x4x128xbf16>
    %28 = vector.shape_cast %27 : vector<1x1x1x4x128xbf16> to vector<4x128xbf16>
    %cst_39 = arith.constant dense<0.000000e+00> : vector<8x128xf32>
    %29 = tpu.matmul %26, %28, %cst_39 {dimension_numbers = #tpu.dot_dimension_numbers<[1], [0], [0], [1], [0, 0, 1, 1], [], []>} : vector<8x4xbf16>, vector<4x128xbf16>, vector<8x128xf32> -> vector<8x128xf32>
    %30 = arith.addf %24, %29 : vector<8x128xf32>
    %c5 = arith.constant 5 : index
    %c0_40 = arith.constant 0 : index
    %c0_41 = arith.constant 0 : index
    %31 = vector.load %arg4[%c5, %c0_40, %c0_41] : memref<27x8x4xbf16, #tpu.memory_space<vmem>>, vector<1x8x4xbf16>
    %32 = vector.shape_cast %31 : vector<1x8x4xbf16> to vector<8x4xbf16>
    %c0_42 = arith.constant 0 : index
    %c0_43 = arith.constant 0 : index
    %c2_44 = arith.constant 2 : index
    %c0_45 = arith.constant 0 : index
    %c1_46 = arith.constant 1 : index
    %33 = vector.load %arg2[%c0_42, %c0_43, %c2_44, %c0_45, %c1_46] : memref<1x1x8x4x256xbf16, #tpu.memory_space<vmem>>, vector<1x1x1x4x128xbf16>
    %34 = vector.shape_cast %33 : vector<1x1x1x4x128xbf16> to vector<4x128xbf16>
    %cst_47 = arith.constant dense<0.000000e+00> : vector<8x128xf32>
    %35 = tpu.matmul %32, %34, %cst_47 {dimension_numbers = #tpu.dot_dimension_numbers<[1], [0], [0], [1], [0, 0, 1, 1], [], []>} : vector<8x4xbf16>, vector<4x128xbf16>, vector<8x128xf32> -> vector<8x128xf32>
    %36 = arith.addf %30, %35 : vector<8x128xf32>
    %c6 = arith.constant 6 : index
    %c0_48 = arith.constant 0 : index
    %c0_49 = arith.constant 0 : index
    %37 = vector.load %arg4[%c6, %c0_48, %c0_49] : memref<27x8x4xbf16, #tpu.memory_space<vmem>>, vector<1x8x4xbf16>
    %38 = vector.shape_cast %37 : vector<1x8x4xbf16> to vector<8x4xbf16>
    %c0_50 = arith.constant 0 : index
    %c0_51 = arith.constant 0 : index
    %c0_52 = arith.constant 0 : index
    %c0_53 = arith.constant 0 : index
    %c3_54 = arith.constant 3 : index
    %39 = vector.load %arg2[%c0_50, %c0_51, %c0_52, %c0_53, %c3_54] : memref<1x1x8x4x256xbf16, #tpu.memory_space<vmem>>, vector<1x1x1x4x128xbf16>
    %40 = vector.shape_cast %39 : vector<1x1x1x4x128xbf16> to vector<4x128xbf16>
    %cst_55 = arith.constant dense<0.000000e+00> : vector<8x128xf32>
    %41 = tpu.matmul %38, %40, %cst_55 {dimension_numbers = #tpu.dot_dimension_numbers<[1], [0], [0], [1], [0, 0, 1, 1], [], []>} : vector<8x4xbf16>, vector<4x128xbf16>, vector<8x128xf32> -> vector<8x128xf32>
    %42 = arith.addf %36, %41 : vector<8x128xf32>
    %c7 = arith.constant 7 : index
    %c0_56 = arith.constant 0 : index
    %c0_57 = arith.constant 0 : index
    %43 = vector.load %arg4[%c7, %c0_56, %c0_57] : memref<27x8x4xbf16, #tpu.memory_space<vmem>>, vector<1x8x4xbf16>
    %44 = vector.shape_cast %43 : vector<1x8x4xbf16> to vector<8x4xbf16>
    %c0_58 = arith.constant 0 : index
    %c0_59 = arith.constant 0 : index
    %c1_60 = arith.constant 1 : index
    %c0_61 = arith.constant 0 : index
    %c3_62 = arith.constant 3 : index
    %45 = vector.load %arg2[%c0_58, %c0_59, %c1_60, %c0_61, %c3_62] : memref<1x1x8x4x256xbf16, #tpu.memory_space<vmem>>, vector<1x1x1x4x128xbf16>
    %46 = vector.shape_cast %45 : vector<1x1x1x4x128xbf16> to vector<4x128xbf16>
    %cst_63 = arith.constant dense<0.000000e+00> : vector<8x128xf32>
    %47 = tpu.matmul %44, %46, %cst_63 {dimension_numbers = #tpu.dot_dimension_numbers<[1], [0], [0], [1], [0, 0, 1, 1], [], []>} : vector<8x4xbf16>, vector<4x128xbf16>, vector<8x128xf32> -> vector<8x128xf32>
    %48 = arith.addf %42, %47 : vector<8x128xf32>
    %c8 = arith.constant 8 : index
    %c0_64 = arith.constant 0 : index
    %c0_65 = arith.constant 0 : index
    %49 = vector.load %arg4[%c8, %c0_64, %c0_65] : memref<27x8x4xbf16, #tpu.memory_space<vmem>>, vector<1x8x4xbf16>
    %50 = vector.shape_cast %49 : vector<1x8x4xbf16> to vector<8x4xbf16>
    %c0_66 = arith.constant 0 : index
    %c0_67 = arith.constant 0 : index
    %c0_68 = arith.constant 0 : index
    %c0_69 = arith.constant 0 : index
    %c4_70 = arith.constant 4 : index
    %51 = vector.load %arg2[%c0_66, %c0_67, %c0_68, %c0_69, %c4_70] : memref<1x1x8x4x256xbf16, #tpu.memory_space<vmem>>, vector<1x1x1x4x128xbf16>
    %52 = vector.shape_cast %51 : vector<1x1x1x4x128xbf16> to vector<4x128xbf16>
    %cst_71 = arith.constant dense<0.000000e+00> : vector<8x128xf32>
    %53 = tpu.matmul %50, %52, %cst_71 {dimension_numbers = #tpu.dot_dimension_numbers<[1], [0], [0], [1], [0, 0, 1, 1], [], []>} : vector<8x4xbf16>, vector<4x128xbf16>, vector<8x128xf32> -> vector<8x128xf32>
    %54 = arith.addf %48, %53 : vector<8x128xf32>
    %c9 = arith.constant 9 : index
    %c0_72 = arith.constant 0 : index
    %c0_73 = arith.constant 0 : index
    %55 = vector.load %arg4[%c9, %c0_72, %c0_73] : memref<27x8x4xbf16, #tpu.memory_space<vmem>>, vector<1x8x4xbf16>
    %56 = vector.shape_cast %55 : vector<1x8x4xbf16> to vector<8x4xbf16>
    %c0_74 = arith.constant 0 : index
    %c0_75 = arith.constant 0 : index
    %c4_76 = arith.constant 4 : index
    %c0_77 = arith.constant 0 : index
    %c0_78 = arith.constant 0 : index
    %57 = vector.load %arg2[%c0_74, %c0_75, %c4_76, %c0_77, %c0_78] : memref<1x1x8x4x256xbf16, #tpu.memory_space<vmem>>, vector<1x1x1x4x128xbf16>
    %58 = vector.shape_cast %57 : vector<1x1x1x4x128xbf16> to vector<4x128xbf16>
    %cst_79 = arith.constant dense<0.000000e+00> : vector<8x128xf32>
    %59 = tpu.matmul %56, %58, %cst_79 {dimension_numbers = #tpu.dot_dimension_numbers<[1], [0], [0], [1], [0, 0, 1, 1], [], []>} : vector<8x4xbf16>, vector<4x128xbf16>, vector<8x128xf32> -> vector<8x128xf32>
    %60 = arith.addf %54, %59 : vector<8x128xf32>
    %c10 = arith.constant 10 : index
    %c0_80 = arith.constant 0 : index
    %c0_81 = arith.constant 0 : index
    %61 = vector.load %arg4[%c10, %c0_80, %c0_81] : memref<27x8x4xbf16, #tpu.memory_space<vmem>>, vector<1x8x4xbf16>
    %62 = vector.shape_cast %61 : vector<1x8x4xbf16> to vector<8x4xbf16>
    %c0_82 = arith.constant 0 : index
    %c0_83 = arith.constant 0 : index
    %c5_84 = arith.constant 5 : index
    %c0_85 = arith.constant 0 : index
    %c0_86 = arith.constant 0 : index
    %63 = vector.load %arg2[%c0_82, %c0_83, %c5_84, %c0_85, %c0_86] : memref<1x1x8x4x256xbf16, #tpu.memory_space<vmem>>, vector<1x1x1x4x128xbf16>
    %64 = vector.shape_cast %63 : vector<1x1x1x4x128xbf16> to vector<4x128xbf16>
    %cst_87 = arith.constant dense<0.000000e+00> : vector<8x128xf32>
    %65 = tpu.matmul %62, %64, %cst_87 {dimension_numbers = #tpu.dot_dimension_numbers<[1], [0], [0], [1], [0, 0, 1, 1], [], []>} : vector<8x4xbf16>, vector<4x128xbf16>, vector<8x128xf32> -> vector<8x128xf32>
    %66 = arith.addf %60, %65 : vector<8x128xf32>
    %c11 = arith.constant 11 : index
    %c0_88 = arith.constant 0 : index
    %c0_89 = arith.constant 0 : index
    %67 = vector.load %arg4[%c11, %c0_88, %c0_89] : memref<27x8x4xbf16, #tpu.memory_space<vmem>>, vector<1x8x4xbf16>
    %68 = vector.shape_cast %67 : vector<1x8x4xbf16> to vector<8x4xbf16>
    %c0_90 = arith.constant 0 : index
    %c0_91 = arith.constant 0 : index
    %c4_92 = arith.constant 4 : index
    %c0_93 = arith.constant 0 : index
    %c1_94 = arith.constant 1 : index
    %69 = vector.load %arg2[%c0_90, %c0_91, %c4_92, %c0_93, %c1_94] : memref<1x1x8x4x256xbf16, #tpu.memory_space<vmem>>, vector<1x1x1x4x128xbf16>
    %70 = vector.shape_cast %69 : vector<1x1x1x4x128xbf16> to vector<4x128xbf16>
    %cst_95 = arith.constant dense<0.000000e+00> : vector<8x128xf32>
    %71 = tpu.matmul %68, %70, %cst_95 {dimension_numbers = #tpu.dot_dimension_numbers<[1], [0], [0], [1], [0, 0, 1, 1], [], []>} : vector<8x4xbf16>, vector<4x128xbf16>, vector<8x128xf32> -> vector<8x128xf32>
    %72 = arith.addf %66, %71 : vector<8x128xf32>
    %c12 = arith.constant 12 : index
    %c0_96 = arith.constant 0 : index
    %c0_97 = arith.constant 0 : index
    %73 = vector.load %arg4[%c12, %c0_96, %c0_97] : memref<27x8x4xbf16, #tpu.memory_space<vmem>>, vector<1x8x4xbf16>
    %74 = vector.shape_cast %73 : vector<1x8x4xbf16> to vector<8x4xbf16>
    %c0_98 = arith.constant 0 : index
    %c0_99 = arith.constant 0 : index
    %c6_100 = arith.constant 6 : index
    %c0_101 = arith.constant 0 : index
    %c0_102 = arith.constant 0 : index
    %75 = vector.load %arg2[%c0_98, %c0_99, %c6_100, %c0_101, %c0_102] : memref<1x1x8x4x256xbf16, #tpu.memory_space<vmem>>, vector<1x1x1x4x128xbf16>
    %76 = vector.shape_cast %75 : vector<1x1x1x4x128xbf16> to vector<4x128xbf16>
    %cst_103 = arith.constant dense<0.000000e+00> : vector<8x128xf32>
    %77 = tpu.matmul %74, %76, %cst_103 {dimension_numbers = #tpu.dot_dimension_numbers<[1], [0], [0], [1], [0, 0, 1, 1], [], []>} : vector<8x4xbf16>, vector<4x128xbf16>, vector<8x128xf32> -> vector<8x128xf32>
    %78 = arith.addf %72, %77 : vector<8x128xf32>
    %c13 = arith.constant 13 : index
    %c0_104 = arith.constant 0 : index
    %c0_105 = arith.constant 0 : index
    %79 = vector.load %arg4[%c13, %c0_104, %c0_105] : memref<27x8x4xbf16, #tpu.memory_space<vmem>>, vector<1x8x4xbf16>
    %80 = vector.shape_cast %79 : vector<1x8x4xbf16> to vector<8x4xbf16>
    %c0_106 = arith.constant 0 : index
    %c0_107 = arith.constant 0 : index
    %c7_108 = arith.constant 7 : index
    %c0_109 = arith.constant 0 : index
    %c0_110 = arith.constant 0 : index
    %81 = vector.load %arg2[%c0_106, %c0_107, %c7_108, %c0_109, %c0_110] : memref<1x1x8x4x256xbf16, #tpu.memory_space<vmem>>, vector<1x1x1x4x128xbf16>
    %82 = vector.shape_cast %81 : vector<1x1x1x4x128xbf16> to vector<4x128xbf16>
    %cst_111 = arith.constant dense<0.000000e+00> : vector<8x128xf32>
    %83 = tpu.matmul %80, %82, %cst_111 {dimension_numbers = #tpu.dot_dimension_numbers<[1], [0], [0], [1], [0, 0, 1, 1], [], []>} : vector<8x4xbf16>, vector<4x128xbf16>, vector<8x128xf32> -> vector<8x128xf32>
    %84 = arith.addf %78, %83 : vector<8x128xf32>
    %c14 = arith.constant 14 : index
    %c0_112 = arith.constant 0 : index
    %c0_113 = arith.constant 0 : index
    %85 = vector.load %arg4[%c14, %c0_112, %c0_113] : memref<27x8x4xbf16, #tpu.memory_space<vmem>>, vector<1x8x4xbf16>
    %86 = vector.shape_cast %85 : vector<1x8x4xbf16> to vector<8x4xbf16>
    %c0_114 = arith.constant 0 : index
    %c0_115 = arith.constant 0 : index
    %c6_116 = arith.constant 6 : index
    %c0_117 = arith.constant 0 : index
    %c1_118 = arith.constant 1 : index
    %87 = vector.load %arg2[%c0_114, %c0_115, %c6_116, %c0_117, %c1_118] : memref<1x1x8x4x256xbf16, #tpu.memory_space<vmem>>, vector<1x1x1x4x128xbf16>
    %88 = vector.shape_cast %87 : vector<1x1x1x4x128xbf16> to vector<4x128xbf16>
    %cst_119 = arith.constant dense<0.000000e+00> : vector<8x128xf32>
    %89 = tpu.matmul %86, %88, %cst_119 {dimension_numbers = #tpu.dot_dimension_numbers<[1], [0], [0], [1], [0, 0, 1, 1], [], []>} : vector<8x4xbf16>, vector<4x128xbf16>, vector<8x128xf32> -> vector<8x128xf32>
    %90 = arith.addf %84, %89 : vector<8x128xf32>
    %c15 = arith.constant 15 : index
    %c0_120 = arith.constant 0 : index
    %c0_121 = arith.constant 0 : index
    %91 = vector.load %arg4[%c15, %c0_120, %c0_121] : memref<27x8x4xbf16, #tpu.memory_space<vmem>>, vector<1x8x4xbf16>
    %92 = vector.shape_cast %91 : vector<1x8x4xbf16> to vector<8x4xbf16>
    %c0_122 = arith.constant 0 : index
    %c0_123 = arith.constant 0 : index
    %c4_124 = arith.constant 4 : index
    %c0_125 = arith.constant 0 : index
    %c3_126 = arith.constant 3 : index
    %93 = vector.load %arg2[%c0_122, %c0_123, %c4_124, %c0_125, %c3_126] : memref<1x1x8x4x256xbf16, #tpu.memory_space<vmem>>, vector<1x1x1x4x128xbf16>
    %94 = vector.shape_cast %93 : vector<1x1x1x4x128xbf16> to vector<4x128xbf16>
    %cst_127 = arith.constant dense<0.000000e+00> : vector<8x128xf32>
    %95 = tpu.matmul %92, %94, %cst_127 {dimension_numbers = #tpu.dot_dimension_numbers<[1], [0], [0], [1], [0, 0, 1, 1], [], []>} : vector<8x4xbf16>, vector<4x128xbf16>, vector<8x128xf32> -> vector<8x128xf32>
    %96 = arith.addf %90, %95 : vector<8x128xf32>
    %c16 = arith.constant 16 : index
    %c0_128 = arith.constant 0 : index
    %c0_129 = arith.constant 0 : index
    %97 = vector.load %arg4[%c16, %c0_128, %c0_129] : memref<27x8x4xbf16, #tpu.memory_space<vmem>>, vector<1x8x4xbf16>
    %98 = vector.shape_cast %97 : vector<1x8x4xbf16> to vector<8x4xbf16>
    %c0_130 = arith.constant 0 : index
    %c0_131 = arith.constant 0 : index
    %c5_132 = arith.constant 5 : index
    %c0_133 = arith.constant 0 : index
    %c3_134 = arith.constant 3 : index
    %99 = vector.load %arg2[%c0_130, %c0_131, %c5_132, %c0_133, %c3_134] : memref<1x1x8x4x256xbf16, #tpu.memory_space<vmem>>, vector<1x1x1x4x128xbf16>
    %100 = vector.shape_cast %99 : vector<1x1x1x4x128xbf16> to vector<4x128xbf16>
    %cst_135 = arith.constant dense<0.000000e+00> : vector<8x128xf32>
    %101 = tpu.matmul %98, %100, %cst_135 {dimension_numbers = #tpu.dot_dimension_numbers<[1], [0], [0], [1], [0, 0, 1, 1], [], []>} : vector<8x4xbf16>, vector<4x128xbf16>, vector<8x128xf32> -> vector<8x128xf32>
    %102 = arith.addf %96, %101 : vector<8x128xf32>
    %c17 = arith.constant 17 : index
    %c0_136 = arith.constant 0 : index
    %c0_137 = arith.constant 0 : index
    %103 = vector.load %arg4[%c17, %c0_136, %c0_137] : memref<27x8x4xbf16, #tpu.memory_space<vmem>>, vector<1x8x4xbf16>
    %104 = vector.shape_cast %103 : vector<1x8x4xbf16> to vector<8x4xbf16>
    %c0_138 = arith.constant 0 : index
    %c0_139 = arith.constant 0 : index
    %c4_140 = arith.constant 4 : index
    %c0_141 = arith.constant 0 : index
    %c4_142 = arith.constant 4 : index
    %105 = vector.load %arg2[%c0_138, %c0_139, %c4_140, %c0_141, %c4_142] : memref<1x1x8x4x256xbf16, #tpu.memory_space<vmem>>, vector<1x1x1x4x128xbf16>
    %106 = vector.shape_cast %105 : vector<1x1x1x4x128xbf16> to vector<4x128xbf16>
    %cst_143 = arith.constant dense<0.000000e+00> : vector<8x128xf32>
    %107 = tpu.matmul %104, %106, %cst_143 {dimension_numbers = #tpu.dot_dimension_numbers<[1], [0], [0], [1], [0, 0, 1, 1], [], []>} : vector<8x4xbf16>, vector<4x128xbf16>, vector<8x128xf32> -> vector<8x128xf32>
    %108 = arith.addf %102, %107 : vector<8x128xf32>
    %c18 = arith.constant 18 : index
    %c0_144 = arith.constant 0 : index
    %c0_145 = arith.constant 0 : index
    %109 = vector.load %arg4[%c18, %c0_144, %c0_145] : memref<27x8x4xbf16, #tpu.memory_space<vmem>>, vector<1x8x4xbf16>
    %110 = vector.shape_cast %109 : vector<1x8x4xbf16> to vector<8x4xbf16>
    %c0_146 = arith.constant 0 : index
    %c0_147 = arith.constant 0 : index
    %c0_148 = arith.constant 0 : index
    %c0_149 = arith.constant 0 : index
    %c0_150 = arith.constant 0 : index
    %111 = vector.load %arg3[%c0_146, %c0_147, %c0_148, %c0_149, %c0_150] : memref<1x1x8x4x256xbf16, #tpu.memory_space<vmem>>, vector<1x1x1x4x128xbf16>
    %112 = vector.shape_cast %111 : vector<1x1x1x4x128xbf16> to vector<4x128xbf16>
    %cst_151 = arith.constant dense<0.000000e+00> : vector<8x128xf32>
    %113 = tpu.matmul %110, %112, %cst_151 {dimension_numbers = #tpu.dot_dimension_numbers<[1], [0], [0], [1], [0, 0, 1, 1], [], []>} : vector<8x4xbf16>, vector<4x128xbf16>, vector<8x128xf32> -> vector<8x128xf32>
    %114 = arith.addf %108, %113 : vector<8x128xf32>
    %c19 = arith.constant 19 : index
    %c0_152 = arith.constant 0 : index
    %c0_153 = arith.constant 0 : index
    %115 = vector.load %arg4[%c19, %c0_152, %c0_153] : memref<27x8x4xbf16, #tpu.memory_space<vmem>>, vector<1x8x4xbf16>
    %116 = vector.shape_cast %115 : vector<1x8x4xbf16> to vector<8x4xbf16>
    %c0_154 = arith.constant 0 : index
    %c0_155 = arith.constant 0 : index
    %c1_156 = arith.constant 1 : index
    %c0_157 = arith.constant 0 : index
    %c0_158 = arith.constant 0 : index
    %117 = vector.load %arg3[%c0_154, %c0_155, %c1_156, %c0_157, %c0_158] : memref<1x1x8x4x256xbf16, #tpu.memory_space<vmem>>, vector<1x1x1x4x128xbf16>
    %118 = vector.shape_cast %117 : vector<1x1x1x4x128xbf16> to vector<4x128xbf16>
    %cst_159 = arith.constant dense<0.000000e+00> : vector<8x128xf32>
    %119 = tpu.matmul %116, %118, %cst_159 {dimension_numbers = #tpu.dot_dimension_numbers<[1], [0], [0], [1], [0, 0, 1, 1], [], []>} : vector<8x4xbf16>, vector<4x128xbf16>, vector<8x128xf32> -> vector<8x128xf32>
    %120 = arith.addf %114, %119 : vector<8x128xf32>
    %c20 = arith.constant 20 : index
    %c0_160 = arith.constant 0 : index
    %c0_161 = arith.constant 0 : index
    %121 = vector.load %arg4[%c20, %c0_160, %c0_161] : memref<27x8x4xbf16, #tpu.memory_space<vmem>>, vector<1x8x4xbf16>
    %122 = vector.shape_cast %121 : vector<1x8x4xbf16> to vector<8x4xbf16>
    %c0_162 = arith.constant 0 : index
    %c0_163 = arith.constant 0 : index
    %c0_164 = arith.constant 0 : index
    %c0_165 = arith.constant 0 : index
    %c1_166 = arith.constant 1 : index
    %123 = vector.load %arg3[%c0_162, %c0_163, %c0_164, %c0_165, %c1_166] : memref<1x1x8x4x256xbf16, #tpu.memory_space<vmem>>, vector<1x1x1x4x128xbf16>
    %124 = vector.shape_cast %123 : vector<1x1x1x4x128xbf16> to vector<4x128xbf16>
    %cst_167 = arith.constant dense<0.000000e+00> : vector<8x128xf32>
    %125 = tpu.matmul %122, %124, %cst_167 {dimension_numbers = #tpu.dot_dimension_numbers<[1], [0], [0], [1], [0, 0, 1, 1], [], []>} : vector<8x4xbf16>, vector<4x128xbf16>, vector<8x128xf32> -> vector<8x128xf32>
    %126 = arith.addf %120, %125 : vector<8x128xf32>
    %c21 = arith.constant 21 : index
    %c0_168 = arith.constant 0 : index
    %c0_169 = arith.constant 0 : index
    %127 = vector.load %arg4[%c21, %c0_168, %c0_169] : memref<27x8x4xbf16, #tpu.memory_space<vmem>>, vector<1x8x4xbf16>
    %128 = vector.shape_cast %127 : vector<1x8x4xbf16> to vector<8x4xbf16>
    %c0_170 = arith.constant 0 : index
    %c0_171 = arith.constant 0 : index
    %c2_172 = arith.constant 2 : index
    %c0_173 = arith.constant 0 : index
    %c0_174 = arith.constant 0 : index
    %129 = vector.load %arg3[%c0_170, %c0_171, %c2_172, %c0_173, %c0_174] : memref<1x1x8x4x256xbf16, #tpu.memory_space<vmem>>, vector<1x1x1x4x128xbf16>
    %130 = vector.shape_cast %129 : vector<1x1x1x4x128xbf16> to vector<4x128xbf16>
    %cst_175 = arith.constant dense<0.000000e+00> : vector<8x128xf32>
    %131 = tpu.matmul %128, %130, %cst_175 {dimension_numbers = #tpu.dot_dimension_numbers<[1], [0], [0], [1], [0, 0, 1, 1], [], []>} : vector<8x4xbf16>, vector<4x128xbf16>, vector<8x128xf32> -> vector<8x128xf32>
    %132 = arith.addf %126, %131 : vector<8x128xf32>
    %c22 = arith.constant 22 : index
    %c0_176 = arith.constant 0 : index
    %c0_177 = arith.constant 0 : index
    %133 = vector.load %arg4[%c22, %c0_176, %c0_177] : memref<27x8x4xbf16, #tpu.memory_space<vmem>>, vector<1x8x4xbf16>
    %134 = vector.shape_cast %133 : vector<1x8x4xbf16> to vector<8x4xbf16>
    %c0_178 = arith.constant 0 : index
    %c0_179 = arith.constant 0 : index
    %c3_180 = arith.constant 3 : index
    %c0_181 = arith.constant 0 : index
    %c0_182 = arith.constant 0 : index
    %135 = vector.load %arg3[%c0_178, %c0_179, %c3_180, %c0_181, %c0_182] : memref<1x1x8x4x256xbf16, #tpu.memory_space<vmem>>, vector<1x1x1x4x128xbf16>
    %136 = vector.shape_cast %135 : vector<1x1x1x4x128xbf16> to vector<4x128xbf16>
    %cst_183 = arith.constant dense<0.000000e+00> : vector<8x128xf32>
    %137 = tpu.matmul %134, %136, %cst_183 {dimension_numbers = #tpu.dot_dimension_numbers<[1], [0], [0], [1], [0, 0, 1, 1], [], []>} : vector<8x4xbf16>, vector<4x128xbf16>, vector<8x128xf32> -> vector<8x128xf32>
    %138 = arith.addf %132, %137 : vector<8x128xf32>
    %c23 = arith.constant 23 : index
    %c0_184 = arith.constant 0 : index
    %c0_185 = arith.constant 0 : index
    %139 = vector.load %arg4[%c23, %c0_184, %c0_185] : memref<27x8x4xbf16, #tpu.memory_space<vmem>>, vector<1x8x4xbf16>
    %140 = vector.shape_cast %139 : vector<1x8x4xbf16> to vector<8x4xbf16>
    %c0_186 = arith.constant 0 : index
    %c0_187 = arith.constant 0 : index
    %c2_188 = arith.constant 2 : index
    %c0_189 = arith.constant 0 : index
    %c1_190 = arith.constant 1 : index
    %141 = vector.load %arg3[%c0_186, %c0_187, %c2_188, %c0_189, %c1_190] : memref<1x1x8x4x256xbf16, #tpu.memory_space<vmem>>, vector<1x1x1x4x128xbf16>
    %142 = vector.shape_cast %141 : vector<1x1x1x4x128xbf16> to vector<4x128xbf16>
    %cst_191 = arith.constant dense<0.000000e+00> : vector<8x128xf32>
    %143 = tpu.matmul %140, %142, %cst_191 {dimension_numbers = #tpu.dot_dimension_numbers<[1], [0], [0], [1], [0, 0, 1, 1], [], []>} : vector<8x4xbf16>, vector<4x128xbf16>, vector<8x128xf32> -> vector<8x128xf32>
    %144 = arith.addf %138, %143 : vector<8x128xf32>
    %c24 = arith.constant 24 : index
    %c0_192 = arith.constant 0 : index
    %c0_193 = arith.constant 0 : index
    %145 = vector.load %arg4[%c24, %c0_192, %c0_193] : memref<27x8x4xbf16, #tpu.memory_space<vmem>>, vector<1x8x4xbf16>
    %146 = vector.shape_cast %145 : vector<1x8x4xbf16> to vector<8x4xbf16>
    %c0_194 = arith.constant 0 : index
    %c0_195 = arith.constant 0 : index
    %c0_196 = arith.constant 0 : index
    %c0_197 = arith.constant 0 : index
    %c3_198 = arith.constant 3 : index
    %147 = vector.load %arg3[%c0_194, %c0_195, %c0_196, %c0_197, %c3_198] : memref<1x1x8x4x256xbf16, #tpu.memory_space<vmem>>, vector<1x1x1x4x128xbf16>
    %148 = vector.shape_cast %147 : vector<1x1x1x4x128xbf16> to vector<4x128xbf16>
    %cst_199 = arith.constant dense<0.000000e+00> : vector<8x128xf32>
    %149 = tpu.matmul %146, %148, %cst_199 {dimension_numbers = #tpu.dot_dimension_numbers<[1], [0], [0], [1], [0, 0, 1, 1], [], []>} : vector<8x4xbf16>, vector<4x128xbf16>, vector<8x128xf32> -> vector<8x128xf32>
    %150 = arith.addf %144, %149 : vector<8x128xf32>
    %c25 = arith.constant 25 : index
    %c0_200 = arith.constant 0 : index
    %c0_201 = arith.constant 0 : index
    %151 = vector.load %arg4[%c25, %c0_200, %c0_201] : memref<27x8x4xbf16, #tpu.memory_space<vmem>>, vector<1x8x4xbf16>
    %152 = vector.shape_cast %151 : vector<1x8x4xbf16> to vector<8x4xbf16>
    %c0_202 = arith.constant 0 : index
    %c0_203 = arith.constant 0 : index
    %c1_204 = arith.constant 1 : index
    %c0_205 = arith.constant 0 : index
    %c3_206 = arith.constant 3 : index
    %153 = vector.load %arg3[%c0_202, %c0_203, %c1_204, %c0_205, %c3_206] : memref<1x1x8x4x256xbf16, #tpu.memory_space<vmem>>, vector<1x1x1x4x128xbf16>
    %154 = vector.shape_cast %153 : vector<1x1x1x4x128xbf16> to vector<4x128xbf16>
    %cst_207 = arith.constant dense<0.000000e+00> : vector<8x128xf32>
    %155 = tpu.matmul %152, %154, %cst_207 {dimension_numbers = #tpu.dot_dimension_numbers<[1], [0], [0], [1], [0, 0, 1, 1], [], []>} : vector<8x4xbf16>, vector<4x128xbf16>, vector<8x128xf32> -> vector<8x128xf32>
    %156 = arith.addf %150, %155 : vector<8x128xf32>
    %c26 = arith.constant 26 : index
    %c0_208 = arith.constant 0 : index
    %c0_209 = arith.constant 0 : index
    %157 = vector.load %arg4[%c26, %c0_208, %c0_209] : memref<27x8x4xbf16, #tpu.memory_space<vmem>>, vector<1x8x4xbf16>
    %158 = vector.shape_cast %157 : vector<1x8x4xbf16> to vector<8x4xbf16>
    %c0_210 = arith.constant 0 : index
    %c0_211 = arith.constant 0 : index
    %c0_212 = arith.constant 0 : index
    %c0_213 = arith.constant 0 : index
    %c4_214 = arith.constant 4 : index
    %159 = vector.load %arg3[%c0_210, %c0_211, %c0_212, %c0_213, %c4_214] : memref<1x1x8x4x256xbf16, #tpu.memory_space<vmem>>, vector<1x1x1x4x128xbf16>
    %160 = vector.shape_cast %159 : vector<1x1x1x4x128xbf16> to vector<4x128xbf16>
    %cst_215 = arith.constant dense<0.000000e+00> : vector<8x128xf32>
    %161 = tpu.matmul %158, %160, %cst_215 {dimension_numbers = #tpu.dot_dimension_numbers<[1], [0], [0], [1], [0, 0, 1, 1], [], []>} : vector<8x4xbf16>, vector<4x128xbf16>, vector<8x128xf32> -> vector<8x128xf32>
    %162 = arith.addf %156, %161 : vector<8x128xf32>
    %c0_216 = arith.constant 0 : index
    %c0_217 = arith.constant 0 : index
    %163 = vector.load %arg5[%c0_216, %c0_217] : memref<8x1xf32, #tpu.memory_space<vmem>>, vector<8x1xf32>
    %164 = vector.broadcast %163 : vector<8x1xf32> to vector<8x128xf32>
    %165 = arith.addf %162, %164 : vector<8x128xf32>
    %cst_218 = arith.constant 0.000000e+00 : f32
    %166 = vector.broadcast %cst_218 : f32 to vector<8x128xf32>
    %167 = arith.cmpf oge, %165, %166 : vector<8x128xf32>
    %cst_219 = arith.constant 2.000000e-01 : f32
    %168 = vector.broadcast %cst_219 : f32 to vector<8x128xf32>
    %169 = arith.mulf %168, %165 : vector<8x128xf32>
    %170 = arith.select %167, %165, %169 : vector<8x128xi1>, vector<8x128xf32>
    %171 = arith.truncf %170 : vector<8x128xf32> to vector<8x128xbf16>
    %c0_220 = arith.constant 0 : index
    %c0_221 = arith.constant 0 : index
    %c0_222 = arith.constant 0 : index
    %c0_223 = arith.constant 0 : index
    %172 = vector.load %arg6[%c0_220, %c0_221, %c0_222, %c0_223] : memref<1x1x8x128xbf16, #tpu.memory_space<vmem>>, vector<1x1x8x128xbf16>
    %173 = vector.shape_cast %172 : vector<1x1x8x128xbf16> to vector<8x128xbf16>
    %174 = vector.shape_cast %171 : vector<8x128xbf16> to vector<1x1x8x128xbf16>
    tpu.vector_store %arg6[%c0_220, %c0_221, %c0_222, %c0_223], %174 {strides = array<i32>} : memref<1x1x8x128xbf16, #tpu.memory_space<vmem>>, vector<1x1x8x128xbf16>,
    return
  }
  func.func @transform_0(%arg0: i32, %arg1: i32) -> (i32, i32, i32, i32, i32) {
    %c0_i32 = arith.constant 0 : i32
    %0 = arith.addi %arg1, %c0_i32 : i32
    %c0_i32_0 = arith.constant 0 : i32
    %c0_i32_1 = arith.constant 0 : i32
    %c0_i32_2 = arith.constant 0 : i32
    %c0_i32_3 = arith.constant 0 : i32
    return %arg0, %0, %c0_i32_0, %c0_i32_1, %c0_i32_2 : i32, i32, i32, i32, i32
  }
  func.func @transform_1(%arg0: i32, %arg1: i32) -> (i32, i32, i32, i32, i32) {
    %c1_i32 = arith.constant 1 : i32
    %0 = arith.addi %arg1, %c1_i32 : i32
    %c0_i32 = arith.constant 0 : i32
    %c0_i32_0 = arith.constant 0 : i32
    %c0_i32_1 = arith.constant 0 : i32
    %c0_i32_2 = arith.constant 0 : i32
    return %arg0, %0, %c0_i32, %c0_i32_0, %c0_i32_1 : i32, i32, i32, i32, i32
  }
  func.func @transform_2(%arg0: i32, %arg1: i32) -> (i32, i32, i32) {
    %c0_i32 = arith.constant 0 : i32
    %c0_i32_0 = arith.constant 0 : i32
    %c0_i32_1 = arith.constant 0 : i32
    %c0_i32_2 = arith.constant 0 : i32
    return %c0_i32, %c0_i32_0, %c0_i32_1 : i32, i32, i32
  }
  func.func @transform_3(%arg0: i32, %arg1: i32) -> (i32, i32) {
    %c0_i32 = arith.constant 0 : i32
    %c0_i32_0 = arith.constant 0 : i32
    %c0_i32_1 = arith.constant 0 : i32
    return %c0_i32, %c0_i32_0 : i32, i32
  }
  func.func @transform_4(%arg0: i32, %arg1: i32) -> (i32, i32, i32, i32) {
    %c0_i32 = arith.constant 0 : i32
    %c0_i32_0 = arith.constant 0 : i32
    %c0_i32_1 = arith.constant 0 : i32
    return %arg0, %arg1, %c0_i32, %c0_i32_0 : i32, i32, i32, i32
  }
}

module attributes {stable_mosaic.version = 11 : i64} {
  func.func @_conv_s1_kernel(%arg0: i32, %arg1: i32, %arg2: memref<1x1x8x256xbf16, #tpu.memory_space<vmem>>, %arg3: memref<1x1x8x256xbf16, #tpu.memory_space<vmem>>, %arg4: memref<1x1x8x256xbf16, #tpu.memory_space<vmem>>, %arg5: memref<27x8x8xbf16, #tpu.memory_space<vmem>>, %arg6: memref<8x1xf32, #tpu.memory_space<vmem>>, %arg7: memref<1x1x8x128xbf16, #tpu.memory_space<vmem>>) attributes {dimension_semantics = [#tpu.dimension_semantics<parallel>, #tpu.dimension_semantics<parallel>], iteration_bounds = array<i64: 4, 2>, scalar_prefetch = 0 : i64, scratch_operands = 0 : i64, tpu.core_type = #tpu.core_type<tc>, window_params = [{transform_indices = @transform_0, window_bounds = array<i64: 1, 1, 8, 256>}, {transform_indices = @transform_1, window_bounds = array<i64: 1, 1, 8, 256>}, {transform_indices = @transform_2, window_bounds = array<i64: 1, 1, 8, 256>}, {pipeline_mode = #tpu.pipeline_mode<synchronous>, transform_indices = @transform_3, window_bounds = array<i64: 27, 8, 8>}, {pipeline_mode = #tpu.pipeline_mode<synchronous>, transform_indices = @transform_4, window_bounds = array<i64: 8, 1>}, {transform_indices = @transform_5, window_bounds = array<i64: 1, 1, 8, 128>}]} {
    %cst = arith.constant 0.000000e+00 : f32
    %0 = vector.broadcast %cst : f32 to vector<8x128xf32>
    %c0 = arith.constant 0 : index
    %c0_0 = arith.constant 0 : index
    %c0_1 = arith.constant 0 : index
    %1 = vector.load %arg5[%c0, %c0_0, %c0_1] : memref<27x8x8xbf16, #tpu.memory_space<vmem>>, vector<1x8x8xbf16>
    %2 = vector.shape_cast %1 : vector<1x8x8xbf16> to vector<8x8xbf16>
    %c0_2 = arith.constant 0 : index
    %c0_3 = arith.constant 0 : index
    %c0_4 = arith.constant 0 : index
    %c0_5 = arith.constant 0 : index
    %3 = vector.load %arg2[%c0_2, %c0_3, %c0_4, %c0_5] : memref<1x1x8x256xbf16, #tpu.memory_space<vmem>>, vector<1x1x8x128xbf16>
    %4 = vector.shape_cast %3 : vector<1x1x8x128xbf16> to vector<8x128xbf16>
    %cst_6 = arith.constant dense<0.000000e+00> : vector<8x128xf32>
    %5 = tpu.matmul %2, %4, %cst_6 {dimension_numbers = #tpu.dot_dimension_numbers<[1], [0], [0], [1], [0, 0, 1, 1], [], []>} : vector<8x8xbf16>, vector<8x128xbf16>, vector<8x128xf32> -> vector<8x128xf32>
    %6 = arith.addf %0, %5 : vector<8x128xf32>
    %c1 = arith.constant 1 : index
    %c0_7 = arith.constant 0 : index
    %c0_8 = arith.constant 0 : index
    %7 = vector.load %arg5[%c1, %c0_7, %c0_8] : memref<27x8x8xbf16, #tpu.memory_space<vmem>>, vector<1x8x8xbf16>
    %8 = vector.shape_cast %7 : vector<1x8x8xbf16> to vector<8x8xbf16>
    %c0_9 = arith.constant 0 : index
    %c0_10 = arith.constant 0 : index
    %c0_11 = arith.constant 0 : index
    %c1_12 = arith.constant 1 : index
    %9 = vector.load %arg2[%c0_9, %c0_10, %c0_11, %c1_12] : memref<1x1x8x256xbf16, #tpu.memory_space<vmem>>, vector<1x1x8x128xbf16>
    %10 = vector.shape_cast %9 : vector<1x1x8x128xbf16> to vector<8x128xbf16>
    %cst_13 = arith.constant dense<0.000000e+00> : vector<8x128xf32>
    %11 = tpu.matmul %8, %10, %cst_13 {dimension_numbers = #tpu.dot_dimension_numbers<[1], [0], [0], [1], [0, 0, 1, 1], [], []>} : vector<8x8xbf16>, vector<8x128xbf16>, vector<8x128xf32> -> vector<8x128xf32>
    %12 = arith.addf %6, %11 : vector<8x128xf32>
    %c2 = arith.constant 2 : index
    %c0_14 = arith.constant 0 : index
    %c0_15 = arith.constant 0 : index
    %13 = vector.load %arg5[%c2, %c0_14, %c0_15] : memref<27x8x8xbf16, #tpu.memory_space<vmem>>, vector<1x8x8xbf16>
    %14 = vector.shape_cast %13 : vector<1x8x8xbf16> to vector<8x8xbf16>
    %c0_16 = arith.constant 0 : index
    %c0_17 = arith.constant 0 : index
    %c0_18 = arith.constant 0 : index
    %c2_19 = arith.constant 2 : index
    %15 = vector.load %arg2[%c0_16, %c0_17, %c0_18, %c2_19] : memref<1x1x8x256xbf16, #tpu.memory_space<vmem>>, vector<1x1x8x128xbf16>
    %16 = vector.shape_cast %15 : vector<1x1x8x128xbf16> to vector<8x128xbf16>
    %cst_20 = arith.constant dense<0.000000e+00> : vector<8x128xf32>
    %17 = tpu.matmul %14, %16, %cst_20 {dimension_numbers = #tpu.dot_dimension_numbers<[1], [0], [0], [1], [0, 0, 1, 1], [], []>} : vector<8x8xbf16>, vector<8x128xbf16>, vector<8x128xf32> -> vector<8x128xf32>
    %18 = arith.addf %12, %17 : vector<8x128xf32>
    %c3 = arith.constant 3 : index
    %c0_21 = arith.constant 0 : index
    %c0_22 = arith.constant 0 : index
    %19 = vector.load %arg5[%c3, %c0_21, %c0_22] : memref<27x8x8xbf16, #tpu.memory_space<vmem>>, vector<1x8x8xbf16>
    %20 = vector.shape_cast %19 : vector<1x8x8xbf16> to vector<8x8xbf16>
    %c0_23 = arith.constant 0 : index
    %c0_24 = arith.constant 0 : index
    %c0_25 = arith.constant 0 : index
    %c4 = arith.constant 4 : index
    %21 = vector.load %arg2[%c0_23, %c0_24, %c0_25, %c4] : memref<1x1x8x256xbf16, #tpu.memory_space<vmem>>, vector<1x1x8x128xbf16>
    %22 = vector.shape_cast %21 : vector<1x1x8x128xbf16> to vector<8x128xbf16>
    %cst_26 = arith.constant dense<0.000000e+00> : vector<8x128xf32>
    %23 = tpu.matmul %20, %22, %cst_26 {dimension_numbers = #tpu.dot_dimension_numbers<[1], [0], [0], [1], [0, 0, 1, 1], [], []>} : vector<8x8xbf16>, vector<8x128xbf16>, vector<8x128xf32> -> vector<8x128xf32>
    %24 = arith.addf %18, %23 : vector<8x128xf32>
    %c4_27 = arith.constant 4 : index
    %c0_28 = arith.constant 0 : index
    %c0_29 = arith.constant 0 : index
    %25 = vector.load %arg5[%c4_27, %c0_28, %c0_29] : memref<27x8x8xbf16, #tpu.memory_space<vmem>>, vector<1x8x8xbf16>
    %26 = vector.shape_cast %25 : vector<1x8x8xbf16> to vector<8x8xbf16>
    %c0_30 = arith.constant 0 : index
    %c0_31 = arith.constant 0 : index
    %c0_32 = arith.constant 0 : index
    %c5 = arith.constant 5 : index
    %27 = vector.load %arg2[%c0_30, %c0_31, %c0_32, %c5] : memref<1x1x8x256xbf16, #tpu.memory_space<vmem>>, vector<1x1x8x128xbf16>
    %28 = vector.shape_cast %27 : vector<1x1x8x128xbf16> to vector<8x128xbf16>
    %cst_33 = arith.constant dense<0.000000e+00> : vector<8x128xf32>
    %29 = tpu.matmul %26, %28, %cst_33 {dimension_numbers = #tpu.dot_dimension_numbers<[1], [0], [0], [1], [0, 0, 1, 1], [], []>} : vector<8x8xbf16>, vector<8x128xbf16>, vector<8x128xf32> -> vector<8x128xf32>
    %30 = arith.addf %24, %29 : vector<8x128xf32>
    %c5_34 = arith.constant 5 : index
    %c0_35 = arith.constant 0 : index
    %c0_36 = arith.constant 0 : index
    %31 = vector.load %arg5[%c5_34, %c0_35, %c0_36] : memref<27x8x8xbf16, #tpu.memory_space<vmem>>, vector<1x8x8xbf16>
    %32 = vector.shape_cast %31 : vector<1x8x8xbf16> to vector<8x8xbf16>
    %c0_37 = arith.constant 0 : index
    %c0_38 = arith.constant 0 : index
    %c0_39 = arith.constant 0 : index
    %c6 = arith.constant 6 : index
    %33 = vector.load %arg2[%c0_37, %c0_38, %c0_39, %c6] : memref<1x1x8x256xbf16, #tpu.memory_space<vmem>>, vector<1x1x8x128xbf16>
    %34 = vector.shape_cast %33 : vector<1x1x8x128xbf16> to vector<8x128xbf16>
    %cst_40 = arith.constant dense<0.000000e+00> : vector<8x128xf32>
    %35 = tpu.matmul %32, %34, %cst_40 {dimension_numbers = #tpu.dot_dimension_numbers<[1], [0], [0], [1], [0, 0, 1, 1], [], []>} : vector<8x8xbf16>, vector<8x128xbf16>, vector<8x128xf32> -> vector<8x128xf32>
    %36 = arith.addf %30, %35 : vector<8x128xf32>
    %c6_41 = arith.constant 6 : index
    %c0_42 = arith.constant 0 : index
    %c0_43 = arith.constant 0 : index
    %37 = vector.load %arg5[%c6_41, %c0_42, %c0_43] : memref<27x8x8xbf16, #tpu.memory_space<vmem>>, vector<1x8x8xbf16>
    %38 = vector.shape_cast %37 : vector<1x8x8xbf16> to vector<8x8xbf16>
    %c0_44 = arith.constant 0 : index
    %c0_45 = arith.constant 0 : index
    %c0_46 = arith.constant 0 : index
    %c8 = arith.constant 8 : index
    %39 = vector.load %arg2[%c0_44, %c0_45, %c0_46, %c8] : memref<1x1x8x256xbf16, #tpu.memory_space<vmem>>, vector<1x1x8x128xbf16>
    %40 = vector.shape_cast %39 : vector<1x1x8x128xbf16> to vector<8x128xbf16>
    %cst_47 = arith.constant dense<0.000000e+00> : vector<8x128xf32>
    %41 = tpu.matmul %38, %40, %cst_47 {dimension_numbers = #tpu.dot_dimension_numbers<[1], [0], [0], [1], [0, 0, 1, 1], [], []>} : vector<8x8xbf16>, vector<8x128xbf16>, vector<8x128xf32> -> vector<8x128xf32>
    %42 = arith.addf %36, %41 : vector<8x128xf32>
    %c7 = arith.constant 7 : index
    %c0_48 = arith.constant 0 : index
    %c0_49 = arith.constant 0 : index
    %43 = vector.load %arg5[%c7, %c0_48, %c0_49] : memref<27x8x8xbf16, #tpu.memory_space<vmem>>, vector<1x8x8xbf16>
    %44 = vector.shape_cast %43 : vector<1x8x8xbf16> to vector<8x8xbf16>
    %c0_50 = arith.constant 0 : index
    %c0_51 = arith.constant 0 : index
    %c0_52 = arith.constant 0 : index
    %c9 = arith.constant 9 : index
    %45 = vector.load %arg2[%c0_50, %c0_51, %c0_52, %c9] : memref<1x1x8x256xbf16, #tpu.memory_space<vmem>>, vector<1x1x8x128xbf16>
    %46 = vector.shape_cast %45 : vector<1x1x8x128xbf16> to vector<8x128xbf16>
    %cst_53 = arith.constant dense<0.000000e+00> : vector<8x128xf32>
    %47 = tpu.matmul %44, %46, %cst_53 {dimension_numbers = #tpu.dot_dimension_numbers<[1], [0], [0], [1], [0, 0, 1, 1], [], []>} : vector<8x8xbf16>, vector<8x128xbf16>, vector<8x128xf32> -> vector<8x128xf32>
    %48 = arith.addf %42, %47 : vector<8x128xf32>
    %c8_54 = arith.constant 8 : index
    %c0_55 = arith.constant 0 : index
    %c0_56 = arith.constant 0 : index
    %49 = vector.load %arg5[%c8_54, %c0_55, %c0_56] : memref<27x8x8xbf16, #tpu.memory_space<vmem>>, vector<1x8x8xbf16>
    %50 = vector.shape_cast %49 : vector<1x8x8xbf16> to vector<8x8xbf16>
    %c0_57 = arith.constant 0 : index
    %c0_58 = arith.constant 0 : index
    %c0_59 = arith.constant 0 : index
    %c10 = arith.constant 10 : index
    %51 = vector.load %arg2[%c0_57, %c0_58, %c0_59, %c10] : memref<1x1x8x256xbf16, #tpu.memory_space<vmem>>, vector<1x1x8x128xbf16>
    %52 = vector.shape_cast %51 : vector<1x1x8x128xbf16> to vector<8x128xbf16>
    %cst_60 = arith.constant dense<0.000000e+00> : vector<8x128xf32>
    %53 = tpu.matmul %50, %52, %cst_60 {dimension_numbers = #tpu.dot_dimension_numbers<[1], [0], [0], [1], [0, 0, 1, 1], [], []>} : vector<8x8xbf16>, vector<8x128xbf16>, vector<8x128xf32> -> vector<8x128xf32>
    %54 = arith.addf %48, %53 : vector<8x128xf32>
    %c9_61 = arith.constant 9 : index
    %c0_62 = arith.constant 0 : index
    %c0_63 = arith.constant 0 : index
    %55 = vector.load %arg5[%c9_61, %c0_62, %c0_63] : memref<27x8x8xbf16, #tpu.memory_space<vmem>>, vector<1x8x8xbf16>
    %56 = vector.shape_cast %55 : vector<1x8x8xbf16> to vector<8x8xbf16>
    %c0_64 = arith.constant 0 : index
    %c0_65 = arith.constant 0 : index
    %c0_66 = arith.constant 0 : index
    %c0_67 = arith.constant 0 : index
    %57 = vector.load %arg3[%c0_64, %c0_65, %c0_66, %c0_67] : memref<1x1x8x256xbf16, #tpu.memory_space<vmem>>, vector<1x1x8x128xbf16>
    %58 = vector.shape_cast %57 : vector<1x1x8x128xbf16> to vector<8x128xbf16>
    %cst_68 = arith.constant dense<0.000000e+00> : vector<8x128xf32>
    %59 = tpu.matmul %56, %58, %cst_68 {dimension_numbers = #tpu.dot_dimension_numbers<[1], [0], [0], [1], [0, 0, 1, 1], [], []>} : vector<8x8xbf16>, vector<8x128xbf16>, vector<8x128xf32> -> vector<8x128xf32>
    %60 = arith.addf %54, %59 : vector<8x128xf32>
    %c10_69 = arith.constant 10 : index
    %c0_70 = arith.constant 0 : index
    %c0_71 = arith.constant 0 : index
    %61 = vector.load %arg5[%c10_69, %c0_70, %c0_71] : memref<27x8x8xbf16, #tpu.memory_space<vmem>>, vector<1x8x8xbf16>
    %62 = vector.shape_cast %61 : vector<1x8x8xbf16> to vector<8x8xbf16>
    %c0_72 = arith.constant 0 : index
    %c0_73 = arith.constant 0 : index
    %c0_74 = arith.constant 0 : index
    %c1_75 = arith.constant 1 : index
    %63 = vector.load %arg3[%c0_72, %c0_73, %c0_74, %c1_75] : memref<1x1x8x256xbf16, #tpu.memory_space<vmem>>, vector<1x1x8x128xbf16>
    %64 = vector.shape_cast %63 : vector<1x1x8x128xbf16> to vector<8x128xbf16>
    %cst_76 = arith.constant dense<0.000000e+00> : vector<8x128xf32>
    %65 = tpu.matmul %62, %64, %cst_76 {dimension_numbers = #tpu.dot_dimension_numbers<[1], [0], [0], [1], [0, 0, 1, 1], [], []>} : vector<8x8xbf16>, vector<8x128xbf16>, vector<8x128xf32> -> vector<8x128xf32>
    %66 = arith.addf %60, %65 : vector<8x128xf32>
    %c11 = arith.constant 11 : index
    %c0_77 = arith.constant 0 : index
    %c0_78 = arith.constant 0 : index
    %67 = vector.load %arg5[%c11, %c0_77, %c0_78] : memref<27x8x8xbf16, #tpu.memory_space<vmem>>, vector<1x8x8xbf16>
    %68 = vector.shape_cast %67 : vector<1x8x8xbf16> to vector<8x8xbf16>
    %c0_79 = arith.constant 0 : index
    %c0_80 = arith.constant 0 : index
    %c0_81 = arith.constant 0 : index
    %c2_82 = arith.constant 2 : index
    %69 = vector.load %arg3[%c0_79, %c0_80, %c0_81, %c2_82] : memref<1x1x8x256xbf16, #tpu.memory_space<vmem>>, vector<1x1x8x128xbf16>
    %70 = vector.shape_cast %69 : vector<1x1x8x128xbf16> to vector<8x128xbf16>
    %cst_83 = arith.constant dense<0.000000e+00> : vector<8x128xf32>
    %71 = tpu.matmul %68, %70, %cst_83 {dimension_numbers = #tpu.dot_dimension_numbers<[1], [0], [0], [1], [0, 0, 1, 1], [], []>} : vector<8x8xbf16>, vector<8x128xbf16>, vector<8x128xf32> -> vector<8x128xf32>
    %72 = arith.addf %66, %71 : vector<8x128xf32>
    %c12 = arith.constant 12 : index
    %c0_84 = arith.constant 0 : index
    %c0_85 = arith.constant 0 : index
    %73 = vector.load %arg5[%c12, %c0_84, %c0_85] : memref<27x8x8xbf16, #tpu.memory_space<vmem>>, vector<1x8x8xbf16>
    %74 = vector.shape_cast %73 : vector<1x8x8xbf16> to vector<8x8xbf16>
    %c0_86 = arith.constant 0 : index
    %c0_87 = arith.constant 0 : index
    %c0_88 = arith.constant 0 : index
    %c4_89 = arith.constant 4 : index
    %75 = vector.load %arg3[%c0_86, %c0_87, %c0_88, %c4_89] : memref<1x1x8x256xbf16, #tpu.memory_space<vmem>>, vector<1x1x8x128xbf16>
    %76 = vector.shape_cast %75 : vector<1x1x8x128xbf16> to vector<8x128xbf16>
    %cst_90 = arith.constant dense<0.000000e+00> : vector<8x128xf32>
    %77 = tpu.matmul %74, %76, %cst_90 {dimension_numbers = #tpu.dot_dimension_numbers<[1], [0], [0], [1], [0, 0, 1, 1], [], []>} : vector<8x8xbf16>, vector<8x128xbf16>, vector<8x128xf32> -> vector<8x128xf32>
    %78 = arith.addf %72, %77 : vector<8x128xf32>
    %c13 = arith.constant 13 : index
    %c0_91 = arith.constant 0 : index
    %c0_92 = arith.constant 0 : index
    %79 = vector.load %arg5[%c13, %c0_91, %c0_92] : memref<27x8x8xbf16, #tpu.memory_space<vmem>>, vector<1x8x8xbf16>
    %80 = vector.shape_cast %79 : vector<1x8x8xbf16> to vector<8x8xbf16>
    %c0_93 = arith.constant 0 : index
    %c0_94 = arith.constant 0 : index
    %c0_95 = arith.constant 0 : index
    %c5_96 = arith.constant 5 : index
    %81 = vector.load %arg3[%c0_93, %c0_94, %c0_95, %c5_96] : memref<1x1x8x256xbf16, #tpu.memory_space<vmem>>, vector<1x1x8x128xbf16>
    %82 = vector.shape_cast %81 : vector<1x1x8x128xbf16> to vector<8x128xbf16>
    %cst_97 = arith.constant dense<0.000000e+00> : vector<8x128xf32>
    %83 = tpu.matmul %80, %82, %cst_97 {dimension_numbers = #tpu.dot_dimension_numbers<[1], [0], [0], [1], [0, 0, 1, 1], [], []>} : vector<8x8xbf16>, vector<8x128xbf16>, vector<8x128xf32> -> vector<8x128xf32>
    %84 = arith.addf %78, %83 : vector<8x128xf32>
    %c14 = arith.constant 14 : index
    %c0_98 = arith.constant 0 : index
    %c0_99 = arith.constant 0 : index
    %85 = vector.load %arg5[%c14, %c0_98, %c0_99] : memref<27x8x8xbf16, #tpu.memory_space<vmem>>, vector<1x8x8xbf16>
    %86 = vector.shape_cast %85 : vector<1x8x8xbf16> to vector<8x8xbf16>
    %c0_100 = arith.constant 0 : index
    %c0_101 = arith.constant 0 : index
    %c0_102 = arith.constant 0 : index
    %c6_103 = arith.constant 6 : index
    %87 = vector.load %arg3[%c0_100, %c0_101, %c0_102, %c6_103] : memref<1x1x8x256xbf16, #tpu.memory_space<vmem>>, vector<1x1x8x128xbf16>
    %88 = vector.shape_cast %87 : vector<1x1x8x128xbf16> to vector<8x128xbf16>
    %cst_104 = arith.constant dense<0.000000e+00> : vector<8x128xf32>
    %89 = tpu.matmul %86, %88, %cst_104 {dimension_numbers = #tpu.dot_dimension_numbers<[1], [0], [0], [1], [0, 0, 1, 1], [], []>} : vector<8x8xbf16>, vector<8x128xbf16>, vector<8x128xf32> -> vector<8x128xf32>
    %90 = arith.addf %84, %89 : vector<8x128xf32>
    %c15 = arith.constant 15 : index
    %c0_105 = arith.constant 0 : index
    %c0_106 = arith.constant 0 : index
    %91 = vector.load %arg5[%c15, %c0_105, %c0_106] : memref<27x8x8xbf16, #tpu.memory_space<vmem>>, vector<1x8x8xbf16>
    %92 = vector.shape_cast %91 : vector<1x8x8xbf16> to vector<8x8xbf16>
    %c0_107 = arith.constant 0 : index
    %c0_108 = arith.constant 0 : index
    %c0_109 = arith.constant 0 : index
    %c8_110 = arith.constant 8 : index
    %93 = vector.load %arg3[%c0_107, %c0_108, %c0_109, %c8_110] : memref<1x1x8x256xbf16, #tpu.memory_space<vmem>>, vector<1x1x8x128xbf16>
    %94 = vector.shape_cast %93 : vector<1x1x8x128xbf16> to vector<8x128xbf16>
    %cst_111 = arith.constant dense<0.000000e+00> : vector<8x128xf32>
    %95 = tpu.matmul %92, %94, %cst_111 {dimension_numbers = #tpu.dot_dimension_numbers<[1], [0], [0], [1], [0, 0, 1, 1], [], []>} : vector<8x8xbf16>, vector<8x128xbf16>, vector<8x128xf32> -> vector<8x128xf32>
    %96 = arith.addf %90, %95 : vector<8x128xf32>
    %c16 = arith.constant 16 : index
    %c0_112 = arith.constant 0 : index
    %c0_113 = arith.constant 0 : index
    %97 = vector.load %arg5[%c16, %c0_112, %c0_113] : memref<27x8x8xbf16, #tpu.memory_space<vmem>>, vector<1x8x8xbf16>
    %98 = vector.shape_cast %97 : vector<1x8x8xbf16> to vector<8x8xbf16>
    %c0_114 = arith.constant 0 : index
    %c0_115 = arith.constant 0 : index
    %c0_116 = arith.constant 0 : index
    %c9_117 = arith.constant 9 : index
    %99 = vector.load %arg3[%c0_114, %c0_115, %c0_116, %c9_117] : memref<1x1x8x256xbf16, #tpu.memory_space<vmem>>, vector<1x1x8x128xbf16>
    %100 = vector.shape_cast %99 : vector<1x1x8x128xbf16> to vector<8x128xbf16>
    %cst_118 = arith.constant dense<0.000000e+00> : vector<8x128xf32>
    %101 = tpu.matmul %98, %100, %cst_118 {dimension_numbers = #tpu.dot_dimension_numbers<[1], [0], [0], [1], [0, 0, 1, 1], [], []>} : vector<8x8xbf16>, vector<8x128xbf16>, vector<8x128xf32> -> vector<8x128xf32>
    %102 = arith.addf %96, %101 : vector<8x128xf32>
    %c17 = arith.constant 17 : index
    %c0_119 = arith.constant 0 : index
    %c0_120 = arith.constant 0 : index
    %103 = vector.load %arg5[%c17, %c0_119, %c0_120] : memref<27x8x8xbf16, #tpu.memory_space<vmem>>, vector<1x8x8xbf16>
    %104 = vector.shape_cast %103 : vector<1x8x8xbf16> to vector<8x8xbf16>
    %c0_121 = arith.constant 0 : index
    %c0_122 = arith.constant 0 : index
    %c0_123 = arith.constant 0 : index
    %c10_124 = arith.constant 10 : index
    %105 = vector.load %arg3[%c0_121, %c0_122, %c0_123, %c10_124] : memref<1x1x8x256xbf16, #tpu.memory_space<vmem>>, vector<1x1x8x128xbf16>
    %106 = vector.shape_cast %105 : vector<1x1x8x128xbf16> to vector<8x128xbf16>
    %cst_125 = arith.constant dense<0.000000e+00> : vector<8x128xf32>
    %107 = tpu.matmul %104, %106, %cst_125 {dimension_numbers = #tpu.dot_dimension_numbers<[1], [0], [0], [1], [0, 0, 1, 1], [], []>} : vector<8x8xbf16>, vector<8x128xbf16>, vector<8x128xf32> -> vector<8x128xf32>
    %108 = arith.addf %102, %107 : vector<8x128xf32>
    %c18 = arith.constant 18 : index
    %c0_126 = arith.constant 0 : index
    %c0_127 = arith.constant 0 : index
    %109 = vector.load %arg5[%c18, %c0_126, %c0_127] : memref<27x8x8xbf16, #tpu.memory_space<vmem>>, vector<1x8x8xbf16>
    %110 = vector.shape_cast %109 : vector<1x8x8xbf16> to vector<8x8xbf16>
    %c0_128 = arith.constant 0 : index
    %c0_129 = arith.constant 0 : index
    %c0_130 = arith.constant 0 : index
    %c0_131 = arith.constant 0 : index
    %111 = vector.load %arg4[%c0_128, %c0_129, %c0_130, %c0_131] : memref<1x1x8x256xbf16, #tpu.memory_space<vmem>>, vector<1x1x8x128xbf16>
    %112 = vector.shape_cast %111 : vector<1x1x8x128xbf16> to vector<8x128xbf16>
    %cst_132 = arith.constant dense<0.000000e+00> : vector<8x128xf32>
    %113 = tpu.matmul %110, %112, %cst_132 {dimension_numbers = #tpu.dot_dimension_numbers<[1], [0], [0], [1], [0, 0, 1, 1], [], []>} : vector<8x8xbf16>, vector<8x128xbf16>, vector<8x128xf32> -> vector<8x128xf32>
    %114 = arith.addf %108, %113 : vector<8x128xf32>
    %c19 = arith.constant 19 : index
    %c0_133 = arith.constant 0 : index
    %c0_134 = arith.constant 0 : index
    %115 = vector.load %arg5[%c19, %c0_133, %c0_134] : memref<27x8x8xbf16, #tpu.memory_space<vmem>>, vector<1x8x8xbf16>
    %116 = vector.shape_cast %115 : vector<1x8x8xbf16> to vector<8x8xbf16>
    %c0_135 = arith.constant 0 : index
    %c0_136 = arith.constant 0 : index
    %c0_137 = arith.constant 0 : index
    %c1_138 = arith.constant 1 : index
    %117 = vector.load %arg4[%c0_135, %c0_136, %c0_137, %c1_138] : memref<1x1x8x256xbf16, #tpu.memory_space<vmem>>, vector<1x1x8x128xbf16>
    %118 = vector.shape_cast %117 : vector<1x1x8x128xbf16> to vector<8x128xbf16>
    %cst_139 = arith.constant dense<0.000000e+00> : vector<8x128xf32>
    %119 = tpu.matmul %116, %118, %cst_139 {dimension_numbers = #tpu.dot_dimension_numbers<[1], [0], [0], [1], [0, 0, 1, 1], [], []>} : vector<8x8xbf16>, vector<8x128xbf16>, vector<8x128xf32> -> vector<8x128xf32>
    %120 = arith.addf %114, %119 : vector<8x128xf32>
    %c20 = arith.constant 20 : index
    %c0_140 = arith.constant 0 : index
    %c0_141 = arith.constant 0 : index
    %121 = vector.load %arg5[%c20, %c0_140, %c0_141] : memref<27x8x8xbf16, #tpu.memory_space<vmem>>, vector<1x8x8xbf16>
    %122 = vector.shape_cast %121 : vector<1x8x8xbf16> to vector<8x8xbf16>
    %c0_142 = arith.constant 0 : index
    %c0_143 = arith.constant 0 : index
    %c0_144 = arith.constant 0 : index
    %c2_145 = arith.constant 2 : index
    %123 = vector.load %arg4[%c0_142, %c0_143, %c0_144, %c2_145] : memref<1x1x8x256xbf16, #tpu.memory_space<vmem>>, vector<1x1x8x128xbf16>
    %124 = vector.shape_cast %123 : vector<1x1x8x128xbf16> to vector<8x128xbf16>
    %cst_146 = arith.constant dense<0.000000e+00> : vector<8x128xf32>
    %125 = tpu.matmul %122, %124, %cst_146 {dimension_numbers = #tpu.dot_dimension_numbers<[1], [0], [0], [1], [0, 0, 1, 1], [], []>} : vector<8x8xbf16>, vector<8x128xbf16>, vector<8x128xf32> -> vector<8x128xf32>
    %126 = arith.addf %120, %125 : vector<8x128xf32>
    %c21 = arith.constant 21 : index
    %c0_147 = arith.constant 0 : index
    %c0_148 = arith.constant 0 : index
    %127 = vector.load %arg5[%c21, %c0_147, %c0_148] : memref<27x8x8xbf16, #tpu.memory_space<vmem>>, vector<1x8x8xbf16>
    %128 = vector.shape_cast %127 : vector<1x8x8xbf16> to vector<8x8xbf16>
    %c0_149 = arith.constant 0 : index
    %c0_150 = arith.constant 0 : index
    %c0_151 = arith.constant 0 : index
    %c4_152 = arith.constant 4 : index
    %129 = vector.load %arg4[%c0_149, %c0_150, %c0_151, %c4_152] : memref<1x1x8x256xbf16, #tpu.memory_space<vmem>>, vector<1x1x8x128xbf16>
    %130 = vector.shape_cast %129 : vector<1x1x8x128xbf16> to vector<8x128xbf16>
    %cst_153 = arith.constant dense<0.000000e+00> : vector<8x128xf32>
    %131 = tpu.matmul %128, %130, %cst_153 {dimension_numbers = #tpu.dot_dimension_numbers<[1], [0], [0], [1], [0, 0, 1, 1], [], []>} : vector<8x8xbf16>, vector<8x128xbf16>, vector<8x128xf32> -> vector<8x128xf32>
    %132 = arith.addf %126, %131 : vector<8x128xf32>
    %c22 = arith.constant 22 : index
    %c0_154 = arith.constant 0 : index
    %c0_155 = arith.constant 0 : index
    %133 = vector.load %arg5[%c22, %c0_154, %c0_155] : memref<27x8x8xbf16, #tpu.memory_space<vmem>>, vector<1x8x8xbf16>
    %134 = vector.shape_cast %133 : vector<1x8x8xbf16> to vector<8x8xbf16>
    %c0_156 = arith.constant 0 : index
    %c0_157 = arith.constant 0 : index
    %c0_158 = arith.constant 0 : index
    %c5_159 = arith.constant 5 : index
    %135 = vector.load %arg4[%c0_156, %c0_157, %c0_158, %c5_159] : memref<1x1x8x256xbf16, #tpu.memory_space<vmem>>, vector<1x1x8x128xbf16>
    %136 = vector.shape_cast %135 : vector<1x1x8x128xbf16> to vector<8x128xbf16>
    %cst_160 = arith.constant dense<0.000000e+00> : vector<8x128xf32>
    %137 = tpu.matmul %134, %136, %cst_160 {dimension_numbers = #tpu.dot_dimension_numbers<[1], [0], [0], [1], [0, 0, 1, 1], [], []>} : vector<8x8xbf16>, vector<8x128xbf16>, vector<8x128xf32> -> vector<8x128xf32>
    %138 = arith.addf %132, %137 : vector<8x128xf32>
    %c23 = arith.constant 23 : index
    %c0_161 = arith.constant 0 : index
    %c0_162 = arith.constant 0 : index
    %139 = vector.load %arg5[%c23, %c0_161, %c0_162] : memref<27x8x8xbf16, #tpu.memory_space<vmem>>, vector<1x8x8xbf16>
    %140 = vector.shape_cast %139 : vector<1x8x8xbf16> to vector<8x8xbf16>
    %c0_163 = arith.constant 0 : index
    %c0_164 = arith.constant 0 : index
    %c0_165 = arith.constant 0 : index
    %c6_166 = arith.constant 6 : index
    %141 = vector.load %arg4[%c0_163, %c0_164, %c0_165, %c6_166] : memref<1x1x8x256xbf16, #tpu.memory_space<vmem>>, vector<1x1x8x128xbf16>
    %142 = vector.shape_cast %141 : vector<1x1x8x128xbf16> to vector<8x128xbf16>
    %cst_167 = arith.constant dense<0.000000e+00> : vector<8x128xf32>
    %143 = tpu.matmul %140, %142, %cst_167 {dimension_numbers = #tpu.dot_dimension_numbers<[1], [0], [0], [1], [0, 0, 1, 1], [], []>} : vector<8x8xbf16>, vector<8x128xbf16>, vector<8x128xf32> -> vector<8x128xf32>
    %144 = arith.addf %138, %143 : vector<8x128xf32>
    %c24 = arith.constant 24 : index
    %c0_168 = arith.constant 0 : index
    %c0_169 = arith.constant 0 : index
    %145 = vector.load %arg5[%c24, %c0_168, %c0_169] : memref<27x8x8xbf16, #tpu.memory_space<vmem>>, vector<1x8x8xbf16>
    %146 = vector.shape_cast %145 : vector<1x8x8xbf16> to vector<8x8xbf16>
    %c0_170 = arith.constant 0 : index
    %c0_171 = arith.constant 0 : index
    %c0_172 = arith.constant 0 : index
    %c8_173 = arith.constant 8 : index
    %147 = vector.load %arg4[%c0_170, %c0_171, %c0_172, %c8_173] : memref<1x1x8x256xbf16, #tpu.memory_space<vmem>>, vector<1x1x8x128xbf16>
    %148 = vector.shape_cast %147 : vector<1x1x8x128xbf16> to vector<8x128xbf16>
    %cst_174 = arith.constant dense<0.000000e+00> : vector<8x128xf32>
    %149 = tpu.matmul %146, %148, %cst_174 {dimension_numbers = #tpu.dot_dimension_numbers<[1], [0], [0], [1], [0, 0, 1, 1], [], []>} : vector<8x8xbf16>, vector<8x128xbf16>, vector<8x128xf32> -> vector<8x128xf32>
    %150 = arith.addf %144, %149 : vector<8x128xf32>
    %c25 = arith.constant 25 : index
    %c0_175 = arith.constant 0 : index
    %c0_176 = arith.constant 0 : index
    %151 = vector.load %arg5[%c25, %c0_175, %c0_176] : memref<27x8x8xbf16, #tpu.memory_space<vmem>>, vector<1x8x8xbf16>
    %152 = vector.shape_cast %151 : vector<1x8x8xbf16> to vector<8x8xbf16>
    %c0_177 = arith.constant 0 : index
    %c0_178 = arith.constant 0 : index
    %c0_179 = arith.constant 0 : index
    %c9_180 = arith.constant 9 : index
    %153 = vector.load %arg4[%c0_177, %c0_178, %c0_179, %c9_180] : memref<1x1x8x256xbf16, #tpu.memory_space<vmem>>, vector<1x1x8x128xbf16>
    %154 = vector.shape_cast %153 : vector<1x1x8x128xbf16> to vector<8x128xbf16>
    %cst_181 = arith.constant dense<0.000000e+00> : vector<8x128xf32>
    %155 = tpu.matmul %152, %154, %cst_181 {dimension_numbers = #tpu.dot_dimension_numbers<[1], [0], [0], [1], [0, 0, 1, 1], [], []>} : vector<8x8xbf16>, vector<8x128xbf16>, vector<8x128xf32> -> vector<8x128xf32>
    %156 = arith.addf %150, %155 : vector<8x128xf32>
    %c26 = arith.constant 26 : index
    %c0_182 = arith.constant 0 : index
    %c0_183 = arith.constant 0 : index
    %157 = vector.load %arg5[%c26, %c0_182, %c0_183] : memref<27x8x8xbf16, #tpu.memory_space<vmem>>, vector<1x8x8xbf16>
    %158 = vector.shape_cast %157 : vector<1x8x8xbf16> to vector<8x8xbf16>
    %c0_184 = arith.constant 0 : index
    %c0_185 = arith.constant 0 : index
    %c0_186 = arith.constant 0 : index
    %c10_187 = arith.constant 10 : index
    %159 = vector.load %arg4[%c0_184, %c0_185, %c0_186, %c10_187] : memref<1x1x8x256xbf16, #tpu.memory_space<vmem>>, vector<1x1x8x128xbf16>
    %160 = vector.shape_cast %159 : vector<1x1x8x128xbf16> to vector<8x128xbf16>
    %cst_188 = arith.constant dense<0.000000e+00> : vector<8x128xf32>
    %161 = tpu.matmul %158, %160, %cst_188 {dimension_numbers = #tpu.dot_dimension_numbers<[1], [0], [0], [1], [0, 0, 1, 1], [], []>} : vector<8x8xbf16>, vector<8x128xbf16>, vector<8x128xf32> -> vector<8x128xf32>
    %162 = arith.addf %156, %161 : vector<8x128xf32>
    %c0_189 = arith.constant 0 : index
    %c0_190 = arith.constant 0 : index
    %163 = vector.load %arg6[%c0_189, %c0_190] : memref<8x1xf32, #tpu.memory_space<vmem>>, vector<8x1xf32>
    %164 = vector.broadcast %163 : vector<8x1xf32> to vector<8x128xf32>
    %165 = arith.addf %162, %164 : vector<8x128xf32>
    %cst_191 = arith.constant 0.000000e+00 : f32
    %166 = vector.broadcast %cst_191 : f32 to vector<8x128xf32>
    %167 = arith.cmpf oge, %165, %166 : vector<8x128xf32>
    %cst_192 = arith.constant 2.000000e-01 : f32
    %168 = vector.broadcast %cst_192 : f32 to vector<8x128xf32>
    %169 = arith.mulf %168, %165 : vector<8x128xf32>
    %170 = arith.select %167, %165, %169 : vector<8x128xi1>, vector<8x128xf32>
    %171 = arith.truncf %170 : vector<8x128xf32> to vector<8x128xbf16>
    %c0_193 = arith.constant 0 : index
    %c0_194 = arith.constant 0 : index
    %c0_195 = arith.constant 0 : index
    %c0_196 = arith.constant 0 : index
    %172 = vector.load %arg7[%c0_193, %c0_194, %c0_195, %c0_196] : memref<1x1x8x128xbf16, #tpu.memory_space<vmem>>, vector<1x1x8x128xbf16>
    %173 = vector.shape_cast %172 : vector<1x1x8x128xbf16> to vector<8x128xbf16>
    %174 = vector.shape_cast %171 : vector<8x128xbf16> to vector<1x1x8x128xbf16>
    tpu.vector_store %arg7[%c0_193, %c0_194, %c0_195, %c0_196], %174 {strides = array<i32>} : memref<1x1x8x128xbf16, #tpu.memory_space<vmem>>, vector<1x1x8x128xbf16>,
    return
  }
  func.func @transform_0(%arg0: i32, %arg1: i32) -> (i32, i32, i32, i32) {
    %c0_i32 = arith.constant 0 : i32
    %0 = arith.addi %arg1, %c0_i32 : i32
    %c0_i32_0 = arith.constant 0 : i32
    %c0_i32_1 = arith.constant 0 : i32
    %c0_i32_2 = arith.constant 0 : i32
    return %arg0, %0, %c0_i32_0, %c0_i32_1 : i32, i32, i32, i32
  }
  func.func @transform_1(%arg0: i32, %arg1: i32) -> (i32, i32, i32, i32) {
    %c1_i32 = arith.constant 1 : i32
    %0 = arith.addi %arg1, %c1_i32 : i32
    %c0_i32 = arith.constant 0 : i32
    %c0_i32_0 = arith.constant 0 : i32
    %c0_i32_1 = arith.constant 0 : i32
    return %arg0, %0, %c0_i32, %c0_i32_0 : i32, i32, i32, i32
  }
  func.func @transform_2(%arg0: i32, %arg1: i32) -> (i32, i32, i32, i32) {
    %c2_i32 = arith.constant 2 : i32
    %0 = arith.addi %arg1, %c2_i32 : i32
    %c0_i32 = arith.constant 0 : i32
    %c0_i32_0 = arith.constant 0 : i32
    %c0_i32_1 = arith.constant 0 : i32
    return %arg0, %0, %c0_i32, %c0_i32_0 : i32, i32, i32, i32
  }
  func.func @transform_3(%arg0: i32, %arg1: i32) -> (i32, i32, i32) {
    %c0_i32 = arith.constant 0 : i32
    %c0_i32_0 = arith.constant 0 : i32
    %c0_i32_1 = arith.constant 0 : i32
    %c0_i32_2 = arith.constant 0 : i32
    return %c0_i32, %c0_i32_0, %c0_i32_1 : i32, i32, i32
  }
  func.func @transform_4(%arg0: i32, %arg1: i32) -> (i32, i32) {
    %c0_i32 = arith.constant 0 : i32
    %c0_i32_0 = arith.constant 0 : i32
    %c0_i32_1 = arith.constant 0 : i32
    return %c0_i32, %c0_i32_0 : i32, i32
  }
  func.func @transform_5(%arg0: i32, %arg1: i32) -> (i32, i32, i32, i32) {
    %c0_i32 = arith.constant 0 : i32
    %c0_i32_0 = arith.constant 0 : i32
    %c0_i32_1 = arith.constant 0 : i32
    return %arg0, %arg1, %c0_i32, %c0_i32_0 : i32, i32, i32, i32
  }
}

module attributes {stable_mosaic.version = 11 : i64} {
  func.func @_conv_s1_kernel(%arg0: i32, %arg1: i32, %arg2: memref<1x1x12x256xbf16, #tpu.memory_space<vmem>>, %arg3: memref<1x1x12x256xbf16, #tpu.memory_space<vmem>>, %arg4: memref<1x1x12x256xbf16, #tpu.memory_space<vmem>>, %arg5: memref<27x4x12xbf16, #tpu.memory_space<vmem>>, %arg6: memref<4x1xf32, #tpu.memory_space<vmem>>, %arg7: memref<1x1x4x128xbf16, #tpu.memory_space<vmem>>) attributes {dimension_semantics = [#tpu.dimension_semantics<parallel>, #tpu.dimension_semantics<parallel>], iteration_bounds = array<i64: 4, 4>, scalar_prefetch = 0 : i64, scratch_operands = 0 : i64, tpu.core_type = #tpu.core_type<tc>, window_params = [{transform_indices = @transform_0, window_bounds = array<i64: 1, 1, 12, 256>}, {transform_indices = @transform_1, window_bounds = array<i64: 1, 1, 12, 256>}, {transform_indices = @transform_2, window_bounds = array<i64: 1, 1, 12, 256>}, {pipeline_mode = #tpu.pipeline_mode<synchronous>, transform_indices = @transform_3, window_bounds = array<i64: 27, 4, 12>}, {pipeline_mode = #tpu.pipeline_mode<synchronous>, transform_indices = @transform_4, window_bounds = array<i64: 4, 1>}, {transform_indices = @transform_5, window_bounds = array<i64: 1, 1, 4, 128>}]} {
    %cst = arith.constant 0.000000e+00 : f32
    %0 = vector.broadcast %cst : f32 to vector<4x128xf32>
    %c0 = arith.constant 0 : index
    %c0_0 = arith.constant 0 : index
    %c0_1 = arith.constant 0 : index
    %1 = vector.load %arg5[%c0, %c0_0, %c0_1] : memref<27x4x12xbf16, #tpu.memory_space<vmem>>, vector<1x4x12xbf16>
    %2 = vector.shape_cast %1 : vector<1x4x12xbf16> to vector<4x12xbf16>
    %c0_2 = arith.constant 0 : index
    %c0_3 = arith.constant 0 : index
    %c0_4 = arith.constant 0 : index
    %c0_5 = arith.constant 0 : index
    %3 = vector.load %arg2[%c0_2, %c0_3, %c0_4, %c0_5] : memref<1x1x12x256xbf16, #tpu.memory_space<vmem>>, vector<1x1x12x128xbf16>
    %4 = vector.shape_cast %3 : vector<1x1x12x128xbf16> to vector<12x128xbf16>
    %cst_6 = arith.constant dense<0.000000e+00> : vector<4x128xf32>
    %5 = tpu.matmul %2, %4, %cst_6 {dimension_numbers = #tpu.dot_dimension_numbers<[1], [0], [0], [1], [0, 0, 1, 1], [], []>} : vector<4x12xbf16>, vector<12x128xbf16>, vector<4x128xf32> -> vector<4x128xf32>
    %6 = arith.addf %0, %5 : vector<4x128xf32>
    %c1 = arith.constant 1 : index
    %c0_7 = arith.constant 0 : index
    %c0_8 = arith.constant 0 : index
    %7 = vector.load %arg5[%c1, %c0_7, %c0_8] : memref<27x4x12xbf16, #tpu.memory_space<vmem>>, vector<1x4x12xbf16>
    %8 = vector.shape_cast %7 : vector<1x4x12xbf16> to vector<4x12xbf16>
    %c0_9 = arith.constant 0 : index
    %c0_10 = arith.constant 0 : index
    %c0_11 = arith.constant 0 : index
    %c1_12 = arith.constant 1 : index
    %9 = vector.load %arg2[%c0_9, %c0_10, %c0_11, %c1_12] : memref<1x1x12x256xbf16, #tpu.memory_space<vmem>>, vector<1x1x12x128xbf16>
    %10 = vector.shape_cast %9 : vector<1x1x12x128xbf16> to vector<12x128xbf16>
    %cst_13 = arith.constant dense<0.000000e+00> : vector<4x128xf32>
    %11 = tpu.matmul %8, %10, %cst_13 {dimension_numbers = #tpu.dot_dimension_numbers<[1], [0], [0], [1], [0, 0, 1, 1], [], []>} : vector<4x12xbf16>, vector<12x128xbf16>, vector<4x128xf32> -> vector<4x128xf32>
    %12 = arith.addf %6, %11 : vector<4x128xf32>
    %c2 = arith.constant 2 : index
    %c0_14 = arith.constant 0 : index
    %c0_15 = arith.constant 0 : index
    %13 = vector.load %arg5[%c2, %c0_14, %c0_15] : memref<27x4x12xbf16, #tpu.memory_space<vmem>>, vector<1x4x12xbf16>
    %14 = vector.shape_cast %13 : vector<1x4x12xbf16> to vector<4x12xbf16>
    %c0_16 = arith.constant 0 : index
    %c0_17 = arith.constant 0 : index
    %c0_18 = arith.constant 0 : index
    %c2_19 = arith.constant 2 : index
    %15 = vector.load %arg2[%c0_16, %c0_17, %c0_18, %c2_19] : memref<1x1x12x256xbf16, #tpu.memory_space<vmem>>, vector<1x1x12x128xbf16>
    %16 = vector.shape_cast %15 : vector<1x1x12x128xbf16> to vector<12x128xbf16>
    %cst_20 = arith.constant dense<0.000000e+00> : vector<4x128xf32>
    %17 = tpu.matmul %14, %16, %cst_20 {dimension_numbers = #tpu.dot_dimension_numbers<[1], [0], [0], [1], [0, 0, 1, 1], [], []>} : vector<4x12xbf16>, vector<12x128xbf16>, vector<4x128xf32> -> vector<4x128xf32>
    %18 = arith.addf %12, %17 : vector<4x128xf32>
    %c3 = arith.constant 3 : index
    %c0_21 = arith.constant 0 : index
    %c0_22 = arith.constant 0 : index
    %19 = vector.load %arg5[%c3, %c0_21, %c0_22] : memref<27x4x12xbf16, #tpu.memory_space<vmem>>, vector<1x4x12xbf16>
    %20 = vector.shape_cast %19 : vector<1x4x12xbf16> to vector<4x12xbf16>
    %c0_23 = arith.constant 0 : index
    %c0_24 = arith.constant 0 : index
    %c0_25 = arith.constant 0 : index
    %c6 = arith.constant 6 : index
    %21 = vector.load %arg2[%c0_23, %c0_24, %c0_25, %c6] : memref<1x1x12x256xbf16, #tpu.memory_space<vmem>>, vector<1x1x12x128xbf16>
    %22 = vector.shape_cast %21 : vector<1x1x12x128xbf16> to vector<12x128xbf16>
    %cst_26 = arith.constant dense<0.000000e+00> : vector<4x128xf32>
    %23 = tpu.matmul %20, %22, %cst_26 {dimension_numbers = #tpu.dot_dimension_numbers<[1], [0], [0], [1], [0, 0, 1, 1], [], []>} : vector<4x12xbf16>, vector<12x128xbf16>, vector<4x128xf32> -> vector<4x128xf32>
    %24 = arith.addf %18, %23 : vector<4x128xf32>
    %c4 = arith.constant 4 : index
    %c0_27 = arith.constant 0 : index
    %c0_28 = arith.constant 0 : index
    %25 = vector.load %arg5[%c4, %c0_27, %c0_28] : memref<27x4x12xbf16, #tpu.memory_space<vmem>>, vector<1x4x12xbf16>
    %26 = vector.shape_cast %25 : vector<1x4x12xbf16> to vector<4x12xbf16>
    %c0_29 = arith.constant 0 : index
    %c0_30 = arith.constant 0 : index
    %c0_31 = arith.constant 0 : index
    %c7 = arith.constant 7 : index
    %27 = vector.load %arg2[%c0_29, %c0_30, %c0_31, %c7] : memref<1x1x12x256xbf16, #tpu.memory_space<vmem>>, vector<1x1x12x128xbf16>
    %28 = vector.shape_cast %27 : vector<1x1x12x128xbf16> to vector<12x128xbf16>
    %cst_32 = arith.constant dense<0.000000e+00> : vector<4x128xf32>
    %29 = tpu.matmul %26, %28, %cst_32 {dimension_numbers = #tpu.dot_dimension_numbers<[1], [0], [0], [1], [0, 0, 1, 1], [], []>} : vector<4x12xbf16>, vector<12x128xbf16>, vector<4x128xf32> -> vector<4x128xf32>
    %30 = arith.addf %24, %29 : vector<4x128xf32>
    %c5 = arith.constant 5 : index
    %c0_33 = arith.constant 0 : index
    %c0_34 = arith.constant 0 : index
    %31 = vector.load %arg5[%c5, %c0_33, %c0_34] : memref<27x4x12xbf16, #tpu.memory_space<vmem>>, vector<1x4x12xbf16>
    %32 = vector.shape_cast %31 : vector<1x4x12xbf16> to vector<4x12xbf16>
    %c0_35 = arith.constant 0 : index
    %c0_36 = arith.constant 0 : index
    %c0_37 = arith.constant 0 : index
    %c8 = arith.constant 8 : index
    %33 = vector.load %arg2[%c0_35, %c0_36, %c0_37, %c8] : memref<1x1x12x256xbf16, #tpu.memory_space<vmem>>, vector<1x1x12x128xbf16>
    %34 = vector.shape_cast %33 : vector<1x1x12x128xbf16> to vector<12x128xbf16>
    %cst_38 = arith.constant dense<0.000000e+00> : vector<4x128xf32>
    %35 = tpu.matmul %32, %34, %cst_38 {dimension_numbers = #tpu.dot_dimension_numbers<[1], [0], [0], [1], [0, 0, 1, 1], [], []>} : vector<4x12xbf16>, vector<12x128xbf16>, vector<4x128xf32> -> vector<4x128xf32>
    %36 = arith.addf %30, %35 : vector<4x128xf32>
    %c6_39 = arith.constant 6 : index
    %c0_40 = arith.constant 0 : index
    %c0_41 = arith.constant 0 : index
    %37 = vector.load %arg5[%c6_39, %c0_40, %c0_41] : memref<27x4x12xbf16, #tpu.memory_space<vmem>>, vector<1x4x12xbf16>
    %38 = vector.shape_cast %37 : vector<1x4x12xbf16> to vector<4x12xbf16>
    %c0_42 = arith.constant 0 : index
    %c0_43 = arith.constant 0 : index
    %c0_44 = arith.constant 0 : index
    %c12 = arith.constant 12 : index
    %39 = vector.load %arg2[%c0_42, %c0_43, %c0_44, %c12] : memref<1x1x12x256xbf16, #tpu.memory_space<vmem>>, vector<1x1x12x128xbf16>
    %40 = vector.shape_cast %39 : vector<1x1x12x128xbf16> to vector<12x128xbf16>
    %cst_45 = arith.constant dense<0.000000e+00> : vector<4x128xf32>
    %41 = tpu.matmul %38, %40, %cst_45 {dimension_numbers = #tpu.dot_dimension_numbers<[1], [0], [0], [1], [0, 0, 1, 1], [], []>} : vector<4x12xbf16>, vector<12x128xbf16>, vector<4x128xf32> -> vector<4x128xf32>
    %42 = arith.addf %36, %41 : vector<4x128xf32>
    %c7_46 = arith.constant 7 : index
    %c0_47 = arith.constant 0 : index
    %c0_48 = arith.constant 0 : index
    %43 = vector.load %arg5[%c7_46, %c0_47, %c0_48] : memref<27x4x12xbf16, #tpu.memory_space<vmem>>, vector<1x4x12xbf16>
    %44 = vector.shape_cast %43 : vector<1x4x12xbf16> to vector<4x12xbf16>
    %c0_49 = arith.constant 0 : index
    %c0_50 = arith.constant 0 : index
    %c0_51 = arith.constant 0 : index
    %c13 = arith.constant 13 : index
    %45 = vector.load %arg2[%c0_49, %c0_50, %c0_51, %c13] : memref<1x1x12x256xbf16, #tpu.memory_space<vmem>>, vector<1x1x12x128xbf16>
    %46 = vector.shape_cast %45 : vector<1x1x12x128xbf16> to vector<12x128xbf16>
    %cst_52 = arith.constant dense<0.000000e+00> : vector<4x128xf32>
    %47 = tpu.matmul %44, %46, %cst_52 {dimension_numbers = #tpu.dot_dimension_numbers<[1], [0], [0], [1], [0, 0, 1, 1], [], []>} : vector<4x12xbf16>, vector<12x128xbf16>, vector<4x128xf32> -> vector<4x128xf32>
    %48 = arith.addf %42, %47 : vector<4x128xf32>
    %c8_53 = arith.constant 8 : index
    %c0_54 = arith.constant 0 : index
    %c0_55 = arith.constant 0 : index
    %49 = vector.load %arg5[%c8_53, %c0_54, %c0_55] : memref<27x4x12xbf16, #tpu.memory_space<vmem>>, vector<1x4x12xbf16>
    %50 = vector.shape_cast %49 : vector<1x4x12xbf16> to vector<4x12xbf16>
    %c0_56 = arith.constant 0 : index
    %c0_57 = arith.constant 0 : index
    %c0_58 = arith.constant 0 : index
    %c14 = arith.constant 14 : index
    %51 = vector.load %arg2[%c0_56, %c0_57, %c0_58, %c14] : memref<1x1x12x256xbf16, #tpu.memory_space<vmem>>, vector<1x1x12x128xbf16>
    %52 = vector.shape_cast %51 : vector<1x1x12x128xbf16> to vector<12x128xbf16>
    %cst_59 = arith.constant dense<0.000000e+00> : vector<4x128xf32>
    %53 = tpu.matmul %50, %52, %cst_59 {dimension_numbers = #tpu.dot_dimension_numbers<[1], [0], [0], [1], [0, 0, 1, 1], [], []>} : vector<4x12xbf16>, vector<12x128xbf16>, vector<4x128xf32> -> vector<4x128xf32>
    %54 = arith.addf %48, %53 : vector<4x128xf32>
    %c9 = arith.constant 9 : index
    %c0_60 = arith.constant 0 : index
    %c0_61 = arith.constant 0 : index
    %55 = vector.load %arg5[%c9, %c0_60, %c0_61] : memref<27x4x12xbf16, #tpu.memory_space<vmem>>, vector<1x4x12xbf16>
    %56 = vector.shape_cast %55 : vector<1x4x12xbf16> to vector<4x12xbf16>
    %c0_62 = arith.constant 0 : index
    %c0_63 = arith.constant 0 : index
    %c0_64 = arith.constant 0 : index
    %c0_65 = arith.constant 0 : index
    %57 = vector.load %arg3[%c0_62, %c0_63, %c0_64, %c0_65] : memref<1x1x12x256xbf16, #tpu.memory_space<vmem>>, vector<1x1x12x128xbf16>
    %58 = vector.shape_cast %57 : vector<1x1x12x128xbf16> to vector<12x128xbf16>
    %cst_66 = arith.constant dense<0.000000e+00> : vector<4x128xf32>
    %59 = tpu.matmul %56, %58, %cst_66 {dimension_numbers = #tpu.dot_dimension_numbers<[1], [0], [0], [1], [0, 0, 1, 1], [], []>} : vector<4x12xbf16>, vector<12x128xbf16>, vector<4x128xf32> -> vector<4x128xf32>
    %60 = arith.addf %54, %59 : vector<4x128xf32>
    %c10 = arith.constant 10 : index
    %c0_67 = arith.constant 0 : index
    %c0_68 = arith.constant 0 : index
    %61 = vector.load %arg5[%c10, %c0_67, %c0_68] : memref<27x4x12xbf16, #tpu.memory_space<vmem>>, vector<1x4x12xbf16>
    %62 = vector.shape_cast %61 : vector<1x4x12xbf16> to vector<4x12xbf16>
    %c0_69 = arith.constant 0 : index
    %c0_70 = arith.constant 0 : index
    %c0_71 = arith.constant 0 : index
    %c1_72 = arith.constant 1 : index
    %63 = vector.load %arg3[%c0_69, %c0_70, %c0_71, %c1_72] : memref<1x1x12x256xbf16, #tpu.memory_space<vmem>>, vector<1x1x12x128xbf16>
    %64 = vector.shape_cast %63 : vector<1x1x12x128xbf16> to vector<12x128xbf16>
    %cst_73 = arith.constant dense<0.000000e+00> : vector<4x128xf32>
    %65 = tpu.matmul %62, %64, %cst_73 {dimension_numbers = #tpu.dot_dimension_numbers<[1], [0], [0], [1], [0, 0, 1, 1], [], []>} : vector<4x12xbf16>, vector<12x128xbf16>, vector<4x128xf32> -> vector<4x128xf32>
    %66 = arith.addf %60, %65 : vector<4x128xf32>
    %c11 = arith.constant 11 : index
    %c0_74 = arith.constant 0 : index
    %c0_75 = arith.constant 0 : index
    %67 = vector.load %arg5[%c11, %c0_74, %c0_75] : memref<27x4x12xbf16, #tpu.memory_space<vmem>>, vector<1x4x12xbf16>
    %68 = vector.shape_cast %67 : vector<1x4x12xbf16> to vector<4x12xbf16>
    %c0_76 = arith.constant 0 : index
    %c0_77 = arith.constant 0 : index
    %c0_78 = arith.constant 0 : index
    %c2_79 = arith.constant 2 : index
    %69 = vector.load %arg3[%c0_76, %c0_77, %c0_78, %c2_79] : memref<1x1x12x256xbf16, #tpu.memory_space<vmem>>, vector<1x1x12x128xbf16>
    %70 = vector.shape_cast %69 : vector<1x1x12x128xbf16> to vector<12x128xbf16>
    %cst_80 = arith.constant dense<0.000000e+00> : vector<4x128xf32>
    %71 = tpu.matmul %68, %70, %cst_80 {dimension_numbers = #tpu.dot_dimension_numbers<[1], [0], [0], [1], [0, 0, 1, 1], [], []>} : vector<4x12xbf16>, vector<12x128xbf16>, vector<4x128xf32> -> vector<4x128xf32>
    %72 = arith.addf %66, %71 : vector<4x128xf32>
    %c12_81 = arith.constant 12 : index
    %c0_82 = arith.constant 0 : index
    %c0_83 = arith.constant 0 : index
    %73 = vector.load %arg5[%c12_81, %c0_82, %c0_83] : memref<27x4x12xbf16, #tpu.memory_space<vmem>>, vector<1x4x12xbf16>
    %74 = vector.shape_cast %73 : vector<1x4x12xbf16> to vector<4x12xbf16>
    %c0_84 = arith.constant 0 : index
    %c0_85 = arith.constant 0 : index
    %c0_86 = arith.constant 0 : index
    %c6_87 = arith.constant 6 : index
    %75 = vector.load %arg3[%c0_84, %c0_85, %c0_86, %c6_87] : memref<1x1x12x256xbf16, #tpu.memory_space<vmem>>, vector<1x1x12x128xbf16>
    %76 = vector.shape_cast %75 : vector<1x1x12x128xbf16> to vector<12x128xbf16>
    %cst_88 = arith.constant dense<0.000000e+00> : vector<4x128xf32>
    %77 = tpu.matmul %74, %76, %cst_88 {dimension_numbers = #tpu.dot_dimension_numbers<[1], [0], [0], [1], [0, 0, 1, 1], [], []>} : vector<4x12xbf16>, vector<12x128xbf16>, vector<4x128xf32> -> vector<4x128xf32>
    %78 = arith.addf %72, %77 : vector<4x128xf32>
    %c13_89 = arith.constant 13 : index
    %c0_90 = arith.constant 0 : index
    %c0_91 = arith.constant 0 : index
    %79 = vector.load %arg5[%c13_89, %c0_90, %c0_91] : memref<27x4x12xbf16, #tpu.memory_space<vmem>>, vector<1x4x12xbf16>
    %80 = vector.shape_cast %79 : vector<1x4x12xbf16> to vector<4x12xbf16>
    %c0_92 = arith.constant 0 : index
    %c0_93 = arith.constant 0 : index
    %c0_94 = arith.constant 0 : index
    %c7_95 = arith.constant 7 : index
    %81 = vector.load %arg3[%c0_92, %c0_93, %c0_94, %c7_95] : memref<1x1x12x256xbf16, #tpu.memory_space<vmem>>, vector<1x1x12x128xbf16>
    %82 = vector.shape_cast %81 : vector<1x1x12x128xbf16> to vector<12x128xbf16>
    %cst_96 = arith.constant dense<0.000000e+00> : vector<4x128xf32>
    %83 = tpu.matmul %80, %82, %cst_96 {dimension_numbers = #tpu.dot_dimension_numbers<[1], [0], [0], [1], [0, 0, 1, 1], [], []>} : vector<4x12xbf16>, vector<12x128xbf16>, vector<4x128xf32> -> vector<4x128xf32>
    %84 = arith.addf %78, %83 : vector<4x128xf32>
    %c14_97 = arith.constant 14 : index
    %c0_98 = arith.constant 0 : index
    %c0_99 = arith.constant 0 : index
    %85 = vector.load %arg5[%c14_97, %c0_98, %c0_99] : memref<27x4x12xbf16, #tpu.memory_space<vmem>>, vector<1x4x12xbf16>
    %86 = vector.shape_cast %85 : vector<1x4x12xbf16> to vector<4x12xbf16>
    %c0_100 = arith.constant 0 : index
    %c0_101 = arith.constant 0 : index
    %c0_102 = arith.constant 0 : index
    %c8_103 = arith.constant 8 : index
    %87 = vector.load %arg3[%c0_100, %c0_101, %c0_102, %c8_103] : memref<1x1x12x256xbf16, #tpu.memory_space<vmem>>, vector<1x1x12x128xbf16>
    %88 = vector.shape_cast %87 : vector<1x1x12x128xbf16> to vector<12x128xbf16>
    %cst_104 = arith.constant dense<0.000000e+00> : vector<4x128xf32>
    %89 = tpu.matmul %86, %88, %cst_104 {dimension_numbers = #tpu.dot_dimension_numbers<[1], [0], [0], [1], [0, 0, 1, 1], [], []>} : vector<4x12xbf16>, vector<12x128xbf16>, vector<4x128xf32> -> vector<4x128xf32>
    %90 = arith.addf %84, %89 : vector<4x128xf32>
    %c15 = arith.constant 15 : index
    %c0_105 = arith.constant 0 : index
    %c0_106 = arith.constant 0 : index
    %91 = vector.load %arg5[%c15, %c0_105, %c0_106] : memref<27x4x12xbf16, #tpu.memory_space<vmem>>, vector<1x4x12xbf16>
    %92 = vector.shape_cast %91 : vector<1x4x12xbf16> to vector<4x12xbf16>
    %c0_107 = arith.constant 0 : index
    %c0_108 = arith.constant 0 : index
    %c0_109 = arith.constant 0 : index
    %c12_110 = arith.constant 12 : index
    %93 = vector.load %arg3[%c0_107, %c0_108, %c0_109, %c12_110] : memref<1x1x12x256xbf16, #tpu.memory_space<vmem>>, vector<1x1x12x128xbf16>
    %94 = vector.shape_cast %93 : vector<1x1x12x128xbf16> to vector<12x128xbf16>
    %cst_111 = arith.constant dense<0.000000e+00> : vector<4x128xf32>
    %95 = tpu.matmul %92, %94, %cst_111 {dimension_numbers = #tpu.dot_dimension_numbers<[1], [0], [0], [1], [0, 0, 1, 1], [], []>} : vector<4x12xbf16>, vector<12x128xbf16>, vector<4x128xf32> -> vector<4x128xf32>
    %96 = arith.addf %90, %95 : vector<4x128xf32>
    %c16 = arith.constant 16 : index
    %c0_112 = arith.constant 0 : index
    %c0_113 = arith.constant 0 : index
    %97 = vector.load %arg5[%c16, %c0_112, %c0_113] : memref<27x4x12xbf16, #tpu.memory_space<vmem>>, vector<1x4x12xbf16>
    %98 = vector.shape_cast %97 : vector<1x4x12xbf16> to vector<4x12xbf16>
    %c0_114 = arith.constant 0 : index
    %c0_115 = arith.constant 0 : index
    %c0_116 = arith.constant 0 : index
    %c13_117 = arith.constant 13 : index
    %99 = vector.load %arg3[%c0_114, %c0_115, %c0_116, %c13_117] : memref<1x1x12x256xbf16, #tpu.memory_space<vmem>>, vector<1x1x12x128xbf16>
    %100 = vector.shape_cast %99 : vector<1x1x12x128xbf16> to vector<12x128xbf16>
    %cst_118 = arith.constant dense<0.000000e+00> : vector<4x128xf32>
    %101 = tpu.matmul %98, %100, %cst_118 {dimension_numbers = #tpu.dot_dimension_numbers<[1], [0], [0], [1], [0, 0, 1, 1], [], []>} : vector<4x12xbf16>, vector<12x128xbf16>, vector<4x128xf32> -> vector<4x128xf32>
    %102 = arith.addf %96, %101 : vector<4x128xf32>
    %c17 = arith.constant 17 : index
    %c0_119 = arith.constant 0 : index
    %c0_120 = arith.constant 0 : index
    %103 = vector.load %arg5[%c17, %c0_119, %c0_120] : memref<27x4x12xbf16, #tpu.memory_space<vmem>>, vector<1x4x12xbf16>
    %104 = vector.shape_cast %103 : vector<1x4x12xbf16> to vector<4x12xbf16>
    %c0_121 = arith.constant 0 : index
    %c0_122 = arith.constant 0 : index
    %c0_123 = arith.constant 0 : index
    %c14_124 = arith.constant 14 : index
    %105 = vector.load %arg3[%c0_121, %c0_122, %c0_123, %c14_124] : memref<1x1x12x256xbf16, #tpu.memory_space<vmem>>, vector<1x1x12x128xbf16>
    %106 = vector.shape_cast %105 : vector<1x1x12x128xbf16> to vector<12x128xbf16>
    %cst_125 = arith.constant dense<0.000000e+00> : vector<4x128xf32>
    %107 = tpu.matmul %104, %106, %cst_125 {dimension_numbers = #tpu.dot_dimension_numbers<[1], [0], [0], [1], [0, 0, 1, 1], [], []>} : vector<4x12xbf16>, vector<12x128xbf16>, vector<4x128xf32> -> vector<4x128xf32>
    %108 = arith.addf %102, %107 : vector<4x128xf32>
    %c18 = arith.constant 18 : index
    %c0_126 = arith.constant 0 : index
    %c0_127 = arith.constant 0 : index
    %109 = vector.load %arg5[%c18, %c0_126, %c0_127] : memref<27x4x12xbf16, #tpu.memory_space<vmem>>, vector<1x4x12xbf16>
    %110 = vector.shape_cast %109 : vector<1x4x12xbf16> to vector<4x12xbf16>
    %c0_128 = arith.constant 0 : index
    %c0_129 = arith.constant 0 : index
    %c0_130 = arith.constant 0 : index
    %c0_131 = arith.constant 0 : index
    %111 = vector.load %arg4[%c0_128, %c0_129, %c0_130, %c0_131] : memref<1x1x12x256xbf16, #tpu.memory_space<vmem>>, vector<1x1x12x128xbf16>
    %112 = vector.shape_cast %111 : vector<1x1x12x128xbf16> to vector<12x128xbf16>
    %cst_132 = arith.constant dense<0.000000e+00> : vector<4x128xf32>
    %113 = tpu.matmul %110, %112, %cst_132 {dimension_numbers = #tpu.dot_dimension_numbers<[1], [0], [0], [1], [0, 0, 1, 1], [], []>} : vector<4x12xbf16>, vector<12x128xbf16>, vector<4x128xf32> -> vector<4x128xf32>
    %114 = arith.addf %108, %113 : vector<4x128xf32>
    %c19 = arith.constant 19 : index
    %c0_133 = arith.constant 0 : index
    %c0_134 = arith.constant 0 : index
    %115 = vector.load %arg5[%c19, %c0_133, %c0_134] : memref<27x4x12xbf16, #tpu.memory_space<vmem>>, vector<1x4x12xbf16>
    %116 = vector.shape_cast %115 : vector<1x4x12xbf16> to vector<4x12xbf16>
    %c0_135 = arith.constant 0 : index
    %c0_136 = arith.constant 0 : index
    %c0_137 = arith.constant 0 : index
    %c1_138 = arith.constant 1 : index
    %117 = vector.load %arg4[%c0_135, %c0_136, %c0_137, %c1_138] : memref<1x1x12x256xbf16, #tpu.memory_space<vmem>>, vector<1x1x12x128xbf16>
    %118 = vector.shape_cast %117 : vector<1x1x12x128xbf16> to vector<12x128xbf16>
    %cst_139 = arith.constant dense<0.000000e+00> : vector<4x128xf32>
    %119 = tpu.matmul %116, %118, %cst_139 {dimension_numbers = #tpu.dot_dimension_numbers<[1], [0], [0], [1], [0, 0, 1, 1], [], []>} : vector<4x12xbf16>, vector<12x128xbf16>, vector<4x128xf32> -> vector<4x128xf32>
    %120 = arith.addf %114, %119 : vector<4x128xf32>
    %c20 = arith.constant 20 : index
    %c0_140 = arith.constant 0 : index
    %c0_141 = arith.constant 0 : index
    %121 = vector.load %arg5[%c20, %c0_140, %c0_141] : memref<27x4x12xbf16, #tpu.memory_space<vmem>>, vector<1x4x12xbf16>
    %122 = vector.shape_cast %121 : vector<1x4x12xbf16> to vector<4x12xbf16>
    %c0_142 = arith.constant 0 : index
    %c0_143 = arith.constant 0 : index
    %c0_144 = arith.constant 0 : index
    %c2_145 = arith.constant 2 : index
    %123 = vector.load %arg4[%c0_142, %c0_143, %c0_144, %c2_145] : memref<1x1x12x256xbf16, #tpu.memory_space<vmem>>, vector<1x1x12x128xbf16>
    %124 = vector.shape_cast %123 : vector<1x1x12x128xbf16> to vector<12x128xbf16>
    %cst_146 = arith.constant dense<0.000000e+00> : vector<4x128xf32>
    %125 = tpu.matmul %122, %124, %cst_146 {dimension_numbers = #tpu.dot_dimension_numbers<[1], [0], [0], [1], [0, 0, 1, 1], [], []>} : vector<4x12xbf16>, vector<12x128xbf16>, vector<4x128xf32> -> vector<4x128xf32>
    %126 = arith.addf %120, %125 : vector<4x128xf32>
    %c21 = arith.constant 21 : index
    %c0_147 = arith.constant 0 : index
    %c0_148 = arith.constant 0 : index
    %127 = vector.load %arg5[%c21, %c0_147, %c0_148] : memref<27x4x12xbf16, #tpu.memory_space<vmem>>, vector<1x4x12xbf16>
    %128 = vector.shape_cast %127 : vector<1x4x12xbf16> to vector<4x12xbf16>
    %c0_149 = arith.constant 0 : index
    %c0_150 = arith.constant 0 : index
    %c0_151 = arith.constant 0 : index
    %c6_152 = arith.constant 6 : index
    %129 = vector.load %arg4[%c0_149, %c0_150, %c0_151, %c6_152] : memref<1x1x12x256xbf16, #tpu.memory_space<vmem>>, vector<1x1x12x128xbf16>
    %130 = vector.shape_cast %129 : vector<1x1x12x128xbf16> to vector<12x128xbf16>
    %cst_153 = arith.constant dense<0.000000e+00> : vector<4x128xf32>
    %131 = tpu.matmul %128, %130, %cst_153 {dimension_numbers = #tpu.dot_dimension_numbers<[1], [0], [0], [1], [0, 0, 1, 1], [], []>} : vector<4x12xbf16>, vector<12x128xbf16>, vector<4x128xf32> -> vector<4x128xf32>
    %132 = arith.addf %126, %131 : vector<4x128xf32>
    %c22 = arith.constant 22 : index
    %c0_154 = arith.constant 0 : index
    %c0_155 = arith.constant 0 : index
    %133 = vector.load %arg5[%c22, %c0_154, %c0_155] : memref<27x4x12xbf16, #tpu.memory_space<vmem>>, vector<1x4x12xbf16>
    %134 = vector.shape_cast %133 : vector<1x4x12xbf16> to vector<4x12xbf16>
    %c0_156 = arith.constant 0 : index
    %c0_157 = arith.constant 0 : index
    %c0_158 = arith.constant 0 : index
    %c7_159 = arith.constant 7 : index
    %135 = vector.load %arg4[%c0_156, %c0_157, %c0_158, %c7_159] : memref<1x1x12x256xbf16, #tpu.memory_space<vmem>>, vector<1x1x12x128xbf16>
    %136 = vector.shape_cast %135 : vector<1x1x12x128xbf16> to vector<12x128xbf16>
    %cst_160 = arith.constant dense<0.000000e+00> : vector<4x128xf32>
    %137 = tpu.matmul %134, %136, %cst_160 {dimension_numbers = #tpu.dot_dimension_numbers<[1], [0], [0], [1], [0, 0, 1, 1], [], []>} : vector<4x12xbf16>, vector<12x128xbf16>, vector<4x128xf32> -> vector<4x128xf32>
    %138 = arith.addf %132, %137 : vector<4x128xf32>
    %c23 = arith.constant 23 : index
    %c0_161 = arith.constant 0 : index
    %c0_162 = arith.constant 0 : index
    %139 = vector.load %arg5[%c23, %c0_161, %c0_162] : memref<27x4x12xbf16, #tpu.memory_space<vmem>>, vector<1x4x12xbf16>
    %140 = vector.shape_cast %139 : vector<1x4x12xbf16> to vector<4x12xbf16>
    %c0_163 = arith.constant 0 : index
    %c0_164 = arith.constant 0 : index
    %c0_165 = arith.constant 0 : index
    %c8_166 = arith.constant 8 : index
    %141 = vector.load %arg4[%c0_163, %c0_164, %c0_165, %c8_166] : memref<1x1x12x256xbf16, #tpu.memory_space<vmem>>, vector<1x1x12x128xbf16>
    %142 = vector.shape_cast %141 : vector<1x1x12x128xbf16> to vector<12x128xbf16>
    %cst_167 = arith.constant dense<0.000000e+00> : vector<4x128xf32>
    %143 = tpu.matmul %140, %142, %cst_167 {dimension_numbers = #tpu.dot_dimension_numbers<[1], [0], [0], [1], [0, 0, 1, 1], [], []>} : vector<4x12xbf16>, vector<12x128xbf16>, vector<4x128xf32> -> vector<4x128xf32>
    %144 = arith.addf %138, %143 : vector<4x128xf32>
    %c24 = arith.constant 24 : index
    %c0_168 = arith.constant 0 : index
    %c0_169 = arith.constant 0 : index
    %145 = vector.load %arg5[%c24, %c0_168, %c0_169] : memref<27x4x12xbf16, #tpu.memory_space<vmem>>, vector<1x4x12xbf16>
    %146 = vector.shape_cast %145 : vector<1x4x12xbf16> to vector<4x12xbf16>
    %c0_170 = arith.constant 0 : index
    %c0_171 = arith.constant 0 : index
    %c0_172 = arith.constant 0 : index
    %c12_173 = arith.constant 12 : index
    %147 = vector.load %arg4[%c0_170, %c0_171, %c0_172, %c12_173] : memref<1x1x12x256xbf16, #tpu.memory_space<vmem>>, vector<1x1x12x128xbf16>
    %148 = vector.shape_cast %147 : vector<1x1x12x128xbf16> to vector<12x128xbf16>
    %cst_174 = arith.constant dense<0.000000e+00> : vector<4x128xf32>
    %149 = tpu.matmul %146, %148, %cst_174 {dimension_numbers = #tpu.dot_dimension_numbers<[1], [0], [0], [1], [0, 0, 1, 1], [], []>} : vector<4x12xbf16>, vector<12x128xbf16>, vector<4x128xf32> -> vector<4x128xf32>
    %150 = arith.addf %144, %149 : vector<4x128xf32>
    %c25 = arith.constant 25 : index
    %c0_175 = arith.constant 0 : index
    %c0_176 = arith.constant 0 : index
    %151 = vector.load %arg5[%c25, %c0_175, %c0_176] : memref<27x4x12xbf16, #tpu.memory_space<vmem>>, vector<1x4x12xbf16>
    %152 = vector.shape_cast %151 : vector<1x4x12xbf16> to vector<4x12xbf16>
    %c0_177 = arith.constant 0 : index
    %c0_178 = arith.constant 0 : index
    %c0_179 = arith.constant 0 : index
    %c13_180 = arith.constant 13 : index
    %153 = vector.load %arg4[%c0_177, %c0_178, %c0_179, %c13_180] : memref<1x1x12x256xbf16, #tpu.memory_space<vmem>>, vector<1x1x12x128xbf16>
    %154 = vector.shape_cast %153 : vector<1x1x12x128xbf16> to vector<12x128xbf16>
    %cst_181 = arith.constant dense<0.000000e+00> : vector<4x128xf32>
    %155 = tpu.matmul %152, %154, %cst_181 {dimension_numbers = #tpu.dot_dimension_numbers<[1], [0], [0], [1], [0, 0, 1, 1], [], []>} : vector<4x12xbf16>, vector<12x128xbf16>, vector<4x128xf32> -> vector<4x128xf32>
    %156 = arith.addf %150, %155 : vector<4x128xf32>
    %c26 = arith.constant 26 : index
    %c0_182 = arith.constant 0 : index
    %c0_183 = arith.constant 0 : index
    %157 = vector.load %arg5[%c26, %c0_182, %c0_183] : memref<27x4x12xbf16, #tpu.memory_space<vmem>>, vector<1x4x12xbf16>
    %158 = vector.shape_cast %157 : vector<1x4x12xbf16> to vector<4x12xbf16>
    %c0_184 = arith.constant 0 : index
    %c0_185 = arith.constant 0 : index
    %c0_186 = arith.constant 0 : index
    %c14_187 = arith.constant 14 : index
    %159 = vector.load %arg4[%c0_184, %c0_185, %c0_186, %c14_187] : memref<1x1x12x256xbf16, #tpu.memory_space<vmem>>, vector<1x1x12x128xbf16>
    %160 = vector.shape_cast %159 : vector<1x1x12x128xbf16> to vector<12x128xbf16>
    %cst_188 = arith.constant dense<0.000000e+00> : vector<4x128xf32>
    %161 = tpu.matmul %158, %160, %cst_188 {dimension_numbers = #tpu.dot_dimension_numbers<[1], [0], [0], [1], [0, 0, 1, 1], [], []>} : vector<4x12xbf16>, vector<12x128xbf16>, vector<4x128xf32> -> vector<4x128xf32>
    %162 = arith.addf %156, %161 : vector<4x128xf32>
    %c0_189 = arith.constant 0 : index
    %c0_190 = arith.constant 0 : index
    %163 = vector.load %arg6[%c0_189, %c0_190] : memref<4x1xf32, #tpu.memory_space<vmem>>, vector<4x1xf32>
    %164 = vector.broadcast %163 : vector<4x1xf32> to vector<4x128xf32>
    %165 = arith.addf %162, %164 : vector<4x128xf32>
    %cst_191 = arith.constant 0.000000e+00 : f32
    %166 = vector.broadcast %cst_191 : f32 to vector<4x128xf32>
    %167 = arith.cmpf oge, %165, %166 : vector<4x128xf32>
    %cst_192 = arith.constant 2.000000e-01 : f32
    %168 = vector.broadcast %cst_192 : f32 to vector<4x128xf32>
    %169 = arith.mulf %168, %165 : vector<4x128xf32>
    %170 = arith.select %167, %165, %169 : vector<4x128xi1>, vector<4x128xf32>
    %171 = arith.truncf %170 : vector<4x128xf32> to vector<4x128xbf16>
    %c0_193 = arith.constant 0 : index
    %c0_194 = arith.constant 0 : index
    %c0_195 = arith.constant 0 : index
    %c0_196 = arith.constant 0 : index
    %172 = vector.load %arg7[%c0_193, %c0_194, %c0_195, %c0_196] : memref<1x1x4x128xbf16, #tpu.memory_space<vmem>>, vector<1x1x4x128xbf16>
    %173 = vector.shape_cast %172 : vector<1x1x4x128xbf16> to vector<4x128xbf16>
    %174 = vector.shape_cast %171 : vector<4x128xbf16> to vector<1x1x4x128xbf16>
    tpu.vector_store %arg7[%c0_193, %c0_194, %c0_195, %c0_196], %174 {strides = array<i32>} : memref<1x1x4x128xbf16, #tpu.memory_space<vmem>>, vector<1x1x4x128xbf16>,
    return
  }
  func.func @transform_0(%arg0: i32, %arg1: i32) -> (i32, i32, i32, i32) {
    %c0_i32 = arith.constant 0 : i32
    %0 = arith.addi %arg1, %c0_i32 : i32
    %c0_i32_0 = arith.constant 0 : i32
    %c0_i32_1 = arith.constant 0 : i32
    %c0_i32_2 = arith.constant 0 : i32
    return %arg0, %0, %c0_i32_0, %c0_i32_1 : i32, i32, i32, i32
  }
  func.func @transform_1(%arg0: i32, %arg1: i32) -> (i32, i32, i32, i32) {
    %c1_i32 = arith.constant 1 : i32
    %0 = arith.addi %arg1, %c1_i32 : i32
    %c0_i32 = arith.constant 0 : i32
    %c0_i32_0 = arith.constant 0 : i32
    %c0_i32_1 = arith.constant 0 : i32
    return %arg0, %0, %c0_i32, %c0_i32_0 : i32, i32, i32, i32
  }
  func.func @transform_2(%arg0: i32, %arg1: i32) -> (i32, i32, i32, i32) {
    %c2_i32 = arith.constant 2 : i32
    %0 = arith.addi %arg1, %c2_i32 : i32
    %c0_i32 = arith.constant 0 : i32
    %c0_i32_0 = arith.constant 0 : i32
    %c0_i32_1 = arith.constant 0 : i32
    return %arg0, %0, %c0_i32, %c0_i32_0 : i32, i32, i32, i32
  }
  func.func @transform_3(%arg0: i32, %arg1: i32) -> (i32, i32, i32) {
    %c0_i32 = arith.constant 0 : i32
    %c0_i32_0 = arith.constant 0 : i32
    %c0_i32_1 = arith.constant 0 : i32
    %c0_i32_2 = arith.constant 0 : i32
    return %c0_i32, %c0_i32_0, %c0_i32_1 : i32, i32, i32
  }
  func.func @transform_4(%arg0: i32, %arg1: i32) -> (i32, i32) {
    %c0_i32 = arith.constant 0 : i32
    %c0_i32_0 = arith.constant 0 : i32
    %c0_i32_1 = arith.constant 0 : i32
    return %c0_i32, %c0_i32_0 : i32, i32
  }
  func.func @transform_5(%arg0: i32, %arg1: i32) -> (i32, i32, i32, i32) {
    %c0_i32 = arith.constant 0 : i32
    %c0_i32_0 = arith.constant 0 : i32
    %c0_i32_1 = arith.constant 0 : i32
    return %arg0, %arg1, %c0_i32, %c0_i32_0 : i32, i32, i32, i32
  }
}

module attributes {stable_mosaic.version = 11 : i64} {
  func.func @_conv_s1_kernel(%arg0: i32, %arg1: i32, %arg2: memref<1x1x8x256xbf16, #tpu.memory_space<vmem>>, %arg3: memref<1x1x8x256xbf16, #tpu.memory_space<vmem>>, %arg4: memref<1x1x8x256xbf16, #tpu.memory_space<vmem>>, %arg5: memref<27x4x8xbf16, #tpu.memory_space<vmem>>, %arg6: memref<4x1xf32, #tpu.memory_space<vmem>>, %arg7: memref<1x1x4x128xbf16, #tpu.memory_space<vmem>>) attributes {dimension_semantics = [#tpu.dimension_semantics<parallel>, #tpu.dimension_semantics<parallel>], iteration_bounds = array<i64: 4, 2>, scalar_prefetch = 0 : i64, scratch_operands = 0 : i64, tpu.core_type = #tpu.core_type<tc>, window_params = [{transform_indices = @transform_0, window_bounds = array<i64: 1, 1, 8, 256>}, {transform_indices = @transform_1, window_bounds = array<i64: 1, 1, 8, 256>}, {transform_indices = @transform_2, window_bounds = array<i64: 1, 1, 8, 256>}, {pipeline_mode = #tpu.pipeline_mode<synchronous>, transform_indices = @transform_3, window_bounds = array<i64: 27, 4, 8>}, {pipeline_mode = #tpu.pipeline_mode<synchronous>, transform_indices = @transform_4, window_bounds = array<i64: 4, 1>}, {transform_indices = @transform_5, window_bounds = array<i64: 1, 1, 4, 128>}]} {
    %cst = arith.constant 0.000000e+00 : f32
    %0 = vector.broadcast %cst : f32 to vector<4x128xf32>
    %c0 = arith.constant 0 : index
    %c0_0 = arith.constant 0 : index
    %c0_1 = arith.constant 0 : index
    %1 = vector.load %arg5[%c0, %c0_0, %c0_1] : memref<27x4x8xbf16, #tpu.memory_space<vmem>>, vector<1x4x8xbf16>
    %2 = vector.shape_cast %1 : vector<1x4x8xbf16> to vector<4x8xbf16>
    %c0_2 = arith.constant 0 : index
    %c0_3 = arith.constant 0 : index
    %c0_4 = arith.constant 0 : index
    %c0_5 = arith.constant 0 : index
    %3 = vector.load %arg2[%c0_2, %c0_3, %c0_4, %c0_5] : memref<1x1x8x256xbf16, #tpu.memory_space<vmem>>, vector<1x1x8x128xbf16>
    %4 = vector.shape_cast %3 : vector<1x1x8x128xbf16> to vector<8x128xbf16>
    %cst_6 = arith.constant dense<0.000000e+00> : vector<4x128xf32>
    %5 = tpu.matmul %2, %4, %cst_6 {dimension_numbers = #tpu.dot_dimension_numbers<[1], [0], [0], [1], [0, 0, 1, 1], [], []>} : vector<4x8xbf16>, vector<8x128xbf16>, vector<4x128xf32> -> vector<4x128xf32>
    %6 = arith.addf %0, %5 : vector<4x128xf32>
    %c1 = arith.constant 1 : index
    %c0_7 = arith.constant 0 : index
    %c0_8 = arith.constant 0 : index
    %7 = vector.load %arg5[%c1, %c0_7, %c0_8] : memref<27x4x8xbf16, #tpu.memory_space<vmem>>, vector<1x4x8xbf16>
    %8 = vector.shape_cast %7 : vector<1x4x8xbf16> to vector<4x8xbf16>
    %c0_9 = arith.constant 0 : index
    %c0_10 = arith.constant 0 : index
    %c0_11 = arith.constant 0 : index
    %c1_12 = arith.constant 1 : index
    %9 = vector.load %arg2[%c0_9, %c0_10, %c0_11, %c1_12] : memref<1x1x8x256xbf16, #tpu.memory_space<vmem>>, vector<1x1x8x128xbf16>
    %10 = vector.shape_cast %9 : vector<1x1x8x128xbf16> to vector<8x128xbf16>
    %cst_13 = arith.constant dense<0.000000e+00> : vector<4x128xf32>
    %11 = tpu.matmul %8, %10, %cst_13 {dimension_numbers = #tpu.dot_dimension_numbers<[1], [0], [0], [1], [0, 0, 1, 1], [], []>} : vector<4x8xbf16>, vector<8x128xbf16>, vector<4x128xf32> -> vector<4x128xf32>
    %12 = arith.addf %6, %11 : vector<4x128xf32>
    %c2 = arith.constant 2 : index
    %c0_14 = arith.constant 0 : index
    %c0_15 = arith.constant 0 : index
    %13 = vector.load %arg5[%c2, %c0_14, %c0_15] : memref<27x4x8xbf16, #tpu.memory_space<vmem>>, vector<1x4x8xbf16>
    %14 = vector.shape_cast %13 : vector<1x4x8xbf16> to vector<4x8xbf16>
    %c0_16 = arith.constant 0 : index
    %c0_17 = arith.constant 0 : index
    %c0_18 = arith.constant 0 : index
    %c2_19 = arith.constant 2 : index
    %15 = vector.load %arg2[%c0_16, %c0_17, %c0_18, %c2_19] : memref<1x1x8x256xbf16, #tpu.memory_space<vmem>>, vector<1x1x8x128xbf16>
    %16 = vector.shape_cast %15 : vector<1x1x8x128xbf16> to vector<8x128xbf16>
    %cst_20 = arith.constant dense<0.000000e+00> : vector<4x128xf32>
    %17 = tpu.matmul %14, %16, %cst_20 {dimension_numbers = #tpu.dot_dimension_numbers<[1], [0], [0], [1], [0, 0, 1, 1], [], []>} : vector<4x8xbf16>, vector<8x128xbf16>, vector<4x128xf32> -> vector<4x128xf32>
    %18 = arith.addf %12, %17 : vector<4x128xf32>
    %c3 = arith.constant 3 : index
    %c0_21 = arith.constant 0 : index
    %c0_22 = arith.constant 0 : index
    %19 = vector.load %arg5[%c3, %c0_21, %c0_22] : memref<27x4x8xbf16, #tpu.memory_space<vmem>>, vector<1x4x8xbf16>
    %20 = vector.shape_cast %19 : vector<1x4x8xbf16> to vector<4x8xbf16>
    %c0_23 = arith.constant 0 : index
    %c0_24 = arith.constant 0 : index
    %c0_25 = arith.constant 0 : index
    %c4 = arith.constant 4 : index
    %21 = vector.load %arg2[%c0_23, %c0_24, %c0_25, %c4] : memref<1x1x8x256xbf16, #tpu.memory_space<vmem>>, vector<1x1x8x128xbf16>
    %22 = vector.shape_cast %21 : vector<1x1x8x128xbf16> to vector<8x128xbf16>
    %cst_26 = arith.constant dense<0.000000e+00> : vector<4x128xf32>
    %23 = tpu.matmul %20, %22, %cst_26 {dimension_numbers = #tpu.dot_dimension_numbers<[1], [0], [0], [1], [0, 0, 1, 1], [], []>} : vector<4x8xbf16>, vector<8x128xbf16>, vector<4x128xf32> -> vector<4x128xf32>
    %24 = arith.addf %18, %23 : vector<4x128xf32>
    %c4_27 = arith.constant 4 : index
    %c0_28 = arith.constant 0 : index
    %c0_29 = arith.constant 0 : index
    %25 = vector.load %arg5[%c4_27, %c0_28, %c0_29] : memref<27x4x8xbf16, #tpu.memory_space<vmem>>, vector<1x4x8xbf16>
    %26 = vector.shape_cast %25 : vector<1x4x8xbf16> to vector<4x8xbf16>
    %c0_30 = arith.constant 0 : index
    %c0_31 = arith.constant 0 : index
    %c0_32 = arith.constant 0 : index
    %c5 = arith.constant 5 : index
    %27 = vector.load %arg2[%c0_30, %c0_31, %c0_32, %c5] : memref<1x1x8x256xbf16, #tpu.memory_space<vmem>>, vector<1x1x8x128xbf16>
    %28 = vector.shape_cast %27 : vector<1x1x8x128xbf16> to vector<8x128xbf16>
    %cst_33 = arith.constant dense<0.000000e+00> : vector<4x128xf32>
    %29 = tpu.matmul %26, %28, %cst_33 {dimension_numbers = #tpu.dot_dimension_numbers<[1], [0], [0], [1], [0, 0, 1, 1], [], []>} : vector<4x8xbf16>, vector<8x128xbf16>, vector<4x128xf32> -> vector<4x128xf32>
    %30 = arith.addf %24, %29 : vector<4x128xf32>
    %c5_34 = arith.constant 5 : index
    %c0_35 = arith.constant 0 : index
    %c0_36 = arith.constant 0 : index
    %31 = vector.load %arg5[%c5_34, %c0_35, %c0_36] : memref<27x4x8xbf16, #tpu.memory_space<vmem>>, vector<1x4x8xbf16>
    %32 = vector.shape_cast %31 : vector<1x4x8xbf16> to vector<4x8xbf16>
    %c0_37 = arith.constant 0 : index
    %c0_38 = arith.constant 0 : index
    %c0_39 = arith.constant 0 : index
    %c6 = arith.constant 6 : index
    %33 = vector.load %arg2[%c0_37, %c0_38, %c0_39, %c6] : memref<1x1x8x256xbf16, #tpu.memory_space<vmem>>, vector<1x1x8x128xbf16>
    %34 = vector.shape_cast %33 : vector<1x1x8x128xbf16> to vector<8x128xbf16>
    %cst_40 = arith.constant dense<0.000000e+00> : vector<4x128xf32>
    %35 = tpu.matmul %32, %34, %cst_40 {dimension_numbers = #tpu.dot_dimension_numbers<[1], [0], [0], [1], [0, 0, 1, 1], [], []>} : vector<4x8xbf16>, vector<8x128xbf16>, vector<4x128xf32> -> vector<4x128xf32>
    %36 = arith.addf %30, %35 : vector<4x128xf32>
    %c6_41 = arith.constant 6 : index
    %c0_42 = arith.constant 0 : index
    %c0_43 = arith.constant 0 : index
    %37 = vector.load %arg5[%c6_41, %c0_42, %c0_43] : memref<27x4x8xbf16, #tpu.memory_space<vmem>>, vector<1x4x8xbf16>
    %38 = vector.shape_cast %37 : vector<1x4x8xbf16> to vector<4x8xbf16>
    %c0_44 = arith.constant 0 : index
    %c0_45 = arith.constant 0 : index
    %c0_46 = arith.constant 0 : index
    %c8 = arith.constant 8 : index
    %39 = vector.load %arg2[%c0_44, %c0_45, %c0_46, %c8] : memref<1x1x8x256xbf16, #tpu.memory_space<vmem>>, vector<1x1x8x128xbf16>
    %40 = vector.shape_cast %39 : vector<1x1x8x128xbf16> to vector<8x128xbf16>
    %cst_47 = arith.constant dense<0.000000e+00> : vector<4x128xf32>
    %41 = tpu.matmul %38, %40, %cst_47 {dimension_numbers = #tpu.dot_dimension_numbers<[1], [0], [0], [1], [0, 0, 1, 1], [], []>} : vector<4x8xbf16>, vector<8x128xbf16>, vector<4x128xf32> -> vector<4x128xf32>
    %42 = arith.addf %36, %41 : vector<4x128xf32>
    %c7 = arith.constant 7 : index
    %c0_48 = arith.constant 0 : index
    %c0_49 = arith.constant 0 : index
    %43 = vector.load %arg5[%c7, %c0_48, %c0_49] : memref<27x4x8xbf16, #tpu.memory_space<vmem>>, vector<1x4x8xbf16>
    %44 = vector.shape_cast %43 : vector<1x4x8xbf16> to vector<4x8xbf16>
    %c0_50 = arith.constant 0 : index
    %c0_51 = arith.constant 0 : index
    %c0_52 = arith.constant 0 : index
    %c9 = arith.constant 9 : index
    %45 = vector.load %arg2[%c0_50, %c0_51, %c0_52, %c9] : memref<1x1x8x256xbf16, #tpu.memory_space<vmem>>, vector<1x1x8x128xbf16>
    %46 = vector.shape_cast %45 : vector<1x1x8x128xbf16> to vector<8x128xbf16>
    %cst_53 = arith.constant dense<0.000000e+00> : vector<4x128xf32>
    %47 = tpu.matmul %44, %46, %cst_53 {dimension_numbers = #tpu.dot_dimension_numbers<[1], [0], [0], [1], [0, 0, 1, 1], [], []>} : vector<4x8xbf16>, vector<8x128xbf16>, vector<4x128xf32> -> vector<4x128xf32>
    %48 = arith.addf %42, %47 : vector<4x128xf32>
    %c8_54 = arith.constant 8 : index
    %c0_55 = arith.constant 0 : index
    %c0_56 = arith.constant 0 : index
    %49 = vector.load %arg5[%c8_54, %c0_55, %c0_56] : memref<27x4x8xbf16, #tpu.memory_space<vmem>>, vector<1x4x8xbf16>
    %50 = vector.shape_cast %49 : vector<1x4x8xbf16> to vector<4x8xbf16>
    %c0_57 = arith.constant 0 : index
    %c0_58 = arith.constant 0 : index
    %c0_59 = arith.constant 0 : index
    %c10 = arith.constant 10 : index
    %51 = vector.load %arg2[%c0_57, %c0_58, %c0_59, %c10] : memref<1x1x8x256xbf16, #tpu.memory_space<vmem>>, vector<1x1x8x128xbf16>
    %52 = vector.shape_cast %51 : vector<1x1x8x128xbf16> to vector<8x128xbf16>
    %cst_60 = arith.constant dense<0.000000e+00> : vector<4x128xf32>
    %53 = tpu.matmul %50, %52, %cst_60 {dimension_numbers = #tpu.dot_dimension_numbers<[1], [0], [0], [1], [0, 0, 1, 1], [], []>} : vector<4x8xbf16>, vector<8x128xbf16>, vector<4x128xf32> -> vector<4x128xf32>
    %54 = arith.addf %48, %53 : vector<4x128xf32>
    %c9_61 = arith.constant 9 : index
    %c0_62 = arith.constant 0 : index
    %c0_63 = arith.constant 0 : index
    %55 = vector.load %arg5[%c9_61, %c0_62, %c0_63] : memref<27x4x8xbf16, #tpu.memory_space<vmem>>, vector<1x4x8xbf16>
    %56 = vector.shape_cast %55 : vector<1x4x8xbf16> to vector<4x8xbf16>
    %c0_64 = arith.constant 0 : index
    %c0_65 = arith.constant 0 : index
    %c0_66 = arith.constant 0 : index
    %c0_67 = arith.constant 0 : index
    %57 = vector.load %arg3[%c0_64, %c0_65, %c0_66, %c0_67] : memref<1x1x8x256xbf16, #tpu.memory_space<vmem>>, vector<1x1x8x128xbf16>
    %58 = vector.shape_cast %57 : vector<1x1x8x128xbf16> to vector<8x128xbf16>
    %cst_68 = arith.constant dense<0.000000e+00> : vector<4x128xf32>
    %59 = tpu.matmul %56, %58, %cst_68 {dimension_numbers = #tpu.dot_dimension_numbers<[1], [0], [0], [1], [0, 0, 1, 1], [], []>} : vector<4x8xbf16>, vector<8x128xbf16>, vector<4x128xf32> -> vector<4x128xf32>
    %60 = arith.addf %54, %59 : vector<4x128xf32>
    %c10_69 = arith.constant 10 : index
    %c0_70 = arith.constant 0 : index
    %c0_71 = arith.constant 0 : index
    %61 = vector.load %arg5[%c10_69, %c0_70, %c0_71] : memref<27x4x8xbf16, #tpu.memory_space<vmem>>, vector<1x4x8xbf16>
    %62 = vector.shape_cast %61 : vector<1x4x8xbf16> to vector<4x8xbf16>
    %c0_72 = arith.constant 0 : index
    %c0_73 = arith.constant 0 : index
    %c0_74 = arith.constant 0 : index
    %c1_75 = arith.constant 1 : index
    %63 = vector.load %arg3[%c0_72, %c0_73, %c0_74, %c1_75] : memref<1x1x8x256xbf16, #tpu.memory_space<vmem>>, vector<1x1x8x128xbf16>
    %64 = vector.shape_cast %63 : vector<1x1x8x128xbf16> to vector<8x128xbf16>
    %cst_76 = arith.constant dense<0.000000e+00> : vector<4x128xf32>
    %65 = tpu.matmul %62, %64, %cst_76 {dimension_numbers = #tpu.dot_dimension_numbers<[1], [0], [0], [1], [0, 0, 1, 1], [], []>} : vector<4x8xbf16>, vector<8x128xbf16>, vector<4x128xf32> -> vector<4x128xf32>
    %66 = arith.addf %60, %65 : vector<4x128xf32>
    %c11 = arith.constant 11 : index
    %c0_77 = arith.constant 0 : index
    %c0_78 = arith.constant 0 : index
    %67 = vector.load %arg5[%c11, %c0_77, %c0_78] : memref<27x4x8xbf16, #tpu.memory_space<vmem>>, vector<1x4x8xbf16>
    %68 = vector.shape_cast %67 : vector<1x4x8xbf16> to vector<4x8xbf16>
    %c0_79 = arith.constant 0 : index
    %c0_80 = arith.constant 0 : index
    %c0_81 = arith.constant 0 : index
    %c2_82 = arith.constant 2 : index
    %69 = vector.load %arg3[%c0_79, %c0_80, %c0_81, %c2_82] : memref<1x1x8x256xbf16, #tpu.memory_space<vmem>>, vector<1x1x8x128xbf16>
    %70 = vector.shape_cast %69 : vector<1x1x8x128xbf16> to vector<8x128xbf16>
    %cst_83 = arith.constant dense<0.000000e+00> : vector<4x128xf32>
    %71 = tpu.matmul %68, %70, %cst_83 {dimension_numbers = #tpu.dot_dimension_numbers<[1], [0], [0], [1], [0, 0, 1, 1], [], []>} : vector<4x8xbf16>, vector<8x128xbf16>, vector<4x128xf32> -> vector<4x128xf32>
    %72 = arith.addf %66, %71 : vector<4x128xf32>
    %c12 = arith.constant 12 : index
    %c0_84 = arith.constant 0 : index
    %c0_85 = arith.constant 0 : index
    %73 = vector.load %arg5[%c12, %c0_84, %c0_85] : memref<27x4x8xbf16, #tpu.memory_space<vmem>>, vector<1x4x8xbf16>
    %74 = vector.shape_cast %73 : vector<1x4x8xbf16> to vector<4x8xbf16>
    %c0_86 = arith.constant 0 : index
    %c0_87 = arith.constant 0 : index
    %c0_88 = arith.constant 0 : index
    %c4_89 = arith.constant 4 : index
    %75 = vector.load %arg3[%c0_86, %c0_87, %c0_88, %c4_89] : memref<1x1x8x256xbf16, #tpu.memory_space<vmem>>, vector<1x1x8x128xbf16>
    %76 = vector.shape_cast %75 : vector<1x1x8x128xbf16> to vector<8x128xbf16>
    %cst_90 = arith.constant dense<0.000000e+00> : vector<4x128xf32>
    %77 = tpu.matmul %74, %76, %cst_90 {dimension_numbers = #tpu.dot_dimension_numbers<[1], [0], [0], [1], [0, 0, 1, 1], [], []>} : vector<4x8xbf16>, vector<8x128xbf16>, vector<4x128xf32> -> vector<4x128xf32>
    %78 = arith.addf %72, %77 : vector<4x128xf32>
    %c13 = arith.constant 13 : index
    %c0_91 = arith.constant 0 : index
    %c0_92 = arith.constant 0 : index
    %79 = vector.load %arg5[%c13, %c0_91, %c0_92] : memref<27x4x8xbf16, #tpu.memory_space<vmem>>, vector<1x4x8xbf16>
    %80 = vector.shape_cast %79 : vector<1x4x8xbf16> to vector<4x8xbf16>
    %c0_93 = arith.constant 0 : index
    %c0_94 = arith.constant 0 : index
    %c0_95 = arith.constant 0 : index
    %c5_96 = arith.constant 5 : index
    %81 = vector.load %arg3[%c0_93, %c0_94, %c0_95, %c5_96] : memref<1x1x8x256xbf16, #tpu.memory_space<vmem>>, vector<1x1x8x128xbf16>
    %82 = vector.shape_cast %81 : vector<1x1x8x128xbf16> to vector<8x128xbf16>
    %cst_97 = arith.constant dense<0.000000e+00> : vector<4x128xf32>
    %83 = tpu.matmul %80, %82, %cst_97 {dimension_numbers = #tpu.dot_dimension_numbers<[1], [0], [0], [1], [0, 0, 1, 1], [], []>} : vector<4x8xbf16>, vector<8x128xbf16>, vector<4x128xf32> -> vector<4x128xf32>
    %84 = arith.addf %78, %83 : vector<4x128xf32>
    %c14 = arith.constant 14 : index
    %c0_98 = arith.constant 0 : index
    %c0_99 = arith.constant 0 : index
    %85 = vector.load %arg5[%c14, %c0_98, %c0_99] : memref<27x4x8xbf16, #tpu.memory_space<vmem>>, vector<1x4x8xbf16>
    %86 = vector.shape_cast %85 : vector<1x4x8xbf16> to vector<4x8xbf16>
    %c0_100 = arith.constant 0 : index
    %c0_101 = arith.constant 0 : index
    %c0_102 = arith.constant 0 : index
    %c6_103 = arith.constant 6 : index
    %87 = vector.load %arg3[%c0_100, %c0_101, %c0_102, %c6_103] : memref<1x1x8x256xbf16, #tpu.memory_space<vmem>>, vector<1x1x8x128xbf16>
    %88 = vector.shape_cast %87 : vector<1x1x8x128xbf16> to vector<8x128xbf16>
    %cst_104 = arith.constant dense<0.000000e+00> : vector<4x128xf32>
    %89 = tpu.matmul %86, %88, %cst_104 {dimension_numbers = #tpu.dot_dimension_numbers<[1], [0], [0], [1], [0, 0, 1, 1], [], []>} : vector<4x8xbf16>, vector<8x128xbf16>, vector<4x128xf32> -> vector<4x128xf32>
    %90 = arith.addf %84, %89 : vector<4x128xf32>
    %c15 = arith.constant 15 : index
    %c0_105 = arith.constant 0 : index
    %c0_106 = arith.constant 0 : index
    %91 = vector.load %arg5[%c15, %c0_105, %c0_106] : memref<27x4x8xbf16, #tpu.memory_space<vmem>>, vector<1x4x8xbf16>
    %92 = vector.shape_cast %91 : vector<1x4x8xbf16> to vector<4x8xbf16>
    %c0_107 = arith.constant 0 : index
    %c0_108 = arith.constant 0 : index
    %c0_109 = arith.constant 0 : index
    %c8_110 = arith.constant 8 : index
    %93 = vector.load %arg3[%c0_107, %c0_108, %c0_109, %c8_110] : memref<1x1x8x256xbf16, #tpu.memory_space<vmem>>, vector<1x1x8x128xbf16>
    %94 = vector.shape_cast %93 : vector<1x1x8x128xbf16> to vector<8x128xbf16>
    %cst_111 = arith.constant dense<0.000000e+00> : vector<4x128xf32>
    %95 = tpu.matmul %92, %94, %cst_111 {dimension_numbers = #tpu.dot_dimension_numbers<[1], [0], [0], [1], [0, 0, 1, 1], [], []>} : vector<4x8xbf16>, vector<8x128xbf16>, vector<4x128xf32> -> vector<4x128xf32>
    %96 = arith.addf %90, %95 : vector<4x128xf32>
    %c16 = arith.constant 16 : index
    %c0_112 = arith.constant 0 : index
    %c0_113 = arith.constant 0 : index
    %97 = vector.load %arg5[%c16, %c0_112, %c0_113] : memref<27x4x8xbf16, #tpu.memory_space<vmem>>, vector<1x4x8xbf16>
    %98 = vector.shape_cast %97 : vector<1x4x8xbf16> to vector<4x8xbf16>
    %c0_114 = arith.constant 0 : index
    %c0_115 = arith.constant 0 : index
    %c0_116 = arith.constant 0 : index
    %c9_117 = arith.constant 9 : index
    %99 = vector.load %arg3[%c0_114, %c0_115, %c0_116, %c9_117] : memref<1x1x8x256xbf16, #tpu.memory_space<vmem>>, vector<1x1x8x128xbf16>
    %100 = vector.shape_cast %99 : vector<1x1x8x128xbf16> to vector<8x128xbf16>
    %cst_118 = arith.constant dense<0.000000e+00> : vector<4x128xf32>
    %101 = tpu.matmul %98, %100, %cst_118 {dimension_numbers = #tpu.dot_dimension_numbers<[1], [0], [0], [1], [0, 0, 1, 1], [], []>} : vector<4x8xbf16>, vector<8x128xbf16>, vector<4x128xf32> -> vector<4x128xf32>
    %102 = arith.addf %96, %101 : vector<4x128xf32>
    %c17 = arith.constant 17 : index
    %c0_119 = arith.constant 0 : index
    %c0_120 = arith.constant 0 : index
    %103 = vector.load %arg5[%c17, %c0_119, %c0_120] : memref<27x4x8xbf16, #tpu.memory_space<vmem>>, vector<1x4x8xbf16>
    %104 = vector.shape_cast %103 : vector<1x4x8xbf16> to vector<4x8xbf16>
    %c0_121 = arith.constant 0 : index
    %c0_122 = arith.constant 0 : index
    %c0_123 = arith.constant 0 : index
    %c10_124 = arith.constant 10 : index
    %105 = vector.load %arg3[%c0_121, %c0_122, %c0_123, %c10_124] : memref<1x1x8x256xbf16, #tpu.memory_space<vmem>>, vector<1x1x8x128xbf16>
    %106 = vector.shape_cast %105 : vector<1x1x8x128xbf16> to vector<8x128xbf16>
    %cst_125 = arith.constant dense<0.000000e+00> : vector<4x128xf32>
    %107 = tpu.matmul %104, %106, %cst_125 {dimension_numbers = #tpu.dot_dimension_numbers<[1], [0], [0], [1], [0, 0, 1, 1], [], []>} : vector<4x8xbf16>, vector<8x128xbf16>, vector<4x128xf32> -> vector<4x128xf32>
    %108 = arith.addf %102, %107 : vector<4x128xf32>
    %c18 = arith.constant 18 : index
    %c0_126 = arith.constant 0 : index
    %c0_127 = arith.constant 0 : index
    %109 = vector.load %arg5[%c18, %c0_126, %c0_127] : memref<27x4x8xbf16, #tpu.memory_space<vmem>>, vector<1x4x8xbf16>
    %110 = vector.shape_cast %109 : vector<1x4x8xbf16> to vector<4x8xbf16>
    %c0_128 = arith.constant 0 : index
    %c0_129 = arith.constant 0 : index
    %c0_130 = arith.constant 0 : index
    %c0_131 = arith.constant 0 : index
    %111 = vector.load %arg4[%c0_128, %c0_129, %c0_130, %c0_131] : memref<1x1x8x256xbf16, #tpu.memory_space<vmem>>, vector<1x1x8x128xbf16>
    %112 = vector.shape_cast %111 : vector<1x1x8x128xbf16> to vector<8x128xbf16>
    %cst_132 = arith.constant dense<0.000000e+00> : vector<4x128xf32>
    %113 = tpu.matmul %110, %112, %cst_132 {dimension_numbers = #tpu.dot_dimension_numbers<[1], [0], [0], [1], [0, 0, 1, 1], [], []>} : vector<4x8xbf16>, vector<8x128xbf16>, vector<4x128xf32> -> vector<4x128xf32>
    %114 = arith.addf %108, %113 : vector<4x128xf32>
    %c19 = arith.constant 19 : index
    %c0_133 = arith.constant 0 : index
    %c0_134 = arith.constant 0 : index
    %115 = vector.load %arg5[%c19, %c0_133, %c0_134] : memref<27x4x8xbf16, #tpu.memory_space<vmem>>, vector<1x4x8xbf16>
    %116 = vector.shape_cast %115 : vector<1x4x8xbf16> to vector<4x8xbf16>
    %c0_135 = arith.constant 0 : index
    %c0_136 = arith.constant 0 : index
    %c0_137 = arith.constant 0 : index
    %c1_138 = arith.constant 1 : index
    %117 = vector.load %arg4[%c0_135, %c0_136, %c0_137, %c1_138] : memref<1x1x8x256xbf16, #tpu.memory_space<vmem>>, vector<1x1x8x128xbf16>
    %118 = vector.shape_cast %117 : vector<1x1x8x128xbf16> to vector<8x128xbf16>
    %cst_139 = arith.constant dense<0.000000e+00> : vector<4x128xf32>
    %119 = tpu.matmul %116, %118, %cst_139 {dimension_numbers = #tpu.dot_dimension_numbers<[1], [0], [0], [1], [0, 0, 1, 1], [], []>} : vector<4x8xbf16>, vector<8x128xbf16>, vector<4x128xf32> -> vector<4x128xf32>
    %120 = arith.addf %114, %119 : vector<4x128xf32>
    %c20 = arith.constant 20 : index
    %c0_140 = arith.constant 0 : index
    %c0_141 = arith.constant 0 : index
    %121 = vector.load %arg5[%c20, %c0_140, %c0_141] : memref<27x4x8xbf16, #tpu.memory_space<vmem>>, vector<1x4x8xbf16>
    %122 = vector.shape_cast %121 : vector<1x4x8xbf16> to vector<4x8xbf16>
    %c0_142 = arith.constant 0 : index
    %c0_143 = arith.constant 0 : index
    %c0_144 = arith.constant 0 : index
    %c2_145 = arith.constant 2 : index
    %123 = vector.load %arg4[%c0_142, %c0_143, %c0_144, %c2_145] : memref<1x1x8x256xbf16, #tpu.memory_space<vmem>>, vector<1x1x8x128xbf16>
    %124 = vector.shape_cast %123 : vector<1x1x8x128xbf16> to vector<8x128xbf16>
    %cst_146 = arith.constant dense<0.000000e+00> : vector<4x128xf32>
    %125 = tpu.matmul %122, %124, %cst_146 {dimension_numbers = #tpu.dot_dimension_numbers<[1], [0], [0], [1], [0, 0, 1, 1], [], []>} : vector<4x8xbf16>, vector<8x128xbf16>, vector<4x128xf32> -> vector<4x128xf32>
    %126 = arith.addf %120, %125 : vector<4x128xf32>
    %c21 = arith.constant 21 : index
    %c0_147 = arith.constant 0 : index
    %c0_148 = arith.constant 0 : index
    %127 = vector.load %arg5[%c21, %c0_147, %c0_148] : memref<27x4x8xbf16, #tpu.memory_space<vmem>>, vector<1x4x8xbf16>
    %128 = vector.shape_cast %127 : vector<1x4x8xbf16> to vector<4x8xbf16>
    %c0_149 = arith.constant 0 : index
    %c0_150 = arith.constant 0 : index
    %c0_151 = arith.constant 0 : index
    %c4_152 = arith.constant 4 : index
    %129 = vector.load %arg4[%c0_149, %c0_150, %c0_151, %c4_152] : memref<1x1x8x256xbf16, #tpu.memory_space<vmem>>, vector<1x1x8x128xbf16>
    %130 = vector.shape_cast %129 : vector<1x1x8x128xbf16> to vector<8x128xbf16>
    %cst_153 = arith.constant dense<0.000000e+00> : vector<4x128xf32>
    %131 = tpu.matmul %128, %130, %cst_153 {dimension_numbers = #tpu.dot_dimension_numbers<[1], [0], [0], [1], [0, 0, 1, 1], [], []>} : vector<4x8xbf16>, vector<8x128xbf16>, vector<4x128xf32> -> vector<4x128xf32>
    %132 = arith.addf %126, %131 : vector<4x128xf32>
    %c22 = arith.constant 22 : index
    %c0_154 = arith.constant 0 : index
    %c0_155 = arith.constant 0 : index
    %133 = vector.load %arg5[%c22, %c0_154, %c0_155] : memref<27x4x8xbf16, #tpu.memory_space<vmem>>, vector<1x4x8xbf16>
    %134 = vector.shape_cast %133 : vector<1x4x8xbf16> to vector<4x8xbf16>
    %c0_156 = arith.constant 0 : index
    %c0_157 = arith.constant 0 : index
    %c0_158 = arith.constant 0 : index
    %c5_159 = arith.constant 5 : index
    %135 = vector.load %arg4[%c0_156, %c0_157, %c0_158, %c5_159] : memref<1x1x8x256xbf16, #tpu.memory_space<vmem>>, vector<1x1x8x128xbf16>
    %136 = vector.shape_cast %135 : vector<1x1x8x128xbf16> to vector<8x128xbf16>
    %cst_160 = arith.constant dense<0.000000e+00> : vector<4x128xf32>
    %137 = tpu.matmul %134, %136, %cst_160 {dimension_numbers = #tpu.dot_dimension_numbers<[1], [0], [0], [1], [0, 0, 1, 1], [], []>} : vector<4x8xbf16>, vector<8x128xbf16>, vector<4x128xf32> -> vector<4x128xf32>
    %138 = arith.addf %132, %137 : vector<4x128xf32>
    %c23 = arith.constant 23 : index
    %c0_161 = arith.constant 0 : index
    %c0_162 = arith.constant 0 : index
    %139 = vector.load %arg5[%c23, %c0_161, %c0_162] : memref<27x4x8xbf16, #tpu.memory_space<vmem>>, vector<1x4x8xbf16>
    %140 = vector.shape_cast %139 : vector<1x4x8xbf16> to vector<4x8xbf16>
    %c0_163 = arith.constant 0 : index
    %c0_164 = arith.constant 0 : index
    %c0_165 = arith.constant 0 : index
    %c6_166 = arith.constant 6 : index
    %141 = vector.load %arg4[%c0_163, %c0_164, %c0_165, %c6_166] : memref<1x1x8x256xbf16, #tpu.memory_space<vmem>>, vector<1x1x8x128xbf16>
    %142 = vector.shape_cast %141 : vector<1x1x8x128xbf16> to vector<8x128xbf16>
    %cst_167 = arith.constant dense<0.000000e+00> : vector<4x128xf32>
    %143 = tpu.matmul %140, %142, %cst_167 {dimension_numbers = #tpu.dot_dimension_numbers<[1], [0], [0], [1], [0, 0, 1, 1], [], []>} : vector<4x8xbf16>, vector<8x128xbf16>, vector<4x128xf32> -> vector<4x128xf32>
    %144 = arith.addf %138, %143 : vector<4x128xf32>
    %c24 = arith.constant 24 : index
    %c0_168 = arith.constant 0 : index
    %c0_169 = arith.constant 0 : index
    %145 = vector.load %arg5[%c24, %c0_168, %c0_169] : memref<27x4x8xbf16, #tpu.memory_space<vmem>>, vector<1x4x8xbf16>
    %146 = vector.shape_cast %145 : vector<1x4x8xbf16> to vector<4x8xbf16>
    %c0_170 = arith.constant 0 : index
    %c0_171 = arith.constant 0 : index
    %c0_172 = arith.constant 0 : index
    %c8_173 = arith.constant 8 : index
    %147 = vector.load %arg4[%c0_170, %c0_171, %c0_172, %c8_173] : memref<1x1x8x256xbf16, #tpu.memory_space<vmem>>, vector<1x1x8x128xbf16>
    %148 = vector.shape_cast %147 : vector<1x1x8x128xbf16> to vector<8x128xbf16>
    %cst_174 = arith.constant dense<0.000000e+00> : vector<4x128xf32>
    %149 = tpu.matmul %146, %148, %cst_174 {dimension_numbers = #tpu.dot_dimension_numbers<[1], [0], [0], [1], [0, 0, 1, 1], [], []>} : vector<4x8xbf16>, vector<8x128xbf16>, vector<4x128xf32> -> vector<4x128xf32>
    %150 = arith.addf %144, %149 : vector<4x128xf32>
    %c25 = arith.constant 25 : index
    %c0_175 = arith.constant 0 : index
    %c0_176 = arith.constant 0 : index
    %151 = vector.load %arg5[%c25, %c0_175, %c0_176] : memref<27x4x8xbf16, #tpu.memory_space<vmem>>, vector<1x4x8xbf16>
    %152 = vector.shape_cast %151 : vector<1x4x8xbf16> to vector<4x8xbf16>
    %c0_177 = arith.constant 0 : index
    %c0_178 = arith.constant 0 : index
    %c0_179 = arith.constant 0 : index
    %c9_180 = arith.constant 9 : index
    %153 = vector.load %arg4[%c0_177, %c0_178, %c0_179, %c9_180] : memref<1x1x8x256xbf16, #tpu.memory_space<vmem>>, vector<1x1x8x128xbf16>
    %154 = vector.shape_cast %153 : vector<1x1x8x128xbf16> to vector<8x128xbf16>
    %cst_181 = arith.constant dense<0.000000e+00> : vector<4x128xf32>
    %155 = tpu.matmul %152, %154, %cst_181 {dimension_numbers = #tpu.dot_dimension_numbers<[1], [0], [0], [1], [0, 0, 1, 1], [], []>} : vector<4x8xbf16>, vector<8x128xbf16>, vector<4x128xf32> -> vector<4x128xf32>
    %156 = arith.addf %150, %155 : vector<4x128xf32>
    %c26 = arith.constant 26 : index
    %c0_182 = arith.constant 0 : index
    %c0_183 = arith.constant 0 : index
    %157 = vector.load %arg5[%c26, %c0_182, %c0_183] : memref<27x4x8xbf16, #tpu.memory_space<vmem>>, vector<1x4x8xbf16>
    %158 = vector.shape_cast %157 : vector<1x4x8xbf16> to vector<4x8xbf16>
    %c0_184 = arith.constant 0 : index
    %c0_185 = arith.constant 0 : index
    %c0_186 = arith.constant 0 : index
    %c10_187 = arith.constant 10 : index
    %159 = vector.load %arg4[%c0_184, %c0_185, %c0_186, %c10_187] : memref<1x1x8x256xbf16, #tpu.memory_space<vmem>>, vector<1x1x8x128xbf16>
    %160 = vector.shape_cast %159 : vector<1x1x8x128xbf16> to vector<8x128xbf16>
    %cst_188 = arith.constant dense<0.000000e+00> : vector<4x128xf32>
    %161 = tpu.matmul %158, %160, %cst_188 {dimension_numbers = #tpu.dot_dimension_numbers<[1], [0], [0], [1], [0, 0, 1, 1], [], []>} : vector<4x8xbf16>, vector<8x128xbf16>, vector<4x128xf32> -> vector<4x128xf32>
    %162 = arith.addf %156, %161 : vector<4x128xf32>
    %c0_189 = arith.constant 0 : index
    %c0_190 = arith.constant 0 : index
    %163 = vector.load %arg6[%c0_189, %c0_190] : memref<4x1xf32, #tpu.memory_space<vmem>>, vector<4x1xf32>
    %164 = vector.broadcast %163 : vector<4x1xf32> to vector<4x128xf32>
    %165 = arith.addf %162, %164 : vector<4x128xf32>
    %cst_191 = arith.constant 0.000000e+00 : f32
    %166 = vector.broadcast %cst_191 : f32 to vector<4x128xf32>
    %167 = arith.cmpf oge, %165, %166 : vector<4x128xf32>
    %cst_192 = arith.constant 2.000000e-01 : f32
    %168 = vector.broadcast %cst_192 : f32 to vector<4x128xf32>
    %169 = arith.mulf %168, %165 : vector<4x128xf32>
    %170 = arith.select %167, %165, %169 : vector<4x128xi1>, vector<4x128xf32>
    %171 = arith.truncf %170 : vector<4x128xf32> to vector<4x128xbf16>
    %c0_193 = arith.constant 0 : index
    %c0_194 = arith.constant 0 : index
    %c0_195 = arith.constant 0 : index
    %c0_196 = arith.constant 0 : index
    %172 = vector.load %arg7[%c0_193, %c0_194, %c0_195, %c0_196] : memref<1x1x4x128xbf16, #tpu.memory_space<vmem>>, vector<1x1x4x128xbf16>
    %173 = vector.shape_cast %172 : vector<1x1x4x128xbf16> to vector<4x128xbf16>
    %174 = vector.shape_cast %171 : vector<4x128xbf16> to vector<1x1x4x128xbf16>
    tpu.vector_store %arg7[%c0_193, %c0_194, %c0_195, %c0_196], %174 {strides = array<i32>} : memref<1x1x4x128xbf16, #tpu.memory_space<vmem>>, vector<1x1x4x128xbf16>,
    return
  }
  func.func @transform_0(%arg0: i32, %arg1: i32) -> (i32, i32, i32, i32) {
    %c0_i32 = arith.constant 0 : i32
    %0 = arith.addi %arg1, %c0_i32 : i32
    %c0_i32_0 = arith.constant 0 : i32
    %c0_i32_1 = arith.constant 0 : i32
    %c0_i32_2 = arith.constant 0 : i32
    return %arg0, %0, %c0_i32_0, %c0_i32_1 : i32, i32, i32, i32
  }
  func.func @transform_1(%arg0: i32, %arg1: i32) -> (i32, i32, i32, i32) {
    %c1_i32 = arith.constant 1 : i32
    %0 = arith.addi %arg1, %c1_i32 : i32
    %c0_i32 = arith.constant 0 : i32
    %c0_i32_0 = arith.constant 0 : i32
    %c0_i32_1 = arith.constant 0 : i32
    return %arg0, %0, %c0_i32, %c0_i32_0 : i32, i32, i32, i32
  }
  func.func @transform_2(%arg0: i32, %arg1: i32) -> (i32, i32, i32, i32) {
    %c2_i32 = arith.constant 2 : i32
    %0 = arith.addi %arg1, %c2_i32 : i32
    %c0_i32 = arith.constant 0 : i32
    %c0_i32_0 = arith.constant 0 : i32
    %c0_i32_1 = arith.constant 0 : i32
    return %arg0, %0, %c0_i32, %c0_i32_0 : i32, i32, i32, i32
  }
  func.func @transform_3(%arg0: i32, %arg1: i32) -> (i32, i32, i32) {
    %c0_i32 = arith.constant 0 : i32
    %c0_i32_0 = arith.constant 0 : i32
    %c0_i32_1 = arith.constant 0 : i32
    %c0_i32_2 = arith.constant 0 : i32
    return %c0_i32, %c0_i32_0, %c0_i32_1 : i32, i32, i32
  }
  func.func @transform_4(%arg0: i32, %arg1: i32) -> (i32, i32) {
    %c0_i32 = arith.constant 0 : i32
    %c0_i32_0 = arith.constant 0 : i32
    %c0_i32_1 = arith.constant 0 : i32
    return %c0_i32, %c0_i32_0 : i32, i32
  }
  func.func @transform_5(%arg0: i32, %arg1: i32) -> (i32, i32, i32, i32) {
    %c0_i32 = arith.constant 0 : i32
    %c0_i32_0 = arith.constant 0 : i32
    %c0_i32_1 = arith.constant 0 : i32
    return %arg0, %arg1, %c0_i32, %c0_i32_0 : i32, i32, i32, i32
  }
}

module attributes {stable_mosaic.version = 11 : i64} {
  func.func @_conv_s1_kernel(%arg0: i32, %arg1: i32, %arg2: memref<1x1x4x256xbf16, #tpu.memory_space<vmem>>, %arg3: memref<1x1x4x256xbf16, #tpu.memory_space<vmem>>, %arg4: memref<1x1x4x256xbf16, #tpu.memory_space<vmem>>, %arg5: memref<27x8x4xbf16, #tpu.memory_space<vmem>>, %arg6: memref<8x1xf32, #tpu.memory_space<vmem>>, %arg7: memref<1x1x8x128xbf16, #tpu.memory_space<vmem>>) attributes {dimension_semantics = [#tpu.dimension_semantics<parallel>, #tpu.dimension_semantics<parallel>], iteration_bounds = array<i64: 4, 4>, scalar_prefetch = 0 : i64, scratch_operands = 0 : i64, tpu.core_type = #tpu.core_type<tc>, window_params = [{transform_indices = @transform_0, window_bounds = array<i64: 1, 1, 4, 256>}, {transform_indices = @transform_1, window_bounds = array<i64: 1, 1, 4, 256>}, {transform_indices = @transform_2, window_bounds = array<i64: 1, 1, 4, 256>}, {pipeline_mode = #tpu.pipeline_mode<synchronous>, transform_indices = @transform_3, window_bounds = array<i64: 27, 8, 4>}, {pipeline_mode = #tpu.pipeline_mode<synchronous>, transform_indices = @transform_4, window_bounds = array<i64: 8, 1>}, {transform_indices = @transform_5, window_bounds = array<i64: 1, 1, 8, 128>}]} {
    %cst = arith.constant 0.000000e+00 : f32
    %0 = vector.broadcast %cst : f32 to vector<8x128xf32>
    %c0 = arith.constant 0 : index
    %c0_0 = arith.constant 0 : index
    %c0_1 = arith.constant 0 : index
    %1 = vector.load %arg5[%c0, %c0_0, %c0_1] : memref<27x8x4xbf16, #tpu.memory_space<vmem>>, vector<1x8x4xbf16>
    %2 = vector.shape_cast %1 : vector<1x8x4xbf16> to vector<8x4xbf16>
    %c0_2 = arith.constant 0 : index
    %c0_3 = arith.constant 0 : index
    %c0_4 = arith.constant 0 : index
    %c0_5 = arith.constant 0 : index
    %3 = vector.load %arg2[%c0_2, %c0_3, %c0_4, %c0_5] : memref<1x1x4x256xbf16, #tpu.memory_space<vmem>>, vector<1x1x4x128xbf16>
    %4 = vector.shape_cast %3 : vector<1x1x4x128xbf16> to vector<4x128xbf16>
    %cst_6 = arith.constant dense<0.000000e+00> : vector<8x128xf32>
    %5 = tpu.matmul %2, %4, %cst_6 {dimension_numbers = #tpu.dot_dimension_numbers<[1], [0], [0], [1], [0, 0, 1, 1], [], []>} : vector<8x4xbf16>, vector<4x128xbf16>, vector<8x128xf32> -> vector<8x128xf32>
    %6 = arith.addf %0, %5 : vector<8x128xf32>
    %c1 = arith.constant 1 : index
    %c0_7 = arith.constant 0 : index
    %c0_8 = arith.constant 0 : index
    %7 = vector.load %arg5[%c1, %c0_7, %c0_8] : memref<27x8x4xbf16, #tpu.memory_space<vmem>>, vector<1x8x4xbf16>
    %8 = vector.shape_cast %7 : vector<1x8x4xbf16> to vector<8x4xbf16>
    %c0_9 = arith.constant 0 : index
    %c0_10 = arith.constant 0 : index
    %c0_11 = arith.constant 0 : index
    %c1_12 = arith.constant 1 : index
    %9 = vector.load %arg2[%c0_9, %c0_10, %c0_11, %c1_12] : memref<1x1x4x256xbf16, #tpu.memory_space<vmem>>, vector<1x1x4x128xbf16>
    %10 = vector.shape_cast %9 : vector<1x1x4x128xbf16> to vector<4x128xbf16>
    %cst_13 = arith.constant dense<0.000000e+00> : vector<8x128xf32>
    %11 = tpu.matmul %8, %10, %cst_13 {dimension_numbers = #tpu.dot_dimension_numbers<[1], [0], [0], [1], [0, 0, 1, 1], [], []>} : vector<8x4xbf16>, vector<4x128xbf16>, vector<8x128xf32> -> vector<8x128xf32>
    %12 = arith.addf %6, %11 : vector<8x128xf32>
    %c2 = arith.constant 2 : index
    %c0_14 = arith.constant 0 : index
    %c0_15 = arith.constant 0 : index
    %13 = vector.load %arg5[%c2, %c0_14, %c0_15] : memref<27x8x4xbf16, #tpu.memory_space<vmem>>, vector<1x8x4xbf16>
    %14 = vector.shape_cast %13 : vector<1x8x4xbf16> to vector<8x4xbf16>
    %c0_16 = arith.constant 0 : index
    %c0_17 = arith.constant 0 : index
    %c0_18 = arith.constant 0 : index
    %c2_19 = arith.constant 2 : index
    %15 = vector.load %arg2[%c0_16, %c0_17, %c0_18, %c2_19] : memref<1x1x4x256xbf16, #tpu.memory_space<vmem>>, vector<1x1x4x128xbf16>
    %16 = vector.shape_cast %15 : vector<1x1x4x128xbf16> to vector<4x128xbf16>
    %cst_20 = arith.constant dense<0.000000e+00> : vector<8x128xf32>
    %17 = tpu.matmul %14, %16, %cst_20 {dimension_numbers = #tpu.dot_dimension_numbers<[1], [0], [0], [1], [0, 0, 1, 1], [], []>} : vector<8x4xbf16>, vector<4x128xbf16>, vector<8x128xf32> -> vector<8x128xf32>
    %18 = arith.addf %12, %17 : vector<8x128xf32>
    %c3 = arith.constant 3 : index
    %c0_21 = arith.constant 0 : index
    %c0_22 = arith.constant 0 : index
    %19 = vector.load %arg5[%c3, %c0_21, %c0_22] : memref<27x8x4xbf16, #tpu.memory_space<vmem>>, vector<1x8x4xbf16>
    %20 = vector.shape_cast %19 : vector<1x8x4xbf16> to vector<8x4xbf16>
    %c0_23 = arith.constant 0 : index
    %c0_24 = arith.constant 0 : index
    %c0_25 = arith.constant 0 : index
    %c6 = arith.constant 6 : index
    %21 = vector.load %arg2[%c0_23, %c0_24, %c0_25, %c6] : memref<1x1x4x256xbf16, #tpu.memory_space<vmem>>, vector<1x1x4x128xbf16>
    %22 = vector.shape_cast %21 : vector<1x1x4x128xbf16> to vector<4x128xbf16>
    %cst_26 = arith.constant dense<0.000000e+00> : vector<8x128xf32>
    %23 = tpu.matmul %20, %22, %cst_26 {dimension_numbers = #tpu.dot_dimension_numbers<[1], [0], [0], [1], [0, 0, 1, 1], [], []>} : vector<8x4xbf16>, vector<4x128xbf16>, vector<8x128xf32> -> vector<8x128xf32>
    %24 = arith.addf %18, %23 : vector<8x128xf32>
    %c4 = arith.constant 4 : index
    %c0_27 = arith.constant 0 : index
    %c0_28 = arith.constant 0 : index
    %25 = vector.load %arg5[%c4, %c0_27, %c0_28] : memref<27x8x4xbf16, #tpu.memory_space<vmem>>, vector<1x8x4xbf16>
    %26 = vector.shape_cast %25 : vector<1x8x4xbf16> to vector<8x4xbf16>
    %c0_29 = arith.constant 0 : index
    %c0_30 = arith.constant 0 : index
    %c0_31 = arith.constant 0 : index
    %c7 = arith.constant 7 : index
    %27 = vector.load %arg2[%c0_29, %c0_30, %c0_31, %c7] : memref<1x1x4x256xbf16, #tpu.memory_space<vmem>>, vector<1x1x4x128xbf16>
    %28 = vector.shape_cast %27 : vector<1x1x4x128xbf16> to vector<4x128xbf16>
    %cst_32 = arith.constant dense<0.000000e+00> : vector<8x128xf32>
    %29 = tpu.matmul %26, %28, %cst_32 {dimension_numbers = #tpu.dot_dimension_numbers<[1], [0], [0], [1], [0, 0, 1, 1], [], []>} : vector<8x4xbf16>, vector<4x128xbf16>, vector<8x128xf32> -> vector<8x128xf32>
    %30 = arith.addf %24, %29 : vector<8x128xf32>
    %c5 = arith.constant 5 : index
    %c0_33 = arith.constant 0 : index
    %c0_34 = arith.constant 0 : index
    %31 = vector.load %arg5[%c5, %c0_33, %c0_34] : memref<27x8x4xbf16, #tpu.memory_space<vmem>>, vector<1x8x4xbf16>
    %32 = vector.shape_cast %31 : vector<1x8x4xbf16> to vector<8x4xbf16>
    %c0_35 = arith.constant 0 : index
    %c0_36 = arith.constant 0 : index
    %c0_37 = arith.constant 0 : index
    %c8 = arith.constant 8 : index
    %33 = vector.load %arg2[%c0_35, %c0_36, %c0_37, %c8] : memref<1x1x4x256xbf16, #tpu.memory_space<vmem>>, vector<1x1x4x128xbf16>
    %34 = vector.shape_cast %33 : vector<1x1x4x128xbf16> to vector<4x128xbf16>
    %cst_38 = arith.constant dense<0.000000e+00> : vector<8x128xf32>
    %35 = tpu.matmul %32, %34, %cst_38 {dimension_numbers = #tpu.dot_dimension_numbers<[1], [0], [0], [1], [0, 0, 1, 1], [], []>} : vector<8x4xbf16>, vector<4x128xbf16>, vector<8x128xf32> -> vector<8x128xf32>
    %36 = arith.addf %30, %35 : vector<8x128xf32>
    %c6_39 = arith.constant 6 : index
    %c0_40 = arith.constant 0 : index
    %c0_41 = arith.constant 0 : index
    %37 = vector.load %arg5[%c6_39, %c0_40, %c0_41] : memref<27x8x4xbf16, #tpu.memory_space<vmem>>, vector<1x8x4xbf16>
    %38 = vector.shape_cast %37 : vector<1x8x4xbf16> to vector<8x4xbf16>
    %c0_42 = arith.constant 0 : index
    %c0_43 = arith.constant 0 : index
    %c0_44 = arith.constant 0 : index
    %c12 = arith.constant 12 : index
    %39 = vector.load %arg2[%c0_42, %c0_43, %c0_44, %c12] : memref<1x1x4x256xbf16, #tpu.memory_space<vmem>>, vector<1x1x4x128xbf16>
    %40 = vector.shape_cast %39 : vector<1x1x4x128xbf16> to vector<4x128xbf16>
    %cst_45 = arith.constant dense<0.000000e+00> : vector<8x128xf32>
    %41 = tpu.matmul %38, %40, %cst_45 {dimension_numbers = #tpu.dot_dimension_numbers<[1], [0], [0], [1], [0, 0, 1, 1], [], []>} : vector<8x4xbf16>, vector<4x128xbf16>, vector<8x128xf32> -> vector<8x128xf32>
    %42 = arith.addf %36, %41 : vector<8x128xf32>
    %c7_46 = arith.constant 7 : index
    %c0_47 = arith.constant 0 : index
    %c0_48 = arith.constant 0 : index
    %43 = vector.load %arg5[%c7_46, %c0_47, %c0_48] : memref<27x8x4xbf16, #tpu.memory_space<vmem>>, vector<1x8x4xbf16>
    %44 = vector.shape_cast %43 : vector<1x8x4xbf16> to vector<8x4xbf16>
    %c0_49 = arith.constant 0 : index
    %c0_50 = arith.constant 0 : index
    %c0_51 = arith.constant 0 : index
    %c13 = arith.constant 13 : index
    %45 = vector.load %arg2[%c0_49, %c0_50, %c0_51, %c13] : memref<1x1x4x256xbf16, #tpu.memory_space<vmem>>, vector<1x1x4x128xbf16>
    %46 = vector.shape_cast %45 : vector<1x1x4x128xbf16> to vector<4x128xbf16>
    %cst_52 = arith.constant dense<0.000000e+00> : vector<8x128xf32>
    %47 = tpu.matmul %44, %46, %cst_52 {dimension_numbers = #tpu.dot_dimension_numbers<[1], [0], [0], [1], [0, 0, 1, 1], [], []>} : vector<8x4xbf16>, vector<4x128xbf16>, vector<8x128xf32> -> vector<8x128xf32>
    %48 = arith.addf %42, %47 : vector<8x128xf32>
    %c8_53 = arith.constant 8 : index
    %c0_54 = arith.constant 0 : index
    %c0_55 = arith.constant 0 : index
    %49 = vector.load %arg5[%c8_53, %c0_54, %c0_55] : memref<27x8x4xbf16, #tpu.memory_space<vmem>>, vector<1x8x4xbf16>
    %50 = vector.shape_cast %49 : vector<1x8x4xbf16> to vector<8x4xbf16>
    %c0_56 = arith.constant 0 : index
    %c0_57 = arith.constant 0 : index
    %c0_58 = arith.constant 0 : index
    %c14 = arith.constant 14 : index
    %51 = vector.load %arg2[%c0_56, %c0_57, %c0_58, %c14] : memref<1x1x4x256xbf16, #tpu.memory_space<vmem>>, vector<1x1x4x128xbf16>
    %52 = vector.shape_cast %51 : vector<1x1x4x128xbf16> to vector<4x128xbf16>
    %cst_59 = arith.constant dense<0.000000e+00> : vector<8x128xf32>
    %53 = tpu.matmul %50, %52, %cst_59 {dimension_numbers = #tpu.dot_dimension_numbers<[1], [0], [0], [1], [0, 0, 1, 1], [], []>} : vector<8x4xbf16>, vector<4x128xbf16>, vector<8x128xf32> -> vector<8x128xf32>
    %54 = arith.addf %48, %53 : vector<8x128xf32>
    %c9 = arith.constant 9 : index
    %c0_60 = arith.constant 0 : index
    %c0_61 = arith.constant 0 : index
    %55 = vector.load %arg5[%c9, %c0_60, %c0_61] : memref<27x8x4xbf16, #tpu.memory_space<vmem>>, vector<1x8x4xbf16>
    %56 = vector.shape_cast %55 : vector<1x8x4xbf16> to vector<8x4xbf16>
    %c0_62 = arith.constant 0 : index
    %c0_63 = arith.constant 0 : index
    %c0_64 = arith.constant 0 : index
    %c0_65 = arith.constant 0 : index
    %57 = vector.load %arg3[%c0_62, %c0_63, %c0_64, %c0_65] : memref<1x1x4x256xbf16, #tpu.memory_space<vmem>>, vector<1x1x4x128xbf16>
    %58 = vector.shape_cast %57 : vector<1x1x4x128xbf16> to vector<4x128xbf16>
    %cst_66 = arith.constant dense<0.000000e+00> : vector<8x128xf32>
    %59 = tpu.matmul %56, %58, %cst_66 {dimension_numbers = #tpu.dot_dimension_numbers<[1], [0], [0], [1], [0, 0, 1, 1], [], []>} : vector<8x4xbf16>, vector<4x128xbf16>, vector<8x128xf32> -> vector<8x128xf32>
    %60 = arith.addf %54, %59 : vector<8x128xf32>
    %c10 = arith.constant 10 : index
    %c0_67 = arith.constant 0 : index
    %c0_68 = arith.constant 0 : index
    %61 = vector.load %arg5[%c10, %c0_67, %c0_68] : memref<27x8x4xbf16, #tpu.memory_space<vmem>>, vector<1x8x4xbf16>
    %62 = vector.shape_cast %61 : vector<1x8x4xbf16> to vector<8x4xbf16>
    %c0_69 = arith.constant 0 : index
    %c0_70 = arith.constant 0 : index
    %c0_71 = arith.constant 0 : index
    %c1_72 = arith.constant 1 : index
    %63 = vector.load %arg3[%c0_69, %c0_70, %c0_71, %c1_72] : memref<1x1x4x256xbf16, #tpu.memory_space<vmem>>, vector<1x1x4x128xbf16>
    %64 = vector.shape_cast %63 : vector<1x1x4x128xbf16> to vector<4x128xbf16>
    %cst_73 = arith.constant dense<0.000000e+00> : vector<8x128xf32>
    %65 = tpu.matmul %62, %64, %cst_73 {dimension_numbers = #tpu.dot_dimension_numbers<[1], [0], [0], [1], [0, 0, 1, 1], [], []>} : vector<8x4xbf16>, vector<4x128xbf16>, vector<8x128xf32> -> vector<8x128xf32>
    %66 = arith.addf %60, %65 : vector<8x128xf32>
    %c11 = arith.constant 11 : index
    %c0_74 = arith.constant 0 : index
    %c0_75 = arith.constant 0 : index
    %67 = vector.load %arg5[%c11, %c0_74, %c0_75] : memref<27x8x4xbf16, #tpu.memory_space<vmem>>, vector<1x8x4xbf16>
    %68 = vector.shape_cast %67 : vector<1x8x4xbf16> to vector<8x4xbf16>
    %c0_76 = arith.constant 0 : index
    %c0_77 = arith.constant 0 : index
    %c0_78 = arith.constant 0 : index
    %c2_79 = arith.constant 2 : index
    %69 = vector.load %arg3[%c0_76, %c0_77, %c0_78, %c2_79] : memref<1x1x4x256xbf16, #tpu.memory_space<vmem>>, vector<1x1x4x128xbf16>
    %70 = vector.shape_cast %69 : vector<1x1x4x128xbf16> to vector<4x128xbf16>
    %cst_80 = arith.constant dense<0.000000e+00> : vector<8x128xf32>
    %71 = tpu.matmul %68, %70, %cst_80 {dimension_numbers = #tpu.dot_dimension_numbers<[1], [0], [0], [1], [0, 0, 1, 1], [], []>} : vector<8x4xbf16>, vector<4x128xbf16>, vector<8x128xf32> -> vector<8x128xf32>
    %72 = arith.addf %66, %71 : vector<8x128xf32>
    %c12_81 = arith.constant 12 : index
    %c0_82 = arith.constant 0 : index
    %c0_83 = arith.constant 0 : index
    %73 = vector.load %arg5[%c12_81, %c0_82, %c0_83] : memref<27x8x4xbf16, #tpu.memory_space<vmem>>, vector<1x8x4xbf16>
    %74 = vector.shape_cast %73 : vector<1x8x4xbf16> to vector<8x4xbf16>
    %c0_84 = arith.constant 0 : index
    %c0_85 = arith.constant 0 : index
    %c0_86 = arith.constant 0 : index
    %c6_87 = arith.constant 6 : index
    %75 = vector.load %arg3[%c0_84, %c0_85, %c0_86, %c6_87] : memref<1x1x4x256xbf16, #tpu.memory_space<vmem>>, vector<1x1x4x128xbf16>
    %76 = vector.shape_cast %75 : vector<1x1x4x128xbf16> to vector<4x128xbf16>
    %cst_88 = arith.constant dense<0.000000e+00> : vector<8x128xf32>
    %77 = tpu.matmul %74, %76, %cst_88 {dimension_numbers = #tpu.dot_dimension_numbers<[1], [0], [0], [1], [0, 0, 1, 1], [], []>} : vector<8x4xbf16>, vector<4x128xbf16>, vector<8x128xf32> -> vector<8x128xf32>
    %78 = arith.addf %72, %77 : vector<8x128xf32>
    %c13_89 = arith.constant 13 : index
    %c0_90 = arith.constant 0 : index
    %c0_91 = arith.constant 0 : index
    %79 = vector.load %arg5[%c13_89, %c0_90, %c0_91] : memref<27x8x4xbf16, #tpu.memory_space<vmem>>, vector<1x8x4xbf16>
    %80 = vector.shape_cast %79 : vector<1x8x4xbf16> to vector<8x4xbf16>
    %c0_92 = arith.constant 0 : index
    %c0_93 = arith.constant 0 : index
    %c0_94 = arith.constant 0 : index
    %c7_95 = arith.constant 7 : index
    %81 = vector.load %arg3[%c0_92, %c0_93, %c0_94, %c7_95] : memref<1x1x4x256xbf16, #tpu.memory_space<vmem>>, vector<1x1x4x128xbf16>
    %82 = vector.shape_cast %81 : vector<1x1x4x128xbf16> to vector<4x128xbf16>
    %cst_96 = arith.constant dense<0.000000e+00> : vector<8x128xf32>
    %83 = tpu.matmul %80, %82, %cst_96 {dimension_numbers = #tpu.dot_dimension_numbers<[1], [0], [0], [1], [0, 0, 1, 1], [], []>} : vector<8x4xbf16>, vector<4x128xbf16>, vector<8x128xf32> -> vector<8x128xf32>
    %84 = arith.addf %78, %83 : vector<8x128xf32>
    %c14_97 = arith.constant 14 : index
    %c0_98 = arith.constant 0 : index
    %c0_99 = arith.constant 0 : index
    %85 = vector.load %arg5[%c14_97, %c0_98, %c0_99] : memref<27x8x4xbf16, #tpu.memory_space<vmem>>, vector<1x8x4xbf16>
    %86 = vector.shape_cast %85 : vector<1x8x4xbf16> to vector<8x4xbf16>
    %c0_100 = arith.constant 0 : index
    %c0_101 = arith.constant 0 : index
    %c0_102 = arith.constant 0 : index
    %c8_103 = arith.constant 8 : index
    %87 = vector.load %arg3[%c0_100, %c0_101, %c0_102, %c8_103] : memref<1x1x4x256xbf16, #tpu.memory_space<vmem>>, vector<1x1x4x128xbf16>
    %88 = vector.shape_cast %87 : vector<1x1x4x128xbf16> to vector<4x128xbf16>
    %cst_104 = arith.constant dense<0.000000e+00> : vector<8x128xf32>
    %89 = tpu.matmul %86, %88, %cst_104 {dimension_numbers = #tpu.dot_dimension_numbers<[1], [0], [0], [1], [0, 0, 1, 1], [], []>} : vector<8x4xbf16>, vector<4x128xbf16>, vector<8x128xf32> -> vector<8x128xf32>
    %90 = arith.addf %84, %89 : vector<8x128xf32>
    %c15 = arith.constant 15 : index
    %c0_105 = arith.constant 0 : index
    %c0_106 = arith.constant 0 : index
    %91 = vector.load %arg5[%c15, %c0_105, %c0_106] : memref<27x8x4xbf16, #tpu.memory_space<vmem>>, vector<1x8x4xbf16>
    %92 = vector.shape_cast %91 : vector<1x8x4xbf16> to vector<8x4xbf16>
    %c0_107 = arith.constant 0 : index
    %c0_108 = arith.constant 0 : index
    %c0_109 = arith.constant 0 : index
    %c12_110 = arith.constant 12 : index
    %93 = vector.load %arg3[%c0_107, %c0_108, %c0_109, %c12_110] : memref<1x1x4x256xbf16, #tpu.memory_space<vmem>>, vector<1x1x4x128xbf16>
    %94 = vector.shape_cast %93 : vector<1x1x4x128xbf16> to vector<4x128xbf16>
    %cst_111 = arith.constant dense<0.000000e+00> : vector<8x128xf32>
    %95 = tpu.matmul %92, %94, %cst_111 {dimension_numbers = #tpu.dot_dimension_numbers<[1], [0], [0], [1], [0, 0, 1, 1], [], []>} : vector<8x4xbf16>, vector<4x128xbf16>, vector<8x128xf32> -> vector<8x128xf32>
    %96 = arith.addf %90, %95 : vector<8x128xf32>
    %c16 = arith.constant 16 : index
    %c0_112 = arith.constant 0 : index
    %c0_113 = arith.constant 0 : index
    %97 = vector.load %arg5[%c16, %c0_112, %c0_113] : memref<27x8x4xbf16, #tpu.memory_space<vmem>>, vector<1x8x4xbf16>
    %98 = vector.shape_cast %97 : vector<1x8x4xbf16> to vector<8x4xbf16>
    %c0_114 = arith.constant 0 : index
    %c0_115 = arith.constant 0 : index
    %c0_116 = arith.constant 0 : index
    %c13_117 = arith.constant 13 : index
    %99 = vector.load %arg3[%c0_114, %c0_115, %c0_116, %c13_117] : memref<1x1x4x256xbf16, #tpu.memory_space<vmem>>, vector<1x1x4x128xbf16>
    %100 = vector.shape_cast %99 : vector<1x1x4x128xbf16> to vector<4x128xbf16>
    %cst_118 = arith.constant dense<0.000000e+00> : vector<8x128xf32>
    %101 = tpu.matmul %98, %100, %cst_118 {dimension_numbers = #tpu.dot_dimension_numbers<[1], [0], [0], [1], [0, 0, 1, 1], [], []>} : vector<8x4xbf16>, vector<4x128xbf16>, vector<8x128xf32> -> vector<8x128xf32>
    %102 = arith.addf %96, %101 : vector<8x128xf32>
    %c17 = arith.constant 17 : index
    %c0_119 = arith.constant 0 : index
    %c0_120 = arith.constant 0 : index
    %103 = vector.load %arg5[%c17, %c0_119, %c0_120] : memref<27x8x4xbf16, #tpu.memory_space<vmem>>, vector<1x8x4xbf16>
    %104 = vector.shape_cast %103 : vector<1x8x4xbf16> to vector<8x4xbf16>
    %c0_121 = arith.constant 0 : index
    %c0_122 = arith.constant 0 : index
    %c0_123 = arith.constant 0 : index
    %c14_124 = arith.constant 14 : index
    %105 = vector.load %arg3[%c0_121, %c0_122, %c0_123, %c14_124] : memref<1x1x4x256xbf16, #tpu.memory_space<vmem>>, vector<1x1x4x128xbf16>
    %106 = vector.shape_cast %105 : vector<1x1x4x128xbf16> to vector<4x128xbf16>
    %cst_125 = arith.constant dense<0.000000e+00> : vector<8x128xf32>
    %107 = tpu.matmul %104, %106, %cst_125 {dimension_numbers = #tpu.dot_dimension_numbers<[1], [0], [0], [1], [0, 0, 1, 1], [], []>} : vector<8x4xbf16>, vector<4x128xbf16>, vector<8x128xf32> -> vector<8x128xf32>
    %108 = arith.addf %102, %107 : vector<8x128xf32>
    %c18 = arith.constant 18 : index
    %c0_126 = arith.constant 0 : index
    %c0_127 = arith.constant 0 : index
    %109 = vector.load %arg5[%c18, %c0_126, %c0_127] : memref<27x8x4xbf16, #tpu.memory_space<vmem>>, vector<1x8x4xbf16>
    %110 = vector.shape_cast %109 : vector<1x8x4xbf16> to vector<8x4xbf16>
    %c0_128 = arith.constant 0 : index
    %c0_129 = arith.constant 0 : index
    %c0_130 = arith.constant 0 : index
    %c0_131 = arith.constant 0 : index
    %111 = vector.load %arg4[%c0_128, %c0_129, %c0_130, %c0_131] : memref<1x1x4x256xbf16, #tpu.memory_space<vmem>>, vector<1x1x4x128xbf16>
    %112 = vector.shape_cast %111 : vector<1x1x4x128xbf16> to vector<4x128xbf16>
    %cst_132 = arith.constant dense<0.000000e+00> : vector<8x128xf32>
    %113 = tpu.matmul %110, %112, %cst_132 {dimension_numbers = #tpu.dot_dimension_numbers<[1], [0], [0], [1], [0, 0, 1, 1], [], []>} : vector<8x4xbf16>, vector<4x128xbf16>, vector<8x128xf32> -> vector<8x128xf32>
    %114 = arith.addf %108, %113 : vector<8x128xf32>
    %c19 = arith.constant 19 : index
    %c0_133 = arith.constant 0 : index
    %c0_134 = arith.constant 0 : index
    %115 = vector.load %arg5[%c19, %c0_133, %c0_134] : memref<27x8x4xbf16, #tpu.memory_space<vmem>>, vector<1x8x4xbf16>
    %116 = vector.shape_cast %115 : vector<1x8x4xbf16> to vector<8x4xbf16>
    %c0_135 = arith.constant 0 : index
    %c0_136 = arith.constant 0 : index
    %c0_137 = arith.constant 0 : index
    %c1_138 = arith.constant 1 : index
    %117 = vector.load %arg4[%c0_135, %c0_136, %c0_137, %c1_138] : memref<1x1x4x256xbf16, #tpu.memory_space<vmem>>, vector<1x1x4x128xbf16>
    %118 = vector.shape_cast %117 : vector<1x1x4x128xbf16> to vector<4x128xbf16>
    %cst_139 = arith.constant dense<0.000000e+00> : vector<8x128xf32>
    %119 = tpu.matmul %116, %118, %cst_139 {dimension_numbers = #tpu.dot_dimension_numbers<[1], [0], [0], [1], [0, 0, 1, 1], [], []>} : vector<8x4xbf16>, vector<4x128xbf16>, vector<8x128xf32> -> vector<8x128xf32>
    %120 = arith.addf %114, %119 : vector<8x128xf32>
    %c20 = arith.constant 20 : index
    %c0_140 = arith.constant 0 : index
    %c0_141 = arith.constant 0 : index
    %121 = vector.load %arg5[%c20, %c0_140, %c0_141] : memref<27x8x4xbf16, #tpu.memory_space<vmem>>, vector<1x8x4xbf16>
    %122 = vector.shape_cast %121 : vector<1x8x4xbf16> to vector<8x4xbf16>
    %c0_142 = arith.constant 0 : index
    %c0_143 = arith.constant 0 : index
    %c0_144 = arith.constant 0 : index
    %c2_145 = arith.constant 2 : index
    %123 = vector.load %arg4[%c0_142, %c0_143, %c0_144, %c2_145] : memref<1x1x4x256xbf16, #tpu.memory_space<vmem>>, vector<1x1x4x128xbf16>
    %124 = vector.shape_cast %123 : vector<1x1x4x128xbf16> to vector<4x128xbf16>
    %cst_146 = arith.constant dense<0.000000e+00> : vector<8x128xf32>
    %125 = tpu.matmul %122, %124, %cst_146 {dimension_numbers = #tpu.dot_dimension_numbers<[1], [0], [0], [1], [0, 0, 1, 1], [], []>} : vector<8x4xbf16>, vector<4x128xbf16>, vector<8x128xf32> -> vector<8x128xf32>
    %126 = arith.addf %120, %125 : vector<8x128xf32>
    %c21 = arith.constant 21 : index
    %c0_147 = arith.constant 0 : index
    %c0_148 = arith.constant 0 : index
    %127 = vector.load %arg5[%c21, %c0_147, %c0_148] : memref<27x8x4xbf16, #tpu.memory_space<vmem>>, vector<1x8x4xbf16>
    %128 = vector.shape_cast %127 : vector<1x8x4xbf16> to vector<8x4xbf16>
    %c0_149 = arith.constant 0 : index
    %c0_150 = arith.constant 0 : index
    %c0_151 = arith.constant 0 : index
    %c6_152 = arith.constant 6 : index
    %129 = vector.load %arg4[%c0_149, %c0_150, %c0_151, %c6_152] : memref<1x1x4x256xbf16, #tpu.memory_space<vmem>>, vector<1x1x4x128xbf16>
    %130 = vector.shape_cast %129 : vector<1x1x4x128xbf16> to vector<4x128xbf16>
    %cst_153 = arith.constant dense<0.000000e+00> : vector<8x128xf32>
    %131 = tpu.matmul %128, %130, %cst_153 {dimension_numbers = #tpu.dot_dimension_numbers<[1], [0], [0], [1], [0, 0, 1, 1], [], []>} : vector<8x4xbf16>, vector<4x128xbf16>, vector<8x128xf32> -> vector<8x128xf32>
    %132 = arith.addf %126, %131 : vector<8x128xf32>
    %c22 = arith.constant 22 : index
    %c0_154 = arith.constant 0 : index
    %c0_155 = arith.constant 0 : index
    %133 = vector.load %arg5[%c22, %c0_154, %c0_155] : memref<27x8x4xbf16, #tpu.memory_space<vmem>>, vector<1x8x4xbf16>
    %134 = vector.shape_cast %133 : vector<1x8x4xbf16> to vector<8x4xbf16>
    %c0_156 = arith.constant 0 : index
    %c0_157 = arith.constant 0 : index
    %c0_158 = arith.constant 0 : index
    %c7_159 = arith.constant 7 : index
    %135 = vector.load %arg4[%c0_156, %c0_157, %c0_158, %c7_159] : memref<1x1x4x256xbf16, #tpu.memory_space<vmem>>, vector<1x1x4x128xbf16>
    %136 = vector.shape_cast %135 : vector<1x1x4x128xbf16> to vector<4x128xbf16>
    %cst_160 = arith.constant dense<0.000000e+00> : vector<8x128xf32>
    %137 = tpu.matmul %134, %136, %cst_160 {dimension_numbers = #tpu.dot_dimension_numbers<[1], [0], [0], [1], [0, 0, 1, 1], [], []>} : vector<8x4xbf16>, vector<4x128xbf16>, vector<8x128xf32> -> vector<8x128xf32>
    %138 = arith.addf %132, %137 : vector<8x128xf32>
    %c23 = arith.constant 23 : index
    %c0_161 = arith.constant 0 : index
    %c0_162 = arith.constant 0 : index
    %139 = vector.load %arg5[%c23, %c0_161, %c0_162] : memref<27x8x4xbf16, #tpu.memory_space<vmem>>, vector<1x8x4xbf16>
    %140 = vector.shape_cast %139 : vector<1x8x4xbf16> to vector<8x4xbf16>
    %c0_163 = arith.constant 0 : index
    %c0_164 = arith.constant 0 : index
    %c0_165 = arith.constant 0 : index
    %c8_166 = arith.constant 8 : index
    %141 = vector.load %arg4[%c0_163, %c0_164, %c0_165, %c8_166] : memref<1x1x4x256xbf16, #tpu.memory_space<vmem>>, vector<1x1x4x128xbf16>
    %142 = vector.shape_cast %141 : vector<1x1x4x128xbf16> to vector<4x128xbf16>
    %cst_167 = arith.constant dense<0.000000e+00> : vector<8x128xf32>
    %143 = tpu.matmul %140, %142, %cst_167 {dimension_numbers = #tpu.dot_dimension_numbers<[1], [0], [0], [1], [0, 0, 1, 1], [], []>} : vector<8x4xbf16>, vector<4x128xbf16>, vector<8x128xf32> -> vector<8x128xf32>
    %144 = arith.addf %138, %143 : vector<8x128xf32>
    %c24 = arith.constant 24 : index
    %c0_168 = arith.constant 0 : index
    %c0_169 = arith.constant 0 : index
    %145 = vector.load %arg5[%c24, %c0_168, %c0_169] : memref<27x8x4xbf16, #tpu.memory_space<vmem>>, vector<1x8x4xbf16>
    %146 = vector.shape_cast %145 : vector<1x8x4xbf16> to vector<8x4xbf16>
    %c0_170 = arith.constant 0 : index
    %c0_171 = arith.constant 0 : index
    %c0_172 = arith.constant 0 : index
    %c12_173 = arith.constant 12 : index
    %147 = vector.load %arg4[%c0_170, %c0_171, %c0_172, %c12_173] : memref<1x1x4x256xbf16, #tpu.memory_space<vmem>>, vector<1x1x4x128xbf16>
    %148 = vector.shape_cast %147 : vector<1x1x4x128xbf16> to vector<4x128xbf16>
    %cst_174 = arith.constant dense<0.000000e+00> : vector<8x128xf32>
    %149 = tpu.matmul %146, %148, %cst_174 {dimension_numbers = #tpu.dot_dimension_numbers<[1], [0], [0], [1], [0, 0, 1, 1], [], []>} : vector<8x4xbf16>, vector<4x128xbf16>, vector<8x128xf32> -> vector<8x128xf32>
    %150 = arith.addf %144, %149 : vector<8x128xf32>
    %c25 = arith.constant 25 : index
    %c0_175 = arith.constant 0 : index
    %c0_176 = arith.constant 0 : index
    %151 = vector.load %arg5[%c25, %c0_175, %c0_176] : memref<27x8x4xbf16, #tpu.memory_space<vmem>>, vector<1x8x4xbf16>
    %152 = vector.shape_cast %151 : vector<1x8x4xbf16> to vector<8x4xbf16>
    %c0_177 = arith.constant 0 : index
    %c0_178 = arith.constant 0 : index
    %c0_179 = arith.constant 0 : index
    %c13_180 = arith.constant 13 : index
    %153 = vector.load %arg4[%c0_177, %c0_178, %c0_179, %c13_180] : memref<1x1x4x256xbf16, #tpu.memory_space<vmem>>, vector<1x1x4x128xbf16>
    %154 = vector.shape_cast %153 : vector<1x1x4x128xbf16> to vector<4x128xbf16>
    %cst_181 = arith.constant dense<0.000000e+00> : vector<8x128xf32>
    %155 = tpu.matmul %152, %154, %cst_181 {dimension_numbers = #tpu.dot_dimension_numbers<[1], [0], [0], [1], [0, 0, 1, 1], [], []>} : vector<8x4xbf16>, vector<4x128xbf16>, vector<8x128xf32> -> vector<8x128xf32>
    %156 = arith.addf %150, %155 : vector<8x128xf32>
    %c26 = arith.constant 26 : index
    %c0_182 = arith.constant 0 : index
    %c0_183 = arith.constant 0 : index
    %157 = vector.load %arg5[%c26, %c0_182, %c0_183] : memref<27x8x4xbf16, #tpu.memory_space<vmem>>, vector<1x8x4xbf16>
    %158 = vector.shape_cast %157 : vector<1x8x4xbf16> to vector<8x4xbf16>
    %c0_184 = arith.constant 0 : index
    %c0_185 = arith.constant 0 : index
    %c0_186 = arith.constant 0 : index
    %c14_187 = arith.constant 14 : index
    %159 = vector.load %arg4[%c0_184, %c0_185, %c0_186, %c14_187] : memref<1x1x4x256xbf16, #tpu.memory_space<vmem>>, vector<1x1x4x128xbf16>
    %160 = vector.shape_cast %159 : vector<1x1x4x128xbf16> to vector<4x128xbf16>
    %cst_188 = arith.constant dense<0.000000e+00> : vector<8x128xf32>
    %161 = tpu.matmul %158, %160, %cst_188 {dimension_numbers = #tpu.dot_dimension_numbers<[1], [0], [0], [1], [0, 0, 1, 1], [], []>} : vector<8x4xbf16>, vector<4x128xbf16>, vector<8x128xf32> -> vector<8x128xf32>
    %162 = arith.addf %156, %161 : vector<8x128xf32>
    %c0_189 = arith.constant 0 : index
    %c0_190 = arith.constant 0 : index
    %163 = vector.load %arg6[%c0_189, %c0_190] : memref<8x1xf32, #tpu.memory_space<vmem>>, vector<8x1xf32>
    %164 = vector.broadcast %163 : vector<8x1xf32> to vector<8x128xf32>
    %165 = arith.addf %162, %164 : vector<8x128xf32>
    %cst_191 = arith.constant 0.000000e+00 : f32
    %166 = vector.broadcast %cst_191 : f32 to vector<8x128xf32>
    %167 = arith.cmpf oge, %165, %166 : vector<8x128xf32>
    %cst_192 = arith.constant 2.000000e-01 : f32
    %168 = vector.broadcast %cst_192 : f32 to vector<8x128xf32>
    %169 = arith.mulf %168, %165 : vector<8x128xf32>
    %170 = arith.select %167, %165, %169 : vector<8x128xi1>, vector<8x128xf32>
    %171 = arith.truncf %170 : vector<8x128xf32> to vector<8x128xbf16>
    %c0_193 = arith.constant 0 : index
    %c0_194 = arith.constant 0 : index
    %c0_195 = arith.constant 0 : index
    %c0_196 = arith.constant 0 : index
    %172 = vector.load %arg7[%c0_193, %c0_194, %c0_195, %c0_196] : memref<1x1x8x128xbf16, #tpu.memory_space<vmem>>, vector<1x1x8x128xbf16>
    %173 = vector.shape_cast %172 : vector<1x1x8x128xbf16> to vector<8x128xbf16>
    %174 = vector.shape_cast %171 : vector<8x128xbf16> to vector<1x1x8x128xbf16>
    tpu.vector_store %arg7[%c0_193, %c0_194, %c0_195, %c0_196], %174 {strides = array<i32>} : memref<1x1x8x128xbf16, #tpu.memory_space<vmem>>, vector<1x1x8x128xbf16>,
    return
  }
  func.func @transform_0(%arg0: i32, %arg1: i32) -> (i32, i32, i32, i32) {
    %c0_i32 = arith.constant 0 : i32
    %0 = arith.addi %arg1, %c0_i32 : i32
    %c0_i32_0 = arith.constant 0 : i32
    %c0_i32_1 = arith.constant 0 : i32
    %c0_i32_2 = arith.constant 0 : i32
    return %arg0, %0, %c0_i32_0, %c0_i32_1 : i32, i32, i32, i32
  }
  func.func @transform_1(%arg0: i32, %arg1: i32) -> (i32, i32, i32, i32) {
    %c1_i32 = arith.constant 1 : i32
    %0 = arith.addi %arg1, %c1_i32 : i32
    %c0_i32 = arith.constant 0 : i32
    %c0_i32_0 = arith.constant 0 : i32
    %c0_i32_1 = arith.constant 0 : i32
    return %arg0, %0, %c0_i32, %c0_i32_0 : i32, i32, i32, i32
  }
  func.func @transform_2(%arg0: i32, %arg1: i32) -> (i32, i32, i32, i32) {
    %c2_i32 = arith.constant 2 : i32
    %0 = arith.addi %arg1, %c2_i32 : i32
    %c0_i32 = arith.constant 0 : i32
    %c0_i32_0 = arith.constant 0 : i32
    %c0_i32_1 = arith.constant 0 : i32
    return %arg0, %0, %c0_i32, %c0_i32_0 : i32, i32, i32, i32
  }
  func.func @transform_3(%arg0: i32, %arg1: i32) -> (i32, i32, i32) {
    %c0_i32 = arith.constant 0 : i32
    %c0_i32_0 = arith.constant 0 : i32
    %c0_i32_1 = arith.constant 0 : i32
    %c0_i32_2 = arith.constant 0 : i32
    return %c0_i32, %c0_i32_0, %c0_i32_1 : i32, i32, i32
  }
  func.func @transform_4(%arg0: i32, %arg1: i32) -> (i32, i32) {
    %c0_i32 = arith.constant 0 : i32
    %c0_i32_0 = arith.constant 0 : i32
    %c0_i32_1 = arith.constant 0 : i32
    return %c0_i32, %c0_i32_0 : i32, i32
  }
  func.func @transform_5(%arg0: i32, %arg1: i32) -> (i32, i32, i32, i32) {
    %c0_i32 = arith.constant 0 : i32
    %c0_i32_0 = arith.constant 0 : i32
    %c0_i32_1 = arith.constant 0 : i32
    return %arg0, %arg1, %c0_i32, %c0_i32_0 : i32, i32, i32, i32
  }
}

module attributes {stable_mosaic.version = 11 : i64} {
  func.func @_conv_s1_kernel(%arg0: i32, %arg1: i32, %arg2: memref<1x1x8x256xbf16, #tpu.memory_space<vmem>>, %arg3: memref<1x1x8x256xbf16, #tpu.memory_space<vmem>>, %arg4: memref<1x1x8x256xbf16, #tpu.memory_space<vmem>>, %arg5: memref<27x4x8xbf16, #tpu.memory_space<vmem>>, %arg6: memref<4x1xf32, #tpu.memory_space<vmem>>, %arg7: memref<1x1x4x128xbf16, #tpu.memory_space<vmem>>) attributes {dimension_semantics = [#tpu.dimension_semantics<parallel>, #tpu.dimension_semantics<parallel>], iteration_bounds = array<i64: 4, 8>, scalar_prefetch = 0 : i64, scratch_operands = 0 : i64, tpu.core_type = #tpu.core_type<tc>, window_params = [{transform_indices = @transform_0, window_bounds = array<i64: 1, 1, 8, 256>}, {transform_indices = @transform_1, window_bounds = array<i64: 1, 1, 8, 256>}, {transform_indices = @transform_2, window_bounds = array<i64: 1, 1, 8, 256>}, {pipeline_mode = #tpu.pipeline_mode<synchronous>, transform_indices = @transform_3, window_bounds = array<i64: 27, 4, 8>}, {pipeline_mode = #tpu.pipeline_mode<synchronous>, transform_indices = @transform_4, window_bounds = array<i64: 4, 1>}, {transform_indices = @transform_5, window_bounds = array<i64: 1, 1, 4, 128>}]} {
    %cst = arith.constant 0.000000e+00 : f32
    %0 = vector.broadcast %cst : f32 to vector<4x128xf32>
    %c0 = arith.constant 0 : index
    %c0_0 = arith.constant 0 : index
    %c0_1 = arith.constant 0 : index
    %1 = vector.load %arg5[%c0, %c0_0, %c0_1] : memref<27x4x8xbf16, #tpu.memory_space<vmem>>, vector<1x4x8xbf16>
    %2 = vector.shape_cast %1 : vector<1x4x8xbf16> to vector<4x8xbf16>
    %c0_2 = arith.constant 0 : index
    %c0_3 = arith.constant 0 : index
    %c0_4 = arith.constant 0 : index
    %c0_5 = arith.constant 0 : index
    %3 = vector.load %arg2[%c0_2, %c0_3, %c0_4, %c0_5] : memref<1x1x8x256xbf16, #tpu.memory_space<vmem>>, vector<1x1x8x128xbf16>
    %4 = vector.shape_cast %3 : vector<1x1x8x128xbf16> to vector<8x128xbf16>
    %cst_6 = arith.constant dense<0.000000e+00> : vector<4x128xf32>
    %5 = tpu.matmul %2, %4, %cst_6 {dimension_numbers = #tpu.dot_dimension_numbers<[1], [0], [0], [1], [0, 0, 1, 1], [], []>} : vector<4x8xbf16>, vector<8x128xbf16>, vector<4x128xf32> -> vector<4x128xf32>
    %6 = arith.addf %0, %5 : vector<4x128xf32>
    %c1 = arith.constant 1 : index
    %c0_7 = arith.constant 0 : index
    %c0_8 = arith.constant 0 : index
    %7 = vector.load %arg5[%c1, %c0_7, %c0_8] : memref<27x4x8xbf16, #tpu.memory_space<vmem>>, vector<1x4x8xbf16>
    %8 = vector.shape_cast %7 : vector<1x4x8xbf16> to vector<4x8xbf16>
    %c0_9 = arith.constant 0 : index
    %c0_10 = arith.constant 0 : index
    %c0_11 = arith.constant 0 : index
    %c1_12 = arith.constant 1 : index
    %9 = vector.load %arg2[%c0_9, %c0_10, %c0_11, %c1_12] : memref<1x1x8x256xbf16, #tpu.memory_space<vmem>>, vector<1x1x8x128xbf16>
    %10 = vector.shape_cast %9 : vector<1x1x8x128xbf16> to vector<8x128xbf16>
    %cst_13 = arith.constant dense<0.000000e+00> : vector<4x128xf32>
    %11 = tpu.matmul %8, %10, %cst_13 {dimension_numbers = #tpu.dot_dimension_numbers<[1], [0], [0], [1], [0, 0, 1, 1], [], []>} : vector<4x8xbf16>, vector<8x128xbf16>, vector<4x128xf32> -> vector<4x128xf32>
    %12 = arith.addf %6, %11 : vector<4x128xf32>
    %c2 = arith.constant 2 : index
    %c0_14 = arith.constant 0 : index
    %c0_15 = arith.constant 0 : index
    %13 = vector.load %arg5[%c2, %c0_14, %c0_15] : memref<27x4x8xbf16, #tpu.memory_space<vmem>>, vector<1x4x8xbf16>
    %14 = vector.shape_cast %13 : vector<1x4x8xbf16> to vector<4x8xbf16>
    %c0_16 = arith.constant 0 : index
    %c0_17 = arith.constant 0 : index
    %c0_18 = arith.constant 0 : index
    %c2_19 = arith.constant 2 : index
    %15 = vector.load %arg2[%c0_16, %c0_17, %c0_18, %c2_19] : memref<1x1x8x256xbf16, #tpu.memory_space<vmem>>, vector<1x1x8x128xbf16>
    %16 = vector.shape_cast %15 : vector<1x1x8x128xbf16> to vector<8x128xbf16>
    %cst_20 = arith.constant dense<0.000000e+00> : vector<4x128xf32>
    %17 = tpu.matmul %14, %16, %cst_20 {dimension_numbers = #tpu.dot_dimension_numbers<[1], [0], [0], [1], [0, 0, 1, 1], [], []>} : vector<4x8xbf16>, vector<8x128xbf16>, vector<4x128xf32> -> vector<4x128xf32>
    %18 = arith.addf %12, %17 : vector<4x128xf32>
    %c3 = arith.constant 3 : index
    %c0_21 = arith.constant 0 : index
    %c0_22 = arith.constant 0 : index
    %19 = vector.load %arg5[%c3, %c0_21, %c0_22] : memref<27x4x8xbf16, #tpu.memory_space<vmem>>, vector<1x4x8xbf16>
    %20 = vector.shape_cast %19 : vector<1x4x8xbf16> to vector<4x8xbf16>
    %c0_23 = arith.constant 0 : index
    %c0_24 = arith.constant 0 : index
    %c0_25 = arith.constant 0 : index
    %c10 = arith.constant 10 : index
    %21 = vector.load %arg2[%c0_23, %c0_24, %c0_25, %c10] : memref<1x1x8x256xbf16, #tpu.memory_space<vmem>>, vector<1x1x8x128xbf16>
    %22 = vector.shape_cast %21 : vector<1x1x8x128xbf16> to vector<8x128xbf16>
    %cst_26 = arith.constant dense<0.000000e+00> : vector<4x128xf32>
    %23 = tpu.matmul %20, %22, %cst_26 {dimension_numbers = #tpu.dot_dimension_numbers<[1], [0], [0], [1], [0, 0, 1, 1], [], []>} : vector<4x8xbf16>, vector<8x128xbf16>, vector<4x128xf32> -> vector<4x128xf32>
    %24 = arith.addf %18, %23 : vector<4x128xf32>
    %c4 = arith.constant 4 : index
    %c0_27 = arith.constant 0 : index
    %c0_28 = arith.constant 0 : index
    %25 = vector.load %arg5[%c4, %c0_27, %c0_28] : memref<27x4x8xbf16, #tpu.memory_space<vmem>>, vector<1x4x8xbf16>
    %26 = vector.shape_cast %25 : vector<1x4x8xbf16> to vector<4x8xbf16>
    %c0_29 = arith.constant 0 : index
    %c0_30 = arith.constant 0 : index
    %c0_31 = arith.constant 0 : index
    %c11 = arith.constant 11 : index
    %27 = vector.load %arg2[%c0_29, %c0_30, %c0_31, %c11] : memref<1x1x8x256xbf16, #tpu.memory_space<vmem>>, vector<1x1x8x128xbf16>
    %28 = vector.shape_cast %27 : vector<1x1x8x128xbf16> to vector<8x128xbf16>
    %cst_32 = arith.constant dense<0.000000e+00> : vector<4x128xf32>
    %29 = tpu.matmul %26, %28, %cst_32 {dimension_numbers = #tpu.dot_dimension_numbers<[1], [0], [0], [1], [0, 0, 1, 1], [], []>} : vector<4x8xbf16>, vector<8x128xbf16>, vector<4x128xf32> -> vector<4x128xf32>
    %30 = arith.addf %24, %29 : vector<4x128xf32>
    %c5 = arith.constant 5 : index
    %c0_33 = arith.constant 0 : index
    %c0_34 = arith.constant 0 : index
    %31 = vector.load %arg5[%c5, %c0_33, %c0_34] : memref<27x4x8xbf16, #tpu.memory_space<vmem>>, vector<1x4x8xbf16>
    %32 = vector.shape_cast %31 : vector<1x4x8xbf16> to vector<4x8xbf16>
    %c0_35 = arith.constant 0 : index
    %c0_36 = arith.constant 0 : index
    %c0_37 = arith.constant 0 : index
    %c12 = arith.constant 12 : index
    %33 = vector.load %arg2[%c0_35, %c0_36, %c0_37, %c12] : memref<1x1x8x256xbf16, #tpu.memory_space<vmem>>, vector<1x1x8x128xbf16>
    %34 = vector.shape_cast %33 : vector<1x1x8x128xbf16> to vector<8x128xbf16>
    %cst_38 = arith.constant dense<0.000000e+00> : vector<4x128xf32>
    %35 = tpu.matmul %32, %34, %cst_38 {dimension_numbers = #tpu.dot_dimension_numbers<[1], [0], [0], [1], [0, 0, 1, 1], [], []>} : vector<4x8xbf16>, vector<8x128xbf16>, vector<4x128xf32> -> vector<4x128xf32>
    %36 = arith.addf %30, %35 : vector<4x128xf32>
    %c6 = arith.constant 6 : index
    %c0_39 = arith.constant 0 : index
    %c0_40 = arith.constant 0 : index
    %37 = vector.load %arg5[%c6, %c0_39, %c0_40] : memref<27x4x8xbf16, #tpu.memory_space<vmem>>, vector<1x4x8xbf16>
    %38 = vector.shape_cast %37 : vector<1x4x8xbf16> to vector<4x8xbf16>
    %c0_41 = arith.constant 0 : index
    %c0_42 = arith.constant 0 : index
    %c0_43 = arith.constant 0 : index
    %c20 = arith.constant 20 : index
    %39 = vector.load %arg2[%c0_41, %c0_42, %c0_43, %c20] : memref<1x1x8x256xbf16, #tpu.memory_space<vmem>>, vector<1x1x8x128xbf16>
    %40 = vector.shape_cast %39 : vector<1x1x8x128xbf16> to vector<8x128xbf16>
    %cst_44 = arith.constant dense<0.000000e+00> : vector<4x128xf32>
    %41 = tpu.matmul %38, %40, %cst_44 {dimension_numbers = #tpu.dot_dimension_numbers<[1], [0], [0], [1], [0, 0, 1, 1], [], []>} : vector<4x8xbf16>, vector<8x128xbf16>, vector<4x128xf32> -> vector<4x128xf32>
    %42 = arith.addf %36, %41 : vector<4x128xf32>
    %c7 = arith.constant 7 : index
    %c0_45 = arith.constant 0 : index
    %c0_46 = arith.constant 0 : index
    %43 = vector.load %arg5[%c7, %c0_45, %c0_46] : memref<27x4x8xbf16, #tpu.memory_space<vmem>>, vector<1x4x8xbf16>
    %44 = vector.shape_cast %43 : vector<1x4x8xbf16> to vector<4x8xbf16>
    %c0_47 = arith.constant 0 : index
    %c0_48 = arith.constant 0 : index
    %c0_49 = arith.constant 0 : index
    %c21 = arith.constant 21 : index
    %45 = vector.load %arg2[%c0_47, %c0_48, %c0_49, %c21] : memref<1x1x8x256xbf16, #tpu.memory_space<vmem>>, vector<1x1x8x128xbf16>
    %46 = vector.shape_cast %45 : vector<1x1x8x128xbf16> to vector<8x128xbf16>
    %cst_50 = arith.constant dense<0.000000e+00> : vector<4x128xf32>
    %47 = tpu.matmul %44, %46, %cst_50 {dimension_numbers = #tpu.dot_dimension_numbers<[1], [0], [0], [1], [0, 0, 1, 1], [], []>} : vector<4x8xbf16>, vector<8x128xbf16>, vector<4x128xf32> -> vector<4x128xf32>
    %48 = arith.addf %42, %47 : vector<4x128xf32>
    %c8 = arith.constant 8 : index
    %c0_51 = arith.constant 0 : index
    %c0_52 = arith.constant 0 : index
    %49 = vector.load %arg5[%c8, %c0_51, %c0_52] : memref<27x4x8xbf16, #tpu.memory_space<vmem>>, vector<1x4x8xbf16>
    %50 = vector.shape_cast %49 : vector<1x4x8xbf16> to vector<4x8xbf16>
    %c0_53 = arith.constant 0 : index
    %c0_54 = arith.constant 0 : index
    %c0_55 = arith.constant 0 : index
    %c22 = arith.constant 22 : index
    %51 = vector.load %arg2[%c0_53, %c0_54, %c0_55, %c22] : memref<1x1x8x256xbf16, #tpu.memory_space<vmem>>, vector<1x1x8x128xbf16>
    %52 = vector.shape_cast %51 : vector<1x1x8x128xbf16> to vector<8x128xbf16>
    %cst_56 = arith.constant dense<0.000000e+00> : vector<4x128xf32>
    %53 = tpu.matmul %50, %52, %cst_56 {dimension_numbers = #tpu.dot_dimension_numbers<[1], [0], [0], [1], [0, 0, 1, 1], [], []>} : vector<4x8xbf16>, vector<8x128xbf16>, vector<4x128xf32> -> vector<4x128xf32>
    %54 = arith.addf %48, %53 : vector<4x128xf32>
    %c9 = arith.constant 9 : index
    %c0_57 = arith.constant 0 : index
    %c0_58 = arith.constant 0 : index
    %55 = vector.load %arg5[%c9, %c0_57, %c0_58] : memref<27x4x8xbf16, #tpu.memory_space<vmem>>, vector<1x4x8xbf16>
    %56 = vector.shape_cast %55 : vector<1x4x8xbf16> to vector<4x8xbf16>
    %c0_59 = arith.constant 0 : index
    %c0_60 = arith.constant 0 : index
    %c0_61 = arith.constant 0 : index
    %c0_62 = arith.constant 0 : index
    %57 = vector.load %arg3[%c0_59, %c0_60, %c0_61, %c0_62] : memref<1x1x8x256xbf16, #tpu.memory_space<vmem>>, vector<1x1x8x128xbf16>
    %58 = vector.shape_cast %57 : vector<1x1x8x128xbf16> to vector<8x128xbf16>
    %cst_63 = arith.constant dense<0.000000e+00> : vector<4x128xf32>
    %59 = tpu.matmul %56, %58, %cst_63 {dimension_numbers = #tpu.dot_dimension_numbers<[1], [0], [0], [1], [0, 0, 1, 1], [], []>} : vector<4x8xbf16>, vector<8x128xbf16>, vector<4x128xf32> -> vector<4x128xf32>
    %60 = arith.addf %54, %59 : vector<4x128xf32>
    %c10_64 = arith.constant 10 : index
    %c0_65 = arith.constant 0 : index
    %c0_66 = arith.constant 0 : index
    %61 = vector.load %arg5[%c10_64, %c0_65, %c0_66] : memref<27x4x8xbf16, #tpu.memory_space<vmem>>, vector<1x4x8xbf16>
    %62 = vector.shape_cast %61 : vector<1x4x8xbf16> to vector<4x8xbf16>
    %c0_67 = arith.constant 0 : index
    %c0_68 = arith.constant 0 : index
    %c0_69 = arith.constant 0 : index
    %c1_70 = arith.constant 1 : index
    %63 = vector.load %arg3[%c0_67, %c0_68, %c0_69, %c1_70] : memref<1x1x8x256xbf16, #tpu.memory_space<vmem>>, vector<1x1x8x128xbf16>
    %64 = vector.shape_cast %63 : vector<1x1x8x128xbf16> to vector<8x128xbf16>
    %cst_71 = arith.constant dense<0.000000e+00> : vector<4x128xf32>
    %65 = tpu.matmul %62, %64, %cst_71 {dimension_numbers = #tpu.dot_dimension_numbers<[1], [0], [0], [1], [0, 0, 1, 1], [], []>} : vector<4x8xbf16>, vector<8x128xbf16>, vector<4x128xf32> -> vector<4x128xf32>
    %66 = arith.addf %60, %65 : vector<4x128xf32>
    %c11_72 = arith.constant 11 : index
    %c0_73 = arith.constant 0 : index
    %c0_74 = arith.constant 0 : index
    %67 = vector.load %arg5[%c11_72, %c0_73, %c0_74] : memref<27x4x8xbf16, #tpu.memory_space<vmem>>, vector<1x4x8xbf16>
    %68 = vector.shape_cast %67 : vector<1x4x8xbf16> to vector<4x8xbf16>
    %c0_75 = arith.constant 0 : index
    %c0_76 = arith.constant 0 : index
    %c0_77 = arith.constant 0 : index
    %c2_78 = arith.constant 2 : index
    %69 = vector.load %arg3[%c0_75, %c0_76, %c0_77, %c2_78] : memref<1x1x8x256xbf16, #tpu.memory_space<vmem>>, vector<1x1x8x128xbf16>
    %70 = vector.shape_cast %69 : vector<1x1x8x128xbf16> to vector<8x128xbf16>
    %cst_79 = arith.constant dense<0.000000e+00> : vector<4x128xf32>
    %71 = tpu.matmul %68, %70, %cst_79 {dimension_numbers = #tpu.dot_dimension_numbers<[1], [0], [0], [1], [0, 0, 1, 1], [], []>} : vector<4x8xbf16>, vector<8x128xbf16>, vector<4x128xf32> -> vector<4x128xf32>
    %72 = arith.addf %66, %71 : vector<4x128xf32>
    %c12_80 = arith.constant 12 : index
    %c0_81 = arith.constant 0 : index
    %c0_82 = arith.constant 0 : index
    %73 = vector.load %arg5[%c12_80, %c0_81, %c0_82] : memref<27x4x8xbf16, #tpu.memory_space<vmem>>, vector<1x4x8xbf16>
    %74 = vector.shape_cast %73 : vector<1x4x8xbf16> to vector<4x8xbf16>
    %c0_83 = arith.constant 0 : index
    %c0_84 = arith.constant 0 : index
    %c0_85 = arith.constant 0 : index
    %c10_86 = arith.constant 10 : index
    %75 = vector.load %arg3[%c0_83, %c0_84, %c0_85, %c10_86] : memref<1x1x8x256xbf16, #tpu.memory_space<vmem>>, vector<1x1x8x128xbf16>
    %76 = vector.shape_cast %75 : vector<1x1x8x128xbf16> to vector<8x128xbf16>
    %cst_87 = arith.constant dense<0.000000e+00> : vector<4x128xf32>
    %77 = tpu.matmul %74, %76, %cst_87 {dimension_numbers = #tpu.dot_dimension_numbers<[1], [0], [0], [1], [0, 0, 1, 1], [], []>} : vector<4x8xbf16>, vector<8x128xbf16>, vector<4x128xf32> -> vector<4x128xf32>
    %78 = arith.addf %72, %77 : vector<4x128xf32>
    %c13 = arith.constant 13 : index
    %c0_88 = arith.constant 0 : index
    %c0_89 = arith.constant 0 : index
    %79 = vector.load %arg5[%c13, %c0_88, %c0_89] : memref<27x4x8xbf16, #tpu.memory_space<vmem>>, vector<1x4x8xbf16>
    %80 = vector.shape_cast %79 : vector<1x4x8xbf16> to vector<4x8xbf16>
    %c0_90 = arith.constant 0 : index
    %c0_91 = arith.constant 0 : index
    %c0_92 = arith.constant 0 : index
    %c11_93 = arith.constant 11 : index
    %81 = vector.load %arg3[%c0_90, %c0_91, %c0_92, %c11_93] : memref<1x1x8x256xbf16, #tpu.memory_space<vmem>>, vector<1x1x8x128xbf16>
    %82 = vector.shape_cast %81 : vector<1x1x8x128xbf16> to vector<8x128xbf16>
    %cst_94 = arith.constant dense<0.000000e+00> : vector<4x128xf32>
    %83 = tpu.matmul %80, %82, %cst_94 {dimension_numbers = #tpu.dot_dimension_numbers<[1], [0], [0], [1], [0, 0, 1, 1], [], []>} : vector<4x8xbf16>, vector<8x128xbf16>, vector<4x128xf32> -> vector<4x128xf32>
    %84 = arith.addf %78, %83 : vector<4x128xf32>
    %c14 = arith.constant 14 : index
    %c0_95 = arith.constant 0 : index
    %c0_96 = arith.constant 0 : index
    %85 = vector.load %arg5[%c14, %c0_95, %c0_96] : memref<27x4x8xbf16, #tpu.memory_space<vmem>>, vector<1x4x8xbf16>
    %86 = vector.shape_cast %85 : vector<1x4x8xbf16> to vector<4x8xbf16>
    %c0_97 = arith.constant 0 : index
    %c0_98 = arith.constant 0 : index
    %c0_99 = arith.constant 0 : index
    %c12_100 = arith.constant 12 : index
    %87 = vector.load %arg3[%c0_97, %c0_98, %c0_99, %c12_100] : memref<1x1x8x256xbf16, #tpu.memory_space<vmem>>, vector<1x1x8x128xbf16>
    %88 = vector.shape_cast %87 : vector<1x1x8x128xbf16> to vector<8x128xbf16>
    %cst_101 = arith.constant dense<0.000000e+00> : vector<4x128xf32>
    %89 = tpu.matmul %86, %88, %cst_101 {dimension_numbers = #tpu.dot_dimension_numbers<[1], [0], [0], [1], [0, 0, 1, 1], [], []>} : vector<4x8xbf16>, vector<8x128xbf16>, vector<4x128xf32> -> vector<4x128xf32>
    %90 = arith.addf %84, %89 : vector<4x128xf32>
    %c15 = arith.constant 15 : index
    %c0_102 = arith.constant 0 : index
    %c0_103 = arith.constant 0 : index
    %91 = vector.load %arg5[%c15, %c0_102, %c0_103] : memref<27x4x8xbf16, #tpu.memory_space<vmem>>, vector<1x4x8xbf16>
    %92 = vector.shape_cast %91 : vector<1x4x8xbf16> to vector<4x8xbf16>
    %c0_104 = arith.constant 0 : index
    %c0_105 = arith.constant 0 : index
    %c0_106 = arith.constant 0 : index
    %c20_107 = arith.constant 20 : index
    %93 = vector.load %arg3[%c0_104, %c0_105, %c0_106, %c20_107] : memref<1x1x8x256xbf16, #tpu.memory_space<vmem>>, vector<1x1x8x128xbf16>
    %94 = vector.shape_cast %93 : vector<1x1x8x128xbf16> to vector<8x128xbf16>
    %cst_108 = arith.constant dense<0.000000e+00> : vector<4x128xf32>
    %95 = tpu.matmul %92, %94, %cst_108 {dimension_numbers = #tpu.dot_dimension_numbers<[1], [0], [0], [1], [0, 0, 1, 1], [], []>} : vector<4x8xbf16>, vector<8x128xbf16>, vector<4x128xf32> -> vector<4x128xf32>
    %96 = arith.addf %90, %95 : vector<4x128xf32>
    %c16 = arith.constant 16 : index
    %c0_109 = arith.constant 0 : index
    %c0_110 = arith.constant 0 : index
    %97 = vector.load %arg5[%c16, %c0_109, %c0_110] : memref<27x4x8xbf16, #tpu.memory_space<vmem>>, vector<1x4x8xbf16>
    %98 = vector.shape_cast %97 : vector<1x4x8xbf16> to vector<4x8xbf16>
    %c0_111 = arith.constant 0 : index
    %c0_112 = arith.constant 0 : index
    %c0_113 = arith.constant 0 : index
    %c21_114 = arith.constant 21 : index
    %99 = vector.load %arg3[%c0_111, %c0_112, %c0_113, %c21_114] : memref<1x1x8x256xbf16, #tpu.memory_space<vmem>>, vector<1x1x8x128xbf16>
    %100 = vector.shape_cast %99 : vector<1x1x8x128xbf16> to vector<8x128xbf16>
    %cst_115 = arith.constant dense<0.000000e+00> : vector<4x128xf32>
    %101 = tpu.matmul %98, %100, %cst_115 {dimension_numbers = #tpu.dot_dimension_numbers<[1], [0], [0], [1], [0, 0, 1, 1], [], []>} : vector<4x8xbf16>, vector<8x128xbf16>, vector<4x128xf32> -> vector<4x128xf32>
    %102 = arith.addf %96, %101 : vector<4x128xf32>
    %c17 = arith.constant 17 : index
    %c0_116 = arith.constant 0 : index
    %c0_117 = arith.constant 0 : index
    %103 = vector.load %arg5[%c17, %c0_116, %c0_117] : memref<27x4x8xbf16, #tpu.memory_space<vmem>>, vector<1x4x8xbf16>
    %104 = vector.shape_cast %103 : vector<1x4x8xbf16> to vector<4x8xbf16>
    %c0_118 = arith.constant 0 : index
    %c0_119 = arith.constant 0 : index
    %c0_120 = arith.constant 0 : index
    %c22_121 = arith.constant 22 : index
    %105 = vector.load %arg3[%c0_118, %c0_119, %c0_120, %c22_121] : memref<1x1x8x256xbf16, #tpu.memory_space<vmem>>, vector<1x1x8x128xbf16>
    %106 = vector.shape_cast %105 : vector<1x1x8x128xbf16> to vector<8x128xbf16>
    %cst_122 = arith.constant dense<0.000000e+00> : vector<4x128xf32>
    %107 = tpu.matmul %104, %106, %cst_122 {dimension_numbers = #tpu.dot_dimension_numbers<[1], [0], [0], [1], [0, 0, 1, 1], [], []>} : vector<4x8xbf16>, vector<8x128xbf16>, vector<4x128xf32> -> vector<4x128xf32>
    %108 = arith.addf %102, %107 : vector<4x128xf32>
    %c18 = arith.constant 18 : index
    %c0_123 = arith.constant 0 : index
    %c0_124 = arith.constant 0 : index
    %109 = vector.load %arg5[%c18, %c0_123, %c0_124] : memref<27x4x8xbf16, #tpu.memory_space<vmem>>, vector<1x4x8xbf16>
    %110 = vector.shape_cast %109 : vector<1x4x8xbf16> to vector<4x8xbf16>
    %c0_125 = arith.constant 0 : index
    %c0_126 = arith.constant 0 : index
    %c0_127 = arith.constant 0 : index
    %c0_128 = arith.constant 0 : index
    %111 = vector.load %arg4[%c0_125, %c0_126, %c0_127, %c0_128] : memref<1x1x8x256xbf16, #tpu.memory_space<vmem>>, vector<1x1x8x128xbf16>
    %112 = vector.shape_cast %111 : vector<1x1x8x128xbf16> to vector<8x128xbf16>
    %cst_129 = arith.constant dense<0.000000e+00> : vector<4x128xf32>
    %113 = tpu.matmul %110, %112, %cst_129 {dimension_numbers = #tpu.dot_dimension_numbers<[1], [0], [0], [1], [0, 0, 1, 1], [], []>} : vector<4x8xbf16>, vector<8x128xbf16>, vector<4x128xf32> -> vector<4x128xf32>
    %114 = arith.addf %108, %113 : vector<4x128xf32>
    %c19 = arith.constant 19 : index
    %c0_130 = arith.constant 0 : index
    %c0_131 = arith.constant 0 : index
    %115 = vector.load %arg5[%c19, %c0_130, %c0_131] : memref<27x4x8xbf16, #tpu.memory_space<vmem>>, vector<1x4x8xbf16>
    %116 = vector.shape_cast %115 : vector<1x4x8xbf16> to vector<4x8xbf16>
    %c0_132 = arith.constant 0 : index
    %c0_133 = arith.constant 0 : index
    %c0_134 = arith.constant 0 : index
    %c1_135 = arith.constant 1 : index
    %117 = vector.load %arg4[%c0_132, %c0_133, %c0_134, %c1_135] : memref<1x1x8x256xbf16, #tpu.memory_space<vmem>>, vector<1x1x8x128xbf16>
    %118 = vector.shape_cast %117 : vector<1x1x8x128xbf16> to vector<8x128xbf16>
    %cst_136 = arith.constant dense<0.000000e+00> : vector<4x128xf32>
    %119 = tpu.matmul %116, %118, %cst_136 {dimension_numbers = #tpu.dot_dimension_numbers<[1], [0], [0], [1], [0, 0, 1, 1], [], []>} : vector<4x8xbf16>, vector<8x128xbf16>, vector<4x128xf32> -> vector<4x128xf32>
    %120 = arith.addf %114, %119 : vector<4x128xf32>
    %c20_137 = arith.constant 20 : index
    %c0_138 = arith.constant 0 : index
    %c0_139 = arith.constant 0 : index
    %121 = vector.load %arg5[%c20_137, %c0_138, %c0_139] : memref<27x4x8xbf16, #tpu.memory_space<vmem>>, vector<1x4x8xbf16>
    %122 = vector.shape_cast %121 : vector<1x4x8xbf16> to vector<4x8xbf16>
    %c0_140 = arith.constant 0 : index
    %c0_141 = arith.constant 0 : index
    %c0_142 = arith.constant 0 : index
    %c2_143 = arith.constant 2 : index
    %123 = vector.load %arg4[%c0_140, %c0_141, %c0_142, %c2_143] : memref<1x1x8x256xbf16, #tpu.memory_space<vmem>>, vector<1x1x8x128xbf16>
    %124 = vector.shape_cast %123 : vector<1x1x8x128xbf16> to vector<8x128xbf16>
    %cst_144 = arith.constant dense<0.000000e+00> : vector<4x128xf32>
    %125 = tpu.matmul %122, %124, %cst_144 {dimension_numbers = #tpu.dot_dimension_numbers<[1], [0], [0], [1], [0, 0, 1, 1], [], []>} : vector<4x8xbf16>, vector<8x128xbf16>, vector<4x128xf32> -> vector<4x128xf32>
    %126 = arith.addf %120, %125 : vector<4x128xf32>
    %c21_145 = arith.constant 21 : index
    %c0_146 = arith.constant 0 : index
    %c0_147 = arith.constant 0 : index
    %127 = vector.load %arg5[%c21_145, %c0_146, %c0_147] : memref<27x4x8xbf16, #tpu.memory_space<vmem>>, vector<1x4x8xbf16>
    %128 = vector.shape_cast %127 : vector<1x4x8xbf16> to vector<4x8xbf16>
    %c0_148 = arith.constant 0 : index
    %c0_149 = arith.constant 0 : index
    %c0_150 = arith.constant 0 : index
    %c10_151 = arith.constant 10 : index
    %129 = vector.load %arg4[%c0_148, %c0_149, %c0_150, %c10_151] : memref<1x1x8x256xbf16, #tpu.memory_space<vmem>>, vector<1x1x8x128xbf16>
    %130 = vector.shape_cast %129 : vector<1x1x8x128xbf16> to vector<8x128xbf16>
    %cst_152 = arith.constant dense<0.000000e+00> : vector<4x128xf32>
    %131 = tpu.matmul %128, %130, %cst_152 {dimension_numbers = #tpu.dot_dimension_numbers<[1], [0], [0], [1], [0, 0, 1, 1], [], []>} : vector<4x8xbf16>, vector<8x128xbf16>, vector<4x128xf32> -> vector<4x128xf32>
    %132 = arith.addf %126, %131 : vector<4x128xf32>
    %c22_153 = arith.constant 22 : index
    %c0_154 = arith.constant 0 : index
    %c0_155 = arith.constant 0 : index
    %133 = vector.load %arg5[%c22_153, %c0_154, %c0_155] : memref<27x4x8xbf16, #tpu.memory_space<vmem>>, vector<1x4x8xbf16>
    %134 = vector.shape_cast %133 : vector<1x4x8xbf16> to vector<4x8xbf16>
    %c0_156 = arith.constant 0 : index
    %c0_157 = arith.constant 0 : index
    %c0_158 = arith.constant 0 : index
    %c11_159 = arith.constant 11 : index
    %135 = vector.load %arg4[%c0_156, %c0_157, %c0_158, %c11_159] : memref<1x1x8x256xbf16, #tpu.memory_space<vmem>>, vector<1x1x8x128xbf16>
    %136 = vector.shape_cast %135 : vector<1x1x8x128xbf16> to vector<8x128xbf16>
    %cst_160 = arith.constant dense<0.000000e+00> : vector<4x128xf32>
    %137 = tpu.matmul %134, %136, %cst_160 {dimension_numbers = #tpu.dot_dimension_numbers<[1], [0], [0], [1], [0, 0, 1, 1], [], []>} : vector<4x8xbf16>, vector<8x128xbf16>, vector<4x128xf32> -> vector<4x128xf32>
    %138 = arith.addf %132, %137 : vector<4x128xf32>
    %c23 = arith.constant 23 : index
    %c0_161 = arith.constant 0 : index
    %c0_162 = arith.constant 0 : index
    %139 = vector.load %arg5[%c23, %c0_161, %c0_162] : memref<27x4x8xbf16, #tpu.memory_space<vmem>>, vector<1x4x8xbf16>
    %140 = vector.shape_cast %139 : vector<1x4x8xbf16> to vector<4x8xbf16>
    %c0_163 = arith.constant 0 : index
    %c0_164 = arith.constant 0 : index
    %c0_165 = arith.constant 0 : index
    %c12_166 = arith.constant 12 : index
    %141 = vector.load %arg4[%c0_163, %c0_164, %c0_165, %c12_166] : memref<1x1x8x256xbf16, #tpu.memory_space<vmem>>, vector<1x1x8x128xbf16>
    %142 = vector.shape_cast %141 : vector<1x1x8x128xbf16> to vector<8x128xbf16>
    %cst_167 = arith.constant dense<0.000000e+00> : vector<4x128xf32>
    %143 = tpu.matmul %140, %142, %cst_167 {dimension_numbers = #tpu.dot_dimension_numbers<[1], [0], [0], [1], [0, 0, 1, 1], [], []>} : vector<4x8xbf16>, vector<8x128xbf16>, vector<4x128xf32> -> vector<4x128xf32>
    %144 = arith.addf %138, %143 : vector<4x128xf32>
    %c24 = arith.constant 24 : index
    %c0_168 = arith.constant 0 : index
    %c0_169 = arith.constant 0 : index
    %145 = vector.load %arg5[%c24, %c0_168, %c0_169] : memref<27x4x8xbf16, #tpu.memory_space<vmem>>, vector<1x4x8xbf16>
    %146 = vector.shape_cast %145 : vector<1x4x8xbf16> to vector<4x8xbf16>
    %c0_170 = arith.constant 0 : index
    %c0_171 = arith.constant 0 : index
    %c0_172 = arith.constant 0 : index
    %c20_173 = arith.constant 20 : index
    %147 = vector.load %arg4[%c0_170, %c0_171, %c0_172, %c20_173] : memref<1x1x8x256xbf16, #tpu.memory_space<vmem>>, vector<1x1x8x128xbf16>
    %148 = vector.shape_cast %147 : vector<1x1x8x128xbf16> to vector<8x128xbf16>
    %cst_174 = arith.constant dense<0.000000e+00> : vector<4x128xf32>
    %149 = tpu.matmul %146, %148, %cst_174 {dimension_numbers = #tpu.dot_dimension_numbers<[1], [0], [0], [1], [0, 0, 1, 1], [], []>} : vector<4x8xbf16>, vector<8x128xbf16>, vector<4x128xf32> -> vector<4x128xf32>
    %150 = arith.addf %144, %149 : vector<4x128xf32>
    %c25 = arith.constant 25 : index
    %c0_175 = arith.constant 0 : index
    %c0_176 = arith.constant 0 : index
    %151 = vector.load %arg5[%c25, %c0_175, %c0_176] : memref<27x4x8xbf16, #tpu.memory_space<vmem>>, vector<1x4x8xbf16>
    %152 = vector.shape_cast %151 : vector<1x4x8xbf16> to vector<4x8xbf16>
    %c0_177 = arith.constant 0 : index
    %c0_178 = arith.constant 0 : index
    %c0_179 = arith.constant 0 : index
    %c21_180 = arith.constant 21 : index
    %153 = vector.load %arg4[%c0_177, %c0_178, %c0_179, %c21_180] : memref<1x1x8x256xbf16, #tpu.memory_space<vmem>>, vector<1x1x8x128xbf16>
    %154 = vector.shape_cast %153 : vector<1x1x8x128xbf16> to vector<8x128xbf16>
    %cst_181 = arith.constant dense<0.000000e+00> : vector<4x128xf32>
    %155 = tpu.matmul %152, %154, %cst_181 {dimension_numbers = #tpu.dot_dimension_numbers<[1], [0], [0], [1], [0, 0, 1, 1], [], []>} : vector<4x8xbf16>, vector<8x128xbf16>, vector<4x128xf32> -> vector<4x128xf32>
    %156 = arith.addf %150, %155 : vector<4x128xf32>
    %c26 = arith.constant 26 : index
    %c0_182 = arith.constant 0 : index
    %c0_183 = arith.constant 0 : index
    %157 = vector.load %arg5[%c26, %c0_182, %c0_183] : memref<27x4x8xbf16, #tpu.memory_space<vmem>>, vector<1x4x8xbf16>
    %158 = vector.shape_cast %157 : vector<1x4x8xbf16> to vector<4x8xbf16>
    %c0_184 = arith.constant 0 : index
    %c0_185 = arith.constant 0 : index
    %c0_186 = arith.constant 0 : index
    %c22_187 = arith.constant 22 : index
    %159 = vector.load %arg4[%c0_184, %c0_185, %c0_186, %c22_187] : memref<1x1x8x256xbf16, #tpu.memory_space<vmem>>, vector<1x1x8x128xbf16>
    %160 = vector.shape_cast %159 : vector<1x1x8x128xbf16> to vector<8x128xbf16>
    %cst_188 = arith.constant dense<0.000000e+00> : vector<4x128xf32>
    %161 = tpu.matmul %158, %160, %cst_188 {dimension_numbers = #tpu.dot_dimension_numbers<[1], [0], [0], [1], [0, 0, 1, 1], [], []>} : vector<4x8xbf16>, vector<8x128xbf16>, vector<4x128xf32> -> vector<4x128xf32>
    %162 = arith.addf %156, %161 : vector<4x128xf32>
    %c0_189 = arith.constant 0 : index
    %c0_190 = arith.constant 0 : index
    %163 = vector.load %arg6[%c0_189, %c0_190] : memref<4x1xf32, #tpu.memory_space<vmem>>, vector<4x1xf32>
    %164 = vector.broadcast %163 : vector<4x1xf32> to vector<4x128xf32>
    %165 = arith.addf %162, %164 : vector<4x128xf32>
    %cst_191 = arith.constant 0.000000e+00 : f32
    %166 = vector.broadcast %cst_191 : f32 to vector<4x128xf32>
    %167 = arith.cmpf oge, %165, %166 : vector<4x128xf32>
    %cst_192 = arith.constant 2.000000e-01 : f32
    %168 = vector.broadcast %cst_192 : f32 to vector<4x128xf32>
    %169 = arith.mulf %168, %165 : vector<4x128xf32>
    %170 = arith.select %167, %165, %169 : vector<4x128xi1>, vector<4x128xf32>
    %171 = arith.truncf %170 : vector<4x128xf32> to vector<4x128xbf16>
    %c0_193 = arith.constant 0 : index
    %c0_194 = arith.constant 0 : index
    %c0_195 = arith.constant 0 : index
    %c0_196 = arith.constant 0 : index
    %172 = vector.load %arg7[%c0_193, %c0_194, %c0_195, %c0_196] : memref<1x1x4x128xbf16, #tpu.memory_space<vmem>>, vector<1x1x4x128xbf16>
    %173 = vector.shape_cast %172 : vector<1x1x4x128xbf16> to vector<4x128xbf16>
    %174 = vector.shape_cast %171 : vector<4x128xbf16> to vector<1x1x4x128xbf16>
    tpu.vector_store %arg7[%c0_193, %c0_194, %c0_195, %c0_196], %174 {strides = array<i32>} : memref<1x1x4x128xbf16, #tpu.memory_space<vmem>>, vector<1x1x4x128xbf16>,
    return
  }
  func.func @transform_0(%arg0: i32, %arg1: i32) -> (i32, i32, i32, i32) {
    %c0_i32 = arith.constant 0 : i32
    %0 = arith.addi %arg1, %c0_i32 : i32
    %c0_i32_0 = arith.constant 0 : i32
    %c0_i32_1 = arith.constant 0 : i32
    %c0_i32_2 = arith.constant 0 : i32
    return %arg0, %0, %c0_i32_0, %c0_i32_1 : i32, i32, i32, i32
  }
  func.func @transform_1(%arg0: i32, %arg1: i32) -> (i32, i32, i32, i32) {
    %c1_i32 = arith.constant 1 : i32
    %0 = arith.addi %arg1, %c1_i32 : i32
    %c0_i32 = arith.constant 0 : i32
    %c0_i32_0 = arith.constant 0 : i32
    %c0_i32_1 = arith.constant 0 : i32
    return %arg0, %0, %c0_i32, %c0_i32_0 : i32, i32, i32, i32
  }
  func.func @transform_2(%arg0: i32, %arg1: i32) -> (i32, i32, i32, i32) {
    %c2_i32 = arith.constant 2 : i32
    %0 = arith.addi %arg1, %c2_i32 : i32
    %c0_i32 = arith.constant 0 : i32
    %c0_i32_0 = arith.constant 0 : i32
    %c0_i32_1 = arith.constant 0 : i32
    return %arg0, %0, %c0_i32, %c0_i32_0 : i32, i32, i32, i32
  }
  func.func @transform_3(%arg0: i32, %arg1: i32) -> (i32, i32, i32) {
    %c0_i32 = arith.constant 0 : i32
    %c0_i32_0 = arith.constant 0 : i32
    %c0_i32_1 = arith.constant 0 : i32
    %c0_i32_2 = arith.constant 0 : i32
    return %c0_i32, %c0_i32_0, %c0_i32_1 : i32, i32, i32
  }
  func.func @transform_4(%arg0: i32, %arg1: i32) -> (i32, i32) {
    %c0_i32 = arith.constant 0 : i32
    %c0_i32_0 = arith.constant 0 : i32
    %c0_i32_1 = arith.constant 0 : i32
    return %c0_i32, %c0_i32_0 : i32, i32
  }
  func.func @transform_5(%arg0: i32, %arg1: i32) -> (i32, i32, i32, i32) {
    %c0_i32 = arith.constant 0 : i32
    %c0_i32_0 = arith.constant 0 : i32
    %c0_i32_1 = arith.constant 0 : i32
    return %arg0, %arg1, %c0_i32, %c0_i32_0 : i32, i32, i32, i32
  }
}

module attributes {stable_mosaic.version = 11 : i64} {
  func.func @_conv_1x1_kernel(%arg0: i32, %arg1: memref<1x5x64xbf16, #tpu.memory_space<vmem>>, %arg2: memref<1x5xbf16, #tpu.memory_space<vmem>>, %arg3: memref<1x1xf32, #tpu.memory_space<vmem>>, %arg4: memref<1x1x64xf32, #tpu.memory_space<vmem>>) attributes {dimension_semantics = [#tpu.dimension_semantics<parallel>], iteration_bounds = array<i64: 32>, scalar_prefetch = 0 : i64, scratch_operands = 0 : i64, tpu.core_type = #tpu.core_type<tc>, window_params = [{transform_indices = @transform_0, window_bounds = array<i64: 1, 5, 64>}, {pipeline_mode = #tpu.pipeline_mode<synchronous>, transform_indices = @transform_1, window_bounds = array<i64: 1, 5>}, {pipeline_mode = #tpu.pipeline_mode<synchronous>, transform_indices = @transform_2, window_bounds = array<i64: 1, 1>}, {transform_indices = @transform_3, window_bounds = array<i64: 1, 1, 64>}]} {
    %c0 = arith.constant 0 : index
    %c0_0 = arith.constant 0 : index
    %0 = vector.load %arg2[%c0, %c0_0] : memref<1x5xbf16, #tpu.memory_space<vmem>>, vector<1x5xbf16>
    %c0_1 = arith.constant 0 : index
    %c0_2 = arith.constant 0 : index
    %c0_3 = arith.constant 0 : index
    %1 = vector.load %arg1[%c0_1, %c0_2, %c0_3] : memref<1x5x64xbf16, #tpu.memory_space<vmem>>, vector<1x5x64xbf16>
    %2 = vector.shape_cast %1 : vector<1x5x64xbf16> to vector<5x64xbf16>
    %cst = arith.constant dense<0.000000e+00> : vector<1x64xf32>
    %3 = tpu.matmul %0, %2, %cst {dimension_numbers = #tpu.dot_dimension_numbers<[1], [0], [0], [1], [0, 0, 1, 1], [], []>} : vector<1x5xbf16>, vector<5x64xbf16>, vector<1x64xf32> -> vector<1x64xf32>
    %c0_4 = arith.constant 0 : index
    %c0_5 = arith.constant 0 : index
    %4 = vector.load %arg3[%c0_4, %c0_5] : memref<1x1xf32, #tpu.memory_space<vmem>>, vector<1x1xf32>
    %5 = vector.broadcast %4 : vector<1x1xf32> to vector<1x64xf32>
    %6 = arith.addf %3, %5 : vector<1x64xf32>
    %c0_6 = arith.constant 0 : index
    %c0_7 = arith.constant 0 : index
    %c0_8 = arith.constant 0 : index
    %7 = vector.load %arg4[%c0_6, %c0_7, %c0_8] : memref<1x1x64xf32, #tpu.memory_space<vmem>>, vector<1x1x64xf32>
    %8 = vector.shape_cast %7 : vector<1x1x64xf32> to vector<1x64xf32>
    %9 = vector.shape_cast %6 : vector<1x64xf32> to vector<1x1x64xf32>
    tpu.vector_store %arg4[%c0_6, %c0_7, %c0_8], %9 {strides = array<i32>} : memref<1x1x64xf32, #tpu.memory_space<vmem>>, vector<1x1x64xf32>,
    return
  }
  func.func @transform_0(%arg0: i32) -> (i32, i32, i32) {
    %c0_i32 = arith.constant 0 : i32
    %c0_i32_0 = arith.constant 0 : i32
    %c0_i32_1 = arith.constant 0 : i32
    return %arg0, %c0_i32, %c0_i32_0 : i32, i32, i32
  }
  func.func @transform_1(%arg0: i32) -> (i32, i32) {
    %c0_i32 = arith.constant 0 : i32
    %c0_i32_0 = arith.constant 0 : i32
    %c0_i32_1 = arith.constant 0 : i32
    return %c0_i32, %c0_i32_0 : i32, i32
  }
  func.func @transform_2(%arg0: i32) -> (i32, i32) {
    %c0_i32 = arith.constant 0 : i32
    %c0_i32_0 = arith.constant 0 : i32
    %c0_i32_1 = arith.constant 0 : i32
    return %c0_i32, %c0_i32_0 : i32, i32
  }
  func.func @transform_3(%arg0: i32) -> (i32, i32, i32) {
    %c0_i32 = arith.constant 0 : i32
    %c0_i32_0 = arith.constant 0 : i32
    %c0_i32_1 = arith.constant 0 : i32
    return %arg0, %c0_i32, %c0_i32_0 : i32, i32, i32
  }
}

</mosaic_0001>

<bundles_post_ra>
// kernel: dpconvlstm_forward.15
= control target key start
LH: loop header
LB: loop body
LE: loop exit
PB: predicated region body
PF: predicated region fallthrough
CT: control target
= control target key end

     0   :  { %s2603_s15 = smov 0   ;;  %s2605_s16 = smov 0   ;;  %s2983_s0 = inlined_call_operand.vmem [shape: bf16[4,5,8,1,256], index: 0, kind: input, shape index: {}, may-alias: {0,1}]   ;;  %s2984_s1 = inlined_call_operand.vmem [shape: bf16[4,5,8,1,256], index: 1, kind: input, shape index: {}, may-alias: {0,1}]   ;;  %s2985_s2 = inlined_call_operand.vmem [shape: bf16[27,4,1], index: 2, kind: input, shape index: {}]   ;;  %s2986_s3 = inlined_call_operand.vmem [shape: f32[4,1], index: 3, kind: input, shape index: {}]   ;;  %s2987_s4 = inlined_call_operand.vmem [shape: bf16[4,4,4,128], index: 4, kind: output, shape index: {}]  }
   0x1   :  { %s2607_s17 = smov 0   ;;  %s2609_s18 = smov 0  }
   0x2   :  { %s2611_s19 = smov 0  }
   0x3 LB: > { %s23_s20 = sadd.s32 1, %s2561_s17  ;;  %s26_s21 = sadd.s32 1, %s2565_s18  ;;  %s2569_s19 = sphi %s2611_s19, %s14_s19   ;;  %s2565_s18 = sphi %s2609_s18, %s2991_s18   ;;  %s2561_s17 = sphi %s2607_s17, %s2990_s17   ;;  %s2557_s16 = sphi %s2605_s16, %s2989_s16   ;;  %s2553_s15 = sphi %s2603_s15, %s2988_s15  }
   0x4   : > { %p24_p0 = scmp.ge.s32.totalorder %s23_s20, 4  ;;  %p2172_p1 = scmp.ge.s32.totalorder %s2569_s19, 1 }
   0x5   : > { %p200_p2 = scmp.lt.s32.totalorder %s2569_s19, 17 }
   0x6   : > { %s2993_s20 = smov (%p24_p0, %s23_s20), 0  ;;  %s2995_s21 = smov (!%p24_p0, %s26_s21), %s2565_s18 }
   0x7   : > { %p201_p3 = pnand %p2172_p1, %p200_p2  ;;  %p28_p4 = scmp.ge.s32.totalorder %s2995_s21, 4 }
   0x8   : > { %p241_p5 = scmp.lt.s32.totalorder (!%p201_p3), %s2557_s16, 3  ;;  %p243_p6 = scmp.lt.s32.totalorder (!%p201_p3), %s2553_s15, 4  ;;  %v385_v0 = vlaneseq (!%p201_p3)  ;;  %v2571_v1 = vmov (!%p201_p3), 1966171168   ;;  %v2572_v3 = vmov (!%p201_p3), 0.0   ;;  %vm2573_vm0 = vmmov (!%p201_p3), 0  }
   0x9   : > { %s2997_s21 = smov (%p28_p4, %s2995_s21), 0  ;;  %204 = sbr.rel (%p201_p3) target bundleno = 468 (0x1d4), region = 36 }
   0xa   : > { %v383_v2 = vunpack.c.l.s4 (!%p201_p3), %v2571_v1  ;;  %2320 = vmatprep.subr.bf16.mxu0 (!%p201_p3), %v2572_v3  ;;  %2326 = vmatprep.subr.bf16.mxu1 (!%p201_p3), %v2572_v3  ;;  %v386_v4 = vshrl.u32 (!%p201_p3), %v385_v0, 7  ;;  %v2574_v6 = vmov (!%p201_p3), 0   ;;  %vm278_vm1 = vcmask (!%p201_p3), 1040384   ;;  %s2575_s29 = smov (!%p201_p3), 127   ;;  %v2177_v20 = vld [vmem:[%s2985_s2 + $0x2] sm:$0x3] (!%p201_p3) }
   0xb   : > { %2322 = vmatprep.mubr.msk.bf16.mxu0 (!%p201_p3), %vm2573_vm0, %v2572_v3  ;;  %2328 = vmatprep.mubr.msk.bf16.mxu1 (!%p201_p3), %vm2573_vm0, %v2572_v3  ;;  %v2655_v8 = vsel (!%p201_p3), %vm278_vm1, 65535, %v2574_v6  ;;  %vm274_vm2 = vcmask (!%p201_p3), 7168   ;;  %v268_v24 = vld [vmem:[%s2985_s2] sm:$0x3] (!%p201_p3)  ;;  %s2576_s8 = smov (!%p201_p3), 123   ;;  %s249_s9 = sadd.s32 (!%p201_p3), 1, %s2553_s15 }
   0xc   : > { %v384_v5 = vunpack.c.0.s8 (!%p201_p3), %v383_v2  ;;  %2530 = vset.pattern.permute.xlu0 (!%p201_p3), %v2574_v6  ;;  %v2184_v30 = vld [vmem:[%s2985_s2 + $0x6] sm:$0x3] (!%p201_p3)  ;;  %p252_p7 = scmp.lt.s32.totalorder (!%p201_p3), %s249_s9, 4  ;;  %s2577_s12 = smov (!%p201_p3), 122   ;;  %v2052_v54 = vld [vmem:[%s2986_s3] sm:$0xf] (!%p201_p3) }
   0xd   : > { %vm400_vm3 = vcmask (!%p201_p3), 1039360   ;;  %v2181_v0 = vld [vmem:[%s2985_s2 + $0x4] sm:$0x3] (!%p201_p3)  ;;  %vm659_vm4 = vcmask (!%p201_p3), 1006592   ;;  %vm816_vm5 = vcmask (!%p201_p3), 998400   ;;  %p261_p8 = scmp.lt.s32.totalorder (!%p201_p3), %s2553_s15, 3 }
   0xe   : > { %v2646_v7 = vsub.s32 (!%p201_p3), %v384_v5, %v386_v4  ;;  %v2190_v5 = vld [vmem:[%s2985_s2 + $0xa] sm:$0x3] (!%p201_p3) }
  0x10   : > { %s2999_s16 = smov (!%p241_p5, %s2557_s16), 3  ;;  %s3001_s9 = smov (!%p252_p7, %s249_s9), 4 }
  0x11   : > { %s244_s22 = scalar_select %p243_p6, %s2553_s15, 4 }
  0x12   : > { %s2482_s23 = smul.u32 80, %s2999_s16  ;;  %s2174_s13 = sshll.u32 %s3001_s9, 4 }
  0x13   : > { %s2173_s24 = sshll.u32 %s244_s22, 4  ;;  %s3003_s15 = smov (!%p261_p8, %s2553_s15), 3 }
  0x14   : > { %s247_s25 = sadd.s32 %s2482_s23, %s2173_s24  ;;  %s256_s14 = sadd.s32 %s2482_s23, %s2174_s13 }
  0x15   : > { %s2653_s28 = scalar_lea.vmem %s2983_s0, %s247_s25  ;;  %s2720_s25 = scalar_lea.vmem %s2984_s1, %s256_s14 }
  0x16   : > { %v2182_v9 = vld.sshfl [vmem:[%s2653_s28] sm:$0x11 pattern:$0x75316420]  ;;  %v2178_v13 = vld [vmem:[%s2653_s28 + $0x2] sm:$0x1] }
  0x17   : > { %v388_v10 = vrot.slane %v2182_v9, %v2646_v7  ;;  %v381_v11 = vcombine.high %v2182_v9, %v2182_v9  ;;  %v2192_v12 = vld.sshfl [vmem:[%s2653_s28 + $0x4] sm:$0x11 pattern:$0x75316420]  ;;  %v282_v16 = vand.u32 %v2178_v13, %v2655_v8  ;;  %v269_v18 = vld [vmem:[%s2653_s28] sm:$0x1] }
  0x18   : > { %v569_v14 = vrot.slane %v2192_v12, %v2646_v7  ;;  %v562_v15 = vcombine.high %v2192_v12, %v2192_v12  ;;  %v2185_v21 = vld [vmem:[%s2653_s28 + $0x4] sm:$0x1]  ;;  %v2199_v22 = vld.sshfl [vmem:[%s2653_s28 + $0x2] sm:$0x11 pattern:$0x75316420]  ;;  %v328_v23 = vand.u32 %v2655_v8, %v269_v18 }
  0x19   : > { %396 = vrot.lane.b32.xlu0 %v388_v10, %s2575_s29  ;;  %v395_v17 = vrot.slane %v381_v11, %v2646_v7  ;;  %2321 = vmatpush3.bf16.msra.mxu0 %v282_v16  ;;  %v457_v25 = vand.u32 %v2185_v21, %v2655_v8  ;;  %v719_v26 = vcombine.high %v2199_v22, %v2199_v22  ;;  %v2212_v29 = vld.sshfl [vmem:[%s2653_s28 + $0x8] sm:$0x11 pattern:$0x75316420]  ;;  %v2188_v60 = vld [vmem:[%s2653_s28 + $0x6] sm:$0x1] }
  0x1a   : > { %577 = vrot.lane.b32.xlu1 %v569_v14, %s2575_s29  ;;  %v576_v19 = vrot.slane %v562_v15, %v2646_v7  ;;  %2332 = vmatprep.subr.bf16.mxu0 %v2572_v3  ;;  %v726_v27 = vrot.slane %v2199_v22, %v2646_v7  ;;  %v978_v31 = vcombine.high %v2212_v29, %v2212_v29  ;;  %v2222_v32 = vld.sshfl [vmem:[%s2653_s28 + $0xc] sm:$0x11 pattern:$0x75316420]  ;;  %v2205_v12 = vld [vmem:[%s2653_s28 + $0x8] sm:$0x1] }
  0x1b   : > { %2327 = vmatpush3.bf16.msra.mxu1 %v328_v23  ;;  %v733_v28 = vrot.slane %v719_v26, %v2646_v7  ;;  %v985_v33 = vrot.slane %v2212_v29, %v2646_v7  ;;  %v1158_v35 = vcombine.high %v2222_v32, %v2222_v32  ;;  %v1165_v36 = vrot.slane %v2222_v32, %v2646_v7  ;;  %v2230_v38 = vld.sshfl [vmem:[%s2653_s28 + $0xa] sm:$0x11 pattern:$0x75316420]  ;;  %v2187_v14 = vld [vmem:[%s2985_s2 + $0x8] sm:$0x3] }
  0x1c   : > { %2323 = vmatmul.mubr.msk.bf16.vlgmr.msra.gmra.mrb[0].mxu0 %vm274_vm2, %v2177_v20  ;;  %2338 = vmatprep.subr.bf16.mxu1 %v2572_v3  ;;  %v992_v34 = vrot.slane %v978_v31, %v2646_v7  ;;  %v1314_v39 = vcombine.high %v2230_v38, %v2230_v38  ;;  %v1321_v40 = vrot.slane %v2230_v38, %v2646_v7  ;;  %v2242_v42 = vld.sshfl [vmem:[%s2720_s25] sm:$0x11 pattern:$0x75316420]  ;;  %v2194_v23 = vld [vmem:[%s2985_s2 + $0xc] sm:$0x3] }
  0x1d   : > { %398 = vrot.lane.b32.xlu0 %v395_v17, %s2575_s29  ;;  %2334 = vmatprep.mubr.msk.bf16.mxu0 %vm2573_vm0, %v2572_v3  ;;  %v1172_v37 = vrot.slane %v1158_v35, %v2646_v7  ;;  %v1571_v43 = vcombine.high %v2242_v42, %v2242_v42  ;;  %v2252_v44 = vld.sshfl [vmem:[%s2720_s25 + $0x4] sm:$0x11 pattern:$0x75316420]  ;;  %v1578_v45 = vrot.slane %v2242_v42, %v2646_v7  ;;  %v2208_v29 = vld [vmem:[%s2653_s28 + $0xa] sm:$0x1] }
  0x1e   : > { %579 = vrot.lane.b32.xlu1 %v576_v19, %s2575_s29  ;;  %2329 = vmatmul.mubr.msk.bf16.vlgmr.msra.gmra.mrb[0].mxu1 %vm274_vm2, %v268_v24  ;;  %v1328_v41 = vrot.slane %v1314_v39, %v2646_v7  ;;  %v1751_v47 = vcombine.high %v2252_v44, %v2252_v44  ;;  %v1758_v48 = vrot.slane %v2252_v44, %v2646_v7  ;;  %v2259_v50 = vld.sshfl [vmem:[%s2720_s25 + $0x2] sm:$0x11 pattern:$0x75316420]  ;;  %v2201_v31 = vld [vmem:[%s2985_s2 + $0x10] sm:$0x3] }
  0x1f   : > { %2339 = vmatpush3.bf16.msra.mxu1 %v457_v25  ;;  %2340 = vmatprep.mubr.msk.bf16.mxu1 %vm2573_vm0, %v2572_v3  ;;  %v1585_v46 = vrot.slane %v1571_v43, %v2646_v7  ;;  %v1907_v51 = vcombine.high %v2259_v50, %v2259_v50  ;;  %v1914_v52 = vrot.slane %v2259_v50, %v2646_v7  ;;  %v2204_v25 = vld [vmem:[%s2985_s2 + $0x12] sm:$0x3]  ;;  %v2210_v35 = vld [vmem:[%s2985_s2 + $0x16] sm:$0x3]  ;;  %v2217_v43 = vld [vmem:[%s2985_s2 + $0x1a] sm:$0x3] }
  0x20   : > { %2350 = vmatprep.subr.bf16.mxu1 %v2572_v3  ;;  %v1765_v49 = vrot.slane %v1751_v47, %v2646_v7  ;;  %v508_v1 = vand.u32 %v2188_v60, %v2655_v8  ;;  %v873_v18 = vand.u32 %v2205_v12, %v2655_v8  ;;  %v924_v32 = vand.u32 %v2208_v29, %v2655_v8  ;;  %v2214_v50 = vld [vmem:[%s2985_s2 + $0x18] sm:$0x3]  ;;  %s2175_s13 = sshll.u32 %s2999_s16, 2 }
  0x21   : > { %655 = vrot.lane.b32.xlu0 %v388_v10, %s2576_s8  ;;  %v1921_v53 = vrot.slane %v1907_v51, %v2646_v7  ;;  %v2224_v51 = vld [vmem:[%s2985_s2 + $0x1e] sm:$0x3]  ;;  %s264_s14 = sadd.s32 %s2175_s13, %s3003_s15 }
  0x22   : > { %657 = vrot.lane.b32.xlu1 %v395_v17, %s2576_s8  ;;  %s2176_s22 = sshll.u32 %s264_s14, 1 }
  0x23   : > { %s266_s26 = scalar_lea.vmem %s2987_s4, %s2176_s22 }
  0x25   : > { %734 = vrot.lane.b32.xlu0 %v726_v27, %s2576_s8 }
  0x26   : > { %736 = vrot.lane.b32.xlu1 %v733_v28, %s2576_s8  ;;  %2341 = vmatmul.mubr.msk.bf16.vlgmr.msra.gmra.mrb[4].mxu1 %vm274_vm2, %v2184_v30  ;;  %v2218_v30 = vld [vmem:[%s2653_s28 + $0xe] sm:$0x1] }
  0x27   : > { %2352 = vmatprep.mubr.msk.bf16.mxu1 %vm2573_vm0, %v2572_v3 }
  0x29   : > { %812 = vrot.lane.b32.xlu0 %v388_v10, %s2577_s12 }
  0x2a   : > { %814 = vrot.lane.b32.xlu1 %v395_v17, %s2577_s12  ;;  %v2197_v17 = vld [vmem:[%s2985_s2 + $0xe] sm:$0x3] }
  0x2d   : > { %993 = vrot.lane.b32.xlu0 %v985_v33, %s2575_s29 }
  0x2e   : > { %995 = vrot.lane.b32.xlu1 %v992_v34, %s2575_s29 }
  0x31   : > { %1173 = vrot.lane.b32.xlu0 %v1165_v36, %s2575_s29  ;;  %v1104_v36 = vand.u32 %v2218_v30, %v2655_v8  ;;  %v2254_v30 = vld [vmem:[%s2985_s2 + $0x30] sm:$0x3] }
  0x32   : > { %1175 = vrot.lane.b32.xlu1 %v1172_v37, %s2575_s29  ;;  %v2215_v37 = vld [vmem:[%s2653_s28 + $0xc] sm:$0x1] }
  0x33   : > { %v1053_v42 = vand.u32 %v2215_v37, %v2655_v8 }
  0x35   : > { %1251 = vrot.lane.b32.xlu0 %v985_v33, %s2576_s8 }
  0x36   : > { %1253 = vrot.lane.b32.xlu1 %v992_v34, %s2576_s8 }
  0x39   : > { %1329 = vrot.lane.b32.xlu0 %v1321_v40, %s2576_s8 }
  0x3a   : > { %1331 = vrot.lane.b32.xlu1 %v1328_v41, %s2576_s8  ;;  %v2207_v41 = vld [vmem:[%s2985_s2 + $0x14] sm:$0x3] }
  0x3d   : > { %1407 = vrot.lane.b32.xlu0 %v985_v33, %s2577_s12 }
  0x3e   : > { %1409 = vrot.lane.b32.xlu1 %v992_v34, %s2577_s12 }
  0x41   : > { %1586 = vrot.lane.b32.xlu0 %v1578_v45, %s2575_s29 }
  0x42   : > { %1588 = vrot.lane.b32.xlu1 %v1585_v46, %s2575_s29 }
  0x45   : > { %1766 = vrot.lane.b32.xlu0 %v1758_v48, %s2575_s29 }
  0x46   : > { %1768 = vrot.lane.b32.xlu1 %v1765_v49, %s2575_s29 }
  0x49   : > { %1844 = vrot.lane.b32.xlu0 %v1578_v45, %s2576_s8 }
  0x4a   : > { %1846 = vrot.lane.b32.xlu1 %v1585_v46, %s2576_s8 }
  0x4d   : > { %1922 = vrot.lane.b32.xlu0 %v1914_v52, %s2576_s8 }
  0x4e   : > { %1924 = vrot.lane.b32.xlu1 %v1921_v53, %s2576_s8 }
  0x51   : > { %2000 = vrot.lane.b32.xlu0 %v1578_v45, %s2577_s12 }
  0x52   : > { %2002 = vrot.lane.b32.xlu1 %v1585_v46, %s2577_s12 }
  0x55   : > { %2055 = vperm.xlu0 %2530, %v2052_v54   ;;  %v2239_v54 = vld [vmem:[%s2720_s25 + $0x2] sm:$0x1] }
  0x8b   : > { %v397_v55 = vpop.permute.xlu0 %396 }
  0x8c   : > { %v578_v56 = vpop.permute.xlu1 %577 }
  0x8f   : > { %v399_v57 = vpop.permute.xlu0 %398 }
  0x90   : > { %v401_v58 = vsel %vm400_vm3, %v397_v55, %v399_v57  ;;  %v580_v59 = vpop.permute.xlu1 %579  ;;  %v2232_v57 = vld [vmem:[%s2985_s2 + $0x22] sm:$0x3] }
  0x91   : > { %v406_v61 = vand.u32 %v401_v58, %v2655_v8  ;;  %v581_v62 = vsel %vm400_vm3, %v578_v56, %v580_v59  ;;  %v2220_v56 = vld [vmem:[%s2985_s2 + $0x1c] sm:$0x3]  ;;  %v1517_v58 = vand.u32 %v2239_v54, %v2655_v8 }
  0x92   : > { %v586_v63 = vand.u32 %v581_v62, %v2655_v8  ;;  %v2245_v62 = vld [vmem:[%s2720_s25 + $0x4] sm:$0x1] }
  0x93   : > { %2333 = vmatpush3.bf16.msra.mxu0 %v406_v61  ;;  %v656_v2 = vpop.permute.xlu0 %655  ;;  %v1461_v61 = vld [vmem:[%s2720_s25] sm:$0x1] }
  0x94   : > { %2344 = vmatprep.subr.bf16.mxu0 %v2572_v3  ;;  %2351 = vmatpush3.bf16.msra.mxu1 %v586_v63  ;;  %v658_v4 = vpop.permute.xlu1 %657  ;;  %v2228_v63 = vld [vmem:[%s2985_s2 + $0x20] sm:$0x3] }
  0x95   : > { %2362 = vmatprep.subr.bf16.mxu1 %v2572_v3  ;;  %v660_v7 = vsel %vm659_vm4, %v656_v2, %v658_v4  ;;  %v2238_v4 = vld [vmem:[%s2985_s2 + $0x26] sm:$0x3] }
  0x96   : > { %2335 = vmatmul.mubr.msk.bf16.vlgmr.msra.gmra.mrb[4].mxu0 %vm274_vm2, %v2181_v0  ;;  %v665_v13 = vand.u32 %v660_v7, %v2655_v8  ;;  %v1466_v0 = vand.u32 %v1461_v61, %v2655_v8 }
  0x97   : > { %2345 = vmatpush3.bf16.msra.mxu0 %v508_v1  ;;  %2346 = vmatprep.mubr.msk.bf16.mxu0 %vm2573_vm0, %v2572_v3  ;;  %v735_v6 = vpop.permute.xlu0 %734 }
  0x98   : > { %2353 = vmatmul.mubr.msk.bf16.vlgmr.msra.gmra.mrb[8].mxu1 %vm274_vm2, %v2190_v5  ;;  %v737_v9 = vpop.permute.xlu1 %736  ;;  %2356 = vmatprep.subr.bf16.mxu0 %v2572_v3  ;;  %v1646_v5 = vand.u32 %v2245_v62, %v2655_v8 }
  0x99   : > { %v738_v10 = vsel %vm659_vm4, %v735_v6, %v737_v9  ;;  %2364 = vmatprep.mubr.msk.bf16.mxu1 %vm2573_vm0, %v2572_v3 }
  0x9a   : > { %v743_v11 = vand.u32 %v738_v10, %v2655_v8 }
  0x9b   : > { %v813_v15 = vpop.permute.xlu0 %812 }
  0x9c   : > { %2363 = vmatpush3.bf16.msra.mxu1 %v743_v11  ;;  %v815_v16 = vpop.permute.xlu1 %814  ;;  %v2236_v11 = vld [vmem:[%s2985_s2 + $0x24] sm:$0x3] }
  0x9d   : > { %2374 = vmatprep.subr.bf16.mxu1 %v2572_v3  ;;  %v817_v20 = vsel %vm816_vm5, %v813_v15, %v815_v16 }
  0x9e   : > { %2347 = vmatmul.mubr.msk.bf16.vlgmr.msra.gmra.mrb[8].mxu0 %vm274_vm2, %v2187_v14  ;;  %v822_v24 = vand.u32 %v817_v20, %v2655_v8 }
  0x9f   : > { %2357 = vmatpush3.bf16.msra.mxu0 %v665_v13  ;;  %2358 = vmatprep.mubr.msk.bf16.mxu0 %vm2573_vm0, %v2572_v3  ;;  %v994_v19 = vpop.permute.xlu0 %993  ;;  %v2244_v13 = vld [vmem:[%s2985_s2 + $0x2a] sm:$0x3] }
  0xa0   : > { %2365 = vmatmul.mubr.msk.bf16.vlgmr.msra.gmra.mrb[12].mxu1 %vm274_vm2, %v2197_v17  ;;  %2368 = vmatprep.subr.bf16.mxu0 %v2572_v3  ;;  %v996_v21 = vpop.permute.xlu1 %995  ;;  %v2248_v17 = vld [vmem:[%s2720_s25 + $0x6] sm:$0x1] }
  0xa1   : > { %2375 = vmatpush3.bf16.msra.mxu1 %v873_v18  ;;  %2376 = vmatprep.mubr.msk.bf16.mxu1 %vm2573_vm0, %v2572_v3  ;;  %v997_v22 = vsel %vm400_vm3, %v994_v19, %v996_v21  ;;  %v2241_v19 = vld [vmem:[%s2985_s2 + $0x28] sm:$0x3]  ;;  %v1697_v20 = vand.u32 %v2248_v17, %v2655_v8  ;;  %v2250_v21 = vld [vmem:[%s2985_s2 + $0x2e] sm:$0x3] }
  0xa2   : > { %2386 = vmatprep.subr.bf16.mxu1 %v2572_v3  ;;  %v1002_v26 = vand.u32 %v997_v22, %v2655_v8 }
  0xa3   : > { %v1174_v28 = vpop.permute.xlu0 %1173 }
  0xa4   : > { %v1176_v27 = vpop.permute.xlu1 %1175 }
  0xa5   : > { %v1177_v47 = vsel %vm400_vm3, %v1174_v28, %v1176_v27  ;;  %v2257_v28 = vld [vmem:[%s2985_s2 + $0x32] sm:$0x3] }
  0xa6   : > { %2359 = vmatmul.mubr.msk.bf16.vlgmr.msra.gmra.mrb[12].mxu0 %vm274_vm2, %v2194_v23  ;;  %v1182_v49 = vand.u32 %v1177_v47, %v2655_v8 }
  0xa7   : > { %2369 = vmatpush3.bf16.msra.mxu0 %v822_v24  ;;  %2370 = vmatprep.mubr.msk.bf16.mxu0 %vm2573_vm0, %v2572_v3  ;;  %v1252_v34 = vpop.permute.xlu0 %1251 }
  0xa8   : > { %2377 = vmatmul.mubr.msk.bf16.vlgmr.msra.gmra.mrb[16].mxu1 %vm274_vm2, %v2204_v25  ;;  %2380 = vmatprep.subr.bf16.mxu0 %v2572_v3  ;;  %v1254_v33 = vpop.permute.xlu1 %1253  ;;  %v2247_v25 = vld [vmem:[%s2985_s2 + $0x2c] sm:$0x3] }
  0xa9   : > { %2387 = vmatpush3.bf16.msra.mxu1 %v1002_v26  ;;  %2388 = vmatprep.mubr.msk.bf16.mxu1 %vm2573_vm0, %v2572_v3  ;;  %v1255_v40 = vsel %vm659_vm4, %v1252_v34, %v1254_v33  ;;  %v2261_v34 = vld [vmem:[%s2985_s2 + $0x34] sm:$0x3] }
  0xaa   : > { %2398 = vmatprep.subr.bf16.mxu1 %v2572_v3  ;;  %v1260_v44 = vand.u32 %v1255_v40, %v2655_v8 }
  0xab   : > { %v1330_v39 = vpop.permute.xlu0 %1329 }
  0xac   : > { %v1332_v38 = vpop.permute.xlu1 %1331 }
  0xad   : > { %v1333_v53 = vsel %vm659_vm4, %v1330_v39, %v1332_v38 }
  0xae   : > { %2371 = vmatmul.mubr.msk.bf16.vlgmr.msra.gmra.mrb[16].mxu0 %vm274_vm2, %v2201_v31  ;;  %v1338_v55 = vand.u32 %v1333_v53, %v2655_v8 }
  0xaf   : > { %2381 = vmatpush3.bf16.msra.mxu0 %v924_v32  ;;  %2382 = vmatprep.mubr.msk.bf16.mxu0 %vm2573_vm0, %v2572_v3  ;;  %v1408_v46 = vpop.permute.xlu0 %1407 }
  0xb0   : > { %2389 = vmatmul.mubr.msk.bf16.vlgmr.msra.gmra.mrb[20].mxu1 %vm274_vm2, %v2210_v35  ;;  %2392 = vmatprep.subr.bf16.mxu0 %v2572_v3  ;;  %v1410_v45 = vpop.permute.xlu1 %1409 }
  0xb1   : > { %2399 = vmatpush3.bf16.msra.mxu1 %v1104_v36  ;;  %2400 = vmatprep.mubr.msk.bf16.mxu1 %vm2573_vm0, %v2572_v3  ;;  %v1411_v48 = vsel %vm816_vm5, %v1408_v46, %v1410_v45 }
  0xb2   : > { %2410 = vmatprep.subr.bf16.mxu1 %v2572_v3  ;;  %v1416_v52 = vand.u32 %v1411_v48, %v2655_v8 }
  0xb3   : > { %v1587_v60 = vpop.permute.xlu0 %1586 }
  0xb4   : > { %v1589_v59 = vpop.permute.xlu1 %1588 }
  0xb5   : > { %v1590_v6 = vsel %vm400_vm3, %v1587_v60, %v1589_v59 }
  0xb6   : > { %2383 = vmatmul.mubr.msk.bf16.vlgmr.msra.gmra.mrb[20].mxu0 %vm274_vm2, %v2207_v41  ;;  %v1595_v12 = vand.u32 %v1590_v6, %v2655_v8 }
  0xb7   : > { %2393 = vmatpush3.bf16.msra.mxu0 %v1053_v42  ;;  %2394 = vmatprep.mubr.msk.bf16.mxu0 %vm2573_vm0, %v2572_v3  ;;  %v1767_v2 = vpop.permute.xlu0 %1766 }
  0xb8   : > { %2401 = vmatmul.mubr.msk.bf16.vlgmr.msra.gmra.mrb[24].mxu1 %vm274_vm2, %v2217_v43  ;;  %2404 = vmatprep.subr.bf16.mxu0 %v2572_v3  ;;  %v1769_v1 = vpop.permute.xlu1 %1768 }
  0xb9   : > { %2411 = vmatpush3.bf16.msra.mxu1 %v1260_v44  ;;  %2412 = vmatprep.mubr.msk.bf16.mxu1 %vm2573_vm0, %v2572_v3  ;;  %v1770_v10 = vsel %vm400_vm3, %v1767_v2, %v1769_v1 }
  0xba   : > { %2422 = vmatprep.subr.bf16.mxu1 %v2572_v3  ;;  %v1775_v14 = vand.u32 %v1770_v10, %v2655_v8 }
  0xbb   : > { %v1845_v9 = vpop.permute.xlu0 %1844 }
  0xbc   : > { %v1847_v7 = vpop.permute.xlu1 %1846 }
  0xbd   : > { %v1848_v23 = vsel %vm659_vm4, %v1845_v9, %v1847_v7 }
  0xbe   : > { %2395 = vmatmul.mubr.msk.bf16.vlgmr.msra.gmra.mrb[24].mxu0 %vm274_vm2, %v2214_v50  ;;  %v1853_v24 = vand.u32 %v1848_v23, %v2655_v8 }
  0xbf   : > { %2405 = vmatpush3.bf16.msra.mxu0 %v1182_v49  ;;  %2406 = vmatprep.mubr.msk.bf16.mxu0 %vm2573_vm0, %v2572_v3  ;;  %v1923_v16 = vpop.permute.xlu0 %1922 }
  0xc0   : > { %2413 = vmatmul.mubr.msk.bf16.vlgmr.msra.gmra.mrb[28].mxu1 %vm274_vm2, %v2224_v51  ;;  %2416 = vmatprep.subr.bf16.mxu0 %v2572_v3  ;;  %v1925_v15 = vpop.permute.xlu1 %1924 }
  0xc1   : > { %2423 = vmatpush3.bf16.msra.mxu1 %v1416_v52  ;;  %2424 = vmatprep.mubr.msk.bf16.mxu1 %vm2573_vm0, %v2572_v3  ;;  %v1926_v18 = vsel %vm659_vm4, %v1923_v16, %v1925_v15 }
  0xc2   : > { %2434 = vmatprep.subr.bf16.mxu1 %v2572_v3  ;;  %v1931_v22 = vand.u32 %v1926_v18, %v2655_v8 }
  0xc3   : > { %v2001_v27 = vpop.permute.xlu0 %2000 }
  0xc4   : > { %v2003_v26 = vpop.permute.xlu1 %2002 }
  0xc5   : > { %v2004_v29 = vsel %vm816_vm5, %v2001_v27, %v2003_v26 }
  0xc6   : > { %2407 = vmatmul.mubr.msk.bf16.vlgmr.msra.gmra.mrb[28].mxu0 %vm274_vm2, %v2220_v56  ;;  %v2009_v31 = vand.u32 %v2004_v29, %v2655_v8 }
  0xc7   : > { %2417 = vmatpush3.bf16.msra.mxu0 %v1338_v55  ;;  %2418 = vmatprep.mubr.msk.bf16.mxu0 %vm2573_vm0, %v2572_v3 }
  0xc8   : > { %2425 = vmatmul.mubr.msk.bf16.vlgmr.msra.gmra.mrb[32].mxu1 %vm274_vm2, %v2232_v57  ;;  %2428 = vmatprep.subr.bf16.mxu0 %v2572_v3 }
  0xc9   : > { %2435 = vmatpush3.bf16.msra.mxu1 %v1517_v58  ;;  %2436 = vmatprep.mubr.msk.bf16.mxu1 %vm2573_vm0, %v2572_v3 }
  0xca   : > { %2446 = vmatprep.subr.bf16.mxu1 %v2572_v3 }
  0xce   : > { %2419 = vmatmul.mubr.msk.bf16.vlgmr.msra.gmra.mrb[32].mxu0 %vm274_vm2, %v2228_v63 }
  0xcf   : > { %2429 = vmatpush3.bf16.msra.mxu0 %v1466_v0  ;;  %2430 = vmatprep.mubr.msk.bf16.mxu0 %vm2573_vm0, %v2572_v3 }
  0xd0   : > { %2437 = vmatmul.mubr.msk.bf16.vlgmr.msra.gmra.mrb[36].mxu1 %vm274_vm2, %v2238_v4  ;;  %2440 = vmatprep.subr.bf16.mxu0 %v2572_v3 }
  0xd1   : > { %2447 = vmatpush3.bf16.msra.mxu1 %v1646_v5  ;;  %2448 = vmatprep.mubr.msk.bf16.mxu1 %vm2573_vm0, %v2572_v3 }
  0xd2   : > { %2458 = vmatprep.subr.bf16.mxu1 %v2572_v3 }
  0xd6   : > { %2431 = vmatmul.mubr.msk.bf16.vlgmr.msra.gmra.mrb[36].mxu0 %vm274_vm2, %v2236_v11 }
  0xd7   : > { %2441 = vmatpush3.bf16.msra.mxu0 %v1595_v12  ;;  %2442 = vmatprep.mubr.msk.bf16.mxu0 %vm2573_vm0, %v2572_v3 }
  0xd8   : > { %2449 = vmatmul.mubr.msk.bf16.vlgmr.msra.gmra.mrb[40].mxu1 %vm274_vm2, %v2244_v13  ;;  %2452 = vmatprep.subr.bf16.mxu0 %v2572_v3 }
  0xd9   : > { %2459 = vmatpush3.bf16.msra.mxu1 %v1775_v14  ;;  %2460 = vmatprep.mubr.msk.bf16.mxu1 %vm2573_vm0, %v2572_v3 }
  0xda   : > { %2470 = vmatprep.subr.bf16.mxu1 %v2572_v3 }
  0xde   : > { %2443 = vmatmul.mubr.msk.bf16.vlgmr.msra.gmra.mrb[40].mxu0 %vm274_vm2, %v2241_v19 }
  0xdf   : > { %2453 = vmatpush3.bf16.msra.mxu0 %v1697_v20  ;;  %2454 = vmatprep.mubr.msk.bf16.mxu0 %vm2573_vm0, %v2572_v3 }
  0xe0   : > { %2461 = vmatmul.mubr.msk.bf16.vlgmr.msra.gmra.mrb[44].mxu1 %vm274_vm2, %v2250_v21  ;;  %2464 = vmatprep.subr.bf16.mxu0 %v2572_v3 }
  0xe1   : > { %2471 = vmatpush3.bf16.msra.mxu1 %v1931_v22  ;;  %2472 = vmatprep.mubr.msk.bf16.mxu1 %vm2573_vm0, %v2572_v3 }
  0xe6   : > { %2455 = vmatmul.mubr.msk.bf16.vlgmr.msra.gmra.mrb[44].mxu0 %vm274_vm2, %v2247_v25 }
  0xe7   : > { %2465 = vmatpush3.bf16.msra.mxu0 %v1853_v24  ;;  %2466 = vmatprep.mubr.msk.bf16.mxu0 %vm2573_vm0, %v2572_v3 }
  0xe8   : > { %2473 = vmatmul.mubr.msk.bf16.vlgmr.msra.gmra.mrb[48].mxu1 %vm274_vm2, %v2257_v28  ;;  %2476 = vmatprep.subr.bf16.mxu0 %v2572_v3 }
  0xee   : > { %2467 = vmatmul.mubr.msk.bf16.vlgmr.msra.gmra.mrb[48].mxu0 %vm274_vm2, %v2254_v30 }
  0xef   : > { %2477 = vmatpush3.bf16.msra.mxu0 %v2009_v31  ;;  %2478 = vmatprep.mubr.msk.bf16.mxu0 %vm2573_vm0, %v2572_v3  ;;  %v318_v32 = vpop.f32.mrb[0].mxu0 }
  0xf0   : > { %v2324_v33 = vpop.f32.mrb[1].mxu0 }
  0xf1   : > { %v321_v35 = vpop.f32.mrb[2].mxu0  ;;  %v364_v36 = vpop.f32.mrb[0].mxu1 }
  0xf2   : > { %v2325_v37 = vpop.f32.mrb[3].mxu0  ;;  %v365_v38 = vadd.f32 %v364_v36, %v318_v32  ;;  %v2330_v39 = vpop.f32.mrb[1].mxu1 }
  0xf3   : > { %v367_v40 = vpop.f32.mrb[2].mxu1 }
  0xf4   : > { %v2331_v8 = vpop.f32.mrb[3].mxu1 }
  0xf6   : > { %2479 = vmatmul.mubr.msk.bf16.vlgmr.msra.gmra.mrb[52].mxu0 %vm274_vm2, %v2261_v34 }
  0xf9   : > { %v493_v41 = vpop.f32.mrb[4].mxu1 }
  0xfa   : > { %v2342_v42 = vpop.f32.mrb[5].mxu1 }
  0xfb   : > { %v496_v43 = vpop.f32.mrb[6].mxu1 }
  0xfc   : > { %v2343_v44 = vpop.f32.mrb[7].mxu1 }
 0x169   : > { %v442_v3 = vpop.f32.mrb[4].mxu0 }
 0x16a   : > { %v448_v45 = vadd.f32 %v442_v3, %v365_v38  ;;  %v2336_v46 = vpop.f32.mrb[5].mxu0 }
 0x16b   : > { %v445_v47 = vpop.f32.mrb[6].mxu0  ;;  %v622_v48 = vpop.f32.mrb[8].mxu1 }
 0x16c   : > { %v499_v49 = vadd.f32 %v493_v41, %v448_v45  ;;  %v2337_v50 = vpop.f32.mrb[7].mxu0  ;;  %v2354_v51 = vpop.f32.mrb[9].mxu1 }
 0x16d   : > { %v625_v52 = vpop.f32.mrb[10].mxu1 }
 0x16e   : > { %v2355_v53 = vpop.f32.mrb[11].mxu1 }
 0x171   : > { %v544_v54 = vpop.f32.mrb[8].mxu0 }
 0x172   : > { %v550_v55 = vadd.f32 %v544_v54, %v499_v49  ;;  %v2348_v56 = vpop.f32.mrb[9].mxu0 }
 0x173   : > { %v547_v57 = vpop.f32.mrb[10].mxu0  ;;  %v779_v58 = vpop.f32.mrb[12].mxu1 }
 0x174   : > { %v628_v59 = vadd.f32 %v622_v48, %v550_v55  ;;  %v2349_v60 = vpop.f32.mrb[11].mxu0  ;;  %v2366_v61 = vpop.f32.mrb[13].mxu1 }
 0x175   : > { %v782_v62 = vpop.f32.mrb[14].mxu1 }
 0x176   : > { %v2367_v63 = vpop.f32.mrb[15].mxu1 }
 0x179   : > { %v701_v0 = vpop.f32.mrb[12].mxu0 }
 0x17a   : > { %v707_v1 = vadd.f32 %v701_v0, %v628_v59  ;;  %v2360_v2 = vpop.f32.mrb[13].mxu0 }
 0x17b   : > { %v704_v4 = vpop.f32.mrb[14].mxu0  ;;  %v909_v5 = vpop.f32.mrb[16].mxu1 }
 0x17c   : > { %v785_v6 = vadd.f32 %v779_v58, %v707_v1  ;;  %v2361_v7 = vpop.f32.mrb[15].mxu0  ;;  %v2378_v9 = vpop.f32.mrb[17].mxu1 }
 0x17d   : > { %v912_v10 = vpop.f32.mrb[18].mxu1 }
 0x17e   : > { %v2379_v11 = vpop.f32.mrb[19].mxu1 }
 0x181   : > { %v858_v12 = vpop.f32.mrb[16].mxu0 }
 0x182   : > { %v864_v13 = vadd.f32 %v858_v12, %v785_v6  ;;  %v2372_v14 = vpop.f32.mrb[17].mxu0 }
 0x183   : > { %v861_v15 = vpop.f32.mrb[18].mxu0  ;;  %v1038_v16 = vpop.f32.mrb[20].mxu1 }
 0x184   : > { %v915_v17 = vadd.f32 %v909_v5, %v864_v13  ;;  %v2373_v18 = vpop.f32.mrb[19].mxu0  ;;  %v2390_v19 = vpop.f32.mrb[21].mxu1 }
 0x185   : > { %v1041_v20 = vpop.f32.mrb[22].mxu1 }
 0x186   : > { %v2391_v21 = vpop.f32.mrb[23].mxu1 }
 0x189   : > { %v960_v22 = vpop.f32.mrb[20].mxu0 }
 0x18a   : > { %v966_v23 = vadd.f32 %v960_v22, %v915_v17  ;;  %v2384_v24 = vpop.f32.mrb[21].mxu0 }
 0x18b   : > { %v963_v25 = vpop.f32.mrb[22].mxu0  ;;  %v1140_v26 = vpop.f32.mrb[24].mxu1 }
 0x18c   : > { %v1044_v27 = vadd.f32 %v1038_v16, %v966_v23  ;;  %v2385_v28 = vpop.f32.mrb[23].mxu0  ;;  %v2402_v29 = vpop.f32.mrb[25].mxu1 }
 0x18d   : > { %v1143_v30 = vpop.f32.mrb[26].mxu1 }
 0x18e   : > { %v2403_v31 = vpop.f32.mrb[27].mxu1 }
 0x191   : > { %v1089_v32 = vpop.f32.mrb[24].mxu0 }
 0x192   : > { %v1095_v33 = vadd.f32 %v1089_v32, %v1044_v27  ;;  %v2396_v34 = vpop.f32.mrb[25].mxu0 }
 0x193   : > { %v1092_v35 = vpop.f32.mrb[26].mxu0  ;;  %v1296_v36 = vpop.f32.mrb[28].mxu1 }
 0x194   : > { %v1146_v37 = vadd.f32 %v1140_v26, %v1095_v33  ;;  %v2397_v38 = vpop.f32.mrb[27].mxu0  ;;  %v2414_v39 = vpop.f32.mrb[29].mxu1 }
 0x195   : > { %v1299_v40 = vpop.f32.mrb[30].mxu1  ;;  %v2056_v35 = vpop.permute.xlu0 %2055 }
 0x196   : > { %v2415_v8 = vpop.f32.mrb[31].mxu1 }
 0x199   : > { %v1218_v41 = vpop.f32.mrb[28].mxu0 }
 0x19a   : > { %v1224_v42 = vadd.f32 %v1218_v41, %v1146_v37  ;;  %v2408_v43 = vpop.f32.mrb[29].mxu0 }
 0x19b   : > { %v1221_v44 = vpop.f32.mrb[30].mxu0  ;;  %v1452_v3 = vpop.f32.mrb[32].mxu1 }
 0x19c   : > { %v1302_v45 = vadd.f32 %v1296_v36, %v1224_v42  ;;  %v2409_v46 = vpop.f32.mrb[31].mxu0  ;;  %v2426_v47 = vpop.f32.mrb[33].mxu1 }
 0x19d   : > { %v1455_v48 = vpop.f32.mrb[34].mxu1 }
 0x19e   : > { %v2427_v49 = vpop.f32.mrb[35].mxu1 }
 0x1a1   : > { %v1374_v50 = vpop.f32.mrb[32].mxu0 }
 0x1a2   : > { %v1380_v51 = vadd.f32 %v1374_v50, %v1302_v45  ;;  %v2420_v52 = vpop.f32.mrb[33].mxu0 }
 0x1a3   : > { %v1377_v53 = vpop.f32.mrb[34].mxu0  ;;  %v1553_v54 = vpop.f32.mrb[36].mxu1 }
 0x1a4   : > { %v1458_v55 = vadd.f32 %v1452_v3, %v1380_v51  ;;  %v2421_v56 = vpop.f32.mrb[35].mxu0  ;;  %v2438_v57 = vpop.f32.mrb[37].mxu1 }
 0x1a5   : > { %v1556_v58 = vpop.f32.mrb[38].mxu1 }
 0x1a6   : > { %v2439_v59 = vpop.f32.mrb[39].mxu1 }
 0x1a9   : > { %v1502_v60 = vpop.f32.mrb[36].mxu0 }
 0x1aa   : > { %v1508_v61 = vadd.f32 %v1502_v60, %v1458_v55  ;;  %v2432_v62 = vpop.f32.mrb[37].mxu0 }
 0x1ab   : > { %v1505_v63 = vpop.f32.mrb[38].mxu0  ;;  %v1682_v0 = vpop.f32.mrb[40].mxu1 }
 0x1ac   : > { %v1559_v1 = vadd.f32 %v1553_v54, %v1508_v61  ;;  %v2433_v2 = vpop.f32.mrb[39].mxu0  ;;  %v2450_v4 = vpop.f32.mrb[41].mxu1 }
 0x1ad   : > { %v1685_v5 = vpop.f32.mrb[42].mxu1 }
 0x1ae   : > { %v2451_v6 = vpop.f32.mrb[43].mxu1 }
 0x1b1   : > { %v1631_v7 = vpop.f32.mrb[40].mxu0 }
 0x1b2   : > { %v1637_v9 = vadd.f32 %v1631_v7, %v1559_v1  ;;  %v2444_v10 = vpop.f32.mrb[41].mxu0 }
 0x1b3   : > { %v1634_v11 = vpop.f32.mrb[42].mxu0  ;;  %v1811_v12 = vpop.f32.mrb[44].mxu1 }
 0x1b4   : > { %v1688_v13 = vadd.f32 %v1682_v0, %v1637_v9  ;;  %v2445_v14 = vpop.f32.mrb[43].mxu0  ;;  %v2462_v15 = vpop.f32.mrb[45].mxu1 }
 0x1b5   : > { %v1814_v16 = vpop.f32.mrb[46].mxu1 }
 0x1b6   : > { %v2463_v17 = vpop.f32.mrb[47].mxu1 }
 0x1b9   : > { %v1733_v18 = vpop.f32.mrb[44].mxu0 }
 0x1ba   : > { %v1739_v19 = vadd.f32 %v1733_v18, %v1688_v13  ;;  %v2456_v20 = vpop.f32.mrb[45].mxu0 }
 0x1bb   : > { %v1736_v21 = vpop.f32.mrb[46].mxu0  ;;  %v1967_v22 = vpop.f32.mrb[48].mxu1 }
 0x1bc   : > { %v1817_v23 = vadd.f32 %v1811_v12, %v1739_v19  ;;  %v2457_v24 = vpop.f32.mrb[47].mxu0  ;;  %v2474_v25 = vpop.f32.mrb[49].mxu1 }
 0x1bd   : > { %v1970_v26 = vpop.f32.mrb[50].mxu1 }
 0x1be   : > { %v2475_v27 = vpop.f32.mrb[51].mxu1 }
 0x1c1   : > { %v1889_v28 = vpop.f32.mrb[48].mxu0 }
 0x1c2   : > { %v1895_v29 = vadd.f32 %v1889_v28, %v1817_v23  ;;  %v2468_v30 = vpop.f32.mrb[49].mxu0 }
 0x1c3   : > { %v1892_v31 = vpop.f32.mrb[50].mxu0 }
 0x1c4   : > { %v1973_v32 = vadd.f32 %v1967_v22, %v1895_v29  ;;  %v2469_v33 = vpop.f32.mrb[51].mxu0 }
 0x1c9   : > { %v2045_v34 = vpop.f32.mrb[52].mxu0 }
 0x1ca   : > { %v2051_v36 = vadd.f32 %v2045_v34, %v1973_v32  ;;  %v2480_v37 = vpop.f32.mrb[53].mxu0 }
 0x1cb   : > { %v2048_v38 = vpop.f32.mrb[54].mxu0 }
 0x1cc   : > { %v2058_v39 = vadd.f32 %v2056_v35, %v2051_v36  ;;  %v2481_v40 = vpop.f32.mrb[55].mxu0 }
 0x1ce   : > { %vm2059_vm6 = vcmp.ge.f32.partialorder %v2058_v39, 0.0  ;;  %v2060_v8 = vmul.f32 0.2, %v2058_v39 }
 0x1d0   : > { %v2061_v41 = vsel %vm2059_vm6, %v2058_v39, %v2060_v8 }
 0x1d1   : > { %v2062_v42 = vpack.c.bf16 %v2061_v41, %v2061_v41 }
 0x1d3   : > { %2063 = vst [vmem:[%s266_s26] sm:$0x3] %v2062_v42 }
 0x1d4 PF: > { %s14_s19 = sadd.s32 1, %s2569_s19   ;;  %s2988_s15 = smov %s2561_s17 }
 0x1d5   : > { %p11_p9 = scmp.ge.s32.totalorder %s14_s19, 18   ;;  %s2989_s16 = smov %s2565_s18 }
 0x1d6   : > { %s2990_s17 = smov %s2993_s20  ;;  %s2991_s18 = smov %s2997_s21 }
 0x1d7   :  { %13 = sbr.rel (!%p11_p9) target bundleno = 3 (0x3), region = 105 }

// kernel: dpconvlstm_forward.16
= control target key start
LH: loop header
LB: loop body
LE: loop exit
PB: predicated region body
PF: predicated region fallthrough
CT: control target
= control target key end

     0   :  { %s2403_s15 = smov 0   ;;  %s2405_s16 = smov 0   ;;  %s2761_s0 = inlined_call_operand.vmem [shape: bf16[4,3,8,4,256], index: 0, kind: input, shape index: {}, may-alias: {0,1}]   ;;  %s2762_s1 = inlined_call_operand.vmem [shape: bf16[4,3,8,4,256], index: 1, kind: input, shape index: {}, may-alias: {0,1}]   ;;  %s2763_s2 = inlined_call_operand.vmem [shape: bf16[27,8,4], index: 2, kind: input, shape index: {}]   ;;  %s2764_s3 = inlined_call_operand.vmem [shape: f32[8,1], index: 3, kind: input, shape index: {}]   ;;  %s2765_s4 = inlined_call_operand.vmem [shape: bf16[4,2,8,128], index: 4, kind: output, shape index: {}]  }
   0x1   :  { %s2407_s17 = smov 0   ;;  %s2409_s18 = smov 0  }
   0x2   :  { %s2411_s19 = smov 0  }
   0x3 LB: > { %s23_s20 = sadd.s32 1, %s2362_s17  ;;  %s26_s21 = sadd.s32 1, %s2366_s18  ;;  %s2370_s19 = sphi %s2411_s19, %s14_s19   ;;  %s2366_s18 = sphi %s2409_s18, %s2769_s18   ;;  %s2362_s17 = sphi %s2407_s17, %s2768_s17   ;;  %s2358_s16 = sphi %s2405_s16, %s2767_s16   ;;  %s2354_s15 = sphi %s2403_s15, %s2766_s15  }
   0x4   : > { %p24_p0 = scmp.ge.s32.totalorder %s23_s20, 2  ;;  %p1972_p1 = scmp.ge.s32.totalorder %s2370_s19, 1 }
   0x5   : > { %p202_p2 = scmp.lt.s32.totalorder %s2370_s19, 9 }
   0x6   : > { %s2771_s20 = smov (%p24_p0, %s23_s20), 0  ;;  %s2773_s21 = smov (!%p24_p0, %s26_s21), %s2366_s18 }
   0x7   : > { %p203_p3 = pnand %p1972_p1, %p202_p2  ;;  %p28_p4 = scmp.ge.s32.totalorder %s2773_s21, 4 }
   0x8   : > { %p245_p5 = scmp.lt.s32.totalorder (!%p203_p3), %s2358_s16, 3  ;;  %p247_p6 = scmp.lt.s32.totalorder (!%p203_p3), %s2354_s15, 2  ;;  %v2372_v0 = vmov (!%p203_p3), 0.0   ;;  %vm2373_vm0 = vmmov (!%p203_p3), 0   ;;  %vm284_vm1 = vcmask (!%p203_p3), 1041408   ;;  %vm280_vm2 = vcmask (!%p203_p3), 31744  }
   0x9   : > { %s2775_s21 = smov (%p28_p4, %s2773_s21), 0  ;;  %206 = sbr.rel (%p203_p3) target bundleno = 466 (0x1d2), region = 36 }
   0xa   : > { %2122 = vmatprep.subr.bf16.mxu0 (!%p203_p3), %v2372_v0  ;;  %2128 = vmatprep.subr.bf16.mxu1 (!%p203_p3), %v2372_v0  ;;  %s2374_s30 = smov (!%p203_p3), 127   ;;  %v1979_v8 = vld [vmem:[%s2763_s2 + $0x4] sm:$0xf] (!%p203_p3)  ;;  %v274_v10 = vld [vmem:[%s2763_s2] sm:$0xf] (!%p203_p3)  ;;  %s2375_s9 = smov (!%p203_p3), 125  }
   0xb   : > { %2124 = vmatprep.mubr.msk.bf16.mxu0 (!%p203_p3), %vm2373_vm0, %v2372_v0  ;;  %2130 = vmatprep.mubr.msk.bf16.mxu1 (!%p203_p3), %vm2373_vm0, %v2372_v0  ;;  %s254_s10 = sadd.s32 (!%p203_p3), 1, %s2354_s15  ;;  %v1986_v15 = vld [vmem:[%s2763_s2 + $0xc] sm:$0xf] (!%p203_p3)  ;;  %s2376_s13 = smov (!%p203_p3), 124   ;;  %v1846_v28 = vld [vmem:[%s2764_s3] sm:$0xff] (!%p203_p3)  ;;  %v2377_v29 = vmov (!%p203_p3), 0  }
   0xc   : > { %p257_p7 = scmp.lt.s32.totalorder (!%p203_p3), %s254_s10, 2  ;;  %2331 = vset.pattern.permute.xlu0 (!%p203_p3), %v2377_v29  ;;  %vm390_vm3 = vcmask (!%p203_p3), 1039360   ;;  %v1983_v38 = vld [vmem:[%s2763_s2 + $0x8] sm:$0xf] (!%p203_p3)  ;;  %v1992_v43 = vld [vmem:[%s2763_s2 + $0x14] sm:$0xf] (!%p203_p3) }
   0xd   : > { %vm621_vm4 = vcmask (!%p203_p3), 1022976   ;;  %v1989_v48 = vld [vmem:[%s2763_s2 + $0x10] sm:$0xf] (!%p203_p3)  ;;  %v1999_v54 = vld [vmem:[%s2763_s2 + $0x1c] sm:$0xf] (!%p203_p3)  ;;  %vm750_vm5 = vcmask (!%p203_p3), 1014784  }
   0xe   : > { %v1996_v59 = vld [vmem:[%s2763_s2 + $0x18] sm:$0xf] (!%p203_p3)  ;;  %v2006_v62 = vld [vmem:[%s2763_s2 + $0x24] sm:$0xf] (!%p203_p3)  ;;  %p267_p8 = scmp.lt.s32.totalorder (!%p203_p3), %s2354_s15, 1 }
  0x10   : > { %s2777_s16 = smov (!%p245_p5, %s2358_s16), 3  ;;  %s2779_s10 = smov (!%p257_p7, %s254_s10), 2 }
  0x11   : > { %s248_s22 = scalar_select %p247_p6, %s2354_s15, 2 }
  0x12   : > { %s2284_s23 = smul.u32 48, %s2777_s16  ;;  %s1975_s14 = sshll.u32 %s2779_s10, 4 }
  0x13   : > { %s1973_s24 = sshll.u32 %s248_s22, 4  ;;  %s2781_s15 = smov (!%p267_p8, %s2354_s15), 1 }
  0x14   : > { %s251_s25 = sadd.s32 %s2284_s23, %s1973_s24  ;;  %s261_s22 = sadd.s32 %s2284_s23, %s1975_s14 }
  0x15   : > { %s1974_s26 = sshll.u32 %s251_s25, 1  ;;  %s1976_s24 = sshll.u32 %s261_s22, 1 }
  0x16   : > { %s2451_s29 = scalar_lea.vmem %s2761_s0, %s1974_s26  ;;  %s2508_s27 = scalar_lea.vmem %s2762_s1, %s1976_s24 }
  0x17   : > { %v1984_v1 = vld.sshfl [vmem:[%s2451_s29] sm:$0x33 pattern:$0x76325410]  ;;  %v1980_v4 = vld [vmem:[%s2451_s29 + $0x4] sm:$0x3] }
  0x18   : > { %386 = vrot.lane.b32.xlu0 %v1984_v1, %s2374_s30  ;;  %v385_v2 = vcombine.high %v1984_v1, %v1984_v1  ;;  %v1994_v3 = vld.sshfl [vmem:[%s2451_s29 + $0x8] sm:$0x33 pattern:$0x76325410]  ;;  %v286_v6 = vsel %vm284_vm1, %v1980_v4, 0  ;;  %s1977_s22 = sshll.u32 %s2777_s16, 1 }
  0x19   : > { %553 = vrot.lane.b32.xlu1 %v1994_v3, %s2374_s30  ;;  %v552_v5 = vcombine.high %v1994_v3, %v1994_v3  ;;  %2123 = vmatpush3.bf16.msra.mxu0 %v286_v6  ;;  %v275_v7 = vld [vmem:[%s2451_s29] sm:$0x3]  ;;  %v1987_v11 = vld [vmem:[%s2451_s29 + $0x8] sm:$0x3]  ;;  %v1990_v35 = vld [vmem:[%s2451_s29 + $0xc] sm:$0x3]  ;;  %s270_s24 = sadd.s32 %s1977_s22, %s2781_s15 }
  0x1a   : > { %v332_v9 = vsel %vm284_vm1, %v275_v7, 0  ;;  %2134 = vmatprep.subr.bf16.mxu0 %v2372_v0  ;;  %v447_v12 = vsel %vm284_vm1, %v1987_v11, 0  ;;  %v2001_v13 = vld.sshfl [vmem:[%s2451_s29 + $0x4] sm:$0x33 pattern:$0x76325410] }
  0x1b   : > { %2129 = vmatpush3.bf16.msra.mxu1 %v332_v9  ;;  %v681_v14 = vcombine.high %v2001_v13, %v2001_v13  ;;  %v2014_v16 = vld.sshfl [vmem:[%s2451_s29 + $0x10] sm:$0x33 pattern:$0x76325410]  ;;  %v498_v40 = vsel %vm284_vm1, %v1990_v35, 0  ;;  %s1978_s25 = sshll.u32 %s270_s24, 2 }
  0x1c   : > { %388 = vrot.lane.b32.xlu0 %v385_v2, %s2374_s30  ;;  %2125 = vmatmul.mubr.msk.bf16.vlgmr.msra.gmra.mrb[0].mxu0 %vm280_vm2, %v1979_v8  ;;  %v912_v17 = vcombine.high %v2014_v16, %v2014_v16  ;;  %v2024_v18 = vld.sshfl [vmem:[%s2451_s29 + $0x18] sm:$0x33 pattern:$0x76325410]  ;;  %v2007_v50 = vld [vmem:[%s2451_s29 + $0x10] sm:$0x3]  ;;  %s272_s28 = scalar_lea.vmem %s2765_s4, %s1978_s25 }
  0x1d   : > { %555 = vrot.lane.b32.xlu1 %v552_v5, %s2374_s30  ;;  %2140 = vmatprep.subr.bf16.mxu1 %v2372_v0  ;;  %v1078_v19 = vcombine.high %v2024_v18, %v2024_v18  ;;  %v2032_v20 = vld.sshfl [vmem:[%s2451_s29 + $0x14] sm:$0x33 pattern:$0x76325410]  ;;  %v807_v55 = vsel %vm284_vm1, %v2007_v50, 0 }
  0x1e   : > { %2136 = vmatprep.mubr.msk.bf16.mxu0 %vm2373_vm0, %v2372_v0  ;;  %2131 = vmatmul.mubr.msk.bf16.vlgmr.msra.gmra.mrb[0].mxu1 %vm280_vm2, %v274_v10  ;;  %v1206_v21 = vcombine.high %v2032_v20, %v2032_v20  ;;  %v2044_v22 = vld.sshfl [vmem:[%s2508_s27] sm:$0x33 pattern:$0x76325410]  ;;  %v2010_v3 = vld [vmem:[%s2451_s29 + $0x14] sm:$0x3] }
  0x1f   : > { %2141 = vmatpush3.bf16.msra.mxu1 %v447_v12  ;;  %2142 = vmatprep.mubr.msk.bf16.mxu1 %vm2373_vm0, %v2372_v0  ;;  %v1435_v23 = vcombine.high %v2044_v22, %v2044_v22  ;;  %v2054_v24 = vld.sshfl [vmem:[%s2508_s27 + $0x8] sm:$0x33 pattern:$0x76325410]  ;;  %v2003_v4 = vld [vmem:[%s2763_s2 + $0x20] sm:$0xf] }
  0x20   : > { %617 = vrot.lane.b32.xlu0 %v1984_v1, %s2375_s9  ;;  %2152 = vmatprep.subr.bf16.mxu1 %v2372_v0  ;;  %v1601_v25 = vcombine.high %v2054_v24, %v2054_v24  ;;  %v2061_v26 = vld.sshfl [vmem:[%s2508_s27 + $0x4] sm:$0x33 pattern:$0x76325410]  ;;  %v2020_v5 = vld [vmem:[%s2451_s29 + $0x1c] sm:$0x3] }
  0x21   : > { %619 = vrot.lane.b32.xlu1 %v385_v2, %s2375_s9  ;;  %v1729_v27 = vcombine.high %v2061_v26, %v2061_v26  ;;  %v858_v6 = vsel %vm284_vm1, %v2010_v3, 0  ;;  %v2012_v9 = vld [vmem:[%s2763_s2 + $0x2c] sm:$0xf]  ;;  %v1024_v10 = vsel %vm284_vm1, %v2020_v5, 0  ;;  %v2017_v11 = vld [vmem:[%s2451_s29 + $0x18] sm:$0x3] }
  0x22   : > { %v2041_v29 = vld [vmem:[%s2508_s27 + $0x4] sm:$0x3]  ;;  %v1325_v35 = vld [vmem:[%s2508_s27] sm:$0x3] }
  0x23   : > { %v2056_v3 = vld [vmem:[%s2763_s2 + $0x60] sm:$0xf] }
  0x24   : > { %682 = vrot.lane.b32.xlu0 %v2001_v13, %s2375_s9 }
  0x25   : > { %684 = vrot.lane.b32.xlu1 %v681_v14, %s2375_s9  ;;  %v2009_v14 = vld [vmem:[%s2763_s2 + $0x28] sm:$0xf] }
  0x26   : > { %2143 = vmatmul.mubr.msk.bf16.vlgmr.msra.gmra.mrb[4].mxu1 %vm280_vm2, %v1986_v15 }
  0x27   : > { %2154 = vmatprep.mubr.msk.bf16.mxu1 %vm2373_vm0, %v2372_v0 }
  0x28   : > { %746 = vrot.lane.b32.xlu0 %v1984_v1, %s2376_s13 }
  0x29   : > { %748 = vrot.lane.b32.xlu1 %v385_v2, %s2376_s13 }
  0x2c   : > { %913 = vrot.lane.b32.xlu0 %v2014_v16, %s2374_s30 }
  0x2d   : > { %915 = vrot.lane.b32.xlu1 %v912_v17, %s2374_s30 }
  0x30   : > { %1079 = vrot.lane.b32.xlu0 %v2024_v18, %s2374_s30 }
  0x31   : > { %1081 = vrot.lane.b32.xlu1 %v1078_v19, %s2374_s30 }
  0x34   : > { %1143 = vrot.lane.b32.xlu0 %v2014_v16, %s2375_s9 }
  0x35   : > { %1145 = vrot.lane.b32.xlu1 %v912_v17, %s2375_s9 }
  0x38   : > { %1207 = vrot.lane.b32.xlu0 %v2032_v20, %s2375_s9 }
  0x39   : > { %1209 = vrot.lane.b32.xlu1 %v1206_v21, %s2375_s9 }
  0x3c   : > { %1271 = vrot.lane.b32.xlu0 %v2014_v16, %s2376_s13  ;;  %v973_v16 = vsel %vm284_vm1, %v2017_v11, 0 }
  0x3d   : > { %1273 = vrot.lane.b32.xlu1 %v912_v17, %s2376_s13  ;;  %v2019_v17 = vld [vmem:[%s2763_s2 + $0x34] sm:$0xf] }
  0x40   : > { %1436 = vrot.lane.b32.xlu0 %v2044_v22, %s2374_s30 }
  0x41   : > { %1438 = vrot.lane.b32.xlu1 %v1435_v23, %s2374_s30 }
  0x44   : > { %1602 = vrot.lane.b32.xlu0 %v2054_v24, %s2374_s30 }
  0x45   : > { %1604 = vrot.lane.b32.xlu1 %v1601_v25, %s2374_s30  ;;  %v2026_v25 = vld [vmem:[%s2763_s2 + $0x3c] sm:$0xf] }
  0x48   : > { %1666 = vrot.lane.b32.xlu0 %v2044_v22, %s2375_s9 }
  0x49   : > { %1668 = vrot.lane.b32.xlu1 %v1435_v23, %s2375_s9 }
  0x4c   : > { %1730 = vrot.lane.b32.xlu0 %v2061_v26, %s2375_s9 }
  0x4d   : > { %1732 = vrot.lane.b32.xlu1 %v1729_v27, %s2375_s9 }
  0x50   : > { %1794 = vrot.lane.b32.xlu0 %v2044_v22, %s2376_s13  ;;  %v2016_v22 = vld [vmem:[%s2763_s2 + $0x30] sm:$0xf] }
  0x51   : > { %1796 = vrot.lane.b32.xlu1 %v1435_v23, %s2376_s13 }
  0x54   : > { %1849 = vperm.xlu0 %2331, %v1846_v28   ;;  %v2022_v28 = vld [vmem:[%s2763_s2 + $0x38] sm:$0xf] }
  0x8a   : > { %v387_v30 = vpop.permute.xlu0 %386 }
  0x8b   : > { %v554_v31 = vpop.permute.xlu1 %553 }
  0x8e   : > { %v389_v32 = vpop.permute.xlu0 %388 }
  0x8f   : > { %v391_v33 = vsel %vm390_vm3, %v387_v30, %v389_v32  ;;  %v556_v34 = vpop.permute.xlu1 %555  ;;  %v1381_v32 = vsel %vm284_vm1, %v2041_v29, 0 }
  0x90   : > { %v396_v36 = vsel %vm284_vm1, %v391_v33, 0  ;;  %v557_v37 = vsel %vm390_vm3, %v554_v31, %v556_v34  ;;  %v2034_v31 = vld [vmem:[%s2763_s2 + $0x44] sm:$0xf] }
  0x91   : > { %2135 = vmatpush3.bf16.msra.mxu0 %v396_v36  ;;  %v562_v39 = vsel %vm284_vm1, %v557_v37, 0  ;;  %v2030_v36 = vld [vmem:[%s2763_s2 + $0x40] sm:$0xf]  ;;  %v2047_v37 = vld [vmem:[%s2508_s27 + $0x8] sm:$0x3] }
  0x92   : > { %2146 = vmatprep.subr.bf16.mxu0 %v2372_v0  ;;  %2153 = vmatpush3.bf16.msra.mxu1 %v562_v39  ;;  %v618_v41 = vpop.permute.xlu0 %617 }
  0x93   : > { %v620_v42 = vpop.permute.xlu1 %619  ;;  %2164 = vmatprep.subr.bf16.mxu1 %v2372_v0 }
  0x94   : > { %2137 = vmatmul.mubr.msk.bf16.vlgmr.msra.gmra.mrb[4].mxu0 %vm280_vm2, %v1983_v38  ;;  %v622_v45 = vsel %vm621_vm4, %v618_v41, %v620_v42  ;;  %v1330_v38 = vsel %vm284_vm1, %v1325_v35, 0  ;;  %v2040_v41 = vld [vmem:[%s2763_s2 + $0x4c] sm:$0xf]  ;;  %v1496_v42 = vsel %vm284_vm1, %v2047_v37, 0 }
  0x95   : > { %2147 = vmatpush3.bf16.msra.mxu0 %v498_v40  ;;  %2148 = vmatprep.mubr.msk.bf16.mxu0 %vm2373_vm0, %v2372_v0  ;;  %v627_v51 = vsel %vm284_vm1, %v622_v45, 0 }
  0x96   : > { %2155 = vmatmul.mubr.msk.bf16.vlgmr.msra.gmra.mrb[8].mxu1 %vm280_vm2, %v1992_v43  ;;  %v683_v44 = vpop.permute.xlu0 %682  ;;  %2158 = vmatprep.subr.bf16.mxu0 %v2372_v0 }
  0x97   : > { %v685_v46 = vpop.permute.xlu1 %684  ;;  %2166 = vmatprep.mubr.msk.bf16.mxu1 %vm2373_vm0, %v2372_v0 }
  0x98   : > { %v686_v47 = vsel %vm621_vm4, %v683_v44, %v685_v46  ;;  %v2038_v46 = vld [vmem:[%s2763_s2 + $0x48] sm:$0xf] }
  0x99   : > { %v691_v49 = vsel %vm284_vm1, %v686_v47, 0 }
  0x9a   : > { %2165 = vmatpush3.bf16.msra.mxu1 %v691_v49  ;;  %v747_v52 = vpop.permute.xlu0 %746  ;;  %v2046_v49 = vld [vmem:[%s2763_s2 + $0x54] sm:$0xf] }
  0x9b   : > { %v749_v53 = vpop.permute.xlu1 %748  ;;  %2176 = vmatprep.subr.bf16.mxu1 %v2372_v0 }
  0x9c   : > { %2149 = vmatmul.mubr.msk.bf16.vlgmr.msra.gmra.mrb[8].mxu0 %vm280_vm2, %v1989_v48  ;;  %v751_v57 = vsel %vm750_vm5, %v747_v52, %v749_v53  ;;  %v2050_v53 = vld [vmem:[%s2508_s27 + $0xc] sm:$0x3] }
  0x9d   : > { %2159 = vmatpush3.bf16.msra.mxu0 %v627_v51  ;;  %2160 = vmatprep.mubr.msk.bf16.mxu0 %vm2373_vm0, %v2372_v0  ;;  %v756_v61 = vsel %vm284_vm1, %v751_v57, 0  ;;  %v2052_v57 = vld [vmem:[%s2763_s2 + $0x5c] sm:$0xf] }
  0x9e   : > { %2167 = vmatmul.mubr.msk.bf16.vlgmr.msra.gmra.mrb[12].mxu1 %vm280_vm2, %v1999_v54  ;;  %2170 = vmatprep.subr.bf16.mxu0 %v2372_v0  ;;  %v914_v56 = vpop.permute.xlu0 %913  ;;  %v2043_v54 = vld [vmem:[%s2763_s2 + $0x50] sm:$0xf] }
  0x9f   : > { %2177 = vmatpush3.bf16.msra.mxu1 %v807_v55  ;;  %2178 = vmatprep.mubr.msk.bf16.mxu1 %vm2373_vm0, %v2372_v0  ;;  %v916_v58 = vpop.permute.xlu1 %915 }
  0xa0   : > { %2188 = vmatprep.subr.bf16.mxu1 %v2372_v0  ;;  %v917_v60 = vsel %vm390_vm3, %v914_v56, %v916_v58  ;;  %v1547_v56 = vsel %vm284_vm1, %v2050_v53, 0 }
  0xa1   : > { %v922_v63 = vsel %vm284_vm1, %v917_v60, 0  ;;  %v2049_v60 = vld [vmem:[%s2763_s2 + $0x58] sm:$0xf] }
  0xa2   : > { %v1080_v2 = vpop.permute.xlu0 %1079 }
  0xa3   : > { %v1082_v1 = vpop.permute.xlu1 %1081 }
  0xa4   : > { %2161 = vmatmul.mubr.msk.bf16.vlgmr.msra.gmra.mrb[12].mxu0 %vm280_vm2, %v1996_v59  ;;  %v1083_v21 = vsel %vm390_vm3, %v1080_v2, %v1082_v1 }
  0xa5   : > { %2171 = vmatpush3.bf16.msra.mxu0 %v756_v61  ;;  %2172 = vmatprep.mubr.msk.bf16.mxu0 %vm2373_vm0, %v2372_v0  ;;  %v1088_v24 = vsel %vm284_vm1, %v1083_v21, 0 }
  0xa6   : > { %2179 = vmatmul.mubr.msk.bf16.vlgmr.msra.gmra.mrb[16].mxu1 %vm280_vm2, %v2006_v62  ;;  %2182 = vmatprep.subr.bf16.mxu0 %v2372_v0  ;;  %v1144_v8 = vpop.permute.xlu0 %1143  ;;  %v2059_v62 = vld [vmem:[%s2763_s2 + $0x64] sm:$0xf] }
  0xa7   : > { %2189 = vmatpush3.bf16.msra.mxu1 %v922_v63  ;;  %2190 = vmatprep.mubr.msk.bf16.mxu1 %vm2373_vm0, %v2372_v0  ;;  %v1146_v7 = vpop.permute.xlu1 %1145 }
  0xa8   : > { %2200 = vmatprep.subr.bf16.mxu1 %v2372_v0  ;;  %v1147_v15 = vsel %vm621_vm4, %v1144_v8, %v1146_v7 }
  0xa9   : > { %v1152_v18 = vsel %vm284_vm1, %v1147_v15, 0 }
  0xaa   : > { %v1208_v13 = vpop.permute.xlu0 %1207 }
  0xab   : > { %v1210_v12 = vpop.permute.xlu1 %1209 }
  0xac   : > { %2173 = vmatmul.mubr.msk.bf16.vlgmr.msra.gmra.mrb[16].mxu0 %vm280_vm2, %v2003_v4  ;;  %v1211_v27 = vsel %vm621_vm4, %v1208_v13, %v1210_v12 }
  0xad   : > { %2183 = vmatpush3.bf16.msra.mxu0 %v858_v6  ;;  %2184 = vmatprep.mubr.msk.bf16.mxu0 %vm2373_vm0, %v2372_v0  ;;  %v1216_v30 = vsel %vm284_vm1, %v1211_v27, 0  ;;  %v2063_v6 = vld [vmem:[%s2763_s2 + $0x68] sm:$0xf] }
  0xae   : > { %2191 = vmatmul.mubr.msk.bf16.vlgmr.msra.gmra.mrb[20].mxu1 %vm280_vm2, %v2012_v9  ;;  %2194 = vmatprep.subr.bf16.mxu0 %v2372_v0  ;;  %v1272_v20 = vpop.permute.xlu0 %1271 }
  0xaf   : > { %2201 = vmatpush3.bf16.msra.mxu1 %v1024_v10  ;;  %2202 = vmatprep.mubr.msk.bf16.mxu1 %vm2373_vm0, %v2372_v0  ;;  %v1274_v19 = vpop.permute.xlu1 %1273 }
  0xb0   : > { %2212 = vmatprep.subr.bf16.mxu1 %v2372_v0  ;;  %v1275_v23 = vsel %vm750_vm5, %v1272_v20, %v1274_v19 }
  0xb1   : > { %v1280_v26 = vsel %vm284_vm1, %v1275_v23, 0 }
  0xb2   : > { %v1437_v34 = vpop.permute.xlu0 %1436 }
  0xb3   : > { %v1439_v33 = vpop.permute.xlu1 %1438 }
  0xb4   : > { %2185 = vmatmul.mubr.msk.bf16.vlgmr.msra.gmra.mrb[20].mxu0 %vm280_vm2, %v2009_v14  ;;  %v1440_v43 = vsel %vm390_vm3, %v1437_v34, %v1439_v33 }
  0xb5   : > { %2195 = vmatpush3.bf16.msra.mxu0 %v973_v16  ;;  %2196 = vmatprep.mubr.msk.bf16.mxu0 %vm2373_vm0, %v2372_v0  ;;  %v1445_v48 = vsel %vm284_vm1, %v1440_v43, 0 }
  0xb6   : > { %2203 = vmatmul.mubr.msk.bf16.vlgmr.msra.gmra.mrb[24].mxu1 %vm280_vm2, %v2019_v17  ;;  %2206 = vmatprep.subr.bf16.mxu0 %v2372_v0  ;;  %v1603_v40 = vpop.permute.xlu0 %1602 }
  0xb7   : > { %2213 = vmatpush3.bf16.msra.mxu1 %v1152_v18  ;;  %2214 = vmatprep.mubr.msk.bf16.mxu1 %vm2373_vm0, %v2372_v0  ;;  %v1605_v39 = vpop.permute.xlu1 %1604 }
  0xb8   : > { %2224 = vmatprep.subr.bf16.mxu1 %v2372_v0  ;;  %v1606_v47 = vsel %vm390_vm3, %v1603_v40, %v1605_v39 }
  0xb9   : > { %v1611_v50 = vsel %vm284_vm1, %v1606_v47, 0 }
  0xba   : > { %v1667_v45 = vpop.permute.xlu0 %1666 }
  0xbb   : > { %v1669_v44 = vpop.permute.xlu1 %1668 }
  0xbc   : > { %2197 = vmatmul.mubr.msk.bf16.vlgmr.msra.gmra.mrb[24].mxu0 %vm280_vm2, %v2016_v22  ;;  %v1670_v59 = vsel %vm621_vm4, %v1667_v45, %v1669_v44 }
  0xbd   : > { %2207 = vmatpush3.bf16.msra.mxu0 %v1088_v24  ;;  %2208 = vmatprep.mubr.msk.bf16.mxu0 %vm2373_vm0, %v2372_v0  ;;  %v1675_v61 = vsel %vm284_vm1, %v1670_v59, 0 }
  0xbe   : > { %2215 = vmatmul.mubr.msk.bf16.vlgmr.msra.gmra.mrb[28].mxu1 %vm280_vm2, %v2026_v25  ;;  %2218 = vmatprep.subr.bf16.mxu0 %v2372_v0  ;;  %v1731_v52 = vpop.permute.xlu0 %1730 }
  0xbf   : > { %2225 = vmatpush3.bf16.msra.mxu1 %v1280_v26  ;;  %2226 = vmatprep.mubr.msk.bf16.mxu1 %vm2373_vm0, %v2372_v0  ;;  %v1733_v51 = vpop.permute.xlu1 %1732 }
  0xc0   : > { %2236 = vmatprep.subr.bf16.mxu1 %v2372_v0  ;;  %v1734_v55 = vsel %vm621_vm4, %v1731_v52, %v1733_v51 }
  0xc1   : > { %v1739_v58 = vsel %vm284_vm1, %v1734_v55, 0 }
  0xc2   : > { %v1795_v1 = vpop.permute.xlu0 %1794 }
  0xc3   : > { %v1797_v63 = vpop.permute.xlu1 %1796 }
  0xc4   : > { %2209 = vmatmul.mubr.msk.bf16.vlgmr.msra.gmra.mrb[28].mxu0 %vm280_vm2, %v2022_v28  ;;  %v1798_v2 = vsel %vm750_vm5, %v1795_v1, %v1797_v63 }
  0xc5   : > { %2219 = vmatpush3.bf16.msra.mxu0 %v1216_v30  ;;  %2220 = vmatprep.mubr.msk.bf16.mxu0 %vm2373_vm0, %v2372_v0  ;;  %v1803_v4 = vsel %vm284_vm1, %v1798_v2, 0 }
  0xc6   : > { %2227 = vmatmul.mubr.msk.bf16.vlgmr.msra.gmra.mrb[32].mxu1 %vm280_vm2, %v2034_v31  ;;  %2230 = vmatprep.subr.bf16.mxu0 %v2372_v0 }
  0xc7   : > { %2237 = vmatpush3.bf16.msra.mxu1 %v1381_v32  ;;  %2238 = vmatprep.mubr.msk.bf16.mxu1 %vm2373_vm0, %v2372_v0 }
  0xc8   : > { %2248 = vmatprep.subr.bf16.mxu1 %v2372_v0 }
  0xcc   : > { %2221 = vmatmul.mubr.msk.bf16.vlgmr.msra.gmra.mrb[32].mxu0 %vm280_vm2, %v2030_v36 }
  0xcd   : > { %2231 = vmatpush3.bf16.msra.mxu0 %v1330_v38  ;;  %2232 = vmatprep.mubr.msk.bf16.mxu0 %vm2373_vm0, %v2372_v0 }
  0xce   : > { %2239 = vmatmul.mubr.msk.bf16.vlgmr.msra.gmra.mrb[36].mxu1 %vm280_vm2, %v2040_v41  ;;  %2242 = vmatprep.subr.bf16.mxu0 %v2372_v0 }
  0xcf   : > { %2249 = vmatpush3.bf16.msra.mxu1 %v1496_v42  ;;  %2250 = vmatprep.mubr.msk.bf16.mxu1 %vm2373_vm0, %v2372_v0 }
  0xd0   : > { %2260 = vmatprep.subr.bf16.mxu1 %v2372_v0 }
  0xd4   : > { %2233 = vmatmul.mubr.msk.bf16.vlgmr.msra.gmra.mrb[36].mxu0 %vm280_vm2, %v2038_v46 }
  0xd5   : > { %2243 = vmatpush3.bf16.msra.mxu0 %v1445_v48  ;;  %2244 = vmatprep.mubr.msk.bf16.mxu0 %vm2373_vm0, %v2372_v0 }
  0xd6   : > { %2251 = vmatmul.mubr.msk.bf16.vlgmr.msra.gmra.mrb[40].mxu1 %vm280_vm2, %v2046_v49  ;;  %2254 = vmatprep.subr.bf16.mxu0 %v2372_v0 }
  0xd7   : > { %2261 = vmatpush3.bf16.msra.mxu1 %v1611_v50  ;;  %2262 = vmatprep.mubr.msk.bf16.mxu1 %vm2373_vm0, %v2372_v0 }
  0xd8   : > { %2272 = vmatprep.subr.bf16.mxu1 %v2372_v0 }
  0xdc   : > { %2245 = vmatmul.mubr.msk.bf16.vlgmr.msra.gmra.mrb[40].mxu0 %vm280_vm2, %v2043_v54 }
  0xdd   : > { %2255 = vmatpush3.bf16.msra.mxu0 %v1547_v56  ;;  %2256 = vmatprep.mubr.msk.bf16.mxu0 %vm2373_vm0, %v2372_v0 }
  0xde   : > { %2263 = vmatmul.mubr.msk.bf16.vlgmr.msra.gmra.mrb[44].mxu1 %vm280_vm2, %v2052_v57  ;;  %2266 = vmatprep.subr.bf16.mxu0 %v2372_v0 }
  0xdf   : > { %2273 = vmatpush3.bf16.msra.mxu1 %v1739_v58  ;;  %2274 = vmatprep.mubr.msk.bf16.mxu1 %vm2373_vm0, %v2372_v0 }
  0xe4   : > { %2257 = vmatmul.mubr.msk.bf16.vlgmr.msra.gmra.mrb[44].mxu0 %vm280_vm2, %v2049_v60 }
  0xe5   : > { %2267 = vmatpush3.bf16.msra.mxu0 %v1675_v61  ;;  %2268 = vmatprep.mubr.msk.bf16.mxu0 %vm2373_vm0, %v2372_v0 }
  0xe6   : > { %2275 = vmatmul.mubr.msk.bf16.vlgmr.msra.gmra.mrb[48].mxu1 %vm280_vm2, %v2059_v62  ;;  %2278 = vmatprep.subr.bf16.mxu0 %v2372_v0 }
  0xec   : > { %2269 = vmatmul.mubr.msk.bf16.vlgmr.msra.gmra.mrb[48].mxu0 %vm280_vm2, %v2056_v3 }
  0xed   : > { %2279 = vmatpush3.bf16.msra.mxu0 %v1803_v4  ;;  %2280 = vmatprep.mubr.msk.bf16.mxu0 %vm2373_vm0, %v2372_v0 }
  0xef   : > { %v322_v5 = vpop.f32.mrb[0].mxu0 }
  0xf0   : > { %v2126_v7 = vpop.f32.mrb[1].mxu0 }
  0xf1   : > { %v325_v8 = vpop.f32.mrb[2].mxu0  ;;  %v368_v9 = vpop.f32.mrb[0].mxu1 }
  0xf2   : > { %v2127_v10 = vpop.f32.mrb[3].mxu0  ;;  %v369_v11 = vadd.f32 %v368_v9, %v322_v5  ;;  %v2132_v12 = vpop.f32.mrb[1].mxu1 }
  0xf3   : > { %v371_v13 = vpop.f32.mrb[2].mxu1 }
  0xf4   : > { %2281 = vmatmul.mubr.msk.bf16.vlgmr.msra.gmra.mrb[52].mxu0 %vm280_vm2, %v2063_v6  ;;  %v2133_v14 = vpop.f32.mrb[3].mxu1 }
  0xf9   : > { %v483_v15 = vpop.f32.mrb[4].mxu1 }
  0xfa   : > { %v2144_v16 = vpop.f32.mrb[5].mxu1 }
  0xfb   : > { %v486_v17 = vpop.f32.mrb[6].mxu1 }
  0xfc   : > { %v2145_v18 = vpop.f32.mrb[7].mxu1 }
 0x167   : > { %v432_v0 = vpop.f32.mrb[4].mxu0 }
 0x168   : > { %v438_v19 = vadd.f32 %v432_v0, %v369_v11  ;;  %v2138_v20 = vpop.f32.mrb[5].mxu0 }
 0x169   : > { %v435_v21 = vpop.f32.mrb[6].mxu0  ;;  %v598_v22 = vpop.f32.mrb[8].mxu1 }
 0x16a   : > { %v489_v23 = vadd.f32 %v483_v15, %v438_v19  ;;  %v2139_v24 = vpop.f32.mrb[7].mxu0  ;;  %v2156_v25 = vpop.f32.mrb[9].mxu1 }
 0x16b   : > { %v601_v26 = vpop.f32.mrb[10].mxu1 }
 0x16c   : > { %v2157_v27 = vpop.f32.mrb[11].mxu1 }
 0x16f   : > { %v534_v28 = vpop.f32.mrb[8].mxu0 }
 0x170   : > { %v540_v29 = vadd.f32 %v534_v28, %v489_v23  ;;  %v2150_v30 = vpop.f32.mrb[9].mxu0 }
 0x171   : > { %v537_v31 = vpop.f32.mrb[10].mxu0  ;;  %v727_v32 = vpop.f32.mrb[12].mxu1 }
 0x172   : > { %v604_v33 = vadd.f32 %v598_v22, %v540_v29  ;;  %v2151_v34 = vpop.f32.mrb[11].mxu0  ;;  %v2168_v35 = vpop.f32.mrb[13].mxu1 }
 0x173   : > { %v730_v36 = vpop.f32.mrb[14].mxu1 }
 0x174   : > { %v2169_v37 = vpop.f32.mrb[15].mxu1 }
 0x177   : > { %v663_v38 = vpop.f32.mrb[12].mxu0 }
 0x178   : > { %v669_v39 = vadd.f32 %v663_v38, %v604_v33  ;;  %v2162_v40 = vpop.f32.mrb[13].mxu0 }
 0x179   : > { %v666_v41 = vpop.f32.mrb[14].mxu0  ;;  %v843_v42 = vpop.f32.mrb[16].mxu1 }
 0x17a   : > { %v733_v43 = vadd.f32 %v727_v32, %v669_v39  ;;  %v2163_v44 = vpop.f32.mrb[15].mxu0  ;;  %v2180_v45 = vpop.f32.mrb[17].mxu1 }
 0x17b   : > { %v846_v46 = vpop.f32.mrb[18].mxu1 }
 0x17c   : > { %v2181_v47 = vpop.f32.mrb[19].mxu1 }
 0x17f   : > { %v792_v48 = vpop.f32.mrb[16].mxu0 }
 0x180   : > { %v798_v49 = vadd.f32 %v792_v48, %v733_v43  ;;  %v2174_v50 = vpop.f32.mrb[17].mxu0 }
 0x181   : > { %v795_v51 = vpop.f32.mrb[18].mxu0  ;;  %v958_v52 = vpop.f32.mrb[20].mxu1 }
 0x182   : > { %v849_v53 = vadd.f32 %v843_v42, %v798_v49  ;;  %v2175_v54 = vpop.f32.mrb[19].mxu0  ;;  %v2192_v55 = vpop.f32.mrb[21].mxu1 }
 0x183   : > { %v961_v56 = vpop.f32.mrb[22].mxu1 }
 0x184   : > { %v2193_v57 = vpop.f32.mrb[23].mxu1 }
 0x187   : > { %v894_v58 = vpop.f32.mrb[20].mxu0 }
 0x188   : > { %v900_v59 = vadd.f32 %v894_v58, %v849_v53  ;;  %v2186_v60 = vpop.f32.mrb[21].mxu0 }
 0x189   : > { %v897_v61 = vpop.f32.mrb[22].mxu0  ;;  %v1060_v62 = vpop.f32.mrb[24].mxu1 }
 0x18a   : > { %v964_v63 = vadd.f32 %v958_v52, %v900_v59  ;;  %v2187_v1 = vpop.f32.mrb[23].mxu0  ;;  %v2204_v2 = vpop.f32.mrb[25].mxu1 }
 0x18b   : > { %v1063_v3 = vpop.f32.mrb[26].mxu1 }
 0x18c   : > { %v2205_v4 = vpop.f32.mrb[27].mxu1 }
 0x18f   : > { %v1009_v5 = vpop.f32.mrb[24].mxu0 }
 0x190   : > { %v1015_v6 = vadd.f32 %v1009_v5, %v964_v63  ;;  %v2198_v7 = vpop.f32.mrb[25].mxu0 }
 0x191   : > { %v1012_v8 = vpop.f32.mrb[26].mxu0  ;;  %v1188_v9 = vpop.f32.mrb[28].mxu1 }
 0x192   : > { %v1066_v10 = vadd.f32 %v1060_v62, %v1015_v6  ;;  %v2199_v11 = vpop.f32.mrb[27].mxu0  ;;  %v2216_v12 = vpop.f32.mrb[29].mxu1 }
 0x193   : > { %v1191_v13 = vpop.f32.mrb[30].mxu1  ;;  %v1850_v8 = vpop.permute.xlu0 %1849 }
 0x194   : > { %v2217_v14 = vpop.f32.mrb[31].mxu1 }
 0x197   : > { %v1124_v15 = vpop.f32.mrb[28].mxu0 }
 0x198   : > { %v1130_v16 = vadd.f32 %v1124_v15, %v1066_v10  ;;  %v2210_v17 = vpop.f32.mrb[29].mxu0 }
 0x199   : > { %v1127_v18 = vpop.f32.mrb[30].mxu0  ;;  %v1316_v0 = vpop.f32.mrb[32].mxu1 }
 0x19a   : > { %v1194_v19 = vadd.f32 %v1188_v9, %v1130_v16  ;;  %v2211_v20 = vpop.f32.mrb[31].mxu0  ;;  %v2228_v21 = vpop.f32.mrb[33].mxu1 }
 0x19b   : > { %v1319_v22 = vpop.f32.mrb[34].mxu1 }
 0x19c   : > { %v2229_v23 = vpop.f32.mrb[35].mxu1 }
 0x19f   : > { %v1252_v24 = vpop.f32.mrb[32].mxu0 }
 0x1a0   : > { %v1258_v25 = vadd.f32 %v1252_v24, %v1194_v19  ;;  %v2222_v26 = vpop.f32.mrb[33].mxu0 }
 0x1a1   : > { %v1255_v27 = vpop.f32.mrb[34].mxu0  ;;  %v1417_v28 = vpop.f32.mrb[36].mxu1 }
 0x1a2   : > { %v1322_v29 = vadd.f32 %v1316_v0, %v1258_v25  ;;  %v2223_v30 = vpop.f32.mrb[35].mxu0  ;;  %v2240_v31 = vpop.f32.mrb[37].mxu1 }
 0x1a3   : > { %v1420_v32 = vpop.f32.mrb[38].mxu1 }
 0x1a4   : > { %v2241_v33 = vpop.f32.mrb[39].mxu1 }
 0x1a7   : > { %v1366_v34 = vpop.f32.mrb[36].mxu0 }
 0x1a8   : > { %v1372_v35 = vadd.f32 %v1366_v34, %v1322_v29  ;;  %v2234_v36 = vpop.f32.mrb[37].mxu0 }
 0x1a9   : > { %v1369_v37 = vpop.f32.mrb[38].mxu0  ;;  %v1532_v38 = vpop.f32.mrb[40].mxu1 }
 0x1aa   : > { %v1423_v39 = vadd.f32 %v1417_v28, %v1372_v35  ;;  %v2235_v40 = vpop.f32.mrb[39].mxu0  ;;  %v2252_v41 = vpop.f32.mrb[41].mxu1 }
 0x1ab   : > { %v1535_v42 = vpop.f32.mrb[42].mxu1 }
 0x1ac   : > { %v2253_v43 = vpop.f32.mrb[43].mxu1 }
 0x1af   : > { %v1481_v44 = vpop.f32.mrb[40].mxu0 }
 0x1b0   : > { %v1487_v45 = vadd.f32 %v1481_v44, %v1423_v39  ;;  %v2246_v46 = vpop.f32.mrb[41].mxu0 }
 0x1b1   : > { %v1484_v47 = vpop.f32.mrb[42].mxu0  ;;  %v1647_v48 = vpop.f32.mrb[44].mxu1 }
 0x1b2   : > { %v1538_v49 = vadd.f32 %v1532_v38, %v1487_v45  ;;  %v2247_v50 = vpop.f32.mrb[43].mxu0  ;;  %v2264_v51 = vpop.f32.mrb[45].mxu1 }
 0x1b3   : > { %v1650_v52 = vpop.f32.mrb[46].mxu1 }
 0x1b4   : > { %v2265_v53 = vpop.f32.mrb[47].mxu1 }
 0x1b7   : > { %v1583_v54 = vpop.f32.mrb[44].mxu0 }
 0x1b8   : > { %v1589_v55 = vadd.f32 %v1583_v54, %v1538_v49  ;;  %v2258_v56 = vpop.f32.mrb[45].mxu0 }
 0x1b9   : > { %v1586_v57 = vpop.f32.mrb[46].mxu0  ;;  %v1775_v58 = vpop.f32.mrb[48].mxu1 }
 0x1ba   : > { %v1653_v59 = vadd.f32 %v1647_v48, %v1589_v55  ;;  %v2259_v60 = vpop.f32.mrb[47].mxu0  ;;  %v2276_v61 = vpop.f32.mrb[49].mxu1 }
 0x1bb   : > { %v1778_v62 = vpop.f32.mrb[50].mxu1 }
 0x1bc   : > { %v2277_v63 = vpop.f32.mrb[51].mxu1 }
 0x1bf   : > { %v1711_v1 = vpop.f32.mrb[48].mxu0 }
 0x1c0   : > { %v1717_v2 = vadd.f32 %v1711_v1, %v1653_v59  ;;  %v2270_v3 = vpop.f32.mrb[49].mxu0 }
 0x1c1   : > { %v1714_v4 = vpop.f32.mrb[50].mxu0 }
 0x1c2   : > { %v1781_v5 = vadd.f32 %v1775_v58, %v1717_v2  ;;  %v2271_v6 = vpop.f32.mrb[51].mxu0 }
 0x1c7   : > { %v1839_v7 = vpop.f32.mrb[52].mxu0 }
 0x1c8   : > { %v1845_v9 = vadd.f32 %v1839_v7, %v1781_v5  ;;  %v2282_v10 = vpop.f32.mrb[53].mxu0 }
 0x1c9   : > { %v1842_v11 = vpop.f32.mrb[54].mxu0 }
 0x1ca   : > { %v1852_v12 = vadd.f32 %v1850_v8, %v1845_v9  ;;  %v2283_v13 = vpop.f32.mrb[55].mxu0 }
 0x1cc   : > { %vm1853_vm6 = vcmp.ge.f32.partialorder %v1852_v12, 0.0  ;;  %v1854_v14 = vmul.f32 0.2, %v1852_v12 }
 0x1ce   : > { %v1855_v15 = vsel %vm1853_vm6, %v1852_v12, %v1854_v14 }
 0x1cf   : > { %v1856_v16 = vpack.c.bf16 %v1855_v15, %v1855_v15 }
 0x1d1   : > { %1857 = vst [vmem:[%s272_s28] sm:$0xf] %v1856_v16 }
 0x1d2 PF: > { %s14_s19 = sadd.s32 1, %s2370_s19   ;;  %s2766_s15 = smov %s2362_s17 }
 0x1d3   : > { %p11_p9 = scmp.ge.s32.totalorder %s14_s19, 10   ;;  %s2767_s16 = smov %s2366_s18 }
 0x1d4   : > { %s2768_s17 = smov %s2771_s20  ;;  %s2769_s18 = smov %s2775_s21 }
 0x1d5   :  { %13 = sbr.rel (!%p11_p9) target bundleno = 3 (0x3), region = 105 }

// kernel: dpconvlstm_forward.20
= control target key start
LH: loop header
LB: loop body
LE: loop exit
PB: predicated region body
PF: predicated region fallthrough
CT: control target
= control target key end

     0   :  { %s2388_s18 = smov 0   ;;  %s2390_s19 = smov 0   ;;  %s2761_s0 = inlined_call_operand.vmem [shape: bf16[4,4,8,256], index: 0, kind: input, shape index: {}, may-alias: {0,1,2}]   ;;  %s2762_s1 = inlined_call_operand.vmem [shape: bf16[4,4,8,256], index: 1, kind: input, shape index: {}, may-alias: {0,1,2}]   ;;  %s2763_s2 = inlined_call_operand.vmem [shape: bf16[4,4,8,256], index: 2, kind: input, shape index: {}, may-alias: {0,1,2}]   ;;  %s2764_s3 = inlined_call_operand.vmem [shape: bf16[27,8,8], index: 3, kind: input, shape index: {}]   ;;  %s2765_s4 = inlined_call_operand.vmem [shape: f32[8,1], index: 4, kind: input, shape index: {}]   ;;  %s2766_s5 = inlined_call_operand.vmem [shape: bf16[4,2,8,128], index: 5, kind: output, shape index: {}]  }
   0x1   :  { %s2392_s20 = smov 0   ;;  %s2394_s21 = smov 0  }
   0x2   :  { %s2396_s22 = smov 0  }
   0x3 LB: > { %s24_s23 = sadd.s32 1, %s2337_s20  ;;  %s27_s24 = sadd.s32 1, %s2341_s21  ;;  %s2345_s22 = sphi %s2396_s22, %s15_s22   ;;  %s2341_s21 = sphi %s2394_s21, %s2770_s21   ;;  %s2337_s20 = sphi %s2392_s20, %s2769_s20   ;;  %s2333_s19 = sphi %s2390_s19, %s2768_s19   ;;  %s2329_s18 = sphi %s2388_s18, %s2767_s18  }
   0x4   : > { %p25_p0 = scmp.ge.s32.totalorder %s24_s23, 2  ;;  %p1960_p1 = scmp.ge.s32.totalorder %s2345_s22, 1 }
   0x5   : > { %p247_p2 = scmp.lt.s32.totalorder %s2345_s22, 9 }
   0x6   : > { %s2772_s23 = smov (%p25_p0, %s24_s23), 0  ;;  %s2774_s24 = smov (!%p25_p0, %s27_s24), %s2341_s21 }
   0x7   : > { %p248_p3 = pnand %p1960_p1, %p247_p2  ;;  %p29_p4 = scmp.ge.s32.totalorder %s2774_s24, 4 }
   0x8   : > { %p302_p5 = scmp.lt.s32.totalorder (!%p248_p3), %s2333_s19, 3  ;;  %p304_p6 = scmp.lt.s32.totalorder (!%p248_p3), %s2329_s18, 3  ;;  %v2347_v0 = vmov (!%p248_p3), 0.0   ;;  %vm2348_vm0 = vmmov (!%p248_p3), 0   ;;  %vm362_vm1 = vcmask (!%p248_p3), 1043456   ;;  %vm358_vm2 = vcmask (!%p248_p3), 64512  }
   0x9   : > { %s2776_s24 = smov (%p29_p4, %s2774_s24), 0  ;;  %251 = sbr.rel (%p248_p3) target bundleno = 477 (0x1dd), region = 40 }
   0xa   : > { %2087 = vmatprep.subr.bf16.mxu0 (!%p248_p3), %v2347_v0  ;;  %2093 = vmatprep.subr.bf16.mxu1 (!%p248_p3), %v2347_v0  ;;  %v342_v5 = vld [vmem:[%s2764_s3] sm:$0xf] (!%p248_p3)  ;;  %s2349_s10 = smov (!%p248_p3), 126   ;;  %s2350_s11 = smov (!%p248_p3), 127   ;;  %v2357_v14 = vmov (!%p248_p3), 0   ;;  %vm458_vm3 = vcmask (!%p248_p3), 1031168  }
   0xb   : > { %2089 = vmatprep.mubr.msk.bf16.mxu0 (!%p248_p3), %vm2348_vm0, %v2347_v0  ;;  %2095 = vmatprep.mubr.msk.bf16.mxu1 (!%p248_p3), %vm2348_vm0, %v2347_v0  ;;  %s311_s12 = sadd.s32 (!%p248_p3), 1, %s2329_s18  ;;  %s2351_s13 = smov (!%p248_p3), 124   ;;  %v1813_v13 = vld [vmem:[%s2765_s4] sm:$0xff] (!%p248_p3)  ;;  %vm356_vm4 = vcmask (!%p248_p3), 1039360   ;;  %vm513_vm5 = vcmask (!%p248_p3), 1014784   ;;  %vm568_vm6 = vcmask (!%p248_p3), 1006592  }
   0xc   : > { %p314_p7 = scmp.lt.s32.totalorder (!%p248_p3), %s311_s12, 3  ;;  %s2352_s14 = smov (!%p248_p3), 123   ;;  %2300 = vset.pattern.permute.xlu0 (!%p248_p3), %v2357_v14  ;;  %v1972_v22 = vld [vmem:[%s2764_s3 + $0x4] sm:$0xf] (!%p248_p3)  ;;  %v1979_v28 = vld [vmem:[%s2764_s3 + $0xc] sm:$0xf] (!%p248_p3) }
   0xd   : > { %s2353_s16 = smov (!%p248_p3), 122   ;;  %s2355_s6 = smov (!%p248_p3), 119   ;;  %vm623_vm7 = vcmask (!%p248_p3), 998400   ;;  %v1977_v32 = vld [vmem:[%s2764_s3 + $0x8] sm:$0xf] (!%p248_p3)  ;;  %vm678_vm8 = vcmask (!%p248_p3), 982016  }
   0xe   : > { %s322_s8 = sadd.s32 (!%p248_p3), 2, %s2329_s18  ;;  %v1983_v38 = vld [vmem:[%s2764_s3 + $0x14] sm:$0xf] (!%p248_p3)  ;;  %vm733_vm9 = vcmask (!%p248_p3), 973824   ;;  %v1981_v42 = vld [vmem:[%s2764_s3 + $0x10] sm:$0xf] (!%p248_p3) }
   0xf   : > { %p325_p8 = scmp.lt.s32.totalorder (!%p248_p3), %s322_s8, 3  ;;  %vm788_vm10 = vcmask (!%p248_p3), 965632   ;;  %v1987_v49 = vld [vmem:[%s2764_s3 + $0x1c] sm:$0xf] (!%p248_p3)  ;;  %v1985_v54 = vld [vmem:[%s2764_s3 + $0x18] sm:$0xf] (!%p248_p3) }
  0x10   : > { %s2778_s19 = smov (!%p302_p5, %s2333_s19), 3  ;;  %s2780_s12 = smov (!%p314_p7, %s311_s12), 3  ;;  %v1991_v58 = vld [vmem:[%s2764_s3 + $0x24] sm:$0xf] }
  0x11   : > { %s305_s25 = scalar_select %p304_p6, %s2329_s18, 3 }
  0x12   : > { %s2425_s26 = sshll.u32 %s2778_s19, 3  ;;  %s1964_s15 = sshll.u32 %s2780_s12, 1 }
  0x13   : > { %s1961_s27 = sshll.u32 %s305_s25, 1  ;;  %s318_s17 = sadd.s32 %s1964_s15, %s2425_s26 }
  0x14   : > { %s308_s28 = sadd.s32 %s2425_s26, %s1961_s27  ;;  %s1966_s25 = sshll.u32 %s318_s17, 2 }
  0x15   : > { %s1963_s29 = sshll.u32 %s308_s28, 2  ;;  %s2354_s27 = smov 120  }
  0x16   : > { %s310_s7 = scalar_lea.vmem %s2761_s0, %s1963_s29  ;;  %s2462_s30 = scalar_lea.vmem %s2762_s1, %s1966_s25 }
  0x17   : > { %v346_v1 = vld [vmem:[%s310_s7] sm:$0xff]  ;;  %s2782_s8 = smov (!%p325_p8, %s322_s8), 3  ;;  %p335_p9 = scmp.lt.s32.totalorder %s2329_s18, 1 }
  0x18   : > { %v343_v2 = vld [vmem:[%s310_s7] sm:$0xf]  ;;  %v1973_v3 = vcombine.low %v346_v1, %v346_v1  ;;  %v1974_v6 = vcombine.high %v346_v1, %v346_v1  ;;  %s2356_s7 = smov 118   ;;  %s1967_s9 = sshll.u32 %s2782_s8, 1 }
  0x19   : > { %v410_v4 = vsel %vm362_vm1, %v343_v2, 0  ;;  %v889_v7 = vld [vmem:[%s2462_s30] sm:$0xff]  ;;  %s329_s12 = sadd.s32 %s1967_s9, %s2425_s26  ;;  %s2784_s18 = smov (!%p335_p9, %s2329_s18), 1 }
  0x1a   : > { %2094 = vmatpush3.bf16.msra.mxu1 %v410_v4  ;;  %454 = vrot.lane.b32.xlu1 %v1973_v3, %s2349_s10  ;;  %v1995_v8 = vcombine.high %v889_v7, %v889_v7  ;;  %v1994_v9 = vcombine.low %v889_v7, %v889_v7  ;;  %s1969_s15 = sshll.u32 %s329_s12, 2  ;;  %v839_v47 = vld [vmem:[%s2462_s30] sm:$0xf] }
  0x1b   : > { %352 = vrot.lane.b32.xlu0 %v1973_v3, %s2350_s11  ;;  %2105 = vmatprep.subr.bf16.mxu1 %v2347_v0  ;;  %s2486_s28 = scalar_lea.vmem %s2763_s2, %s1969_s15  ;;  %v844_v52 = vsel %vm362_vm1, %v839_v47, 0  ;;  %v1989_v1 = vld [vmem:[%s2764_s3 + $0x20] sm:$0xf] }
  0x1c   : > { %v1377_v10 = vld [vmem:[%s2486_s28] sm:$0xff] }
  0x1d   : > { %2096 = vmatmul.mubr.msk.bf16.vlgmr.msra.gmra.mrb[0].mxu1 %vm358_vm2, %v342_v5  ;;  %v2015_v11 = vcombine.high %v1377_v10, %v1377_v10  ;;  %v2014_v12 = vcombine.low %v1377_v10, %v1377_v10  ;;  %v1997_v5 = vld [vmem:[%s2764_s3 + $0x2c] sm:$0xf] }
  0x1e   : > { %2107 = vmatprep.mubr.msk.bf16.mxu1 %vm2348_vm0, %v2347_v0  ;;  %456 = vrot.lane.b32.xlu1 %v1974_v6, %s2349_s10 }
  0x1f   : > { %354 = vrot.lane.b32.xlu0 %v1974_v6, %s2350_s11 }
  0x22   : > { %511 = vrot.lane.b32.xlu1 %v1974_v6, %s2351_s13 }
  0x23   : > { %509 = vrot.lane.b32.xlu0 %v1973_v3, %s2351_s13 }
  0x26   : > { %566 = vrot.lane.b32.xlu1 %v1974_v6, %s2352_s14 }
  0x27   : > { %564 = vrot.lane.b32.xlu0 %v1973_v3, %s2352_s14 }
  0x2a   : > { %621 = vrot.lane.b32.xlu1 %v1974_v6, %s2353_s16 }
  0x2b   : > { %619 = vrot.lane.b32.xlu0 %v1973_v3, %s2353_s16 }
  0x2e   : > { %676 = vrot.lane.b32.xlu1 %v1974_v6, %s2354_s27 }
  0x2f   : > { %674 = vrot.lane.b32.xlu0 %v1973_v3, %s2354_s27 }
  0x32   : > { %731 = vrot.lane.b32.xlu1 %v1974_v6, %s2355_s6 }
  0x33   : > { %729 = vrot.lane.b32.xlu0 %v1973_v3, %s2355_s6 }
  0x36   : > { %786 = vrot.lane.b32.xlu1 %v1974_v6, %s2356_s7 }
  0x37   : > { %784 = vrot.lane.b32.xlu0 %v1973_v3, %s2356_s7 }
  0x3a   : > { %897 = vrot.lane.b32.xlu1 %v1995_v8, %s2350_s11 }
  0x3b   : > { %895 = vrot.lane.b32.xlu0 %v1994_v9, %s2350_s11 }
  0x3e   : > { %951 = vrot.lane.b32.xlu1 %v1995_v8, %s2349_s10 }
  0x3f   : > { %949 = vrot.lane.b32.xlu0 %v1994_v9, %s2349_s10 }
  0x42   : > { %1005 = vrot.lane.b32.xlu1 %v1995_v8, %s2351_s13 }
  0x43   : > { %1003 = vrot.lane.b32.xlu0 %v1994_v9, %s2351_s13 }
  0x46   : > { %1059 = vrot.lane.b32.xlu1 %v1995_v8, %s2352_s14 }
  0x47   : > { %1057 = vrot.lane.b32.xlu0 %v1994_v9, %s2352_s14 }
  0x4a   : > { %1113 = vrot.lane.b32.xlu1 %v1995_v8, %s2353_s16 }
  0x4b   : > { %1111 = vrot.lane.b32.xlu0 %v1994_v9, %s2353_s16 }
  0x4e   : > { %1167 = vrot.lane.b32.xlu1 %v1995_v8, %s2354_s27 }
  0x4f   : > { %1165 = vrot.lane.b32.xlu0 %v1994_v9, %s2354_s27 }
  0x52   : > { %1221 = vrot.lane.b32.xlu1 %v1995_v8, %s2355_s6 }
  0x53   : > { %1219 = vrot.lane.b32.xlu0 %v1994_v9, %s2355_s6 }
  0x56   : > { %1275 = vrot.lane.b32.xlu1 %v1995_v8, %s2356_s7 }
  0x57   : > { %1273 = vrot.lane.b32.xlu0 %v1994_v9, %s2356_s7 }
  0x5a   : > { %1385 = vrot.lane.b32.xlu1 %v2015_v11, %s2350_s11 }
  0x5b   : > { %1383 = vrot.lane.b32.xlu0 %v2014_v12, %s2350_s11 }
  0x5e   : > { %1439 = vrot.lane.b32.xlu1 %v2015_v11, %s2349_s10 }
  0x5f   : > { %1437 = vrot.lane.b32.xlu0 %v2014_v12, %s2349_s10 }
  0x62   : > { %1493 = vrot.lane.b32.xlu1 %v2015_v11, %s2351_s13 }
  0x63   : > { %1491 = vrot.lane.b32.xlu0 %v2014_v12, %s2351_s13 }
  0x66   : > { %1547 = vrot.lane.b32.xlu1 %v2015_v11, %s2352_s14 }
  0x67   : > { %1545 = vrot.lane.b32.xlu0 %v2014_v12, %s2352_s14 }
  0x6a   : > { %1601 = vrot.lane.b32.xlu1 %v2015_v11, %s2353_s16 }
  0x6b   : > { %1599 = vrot.lane.b32.xlu0 %v2014_v12, %s2353_s16 }
  0x6e   : > { %1655 = vrot.lane.b32.xlu1 %v2015_v11, %s2354_s27 }
  0x6f   : > { %1653 = vrot.lane.b32.xlu0 %v2014_v12, %s2354_s27 }
  0x72   : > { %1709 = vrot.lane.b32.xlu1 %v2015_v11, %s2355_s6 }
  0x73   : > { %1707 = vrot.lane.b32.xlu0 %v2014_v12, %s2355_s6 }
  0x76   : > { %1763 = vrot.lane.b32.xlu1 %v2015_v11, %s2356_s7  ;;  %v1993_v11 = vld [vmem:[%s2764_s3 + $0x28] sm:$0xf] }
  0x77   : > { %1761 = vrot.lane.b32.xlu0 %v2014_v12, %s2356_s7 }
  0x7b   : > { %1816 = vperm.xlu0 %2300, %v1813_v13  }
  0x8c   : > { %v455_v15 = vpop.permute.xlu1 %454 }
  0x8d   : > { %v353_v16 = vpop.permute.xlu0 %352 }
  0x90   : > { %v457_v17 = vpop.permute.xlu1 %456 }
  0x91   : > { %v355_v18 = vpop.permute.xlu0 %354  ;;  %v459_v19 = vsel %vm458_vm3, %v455_v15, %v457_v17  ;;  %v2001_v15 = vld [vmem:[%s2764_s3 + $0x34] sm:$0xf] }
  0x92   : > { %v357_v20 = vsel %vm356_vm4, %v353_v16, %v355_v18  ;;  %v464_v23 = vsel %vm362_vm1, %v459_v19, 0 }
  0x93   : > { %v364_v21 = vsel %vm362_vm1, %v357_v20, 0 }
  0x94   : > { %2088 = vmatpush3.bf16.msra.mxu0 %v364_v21  ;;  %v512_v24 = vpop.permute.xlu1 %511  ;;  %v1999_v21 = vld [vmem:[%s2764_s3 + $0x30] sm:$0xf] }
  0x95   : > { %2099 = vmatprep.subr.bf16.mxu0 %v2347_v0  ;;  %v510_v25 = vpop.permute.xlu0 %509 }
  0x96   : > { %v514_v26 = vsel %vm513_vm5, %v510_v25, %v512_v24  ;;  %v2005_v25 = vld [vmem:[%s2764_s3 + $0x3c] sm:$0xf] }
  0x97   : > { %2090 = vmatmul.mubr.msk.bf16.vlgmr.msra.gmra.mrb[0].mxu0 %vm358_vm2, %v1972_v22  ;;  %v519_v27 = vsel %vm362_vm1, %v514_v26, 0 }
  0x98   : > { %2100 = vmatpush3.bf16.msra.mxu0 %v464_v23  ;;  %2106 = vmatpush3.bf16.msra.mxu1 %v519_v27  ;;  %v567_v29 = vpop.permute.xlu1 %566 }
  0x99   : > { %v565_v30 = vpop.permute.xlu0 %564  ;;  %2101 = vmatprep.mubr.msk.bf16.mxu0 %vm2348_vm0, %v2347_v0  ;;  %2111 = vmatprep.subr.bf16.mxu0 %v2347_v0 }
  0x9a   : > { %v569_v31 = vsel %vm568_vm6, %v565_v30, %v567_v29  ;;  %2117 = vmatprep.subr.bf16.mxu1 %v2347_v0 }
  0x9b   : > { %2108 = vmatmul.mubr.msk.bf16.vlgmr.msra.gmra.mrb[4].mxu1 %vm358_vm2, %v1979_v28  ;;  %v574_v33 = vsel %vm362_vm1, %v569_v31, 0  ;;  %v2003_v31 = vld [vmem:[%s2764_s3 + $0x38] sm:$0xf] }
  0x9c   : > { %2119 = vmatprep.mubr.msk.bf16.mxu1 %vm2348_vm0, %v2347_v0  ;;  %v622_v34 = vpop.permute.xlu1 %621 }
  0x9d   : > { %v620_v35 = vpop.permute.xlu0 %619 }
  0x9e   : > { %v624_v36 = vsel %vm623_vm7, %v620_v35, %v622_v34 }
  0x9f   : > { %2102 = vmatmul.mubr.msk.bf16.vlgmr.msra.gmra.mrb[4].mxu0 %vm358_vm2, %v1977_v32  ;;  %v629_v37 = vsel %vm362_vm1, %v624_v36, 0  ;;  %v2009_v36 = vld [vmem:[%s2764_s3 + $0x44] sm:$0xf] }
  0xa0   : > { %2112 = vmatpush3.bf16.msra.mxu0 %v574_v33  ;;  %2118 = vmatpush3.bf16.msra.mxu1 %v629_v37  ;;  %v677_v39 = vpop.permute.xlu1 %676 }
  0xa1   : > { %v675_v40 = vpop.permute.xlu0 %674  ;;  %2113 = vmatprep.mubr.msk.bf16.mxu0 %vm2348_vm0, %v2347_v0  ;;  %2123 = vmatprep.subr.bf16.mxu0 %v2347_v0 }
  0xa2   : > { %v679_v41 = vsel %vm678_vm8, %v675_v40, %v677_v39  ;;  %2129 = vmatprep.subr.bf16.mxu1 %v2347_v0  ;;  %v1327_v40 = vld [vmem:[%s2486_s28] sm:$0xf]  ;;  %s1970_s28 = sshll.u32 %s2778_s19, 1 }
  0xa3   : > { %2120 = vmatmul.mubr.msk.bf16.vlgmr.msra.gmra.mrb[8].mxu1 %vm358_vm2, %v1983_v38  ;;  %v684_v43 = vsel %vm362_vm1, %v679_v41, 0  ;;  %v2007_v41 = vld [vmem:[%s2764_s3 + $0x40] sm:$0xf]  ;;  %s338_s11 = sadd.s32 %s1970_s28, %s2784_s18 }
  0xa4   : > { %2131 = vmatprep.mubr.msk.bf16.mxu1 %vm2348_vm0, %v2347_v0  ;;  %v732_v44 = vpop.permute.xlu1 %731  ;;  %s1971_s13 = sshll.u32 %s338_s11, 2 }
  0xa5   : > { %v730_v45 = vpop.permute.xlu0 %729  ;;  %s340_s27 = scalar_lea.vmem %s2766_s5, %s1971_s13 }
  0xa6   : > { %v734_v46 = vsel %vm733_vm9, %v730_v45, %v732_v44 }
  0xa7   : > { %2114 = vmatmul.mubr.msk.bf16.vlgmr.msra.gmra.mrb[8].mxu0 %vm358_vm2, %v1981_v42  ;;  %v739_v48 = vsel %vm362_vm1, %v734_v46, 0  ;;  %v1332_v42 = vsel %vm362_vm1, %v1327_v40, 0  ;;  %v2013_v46 = vld [vmem:[%s2764_s3 + $0x4c] sm:$0xf] }
  0xa8   : > { %2124 = vmatpush3.bf16.msra.mxu0 %v684_v43  ;;  %2130 = vmatpush3.bf16.msra.mxu1 %v739_v48  ;;  %v787_v50 = vpop.permute.xlu1 %786 }
  0xa9   : > { %v785_v51 = vpop.permute.xlu0 %784  ;;  %2125 = vmatprep.mubr.msk.bf16.mxu0 %vm2348_vm0, %v2347_v0  ;;  %2135 = vmatprep.subr.bf16.mxu0 %v2347_v0 }
  0xaa   : > { %v789_v53 = vsel %vm788_vm10, %v785_v51, %v787_v50  ;;  %2141 = vmatprep.subr.bf16.mxu1 %v2347_v0  ;;  %v2011_v51 = vld [vmem:[%s2764_s3 + $0x48] sm:$0xf] }
  0xab   : > { %2132 = vmatmul.mubr.msk.bf16.vlgmr.msra.gmra.mrb[12].mxu1 %vm358_vm2, %v1987_v49  ;;  %v794_v55 = vsel %vm362_vm1, %v789_v53, 0 }
  0xac   : > { %2142 = vmatpush3.bf16.msra.mxu1 %v844_v52  ;;  %2143 = vmatprep.mubr.msk.bf16.mxu1 %vm2348_vm0, %v2347_v0  ;;  %v898_v56 = vpop.permute.xlu1 %897 }
  0xad   : > { %v896_v57 = vpop.permute.xlu0 %895  ;;  %2153 = vmatprep.subr.bf16.mxu1 %v2347_v0 }
  0xae   : > { %v899_v61 = vsel %vm356_vm4, %v896_v57, %v898_v56  ;;  %v2019_v56 = vld [vmem:[%s2764_s3 + $0x54] sm:$0xf] }
  0xaf   : > { %2126 = vmatmul.mubr.msk.bf16.vlgmr.msra.gmra.mrb[12].mxu0 %vm358_vm2, %v1985_v54  ;;  %v904_v2 = vsel %vm362_vm1, %v899_v61, 0  ;;  %v2017_v61 = vld [vmem:[%s2764_s3 + $0x50] sm:$0xf] }
  0xb0   : > { %2136 = vmatpush3.bf16.msra.mxu0 %v794_v55  ;;  %2137 = vmatprep.mubr.msk.bf16.mxu0 %vm2348_vm0, %v2347_v0  ;;  %v952_v59 = vpop.permute.xlu1 %951 }
  0xb1   : > { %2147 = vmatprep.subr.bf16.mxu0 %v2347_v0  ;;  %v950_v60 = vpop.permute.xlu0 %949 }
  0xb2   : > { %v953_v62 = vsel %vm458_vm3, %v950_v60, %v952_v59 }
  0xb3   : > { %v958_v63 = vsel %vm362_vm1, %v953_v62, 0  ;;  %2144 = vmatmul.mubr.msk.bf16.vlgmr.msra.gmra.mrb[16].mxu1 %vm358_vm2, %v1991_v58 }
  0xb4   : > { %2154 = vmatpush3.bf16.msra.mxu1 %v958_v63  ;;  %2155 = vmatprep.mubr.msk.bf16.mxu1 %vm2348_vm0, %v2347_v0  ;;  %v1006_v3 = vpop.permute.xlu1 %1005 }
  0xb5   : > { %v1004_v4 = vpop.permute.xlu0 %1003  ;;  %2165 = vmatprep.subr.bf16.mxu1 %v2347_v0 }
  0xb6   : > { %v1007_v8 = vsel %vm513_vm5, %v1004_v4, %v1006_v3  ;;  %v2023_v3 = vld [vmem:[%s2764_s3 + $0x5c] sm:$0xf] }
  0xb7   : > { %2138 = vmatmul.mubr.msk.bf16.vlgmr.msra.gmra.mrb[16].mxu0 %vm358_vm2, %v1989_v1  ;;  %v1012_v12 = vsel %vm362_vm1, %v1007_v8, 0 }
  0xb8   : > { %2148 = vmatpush3.bf16.msra.mxu0 %v904_v2  ;;  %2149 = vmatprep.mubr.msk.bf16.mxu0 %vm2348_vm0, %v2347_v0  ;;  %v1060_v6 = vpop.permute.xlu1 %1059 }
  0xb9   : > { %2159 = vmatprep.subr.bf16.mxu0 %v2347_v0  ;;  %v1058_v7 = vpop.permute.xlu0 %1057 }
  0xba   : > { %v1061_v9 = vsel %vm568_vm6, %v1058_v7, %v1060_v6  ;;  %v2021_v6 = vld [vmem:[%s2764_s3 + $0x58] sm:$0xf] }
  0xbb   : > { %v1066_v10 = vsel %vm362_vm1, %v1061_v9, 0  ;;  %2156 = vmatmul.mubr.msk.bf16.vlgmr.msra.gmra.mrb[20].mxu1 %vm358_vm2, %v1997_v5 }
  0xbc   : > { %2166 = vmatpush3.bf16.msra.mxu1 %v1066_v10  ;;  %2167 = vmatprep.mubr.msk.bf16.mxu1 %vm2348_vm0, %v2347_v0  ;;  %v1114_v13 = vpop.permute.xlu1 %1113  ;;  %v2027_v10 = vld [vmem:[%s2764_s3 + $0x64] sm:$0xf] }
  0xbd   : > { %v1112_v14 = vpop.permute.xlu0 %1111  ;;  %2177 = vmatprep.subr.bf16.mxu1 %v2347_v0 }
  0xbe   : > { %v1115_v18 = vsel %vm623_vm7, %v1112_v14, %v1114_v13 }
  0xbf   : > { %2150 = vmatmul.mubr.msk.bf16.vlgmr.msra.gmra.mrb[20].mxu0 %vm358_vm2, %v1993_v11  ;;  %v1120_v22 = vsel %vm362_vm1, %v1115_v18, 0  ;;  %v2029_v18 = vld [vmem:[%s2764_s3 + $0x68] sm:$0xf] }
  0xc0   : > { %2160 = vmatpush3.bf16.msra.mxu0 %v1012_v12  ;;  %2161 = vmatprep.mubr.msk.bf16.mxu0 %vm2348_vm0, %v2347_v0  ;;  %v1168_v16 = vpop.permute.xlu1 %1167 }
  0xc1   : > { %2171 = vmatprep.subr.bf16.mxu0 %v2347_v0  ;;  %v1166_v17 = vpop.permute.xlu0 %1165 }
  0xc2   : > { %v1169_v19 = vsel %vm678_vm8, %v1166_v17, %v1168_v16  ;;  %v2025_v16 = vld [vmem:[%s2764_s3 + $0x60] sm:$0xf] }
  0xc3   : > { %v1174_v20 = vsel %vm362_vm1, %v1169_v19, 0  ;;  %2168 = vmatmul.mubr.msk.bf16.vlgmr.msra.gmra.mrb[24].mxu1 %vm358_vm2, %v2001_v15 }
  0xc4   : > { %2178 = vmatpush3.bf16.msra.mxu1 %v1174_v20  ;;  %2179 = vmatprep.mubr.msk.bf16.mxu1 %vm2348_vm0, %v2347_v0  ;;  %v1222_v23 = vpop.permute.xlu1 %1221 }
  0xc5   : > { %v1220_v24 = vpop.permute.xlu0 %1219  ;;  %2189 = vmatprep.subr.bf16.mxu1 %v2347_v0 }
  0xc6   : > { %v1223_v28 = vsel %vm733_vm9, %v1220_v24, %v1222_v23 }
  0xc7   : > { %2162 = vmatmul.mubr.msk.bf16.vlgmr.msra.gmra.mrb[24].mxu0 %vm358_vm2, %v1999_v21  ;;  %v1228_v32 = vsel %vm362_vm1, %v1223_v28, 0 }
  0xc8   : > { %2172 = vmatpush3.bf16.msra.mxu0 %v1120_v22  ;;  %2173 = vmatprep.mubr.msk.bf16.mxu0 %vm2348_vm0, %v2347_v0  ;;  %v1276_v26 = vpop.permute.xlu1 %1275 }
  0xc9   : > { %2183 = vmatprep.subr.bf16.mxu0 %v2347_v0  ;;  %v1274_v27 = vpop.permute.xlu0 %1273 }
  0xca   : > { %v1277_v29 = vsel %vm788_vm10, %v1274_v27, %v1276_v26 }
  0xcb   : > { %2180 = vmatmul.mubr.msk.bf16.vlgmr.msra.gmra.mrb[28].mxu1 %vm358_vm2, %v2005_v25  ;;  %v1282_v30 = vsel %vm362_vm1, %v1277_v29, 0 }
  0xcc   : > { %2190 = vmatpush3.bf16.msra.mxu1 %v1282_v30  ;;  %2191 = vmatprep.mubr.msk.bf16.mxu1 %vm2348_vm0, %v2347_v0  ;;  %v1386_v33 = vpop.permute.xlu1 %1385 }
  0xcd   : > { %v1384_v34 = vpop.permute.xlu0 %1383  ;;  %2201 = vmatprep.subr.bf16.mxu1 %v2347_v0 }
  0xce   : > { %v1387_v35 = vsel %vm356_vm4, %v1384_v34, %v1386_v33 }
  0xcf   : > { %2174 = vmatmul.mubr.msk.bf16.vlgmr.msra.gmra.mrb[28].mxu0 %vm358_vm2, %v2003_v31  ;;  %v1392_v37 = vsel %vm362_vm1, %v1387_v35, 0 }
  0xd0   : > { %2184 = vmatpush3.bf16.msra.mxu0 %v1228_v32  ;;  %2185 = vmatprep.mubr.msk.bf16.mxu0 %vm2348_vm0, %v2347_v0  ;;  %v1440_v38 = vpop.permute.xlu1 %1439 }
  0xd1   : > { %2195 = vmatprep.subr.bf16.mxu0 %v2347_v0  ;;  %v1438_v39 = vpop.permute.xlu0 %1437 }
  0xd2   : > { %v1441_v50 = vsel %vm458_vm3, %v1438_v39, %v1440_v38 }
  0xd3   : > { %2192 = vmatmul.mubr.msk.bf16.vlgmr.msra.gmra.mrb[32].mxu1 %vm358_vm2, %v2009_v36  ;;  %v1446_v52 = vsel %vm362_vm1, %v1441_v50, 0 }
  0xd4   : > { %2202 = vmatpush3.bf16.msra.mxu1 %v1392_v37  ;;  %2203 = vmatprep.mubr.msk.bf16.mxu1 %vm2348_vm0, %v2347_v0  ;;  %v1494_v43 = vpop.permute.xlu1 %1493 }
  0xd5   : > { %v1492_v44 = vpop.permute.xlu0 %1491  ;;  %2213 = vmatprep.subr.bf16.mxu1 %v2347_v0 }
  0xd6   : > { %v1495_v45 = vsel %vm513_vm5, %v1492_v44, %v1494_v43 }
  0xd7   : > { %2186 = vmatmul.mubr.msk.bf16.vlgmr.msra.gmra.mrb[32].mxu0 %vm358_vm2, %v2007_v41  ;;  %v1500_v47 = vsel %vm362_vm1, %v1495_v45, 0 }
  0xd8   : > { %2196 = vmatpush3.bf16.msra.mxu0 %v1332_v42  ;;  %2197 = vmatprep.mubr.msk.bf16.mxu0 %vm2348_vm0, %v2347_v0  ;;  %v1548_v48 = vpop.permute.xlu1 %1547 }
  0xd9   : > { %2207 = vmatprep.subr.bf16.mxu0 %v2347_v0  ;;  %v1546_v49 = vpop.permute.xlu0 %1545 }
  0xda   : > { %v1549_v60 = vsel %vm568_vm6, %v1546_v49, %v1548_v48 }
  0xdb   : > { %2204 = vmatmul.mubr.msk.bf16.vlgmr.msra.gmra.mrb[36].mxu1 %vm358_vm2, %v2013_v46  ;;  %v1554_v62 = vsel %vm362_vm1, %v1549_v60, 0 }
  0xdc   : > { %2214 = vmatpush3.bf16.msra.mxu1 %v1500_v47  ;;  %2215 = vmatprep.mubr.msk.bf16.mxu1 %vm2348_vm0, %v2347_v0  ;;  %v1602_v53 = vpop.permute.xlu1 %1601 }
  0xdd   : > { %v1600_v54 = vpop.permute.xlu0 %1599  ;;  %2225 = vmatprep.subr.bf16.mxu1 %v2347_v0 }
  0xde   : > { %v1603_v55 = vsel %vm623_vm7, %v1600_v54, %v1602_v53 }
  0xdf   : > { %2198 = vmatmul.mubr.msk.bf16.vlgmr.msra.gmra.mrb[36].mxu0 %vm358_vm2, %v2011_v51  ;;  %v1608_v57 = vsel %vm362_vm1, %v1603_v55, 0 }
  0xe0   : > { %2208 = vmatpush3.bf16.msra.mxu0 %v1446_v52  ;;  %2209 = vmatprep.mubr.msk.bf16.mxu0 %vm2348_vm0, %v2347_v0  ;;  %v1656_v58 = vpop.permute.xlu1 %1655 }
  0xe1   : > { %2219 = vmatprep.subr.bf16.mxu0 %v2347_v0  ;;  %v1654_v59 = vpop.permute.xlu0 %1653 }
  0xe2   : > { %v1657_v5 = vsel %vm678_vm8, %v1654_v59, %v1656_v58 }
  0xe3   : > { %2216 = vmatmul.mubr.msk.bf16.vlgmr.msra.gmra.mrb[40].mxu1 %vm358_vm2, %v2019_v56  ;;  %v1662_v7 = vsel %vm362_vm1, %v1657_v5, 0 }
  0xe4   : > { %2226 = vmatpush3.bf16.msra.mxu1 %v1608_v57  ;;  %2227 = vmatprep.mubr.msk.bf16.mxu1 %vm2348_vm0, %v2347_v0  ;;  %v1710_v63 = vpop.permute.xlu1 %1709 }
  0xe5   : > { %v1708_v1 = vpop.permute.xlu0 %1707  ;;  %2237 = vmatprep.subr.bf16.mxu1 %v2347_v0 }
  0xe6   : > { %v1711_v2 = vsel %vm733_vm9, %v1708_v1, %v1710_v63 }
  0xe7   : > { %2210 = vmatmul.mubr.msk.bf16.vlgmr.msra.gmra.mrb[40].mxu0 %vm358_vm2, %v2017_v61  ;;  %v1716_v4 = vsel %vm362_vm1, %v1711_v2, 0 }
  0xe8   : > { %2220 = vmatpush3.bf16.msra.mxu0 %v1554_v62  ;;  %2221 = vmatprep.mubr.msk.bf16.mxu0 %vm2348_vm0, %v2347_v0  ;;  %v1764_v8 = vpop.permute.xlu1 %1763 }
  0xe9   : > { %2231 = vmatprep.subr.bf16.mxu0 %v2347_v0  ;;  %v1762_v9 = vpop.permute.xlu0 %1761 }
  0xea   : > { %v1765_v13 = vsel %vm788_vm10, %v1762_v9, %v1764_v8 }
  0xeb   : > { %2228 = vmatmul.mubr.msk.bf16.vlgmr.msra.gmra.mrb[44].mxu1 %vm358_vm2, %v2023_v3  ;;  %v1770_v17 = vsel %vm362_vm1, %v1765_v13, 0 }
  0xec   : > { %2238 = vmatpush3.bf16.msra.mxu1 %v1716_v4  ;;  %2239 = vmatprep.mubr.msk.bf16.mxu1 %vm2348_vm0, %v2347_v0 }
  0xef   : > { %2222 = vmatmul.mubr.msk.bf16.vlgmr.msra.gmra.mrb[44].mxu0 %vm358_vm2, %v2021_v6 }
  0xf0   : > { %2232 = vmatpush3.bf16.msra.mxu0 %v1662_v7  ;;  %2233 = vmatprep.mubr.msk.bf16.mxu0 %vm2348_vm0, %v2347_v0  ;;  %v446_v11 = vpop.f32.mrb[0].mxu1 }
  0xf1   : > { %2243 = vmatprep.subr.bf16.mxu0 %v2347_v0  ;;  %v2097_v12 = vpop.f32.mrb[1].mxu1 }
  0xf2   : > { %v449_v14 = vpop.f32.mrb[2].mxu1 }
  0xf3   : > { %2240 = vmatmul.mubr.msk.bf16.vlgmr.msra.gmra.mrb[48].mxu1 %vm358_vm2, %v2027_v10  ;;  %v2098_v15 = vpop.f32.mrb[3].mxu1 }
  0xf7   : > { %2234 = vmatmul.mubr.msk.bf16.vlgmr.msra.gmra.mrb[48].mxu0 %vm358_vm2, %v2025_v16 }
  0xf8   : > { %2244 = vmatpush3.bf16.msra.mxu0 %v1770_v17  ;;  %2245 = vmatprep.mubr.msk.bf16.mxu0 %vm2348_vm0, %v2347_v0 }
  0xff   : > { %2246 = vmatmul.mubr.msk.bf16.vlgmr.msra.gmra.mrb[52].mxu0 %vm358_vm2, %v2029_v18 }
 0x16a   : > { %v400_v19 = vpop.f32.mrb[0].mxu0 }
 0x16b   : > { %v2091_v20 = vpop.f32.mrb[1].mxu0  ;;  %v447_v21 = vadd.f32 %v446_v11, %v400_v19 }
 0x16c   : > { %v403_v22 = vpop.f32.mrb[2].mxu0 }
 0x16d   : > { %v2092_v23 = vpop.f32.mrb[3].mxu0 }
 0x16e   : > { %v555_v24 = vpop.f32.mrb[4].mxu1 }
 0x16f   : > { %v2109_v25 = vpop.f32.mrb[5].mxu1 }
 0x170   : > { %v558_v26 = vpop.f32.mrb[6].mxu1 }
 0x171   : > { %v2110_v27 = vpop.f32.mrb[7].mxu1 }
 0x172   : > { %v500_v28 = vpop.f32.mrb[4].mxu0 }
 0x173   : > { %v506_v29 = vadd.f32 %v500_v28, %v447_v21  ;;  %v2103_v30 = vpop.f32.mrb[5].mxu0 }
 0x174   : > { %v503_v31 = vpop.f32.mrb[6].mxu0 }
 0x175   : > { %v561_v0 = vadd.f32 %v555_v24, %v506_v29  ;;  %v2104_v32 = vpop.f32.mrb[7].mxu0 }
 0x176   : > { %v665_v33 = vpop.f32.mrb[8].mxu1 }
 0x177   : > { %v2121_v34 = vpop.f32.mrb[9].mxu1 }
 0x178   : > { %v668_v35 = vpop.f32.mrb[10].mxu1 }
 0x179   : > { %v2122_v36 = vpop.f32.mrb[11].mxu1 }
 0x17a   : > { %v610_v37 = vpop.f32.mrb[8].mxu0 }
 0x17b   : > { %v616_v38 = vadd.f32 %v610_v37, %v561_v0  ;;  %v2115_v39 = vpop.f32.mrb[9].mxu0 }
 0x17c   : > { %v613_v40 = vpop.f32.mrb[10].mxu0 }
 0x17d   : > { %v671_v41 = vadd.f32 %v665_v33, %v616_v38  ;;  %v2116_v42 = vpop.f32.mrb[11].mxu0 }
 0x17e   : > { %v775_v43 = vpop.f32.mrb[12].mxu1 }
 0x17f   : > { %v2133_v44 = vpop.f32.mrb[13].mxu1 }
 0x180   : > { %v778_v45 = vpop.f32.mrb[14].mxu1 }
 0x181   : > { %v2134_v46 = vpop.f32.mrb[15].mxu1 }
 0x182   : > { %v720_v47 = vpop.f32.mrb[12].mxu0 }
 0x183   : > { %v726_v48 = vadd.f32 %v720_v47, %v671_v41  ;;  %v2127_v49 = vpop.f32.mrb[13].mxu0 }
 0x184   : > { %v723_v50 = vpop.f32.mrb[14].mxu0 }
 0x185   : > { %v781_v51 = vadd.f32 %v775_v43, %v726_v48  ;;  %v2128_v52 = vpop.f32.mrb[15].mxu0 }
 0x186   : > { %v880_v53 = vpop.f32.mrb[16].mxu1 }
 0x187   : > { %v2145_v54 = vpop.f32.mrb[17].mxu1 }
 0x188   : > { %v883_v55 = vpop.f32.mrb[18].mxu1 }
 0x189   : > { %v2146_v56 = vpop.f32.mrb[19].mxu1 }
 0x18a   : > { %v830_v57 = vpop.f32.mrb[16].mxu0 }
 0x18b   : > { %v836_v58 = vadd.f32 %v830_v57, %v781_v51  ;;  %v2139_v59 = vpop.f32.mrb[17].mxu0 }
 0x18c   : > { %v833_v60 = vpop.f32.mrb[18].mxu0 }
 0x18d   : > { %v886_v61 = vadd.f32 %v880_v53, %v836_v58  ;;  %v2140_v62 = vpop.f32.mrb[19].mxu0 }
 0x18e   : > { %v994_v63 = vpop.f32.mrb[20].mxu1 }
 0x18f   : > { %v2157_v1 = vpop.f32.mrb[21].mxu1 }
 0x190   : > { %v997_v2 = vpop.f32.mrb[22].mxu1 }
 0x191   : > { %v2158_v3 = vpop.f32.mrb[23].mxu1 }
 0x192   : > { %v940_v4 = vpop.f32.mrb[20].mxu0 }
 0x193   : > { %v946_v5 = vadd.f32 %v940_v4, %v886_v61  ;;  %v2151_v6 = vpop.f32.mrb[21].mxu0 }
 0x194   : > { %v943_v7 = vpop.f32.mrb[22].mxu0 }
 0x195   : > { %v1000_v8 = vadd.f32 %v994_v63, %v946_v5  ;;  %v2152_v9 = vpop.f32.mrb[23].mxu0 }
 0x196   : > { %v1102_v10 = vpop.f32.mrb[24].mxu1 }
 0x197   : > { %v2169_v11 = vpop.f32.mrb[25].mxu1 }
 0x198   : > { %v1105_v12 = vpop.f32.mrb[26].mxu1 }
 0x199   : > { %v2170_v13 = vpop.f32.mrb[27].mxu1 }
 0x19a   : > { %v1048_v14 = vpop.f32.mrb[24].mxu0 }
 0x19b   : > { %v1054_v15 = vadd.f32 %v1048_v14, %v1000_v8  ;;  %v2163_v16 = vpop.f32.mrb[25].mxu0 }
 0x19c   : > { %v1051_v17 = vpop.f32.mrb[26].mxu0 }
 0x19d   : > { %v1108_v18 = vadd.f32 %v1102_v10, %v1054_v15  ;;  %v2164_v19 = vpop.f32.mrb[27].mxu0  ;;  %v1817_v17 = vpop.permute.xlu0 %1816 }
 0x19e   : > { %v1210_v20 = vpop.f32.mrb[28].mxu1 }
 0x19f   : > { %v2181_v21 = vpop.f32.mrb[29].mxu1 }
 0x1a0   : > { %v1213_v22 = vpop.f32.mrb[30].mxu1 }
 0x1a1   : > { %v2182_v23 = vpop.f32.mrb[31].mxu1 }
 0x1a2   : > { %v1156_v24 = vpop.f32.mrb[28].mxu0 }
 0x1a3   : > { %v1162_v25 = vadd.f32 %v1156_v24, %v1108_v18  ;;  %v2175_v26 = vpop.f32.mrb[29].mxu0 }
 0x1a4   : > { %v1159_v27 = vpop.f32.mrb[30].mxu0 }
 0x1a5   : > { %v1216_v28 = vadd.f32 %v1210_v20, %v1162_v25  ;;  %v2176_v29 = vpop.f32.mrb[31].mxu0 }
 0x1a6   : > { %v1318_v30 = vpop.f32.mrb[32].mxu1 }
 0x1a7   : > { %v2193_v31 = vpop.f32.mrb[33].mxu1 }
 0x1a8   : > { %v1321_v0 = vpop.f32.mrb[34].mxu1 }
 0x1a9   : > { %v2194_v32 = vpop.f32.mrb[35].mxu1 }
 0x1aa   : > { %v1264_v33 = vpop.f32.mrb[32].mxu0 }
 0x1ab   : > { %v1270_v34 = vadd.f32 %v1264_v33, %v1216_v28  ;;  %v2187_v35 = vpop.f32.mrb[33].mxu0 }
 0x1ac   : > { %v1267_v36 = vpop.f32.mrb[34].mxu0 }
 0x1ad   : > { %v1324_v37 = vadd.f32 %v1318_v30, %v1270_v34  ;;  %v2188_v38 = vpop.f32.mrb[35].mxu0 }
 0x1ae   : > { %v1428_v39 = vpop.f32.mrb[36].mxu1 }
 0x1af   : > { %v2205_v40 = vpop.f32.mrb[37].mxu1 }
 0x1b0   : > { %v1431_v41 = vpop.f32.mrb[38].mxu1 }
 0x1b1   : > { %v2206_v42 = vpop.f32.mrb[39].mxu1 }
 0x1b2   : > { %v1368_v43 = vpop.f32.mrb[36].mxu0 }
 0x1b3   : > { %v1374_v44 = vadd.f32 %v1368_v43, %v1324_v37  ;;  %v2199_v45 = vpop.f32.mrb[37].mxu0 }
 0x1b4   : > { %v1371_v46 = vpop.f32.mrb[38].mxu0 }
 0x1b5   : > { %v1434_v47 = vadd.f32 %v1428_v39, %v1374_v44  ;;  %v2200_v48 = vpop.f32.mrb[39].mxu0 }
 0x1b6   : > { %v1536_v49 = vpop.f32.mrb[40].mxu1 }
 0x1b7   : > { %v2217_v50 = vpop.f32.mrb[41].mxu1 }
 0x1b8   : > { %v1539_v51 = vpop.f32.mrb[42].mxu1 }
 0x1b9   : > { %v2218_v52 = vpop.f32.mrb[43].mxu1 }
 0x1ba   : > { %v1482_v53 = vpop.f32.mrb[40].mxu0 }
 0x1bb   : > { %v1488_v54 = vadd.f32 %v1482_v53, %v1434_v47  ;;  %v2211_v55 = vpop.f32.mrb[41].mxu0 }
 0x1bc   : > { %v1485_v56 = vpop.f32.mrb[42].mxu0 }
 0x1bd   : > { %v1542_v57 = vadd.f32 %v1536_v49, %v1488_v54  ;;  %v2212_v58 = vpop.f32.mrb[43].mxu0 }
 0x1be   : > { %v1644_v59 = vpop.f32.mrb[44].mxu1 }
 0x1bf   : > { %v2229_v60 = vpop.f32.mrb[45].mxu1 }
 0x1c0   : > { %v1647_v61 = vpop.f32.mrb[46].mxu1 }
 0x1c1   : > { %v2230_v62 = vpop.f32.mrb[47].mxu1 }
 0x1c2   : > { %v1590_v63 = vpop.f32.mrb[44].mxu0 }
 0x1c3   : > { %v1596_v1 = vadd.f32 %v1590_v63, %v1542_v57  ;;  %v2223_v2 = vpop.f32.mrb[45].mxu0 }
 0x1c4   : > { %v1593_v3 = vpop.f32.mrb[46].mxu0 }
 0x1c5   : > { %v1650_v4 = vadd.f32 %v1644_v59, %v1596_v1  ;;  %v2224_v5 = vpop.f32.mrb[47].mxu0 }
 0x1c6   : > { %v1752_v6 = vpop.f32.mrb[48].mxu1 }
 0x1c7   : > { %v2241_v7 = vpop.f32.mrb[49].mxu1 }
 0x1c8   : > { %v1755_v8 = vpop.f32.mrb[50].mxu1 }
 0x1c9   : > { %v2242_v9 = vpop.f32.mrb[51].mxu1 }
 0x1ca   : > { %v1698_v10 = vpop.f32.mrb[48].mxu0 }
 0x1cb   : > { %v1704_v11 = vadd.f32 %v1698_v10, %v1650_v4  ;;  %v2235_v12 = vpop.f32.mrb[49].mxu0 }
 0x1cc   : > { %v1701_v13 = vpop.f32.mrb[50].mxu0 }
 0x1cd   : > { %v1758_v14 = vadd.f32 %v1752_v6, %v1704_v11  ;;  %v2236_v15 = vpop.f32.mrb[51].mxu0 }
 0x1d2   : > { %v1806_v16 = vpop.f32.mrb[52].mxu0 }
 0x1d3   : > { %v1812_v18 = vadd.f32 %v1806_v16, %v1758_v14  ;;  %v2247_v19 = vpop.f32.mrb[53].mxu0 }
 0x1d4   : > { %v1809_v20 = vpop.f32.mrb[54].mxu0 }
 0x1d5   : > { %v1819_v21 = vadd.f32 %v1817_v17, %v1812_v18  ;;  %v2248_v22 = vpop.f32.mrb[55].mxu0 }
 0x1d7   : > { %vm1820_vm11 = vcmp.ge.f32.partialorder %v1819_v21, 0.0  ;;  %v1821_v23 = vmul.f32 0.2, %v1819_v21 }
 0x1d9   : > { %v1822_v24 = vsel %vm1820_vm11, %v1819_v21, %v1821_v23 }
 0x1da   : > { %v1823_v25 = vpack.c.bf16 %v1822_v24, %v1822_v24 }
 0x1dc   : > { %1824 = vst [vmem:[%s340_s27] sm:$0xf] %v1823_v25 }
 0x1dd PF: > { %s15_s22 = sadd.s32 1, %s2345_s22   ;;  %s2767_s18 = smov %s2337_s20 }
 0x1de   : > { %p12_p10 = scmp.ge.s32.totalorder %s15_s22, 10   ;;  %s2768_s19 = smov %s2341_s21 }
 0x1df   : > { %s2769_s20 = smov %s2772_s23  ;;  %s2770_s21 = smov %s2776_s24 }
 0x1e0   :  { %14 = sbr.rel (!%p12_p10) target bundleno = 3 (0x3), region = 102 }

// kernel: dpconvlstm_forward.18
= control target key start
LH: loop header
LB: loop body
LE: loop exit
PB: predicated region body
PF: predicated region fallthrough
CT: control target
= control target key end

     0   :  { %s2425_s18 = smov 0   ;;  %s2427_s19 = smov 0   ;;  %s2800_s0 = inlined_call_operand.vmem [shape: bf16[4,6,12,256], index: 0, kind: input, shape index: {}, may-alias: {0,1,2}]   ;;  %s2801_s1 = inlined_call_operand.vmem [shape: bf16[4,6,12,256], index: 1, kind: input, shape index: {}, may-alias: {0,1,2}]   ;;  %s2802_s2 = inlined_call_operand.vmem [shape: bf16[4,6,12,256], index: 2, kind: input, shape index: {}, may-alias: {0,1,2}]   ;;  %s2803_s3 = inlined_call_operand.vmem [shape: bf16[27,4,12], index: 3, kind: input, shape index: {}]   ;;  %s2804_s4 = inlined_call_operand.vmem [shape: f32[4,1], index: 4, kind: input, shape index: {}]   ;;  %s2805_s5 = inlined_call_operand.vmem [shape: bf16[4,4,4,128], index: 5, kind: output, shape index: {}]  }
   0x1   :  { %s2429_s20 = smov 0   ;;  %s2431_s21 = smov 0  }
   0x2   :  { %s2433_s22 = smov 0  }
   0x3 LB: > { %s24_s23 = sadd.s32 1, %s2374_s20  ;;  %s27_s24 = sadd.s32 1, %s2378_s21  ;;  %s2382_s22 = sphi %s2433_s22, %s15_s22   ;;  %s2378_s21 = sphi %s2431_s21, %s2809_s21   ;;  %s2374_s20 = sphi %s2429_s20, %s2808_s20   ;;  %s2370_s19 = sphi %s2427_s19, %s2807_s19   ;;  %s2366_s18 = sphi %s2425_s18, %s2806_s18  }
   0x4   : > { %p25_p0 = scmp.ge.s32.totalorder %s24_s23, 4  ;;  %p1990_p1 = scmp.ge.s32.totalorder %s2382_s22, 1 }
   0x5   : > { %p247_p2 = scmp.lt.s32.totalorder %s2382_s22, 17 }
   0x6   : > { %s2811_s23 = smov (%p25_p0, %s24_s23), 0  ;;  %s2813_s24 = smov (!%p25_p0, %s27_s24), %s2378_s21 }
   0x7   : > { %p248_p3 = pnand %p1990_p1, %p247_p2  ;;  %p29_p4 = scmp.ge.s32.totalorder %s2813_s24, 4 }
   0x8   : > { %p302_p5 = scmp.lt.s32.totalorder (!%p248_p3), %s2370_s19, 3  ;;  %p304_p6 = scmp.lt.s32.totalorder (!%p248_p3), %s2366_s18, 5  ;;  %v2384_v0 = vmov (!%p248_p3), 0.0   ;;  %vm2385_vm0 = vmmov (!%p248_p3), 0   ;;  %vm367_vm1 = vcmask (!%p248_p3), 1045504   ;;  %vm363_vm2 = vcmask (!%p248_p3), 97280  }
   0x9   : > { %s2815_s24 = smov (%p29_p4, %s2813_s24), 0  ;;  %251 = sbr.rel (%p248_p3) target bundleno = 474 (0x1da), region = 40 }
   0xa   : > { %2117 = vmatprep.subr.bf16.mxu0 (!%p248_p3), %v2384_v0  ;;  %2123 = vmatprep.subr.bf16.mxu1 (!%p248_p3), %v2384_v0  ;;  %s311_s8 = sadd.s32 (!%p248_p3), 1, %s2366_s18  ;;  %s2386_s9 = smov (!%p248_p3), 126   ;;  %v342_v5 = vld [vmem:[%s2803_s3] sm:$0x3] (!%p248_p3)  ;;  %v2394_v11 = vmov (!%p248_p3), 0   ;;  %vm468_vm3 = vcmask (!%p248_p3), 1031168  }
   0xb   : > { %2119 = vmatprep.mubr.msk.bf16.mxu0 (!%p248_p3), %vm2385_vm0, %v2384_v0  ;;  %2125 = vmatprep.mubr.msk.bf16.mxu1 (!%p248_p3), %vm2385_vm0, %v2384_v0  ;;  %s2387_s10 = smov (!%p248_p3), 127   ;;  %p314_p7 = scmp.lt.s32.totalorder (!%p248_p3), %s311_s8, 5  ;;  %v1843_v10 = vld [vmem:[%s2804_s4] sm:$0xf] (!%p248_p3)  ;;  %vm361_vm4 = vcmask (!%p248_p3), 1039360   ;;  %vm523_vm5 = vcmask (!%p248_p3), 998400  }
   0xc   : > { %s322_s11 = sadd.s32 (!%p248_p3), 2, %s2366_s18  ;;  %s2388_s6 = smov (!%p248_p3), 122   ;;  %2331 = vset.pattern.permute.xlu0 (!%p248_p3), %v2394_v11  ;;  %v1999_v19 = vld [vmem:[%s2803_s3 + $0x2] sm:$0x3] (!%p248_p3)  ;;  %vm578_vm6 = vcmask (!%p248_p3), 990208   ;;  %vm633_vm7 = vcmask (!%p248_p3), 982016  }
   0xd   : > { %p325_p8 = scmp.lt.s32.totalorder (!%p248_p3), %s322_s11, 5  ;;  %v2007_v25 = vld [vmem:[%s2803_s3 + $0x6] sm:$0x3] (!%p248_p3)  ;;  %v2005_v29 = vld [vmem:[%s2803_s3 + $0x4] sm:$0x3] (!%p248_p3)  ;;  %vm688_vm8 = vcmask (!%p248_p3), 949248  }
   0xe   : > { %v2011_v35 = vld [vmem:[%s2803_s3 + $0xa] sm:$0x3] (!%p248_p3)  ;;  %vm743_vm9 = vcmask (!%p248_p3), 941056   ;;  %v2009_v39 = vld [vmem:[%s2803_s3 + $0x8] sm:$0x3] (!%p248_p3)  ;;  %vm798_vm10 = vcmask (!%p248_p3), 932864  }
   0xf   : > { %v2015_v46 = vld [vmem:[%s2803_s3 + $0xe] sm:$0x3] (!%p248_p3)  ;;  %v2013_v51 = vld [vmem:[%s2803_s3 + $0xc] sm:$0x3] (!%p248_p3)  ;;  %v2019_v55 = vld [vmem:[%s2803_s3 + $0x12] sm:$0x3] (!%p248_p3) }
  0x10   : > { %s2817_s19 = smov (!%p302_p5, %s2370_s19), 3  ;;  %s2819_s8 = smov (!%p314_p7, %s311_s8), 5  ;;  %v2017_v61 = vld [vmem:[%s2803_s3 + $0x10] sm:$0x3] }
  0x11   : > { %s305_s25 = scalar_select %p304_p6, %s2366_s18, 5 }
  0x12   : > { %s2464_s26 = smul.u32 24, %s2817_s19  ;;  %s2821_s11 = smov (!%p325_p8, %s322_s11), 5 }
  0x13   : > { %s1991_s27 = sshll.u32 %s305_s25, 2  ;;  %s1993_s12 = sshll.u32 %s2819_s8, 2 }
  0x14   : > { %s308_s28 = sadd.s32 %s2464_s26, %s1991_s27  ;;  %s318_s13 = sadd.s32 %s2464_s26, %s1993_s12 }
  0x15   : > { %s1992_s29 = sshll.u32 %s308_s28, 2  ;;  %s1995_s14 = sshll.u32 %s2821_s11, 2 }
  0x16   : > { %s310_s7 = scalar_lea.vmem %s2800_s0, %s1992_s29  ;;  %s1994_s15 = sshll.u32 %s318_s13, 2 }
  0x17   : > { %v2332_v1 = vld [vmem:[%s310_s7] ss:$8 sps:$4 sm:$0x3f]   ;;  %v2334_v2 = vld [vmem:[%s310_s7 + $0x4] ss:$8 sps:$4 sm:$0x3f]   ;;  %s329_s16 = sadd.s32 %s2464_s26, %s1995_s14  ;;  %s2490_s29 = scalar_lea.vmem %s2801_s1, %s1994_s15 }
  0x18   : > { %464 = vrot.lane.b32.xlu1 %v2332_v1, %s2386_s9  ;;  %357 = vrot.lane.b32.xlu0 %v2332_v1, %s2387_s10  ;;  %v2341_v3 = vld [vmem:[%s310_s7] ss:$8 sps:$4 sm:$0x3f]   ;;  %s1996_s30 = sshll.u32 %s329_s16, 2  ;;  %s2389_s11 = smov 121  }
  0x19   : > { %v420_v4 = vsel %vm367_vm1, %v2341_v3, 0  ;;  %s2497_s8 = scalar_lea.vmem %s2802_s2, %s1996_s30  ;;  %s2390_s12 = smov 120   ;;  %v2335_v6 = vld [vmem:[%s2490_s29 + $0x4] ss:$8 sps:$4 sm:$0x3f]  }
  0x1a   : > { %2124 = vmatpush3.bf16.msra.mxu1 %v420_v4  ;;  %s2391_s13 = smov 116   ;;  %s2392_s14 = smov 115   ;;  %v2337_v7 = vld [vmem:[%s2490_s29] ss:$8 sps:$4 sm:$0x3f]  }
  0x1b   : > { %2135 = vmatprep.subr.bf16.mxu1 %v2384_v0  ;;  %s2393_s15 = smov 114   ;;  %v2338_v8 = vld [vmem:[%s2497_s8 + $0x4] ss:$8 sps:$4 sm:$0x3f]   ;;  %p335_p9 = scmp.lt.s32.totalorder %s2366_s18, 3 }
  0x1c   : > { %466 = vrot.lane.b32.xlu1 %v2334_v2, %s2386_s9  ;;  %359 = vrot.lane.b32.xlu0 %v2334_v2, %s2387_s10  ;;  %v2340_v9 = vld [vmem:[%s2497_s8] ss:$8 sps:$4 sm:$0x3f]  }
  0x1d   : > { %2126 = vmatmul.mubr.msk.bf16.vlgmr.msra.gmra.mrb[0].mxu1 %vm363_vm2, %v342_v5  ;;  %v2342_v43 = vld [vmem:[%s2490_s29] ss:$8 sps:$4 sm:$0x3f]   ;;  %s2823_s18 = smov (!%p335_p9, %s2366_s18), 3 }
  0x1e   : > { %2137 = vmatprep.mubr.msk.bf16.mxu1 %vm2385_vm0, %v2384_v0  ;;  %v860_v49 = vsel %vm367_vm1, %v2342_v43, 0  ;;  %v2043_v43 = vld [vmem:[%s2803_s3 + $0x26] sm:$0x3] }
  0x20   : > { %521 = vrot.lane.b32.xlu1 %v2334_v2, %s2388_s6  ;;  %519 = vrot.lane.b32.xlu0 %v2332_v1, %s2388_s6 }
  0x24   : > { %576 = vrot.lane.b32.xlu1 %v2334_v2, %s2389_s11  ;;  %574 = vrot.lane.b32.xlu0 %v2332_v1, %s2389_s11 }
  0x28   : > { %631 = vrot.lane.b32.xlu1 %v2334_v2, %s2390_s12  ;;  %629 = vrot.lane.b32.xlu0 %v2332_v1, %s2390_s12 }
  0x2c   : > { %686 = vrot.lane.b32.xlu1 %v2334_v2, %s2391_s13  ;;  %684 = vrot.lane.b32.xlu0 %v2332_v1, %s2391_s13 }
  0x30   : > { %741 = vrot.lane.b32.xlu1 %v2334_v2, %s2392_s14  ;;  %739 = vrot.lane.b32.xlu0 %v2332_v1, %s2392_s14 }
  0x34   : > { %796 = vrot.lane.b32.xlu1 %v2334_v2, %s2393_s15  ;;  %794 = vrot.lane.b32.xlu0 %v2332_v1, %s2393_s15  ;;  %v2026_v2 = vld [vmem:[%s2803_s3 + $0x16] sm:$0x3] }
  0x38   : > { %917 = vrot.lane.b32.xlu1 %v2335_v6, %s2387_s10  ;;  %915 = vrot.lane.b32.xlu0 %v2337_v7, %s2387_s10 }
  0x3c   : > { %971 = vrot.lane.b32.xlu1 %v2335_v6, %s2386_s9  ;;  %969 = vrot.lane.b32.xlu0 %v2337_v7, %s2386_s9 }
  0x40   : > { %1025 = vrot.lane.b32.xlu1 %v2335_v6, %s2388_s6  ;;  %1023 = vrot.lane.b32.xlu0 %v2337_v7, %s2388_s6 }
  0x44   : > { %1079 = vrot.lane.b32.xlu1 %v2335_v6, %s2389_s11  ;;  %1077 = vrot.lane.b32.xlu0 %v2337_v7, %s2389_s11 }
  0x48   : > { %1133 = vrot.lane.b32.xlu1 %v2335_v6, %s2390_s12  ;;  %1131 = vrot.lane.b32.xlu0 %v2337_v7, %s2390_s12 }
  0x4c   : > { %1187 = vrot.lane.b32.xlu1 %v2335_v6, %s2391_s13  ;;  %1185 = vrot.lane.b32.xlu0 %v2337_v7, %s2391_s13 }
  0x50   : > { %1241 = vrot.lane.b32.xlu1 %v2335_v6, %s2392_s14  ;;  %1239 = vrot.lane.b32.xlu0 %v2337_v7, %s2392_s14 }
  0x54   : > { %1295 = vrot.lane.b32.xlu1 %v2335_v6, %s2393_s15  ;;  %1293 = vrot.lane.b32.xlu0 %v2337_v7, %s2393_s15 }
  0x58   : > { %1415 = vrot.lane.b32.xlu1 %v2338_v8, %s2387_s10  ;;  %1413 = vrot.lane.b32.xlu0 %v2340_v9, %s2387_s10 }
  0x5c   : > { %1469 = vrot.lane.b32.xlu1 %v2338_v8, %s2386_s9  ;;  %1467 = vrot.lane.b32.xlu0 %v2340_v9, %s2386_s9 }
  0x60   : > { %1523 = vrot.lane.b32.xlu1 %v2338_v8, %s2388_s6  ;;  %1521 = vrot.lane.b32.xlu0 %v2340_v9, %s2388_s6 }
  0x64   : > { %1577 = vrot.lane.b32.xlu1 %v2338_v8, %s2389_s11  ;;  %1575 = vrot.lane.b32.xlu0 %v2340_v9, %s2389_s11 }
  0x68   : > { %1631 = vrot.lane.b32.xlu1 %v2338_v8, %s2390_s12  ;;  %1629 = vrot.lane.b32.xlu0 %v2340_v9, %s2390_s12 }
  0x6c   : > { %1685 = vrot.lane.b32.xlu1 %v2338_v8, %s2391_s13  ;;  %1683 = vrot.lane.b32.xlu0 %v2340_v9, %s2391_s13 }
  0x70   : > { %1739 = vrot.lane.b32.xlu1 %v2338_v8, %s2392_s14  ;;  %1737 = vrot.lane.b32.xlu0 %v2340_v9, %s2392_s14 }
  0x74   : > { %1793 = vrot.lane.b32.xlu1 %v2338_v8, %s2393_s15  ;;  %1791 = vrot.lane.b32.xlu0 %v2340_v9, %s2393_s15  ;;  %v2022_v8 = vld [vmem:[%s2803_s3 + $0x14] sm:$0x3] }
  0x78   : > { %1846 = vperm.xlu0 %2331, %v1843_v10  }
  0x8a   : > { %v465_v12 = vpop.permute.xlu1 %464  ;;  %v358_v13 = vpop.permute.xlu0 %357 }
  0x8e   : > { %v467_v14 = vpop.permute.xlu1 %466  ;;  %v360_v15 = vpop.permute.xlu0 %359 }
  0x8f   : > { %v469_v16 = vsel %vm468_vm3, %v465_v12, %v467_v14  ;;  %v362_v17 = vsel %vm361_vm4, %v358_v13, %v360_v15  ;;  %v2030_v12 = vld [vmem:[%s2803_s3 + $0x1a] sm:$0x3] }
  0x90   : > { %v369_v18 = vsel %vm367_vm1, %v362_v17, 0  ;;  %v474_v20 = vsel %vm367_vm1, %v469_v16, 0 }
  0x91   : > { %2118 = vmatpush3.bf16.msra.mxu0 %v369_v18  ;;  %v2028_v18 = vld [vmem:[%s2803_s3 + $0x18] sm:$0x3] }
  0x92   : > { %2129 = vmatprep.subr.bf16.mxu0 %v2384_v0  ;;  %v522_v21 = vpop.permute.xlu1 %521  ;;  %v520_v22 = vpop.permute.xlu0 %519 }
  0x93   : > { %v524_v23 = vsel %vm523_vm5, %v520_v22, %v522_v21  ;;  %v2034_v22 = vld [vmem:[%s2803_s3 + $0x1e] sm:$0x3] }
  0x94   : > { %2120 = vmatmul.mubr.msk.bf16.vlgmr.msra.gmra.mrb[0].mxu0 %vm363_vm2, %v1999_v19  ;;  %v529_v24 = vsel %vm367_vm1, %v524_v23, 0 }
  0x95   : > { %2130 = vmatpush3.bf16.msra.mxu0 %v474_v20  ;;  %2136 = vmatpush3.bf16.msra.mxu1 %v529_v24 }
  0x96   : > { %v577_v26 = vpop.permute.xlu1 %576  ;;  %v575_v27 = vpop.permute.xlu0 %574  ;;  %2131 = vmatprep.mubr.msk.bf16.mxu0 %vm2385_vm0, %v2384_v0  ;;  %2141 = vmatprep.subr.bf16.mxu0 %v2384_v0 }
  0x97   : > { %v579_v28 = vsel %vm578_vm6, %v575_v27, %v577_v26  ;;  %2147 = vmatprep.subr.bf16.mxu1 %v2384_v0 }
  0x98   : > { %2138 = vmatmul.mubr.msk.bf16.vlgmr.msra.gmra.mrb[4].mxu1 %vm363_vm2, %v2007_v25  ;;  %v584_v30 = vsel %vm367_vm1, %v579_v28, 0  ;;  %v2032_v28 = vld [vmem:[%s2803_s3 + $0x1c] sm:$0x3] }
  0x99   : > { %2149 = vmatprep.mubr.msk.bf16.mxu1 %vm2385_vm0, %v2384_v0 }
  0x9a   : > { %v632_v31 = vpop.permute.xlu1 %631  ;;  %v630_v32 = vpop.permute.xlu0 %629 }
  0x9b   : > { %v634_v33 = vsel %vm633_vm7, %v630_v32, %v632_v31 }
  0x9c   : > { %2132 = vmatmul.mubr.msk.bf16.vlgmr.msra.gmra.mrb[4].mxu0 %vm363_vm2, %v2005_v29  ;;  %v639_v34 = vsel %vm367_vm1, %v634_v33, 0  ;;  %v2038_v33 = vld [vmem:[%s2803_s3 + $0x22] sm:$0x3] }
  0x9d   : > { %2142 = vmatpush3.bf16.msra.mxu0 %v584_v30  ;;  %2148 = vmatpush3.bf16.msra.mxu1 %v639_v34  ;;  %v2343_v34 = vld [vmem:[%s2497_s8] ss:$8 sps:$4 sm:$0x3f]   ;;  %s1997_s8 = sshll.u32 %s2817_s19, 2 }
  0x9e   : > { %v687_v36 = vpop.permute.xlu1 %686  ;;  %v685_v37 = vpop.permute.xlu0 %684  ;;  %2143 = vmatprep.mubr.msk.bf16.mxu0 %vm2385_vm0, %v2384_v0  ;;  %2153 = vmatprep.subr.bf16.mxu0 %v2384_v0  ;;  %s338_s16 = sadd.s32 %s1997_s8, %s2823_s18 }
  0x9f   : > { %v689_v38 = vsel %vm688_vm8, %v685_v37, %v687_v36  ;;  %2159 = vmatprep.subr.bf16.mxu1 %v2384_v0  ;;  %s1998_s17 = sshll.u32 %s338_s16, 1 }
  0xa0   : > { %2150 = vmatmul.mubr.msk.bf16.vlgmr.msra.gmra.mrb[8].mxu1 %vm363_vm2, %v2011_v35  ;;  %v694_v40 = vsel %vm367_vm1, %v689_v38, 0  ;;  %v2036_v38 = vld [vmem:[%s2803_s3 + $0x20] sm:$0x3]  ;;  %s340_s28 = scalar_lea.vmem %s2805_s5, %s1998_s17 }
  0xa1   : > { %2161 = vmatprep.mubr.msk.bf16.mxu1 %vm2385_vm0, %v2384_v0 }
  0xa2   : > { %v742_v41 = vpop.permute.xlu1 %741  ;;  %v740_v42 = vpop.permute.xlu0 %739 }
  0xa3   : > { %v744_v44 = vsel %vm743_vm9, %v740_v42, %v742_v41 }
  0xa4   : > { %2144 = vmatmul.mubr.msk.bf16.vlgmr.msra.gmra.mrb[8].mxu0 %vm363_vm2, %v2009_v39  ;;  %v749_v45 = vsel %vm367_vm1, %v744_v44, 0  ;;  %v1358_v39 = vsel %vm367_vm1, %v2343_v34, 0 }
  0xa5   : > { %2154 = vmatpush3.bf16.msra.mxu0 %v694_v40  ;;  %2160 = vmatpush3.bf16.msra.mxu1 %v749_v45 }
  0xa6   : > { %v797_v47 = vpop.permute.xlu1 %796  ;;  %v795_v48 = vpop.permute.xlu0 %794  ;;  %2155 = vmatprep.mubr.msk.bf16.mxu0 %vm2385_vm0, %v2384_v0  ;;  %2165 = vmatprep.subr.bf16.mxu0 %v2384_v0 }
  0xa7   : > { %v799_v50 = vsel %vm798_vm10, %v795_v48, %v797_v47  ;;  %2171 = vmatprep.subr.bf16.mxu1 %v2384_v0  ;;  %v2040_v48 = vld [vmem:[%s2803_s3 + $0x24] sm:$0x3] }
  0xa8   : > { %2162 = vmatmul.mubr.msk.bf16.vlgmr.msra.gmra.mrb[12].mxu1 %vm363_vm2, %v2015_v46  ;;  %v804_v52 = vsel %vm367_vm1, %v799_v50, 0 }
  0xa9   : > { %2172 = vmatpush3.bf16.msra.mxu1 %v860_v49  ;;  %2173 = vmatprep.mubr.msk.bf16.mxu1 %vm2385_vm0, %v2384_v0 }
  0xaa   : > { %v918_v53 = vpop.permute.xlu1 %917  ;;  %v916_v54 = vpop.permute.xlu0 %915  ;;  %2183 = vmatprep.subr.bf16.mxu1 %v2384_v0 }
  0xab   : > { %v919_v58 = vsel %vm361_vm4, %v916_v54, %v918_v53  ;;  %v2049_v53 = vld [vmem:[%s2803_s3 + $0x2a] sm:$0x3] }
  0xac   : > { %2156 = vmatmul.mubr.msk.bf16.vlgmr.msra.gmra.mrb[12].mxu0 %vm363_vm2, %v2013_v51  ;;  %v924_v62 = vsel %vm367_vm1, %v919_v58, 0  ;;  %v2047_v58 = vld [vmem:[%s2803_s3 + $0x28] sm:$0x3] }
  0xad   : > { %2166 = vmatpush3.bf16.msra.mxu0 %v804_v52  ;;  %2167 = vmatprep.mubr.msk.bf16.mxu0 %vm2385_vm0, %v2384_v0 }
  0xae   : > { %2177 = vmatprep.subr.bf16.mxu0 %v2384_v0  ;;  %v972_v56 = vpop.permute.xlu1 %971  ;;  %v970_v57 = vpop.permute.xlu0 %969 }
  0xaf   : > { %v973_v59 = vsel %vm468_vm3, %v970_v57, %v972_v56 }
  0xb0   : > { %v978_v60 = vsel %vm367_vm1, %v973_v59, 0  ;;  %2174 = vmatmul.mubr.msk.bf16.vlgmr.msra.gmra.mrb[16].mxu1 %vm363_vm2, %v2019_v55 }
  0xb1   : > { %2184 = vmatpush3.bf16.msra.mxu1 %v978_v60  ;;  %2185 = vmatprep.mubr.msk.bf16.mxu1 %vm2385_vm0, %v2384_v0 }
  0xb2   : > { %v1026_v63 = vpop.permute.xlu1 %1025  ;;  %v1024_v1 = vpop.permute.xlu0 %1023  ;;  %2195 = vmatprep.subr.bf16.mxu1 %v2384_v0 }
  0xb3   : > { %v1027_v5 = vsel %vm523_vm5, %v1024_v1, %v1026_v63  ;;  %v2053_v63 = vld [vmem:[%s2803_s3 + $0x2e] sm:$0x3] }
  0xb4   : > { %2168 = vmatmul.mubr.msk.bf16.vlgmr.msra.gmra.mrb[16].mxu0 %vm363_vm2, %v2017_v61  ;;  %v1032_v9 = vsel %vm367_vm1, %v1027_v5, 0 }
  0xb5   : > { %2178 = vmatpush3.bf16.msra.mxu0 %v924_v62  ;;  %2179 = vmatprep.mubr.msk.bf16.mxu0 %vm2385_vm0, %v2384_v0 }
  0xb6   : > { %2189 = vmatprep.subr.bf16.mxu0 %v2384_v0  ;;  %v1080_v3 = vpop.permute.xlu1 %1079  ;;  %v1078_v4 = vpop.permute.xlu0 %1077 }
  0xb7   : > { %v1081_v6 = vsel %vm578_vm6, %v1078_v4, %v1080_v3  ;;  %v2051_v3 = vld [vmem:[%s2803_s3 + $0x2c] sm:$0x3] }
  0xb8   : > { %v1086_v7 = vsel %vm367_vm1, %v1081_v6, 0  ;;  %2186 = vmatmul.mubr.msk.bf16.vlgmr.msra.gmra.mrb[20].mxu1 %vm363_vm2, %v2026_v2 }
  0xb9   : > { %2196 = vmatpush3.bf16.msra.mxu1 %v1086_v7  ;;  %2197 = vmatprep.mubr.msk.bf16.mxu1 %vm2385_vm0, %v2384_v0  ;;  %v2057_v7 = vld [vmem:[%s2803_s3 + $0x32] sm:$0x3] }
  0xba   : > { %v1134_v10 = vpop.permute.xlu1 %1133  ;;  %v1132_v11 = vpop.permute.xlu0 %1131  ;;  %2207 = vmatprep.subr.bf16.mxu1 %v2384_v0 }
  0xbb   : > { %v1135_v15 = vsel %vm633_vm7, %v1132_v11, %v1134_v10 }
  0xbc   : > { %2180 = vmatmul.mubr.msk.bf16.vlgmr.msra.gmra.mrb[20].mxu0 %vm363_vm2, %v2022_v8  ;;  %v1140_v19 = vsel %vm367_vm1, %v1135_v15, 0  ;;  %v2059_v15 = vld [vmem:[%s2803_s3 + $0x34] sm:$0x3] }
  0xbd   : > { %2190 = vmatpush3.bf16.msra.mxu0 %v1032_v9  ;;  %2191 = vmatprep.mubr.msk.bf16.mxu0 %vm2385_vm0, %v2384_v0  ;;  %v2055_v9 = vld [vmem:[%s2803_s3 + $0x30] sm:$0x3] }
  0xbe   : > { %2201 = vmatprep.subr.bf16.mxu0 %v2384_v0  ;;  %v1188_v13 = vpop.permute.xlu1 %1187  ;;  %v1186_v14 = vpop.permute.xlu0 %1185 }
  0xbf   : > { %v1189_v16 = vsel %vm688_vm8, %v1186_v14, %v1188_v13 }
  0xc0   : > { %v1194_v17 = vsel %vm367_vm1, %v1189_v16, 0  ;;  %2198 = vmatmul.mubr.msk.bf16.vlgmr.msra.gmra.mrb[24].mxu1 %vm363_vm2, %v2030_v12 }
  0xc1   : > { %2208 = vmatpush3.bf16.msra.mxu1 %v1194_v17  ;;  %2209 = vmatprep.mubr.msk.bf16.mxu1 %vm2385_vm0, %v2384_v0 }
  0xc2   : > { %v1242_v20 = vpop.permute.xlu1 %1241  ;;  %v1240_v21 = vpop.permute.xlu0 %1239  ;;  %2219 = vmatprep.subr.bf16.mxu1 %v2384_v0 }
  0xc3   : > { %v1243_v25 = vsel %vm743_vm9, %v1240_v21, %v1242_v20 }
  0xc4   : > { %2192 = vmatmul.mubr.msk.bf16.vlgmr.msra.gmra.mrb[24].mxu0 %vm363_vm2, %v2028_v18  ;;  %v1248_v29 = vsel %vm367_vm1, %v1243_v25, 0 }
  0xc5   : > { %2202 = vmatpush3.bf16.msra.mxu0 %v1140_v19  ;;  %2203 = vmatprep.mubr.msk.bf16.mxu0 %vm2385_vm0, %v2384_v0 }
  0xc6   : > { %2213 = vmatprep.subr.bf16.mxu0 %v2384_v0  ;;  %v1296_v23 = vpop.permute.xlu1 %1295  ;;  %v1294_v24 = vpop.permute.xlu0 %1293 }
  0xc7   : > { %v1297_v26 = vsel %vm798_vm10, %v1294_v24, %v1296_v23 }
  0xc8   : > { %2210 = vmatmul.mubr.msk.bf16.vlgmr.msra.gmra.mrb[28].mxu1 %vm363_vm2, %v2034_v22  ;;  %v1302_v27 = vsel %vm367_vm1, %v1297_v26, 0 }
  0xc9   : > { %2220 = vmatpush3.bf16.msra.mxu1 %v1302_v27  ;;  %2221 = vmatprep.mubr.msk.bf16.mxu1 %vm2385_vm0, %v2384_v0 }
  0xca   : > { %v1416_v30 = vpop.permute.xlu1 %1415  ;;  %v1414_v31 = vpop.permute.xlu0 %1413  ;;  %2231 = vmatprep.subr.bf16.mxu1 %v2384_v0 }
  0xcb   : > { %v1417_v32 = vsel %vm361_vm4, %v1414_v31, %v1416_v30 }
  0xcc   : > { %2204 = vmatmul.mubr.msk.bf16.vlgmr.msra.gmra.mrb[28].mxu0 %vm363_vm2, %v2032_v28  ;;  %v1422_v35 = vsel %vm367_vm1, %v1417_v32, 0 }
  0xcd   : > { %2214 = vmatpush3.bf16.msra.mxu0 %v1248_v29  ;;  %2215 = vmatprep.mubr.msk.bf16.mxu0 %vm2385_vm0, %v2384_v0 }
  0xce   : > { %2225 = vmatprep.subr.bf16.mxu0 %v2384_v0  ;;  %v1470_v36 = vpop.permute.xlu1 %1469  ;;  %v1468_v37 = vpop.permute.xlu0 %1467 }
  0xcf   : > { %v1471_v47 = vsel %vm468_vm3, %v1468_v37, %v1470_v36 }
  0xd0   : > { %2222 = vmatmul.mubr.msk.bf16.vlgmr.msra.gmra.mrb[32].mxu1 %vm363_vm2, %v2038_v33  ;;  %v1476_v49 = vsel %vm367_vm1, %v1471_v47, 0 }
  0xd1   : > { %2232 = vmatpush3.bf16.msra.mxu1 %v1422_v35  ;;  %2233 = vmatprep.mubr.msk.bf16.mxu1 %vm2385_vm0, %v2384_v0 }
  0xd2   : > { %v1524_v40 = vpop.permute.xlu1 %1523  ;;  %v1522_v41 = vpop.permute.xlu0 %1521  ;;  %2243 = vmatprep.subr.bf16.mxu1 %v2384_v0 }
  0xd3   : > { %v1525_v42 = vsel %vm523_vm5, %v1522_v41, %v1524_v40 }
  0xd4   : > { %2216 = vmatmul.mubr.msk.bf16.vlgmr.msra.gmra.mrb[32].mxu0 %vm363_vm2, %v2036_v38  ;;  %v1530_v44 = vsel %vm367_vm1, %v1525_v42, 0 }
  0xd5   : > { %2226 = vmatpush3.bf16.msra.mxu0 %v1358_v39  ;;  %2227 = vmatprep.mubr.msk.bf16.mxu0 %vm2385_vm0, %v2384_v0 }
  0xd6   : > { %2237 = vmatprep.subr.bf16.mxu0 %v2384_v0  ;;  %v1578_v45 = vpop.permute.xlu1 %1577  ;;  %v1576_v46 = vpop.permute.xlu0 %1575 }
  0xd7   : > { %v1579_v57 = vsel %vm578_vm6, %v1576_v46, %v1578_v45 }
  0xd8   : > { %2234 = vmatmul.mubr.msk.bf16.vlgmr.msra.gmra.mrb[36].mxu1 %vm363_vm2, %v2043_v43  ;;  %v1584_v59 = vsel %vm367_vm1, %v1579_v57, 0 }
  0xd9   : > { %2244 = vmatpush3.bf16.msra.mxu1 %v1530_v44  ;;  %2245 = vmatprep.mubr.msk.bf16.mxu1 %vm2385_vm0, %v2384_v0 }
  0xda   : > { %v1632_v50 = vpop.permute.xlu1 %1631  ;;  %v1630_v51 = vpop.permute.xlu0 %1629  ;;  %2255 = vmatprep.subr.bf16.mxu1 %v2384_v0 }
  0xdb   : > { %v1633_v52 = vsel %vm633_vm7, %v1630_v51, %v1632_v50 }
  0xdc   : > { %2228 = vmatmul.mubr.msk.bf16.vlgmr.msra.gmra.mrb[36].mxu0 %vm363_vm2, %v2040_v48  ;;  %v1638_v54 = vsel %vm367_vm1, %v1633_v52, 0 }
  0xdd   : > { %2238 = vmatpush3.bf16.msra.mxu0 %v1476_v49  ;;  %2239 = vmatprep.mubr.msk.bf16.mxu0 %vm2385_vm0, %v2384_v0 }
  0xde   : > { %2249 = vmatprep.subr.bf16.mxu0 %v2384_v0  ;;  %v1686_v55 = vpop.permute.xlu1 %1685  ;;  %v1684_v56 = vpop.permute.xlu0 %1683 }
  0xdf   : > { %v1687_v2 = vsel %vm688_vm8, %v1684_v56, %v1686_v55 }
  0xe0   : > { %2246 = vmatmul.mubr.msk.bf16.vlgmr.msra.gmra.mrb[40].mxu1 %vm363_vm2, %v2049_v53  ;;  %v1692_v4 = vsel %vm367_vm1, %v1687_v2, 0 }
  0xe1   : > { %2256 = vmatpush3.bf16.msra.mxu1 %v1638_v54  ;;  %2257 = vmatprep.mubr.msk.bf16.mxu1 %vm2385_vm0, %v2384_v0 }
  0xe2   : > { %v1740_v60 = vpop.permute.xlu1 %1739  ;;  %v1738_v61 = vpop.permute.xlu0 %1737  ;;  %2267 = vmatprep.subr.bf16.mxu1 %v2384_v0 }
  0xe3   : > { %v1741_v62 = vsel %vm743_vm9, %v1738_v61, %v1740_v60 }
  0xe4   : > { %2240 = vmatmul.mubr.msk.bf16.vlgmr.msra.gmra.mrb[40].mxu0 %vm363_vm2, %v2047_v58  ;;  %v1746_v1 = vsel %vm367_vm1, %v1741_v62, 0 }
  0xe5   : > { %2250 = vmatpush3.bf16.msra.mxu0 %v1584_v59  ;;  %2251 = vmatprep.mubr.msk.bf16.mxu0 %vm2385_vm0, %v2384_v0 }
  0xe6   : > { %2261 = vmatprep.subr.bf16.mxu0 %v2384_v0  ;;  %v1794_v5 = vpop.permute.xlu1 %1793  ;;  %v1792_v6 = vpop.permute.xlu0 %1791 }
  0xe7   : > { %v1795_v8 = vsel %vm798_vm10, %v1792_v6, %v1794_v5 }
  0xe8   : > { %2258 = vmatmul.mubr.msk.bf16.vlgmr.msra.gmra.mrb[44].mxu1 %vm363_vm2, %v2053_v63  ;;  %v1800_v10 = vsel %vm367_vm1, %v1795_v8, 0 }
  0xe9   : > { %2268 = vmatpush3.bf16.msra.mxu1 %v1746_v1  ;;  %2269 = vmatprep.mubr.msk.bf16.mxu1 %vm2385_vm0, %v2384_v0 }
  0xec   : > { %2252 = vmatmul.mubr.msk.bf16.vlgmr.msra.gmra.mrb[44].mxu0 %vm363_vm2, %v2051_v3 }
  0xed   : > { %2262 = vmatpush3.bf16.msra.mxu0 %v1692_v4  ;;  %2263 = vmatprep.mubr.msk.bf16.mxu0 %vm2385_vm0, %v2384_v0 }
  0xee   : > { %2273 = vmatprep.subr.bf16.mxu0 %v2384_v0 }
  0xf0   : > { %2270 = vmatmul.mubr.msk.bf16.vlgmr.msra.gmra.mrb[48].mxu1 %vm363_vm2, %v2057_v7  ;;  %v456_v11 = vpop.f32.mrb[0].mxu1 }
  0xf1   : > { %v2127_v12 = vpop.f32.mrb[1].mxu1 }
  0xf2   : > { %v459_v13 = vpop.f32.mrb[2].mxu1 }
  0xf3   : > { %v2128_v14 = vpop.f32.mrb[3].mxu1 }
  0xf4   : > { %2264 = vmatmul.mubr.msk.bf16.vlgmr.msra.gmra.mrb[48].mxu0 %vm363_vm2, %v2055_v9 }
  0xf5   : > { %2274 = vmatpush3.bf16.msra.mxu0 %v1800_v10  ;;  %2275 = vmatprep.mubr.msk.bf16.mxu0 %vm2385_vm0, %v2384_v0 }
  0xfc   : > { %2276 = vmatmul.mubr.msk.bf16.vlgmr.msra.gmra.mrb[52].mxu0 %vm363_vm2, %v2059_v15 }
 0x167   : > { %v405_v16 = vpop.f32.mrb[0].mxu0 }
 0x168   : > { %v2121_v17 = vpop.f32.mrb[1].mxu0  ;;  %v457_v18 = vadd.f32 %v456_v11, %v405_v16 }
 0x169   : > { %v408_v19 = vpop.f32.mrb[2].mxu0 }
 0x16a   : > { %v2122_v20 = vpop.f32.mrb[3].mxu0 }
 0x16b   : > { %v565_v21 = vpop.f32.mrb[4].mxu1 }
 0x16c   : > { %v2139_v22 = vpop.f32.mrb[5].mxu1 }
 0x16d   : > { %v568_v23 = vpop.f32.mrb[6].mxu1 }
 0x16e   : > { %v2140_v24 = vpop.f32.mrb[7].mxu1 }
 0x16f   : > { %v510_v25 = vpop.f32.mrb[4].mxu0 }
 0x170   : > { %v516_v0 = vadd.f32 %v510_v25, %v457_v18  ;;  %v2133_v26 = vpop.f32.mrb[5].mxu0 }
 0x171   : > { %v513_v27 = vpop.f32.mrb[6].mxu0 }
 0x172   : > { %v571_v28 = vadd.f32 %v565_v21, %v516_v0  ;;  %v2134_v29 = vpop.f32.mrb[7].mxu0 }
 0x173   : > { %v675_v30 = vpop.f32.mrb[8].mxu1 }
 0x174   : > { %v2151_v31 = vpop.f32.mrb[9].mxu1 }
 0x175   : > { %v678_v32 = vpop.f32.mrb[10].mxu1 }
 0x176   : > { %v2152_v33 = vpop.f32.mrb[11].mxu1 }
 0x177   : > { %v620_v34 = vpop.f32.mrb[8].mxu0 }
 0x178   : > { %v626_v35 = vadd.f32 %v620_v34, %v571_v28  ;;  %v2145_v36 = vpop.f32.mrb[9].mxu0 }
 0x179   : > { %v623_v37 = vpop.f32.mrb[10].mxu0 }
 0x17a   : > { %v681_v38 = vadd.f32 %v675_v30, %v626_v35  ;;  %v2146_v39 = vpop.f32.mrb[11].mxu0 }
 0x17b   : > { %v785_v40 = vpop.f32.mrb[12].mxu1 }
 0x17c   : > { %v2163_v41 = vpop.f32.mrb[13].mxu1 }
 0x17d   : > { %v788_v42 = vpop.f32.mrb[14].mxu1 }
 0x17e   : > { %v2164_v43 = vpop.f32.mrb[15].mxu1 }
 0x17f   : > { %v730_v44 = vpop.f32.mrb[12].mxu0 }
 0x180   : > { %v736_v45 = vadd.f32 %v730_v44, %v681_v38  ;;  %v2157_v46 = vpop.f32.mrb[13].mxu0 }
 0x181   : > { %v733_v47 = vpop.f32.mrb[14].mxu0 }
 0x182   : > { %v791_v48 = vadd.f32 %v785_v40, %v736_v45  ;;  %v2158_v49 = vpop.f32.mrb[15].mxu0 }
 0x183   : > { %v896_v50 = vpop.f32.mrb[16].mxu1 }
 0x184   : > { %v2175_v51 = vpop.f32.mrb[17].mxu1 }
 0x185   : > { %v899_v52 = vpop.f32.mrb[18].mxu1 }
 0x186   : > { %v2176_v53 = vpop.f32.mrb[19].mxu1 }
 0x187   : > { %v840_v54 = vpop.f32.mrb[16].mxu0 }
 0x188   : > { %v846_v55 = vadd.f32 %v840_v54, %v791_v48  ;;  %v2169_v56 = vpop.f32.mrb[17].mxu0 }
 0x189   : > { %v843_v57 = vpop.f32.mrb[18].mxu0 }
 0x18a   : > { %v902_v58 = vadd.f32 %v896_v50, %v846_v55  ;;  %v2170_v59 = vpop.f32.mrb[19].mxu0 }
 0x18b   : > { %v1014_v60 = vpop.f32.mrb[20].mxu1 }
 0x18c   : > { %v2187_v61 = vpop.f32.mrb[21].mxu1 }
 0x18d   : > { %v1017_v62 = vpop.f32.mrb[22].mxu1 }
 0x18e   : > { %v2188_v63 = vpop.f32.mrb[23].mxu1 }
 0x18f   : > { %v960_v1 = vpop.f32.mrb[20].mxu0 }
 0x190   : > { %v966_v2 = vadd.f32 %v960_v1, %v902_v58  ;;  %v2181_v3 = vpop.f32.mrb[21].mxu0 }
 0x191   : > { %v963_v4 = vpop.f32.mrb[22].mxu0 }
 0x192   : > { %v1020_v5 = vadd.f32 %v1014_v60, %v966_v2  ;;  %v2182_v6 = vpop.f32.mrb[23].mxu0 }
 0x193   : > { %v1122_v7 = vpop.f32.mrb[24].mxu1 }
 0x194   : > { %v2199_v8 = vpop.f32.mrb[25].mxu1 }
 0x195   : > { %v1125_v9 = vpop.f32.mrb[26].mxu1 }
 0x196   : > { %v2200_v10 = vpop.f32.mrb[27].mxu1 }
 0x197   : > { %v1068_v11 = vpop.f32.mrb[24].mxu0 }
 0x198   : > { %v1074_v12 = vadd.f32 %v1068_v11, %v1020_v5  ;;  %v2193_v13 = vpop.f32.mrb[25].mxu0 }
 0x199   : > { %v1071_v14 = vpop.f32.mrb[26].mxu0 }
 0x19a   : > { %v1128_v15 = vadd.f32 %v1122_v7, %v1074_v12  ;;  %v2194_v16 = vpop.f32.mrb[27].mxu0  ;;  %v1847_v14 = vpop.permute.xlu0 %1846 }
 0x19b   : > { %v1230_v17 = vpop.f32.mrb[28].mxu1 }
 0x19c   : > { %v2211_v18 = vpop.f32.mrb[29].mxu1 }
 0x19d   : > { %v1233_v19 = vpop.f32.mrb[30].mxu1 }
 0x19e   : > { %v2212_v20 = vpop.f32.mrb[31].mxu1 }
 0x19f   : > { %v1176_v21 = vpop.f32.mrb[28].mxu0 }
 0x1a0   : > { %v1182_v22 = vadd.f32 %v1176_v21, %v1128_v15  ;;  %v2205_v23 = vpop.f32.mrb[29].mxu0 }
 0x1a1   : > { %v1179_v24 = vpop.f32.mrb[30].mxu0 }
 0x1a2   : > { %v1236_v25 = vadd.f32 %v1230_v17, %v1182_v22  ;;  %v2206_v0 = vpop.f32.mrb[31].mxu0 }
 0x1a3   : > { %v1338_v26 = vpop.f32.mrb[32].mxu1 }
 0x1a4   : > { %v2223_v27 = vpop.f32.mrb[33].mxu1 }
 0x1a5   : > { %v1341_v28 = vpop.f32.mrb[34].mxu1 }
 0x1a6   : > { %v2224_v29 = vpop.f32.mrb[35].mxu1 }
 0x1a7   : > { %v1284_v30 = vpop.f32.mrb[32].mxu0 }
 0x1a8   : > { %v1290_v31 = vadd.f32 %v1284_v30, %v1236_v25  ;;  %v2217_v32 = vpop.f32.mrb[33].mxu0 }
 0x1a9   : > { %v1287_v33 = vpop.f32.mrb[34].mxu0 }
 0x1aa   : > { %v1344_v34 = vadd.f32 %v1338_v26, %v1290_v31  ;;  %v2218_v35 = vpop.f32.mrb[35].mxu0 }
 0x1ab   : > { %v1458_v36 = vpop.f32.mrb[36].mxu1 }
 0x1ac   : > { %v2235_v37 = vpop.f32.mrb[37].mxu1 }
 0x1ad   : > { %v1461_v38 = vpop.f32.mrb[38].mxu1 }
 0x1ae   : > { %v2236_v39 = vpop.f32.mrb[39].mxu1 }
 0x1af   : > { %v1394_v40 = vpop.f32.mrb[36].mxu0 }
 0x1b0   : > { %v1400_v41 = vadd.f32 %v1394_v40, %v1344_v34  ;;  %v2229_v42 = vpop.f32.mrb[37].mxu0 }
 0x1b1   : > { %v1397_v43 = vpop.f32.mrb[38].mxu0 }
 0x1b2   : > { %v1464_v44 = vadd.f32 %v1458_v36, %v1400_v41  ;;  %v2230_v45 = vpop.f32.mrb[39].mxu0 }
 0x1b3   : > { %v1566_v46 = vpop.f32.mrb[40].mxu1 }
 0x1b4   : > { %v2247_v47 = vpop.f32.mrb[41].mxu1 }
 0x1b5   : > { %v1569_v48 = vpop.f32.mrb[42].mxu1 }
 0x1b6   : > { %v2248_v49 = vpop.f32.mrb[43].mxu1 }
 0x1b7   : > { %v1512_v50 = vpop.f32.mrb[40].mxu0 }
 0x1b8   : > { %v1518_v51 = vadd.f32 %v1512_v50, %v1464_v44  ;;  %v2241_v52 = vpop.f32.mrb[41].mxu0 }
 0x1b9   : > { %v1515_v53 = vpop.f32.mrb[42].mxu0 }
 0x1ba   : > { %v1572_v54 = vadd.f32 %v1566_v46, %v1518_v51  ;;  %v2242_v55 = vpop.f32.mrb[43].mxu0 }
 0x1bb   : > { %v1674_v56 = vpop.f32.mrb[44].mxu1 }
 0x1bc   : > { %v2259_v57 = vpop.f32.mrb[45].mxu1 }
 0x1bd   : > { %v1677_v58 = vpop.f32.mrb[46].mxu1 }
 0x1be   : > { %v2260_v59 = vpop.f32.mrb[47].mxu1 }
 0x1bf   : > { %v1620_v60 = vpop.f32.mrb[44].mxu0 }
 0x1c0   : > { %v1626_v61 = vadd.f32 %v1620_v60, %v1572_v54  ;;  %v2253_v62 = vpop.f32.mrb[45].mxu0 }
 0x1c1   : > { %v1623_v63 = vpop.f32.mrb[46].mxu0 }
 0x1c2   : > { %v1680_v1 = vadd.f32 %v1674_v56, %v1626_v61  ;;  %v2254_v2 = vpop.f32.mrb[47].mxu0 }
 0x1c3   : > { %v1782_v3 = vpop.f32.mrb[48].mxu1 }
 0x1c4   : > { %v2271_v4 = vpop.f32.mrb[49].mxu1 }
 0x1c5   : > { %v1785_v5 = vpop.f32.mrb[50].mxu1 }
 0x1c6   : > { %v2272_v6 = vpop.f32.mrb[51].mxu1 }
 0x1c7   : > { %v1728_v7 = vpop.f32.mrb[48].mxu0 }
 0x1c8   : > { %v1734_v8 = vadd.f32 %v1728_v7, %v1680_v1  ;;  %v2265_v9 = vpop.f32.mrb[49].mxu0 }
 0x1c9   : > { %v1731_v10 = vpop.f32.mrb[50].mxu0 }
 0x1ca   : > { %v1788_v11 = vadd.f32 %v1782_v3, %v1734_v8  ;;  %v2266_v12 = vpop.f32.mrb[51].mxu0 }
 0x1cf   : > { %v1836_v13 = vpop.f32.mrb[52].mxu0 }
 0x1d0   : > { %v1842_v15 = vadd.f32 %v1836_v13, %v1788_v11  ;;  %v2277_v16 = vpop.f32.mrb[53].mxu0 }
 0x1d1   : > { %v1839_v17 = vpop.f32.mrb[54].mxu0 }
 0x1d2   : > { %v1849_v18 = vadd.f32 %v1847_v14, %v1842_v15  ;;  %v2278_v19 = vpop.f32.mrb[55].mxu0 }
 0x1d4   : > { %vm1850_vm11 = vcmp.ge.f32.partialorder %v1849_v18, 0.0  ;;  %v1851_v20 = vmul.f32 0.2, %v1849_v18 }
 0x1d6   : > { %v1852_v21 = vsel %vm1850_vm11, %v1849_v18, %v1851_v20 }
 0x1d7   : > { %v1853_v22 = vpack.c.bf16 %v1852_v21, %v1852_v21 }
 0x1d9   : > { %1854 = vst [vmem:[%s340_s28] sm:$0x3] %v1853_v22 }
 0x1da PF: > { %s15_s22 = sadd.s32 1, %s2382_s22   ;;  %s2806_s18 = smov %s2374_s20 }
 0x1db   : > { %p12_p10 = scmp.ge.s32.totalorder %s15_s22, 18   ;;  %s2807_s19 = smov %s2378_s21 }
 0x1dc   : > { %s2808_s20 = smov %s2811_s23  ;;  %s2809_s21 = smov %s2815_s24 }
 0x1dd   :  { %14 = sbr.rel (!%p12_p10) target bundleno = 3 (0x3), region = 102 }

// kernel: dpconvlstm_forward.23
= control target key start
LH: loop header
LB: loop body
LE: loop exit
PB: predicated region body
PF: predicated region fallthrough
CT: control target
= control target key end

     0   :  { %s2388_s18 = smov 0   ;;  %s2390_s19 = smov 0   ;;  %s2761_s0 = inlined_call_operand.vmem [shape: bf16[4,4,8,256], index: 0, kind: input, shape index: {}, may-alias: {0,1,2}]   ;;  %s2762_s1 = inlined_call_operand.vmem [shape: bf16[4,4,8,256], index: 1, kind: input, shape index: {}, may-alias: {0,1,2}]   ;;  %s2763_s2 = inlined_call_operand.vmem [shape: bf16[4,4,8,256], index: 2, kind: input, shape index: {}, may-alias: {0,1,2}]   ;;  %s2764_s3 = inlined_call_operand.vmem [shape: bf16[27,4,8], index: 3, kind: input, shape index: {}]   ;;  %s2765_s4 = inlined_call_operand.vmem [shape: f32[4,1], index: 4, kind: input, shape index: {}]   ;;  %s2766_s5 = inlined_call_operand.vmem [shape: bf16[4,2,4,128], index: 5, kind: output, shape index: {}]  }
   0x1   :  { %s2392_s20 = smov 0   ;;  %s2394_s21 = smov 0  }
   0x2   :  { %s2396_s22 = smov 0  }
   0x3 LB: > { %s24_s23 = sadd.s32 1, %s2337_s20  ;;  %s27_s24 = sadd.s32 1, %s2341_s21  ;;  %s2345_s22 = sphi %s2396_s22, %s15_s22   ;;  %s2341_s21 = sphi %s2394_s21, %s2770_s21   ;;  %s2337_s20 = sphi %s2392_s20, %s2769_s20   ;;  %s2333_s19 = sphi %s2390_s19, %s2768_s19   ;;  %s2329_s18 = sphi %s2388_s18, %s2767_s18  }
   0x4   : > { %p25_p0 = scmp.ge.s32.totalorder %s24_s23, 2  ;;  %p1960_p1 = scmp.ge.s32.totalorder %s2345_s22, 1 }
   0x5   : > { %p247_p2 = scmp.lt.s32.totalorder %s2345_s22, 9 }
   0x6   : > { %s2772_s23 = smov (%p25_p0, %s24_s23), 0  ;;  %s2774_s24 = smov (!%p25_p0, %s27_s24), %s2341_s21 }
   0x7   : > { %p248_p3 = pnand %p1960_p1, %p247_p2  ;;  %p29_p4 = scmp.ge.s32.totalorder %s2774_s24, 4 }
   0x8   : > { %p302_p5 = scmp.lt.s32.totalorder (!%p248_p3), %s2333_s19, 3  ;;  %p304_p6 = scmp.lt.s32.totalorder (!%p248_p3), %s2329_s18, 3  ;;  %v2347_v0 = vmov (!%p248_p3), 0.0   ;;  %vm2348_vm0 = vmmov (!%p248_p3), 0   ;;  %vm362_vm1 = vcmask (!%p248_p3), 1043456   ;;  %vm358_vm2 = vcmask (!%p248_p3), 64512  }
   0x9   : > { %s2776_s24 = smov (%p29_p4, %s2774_s24), 0  ;;  %251 = sbr.rel (%p248_p3) target bundleno = 477 (0x1dd), region = 40 }
   0xa   : > { %2087 = vmatprep.subr.bf16.mxu0 (!%p248_p3), %v2347_v0  ;;  %2093 = vmatprep.subr.bf16.mxu1 (!%p248_p3), %v2347_v0  ;;  %v342_v5 = vld [vmem:[%s2764_s3] sm:$0x3] (!%p248_p3)  ;;  %s2349_s10 = smov (!%p248_p3), 126   ;;  %s2350_s11 = smov (!%p248_p3), 127   ;;  %v2357_v14 = vmov (!%p248_p3), 0   ;;  %vm458_vm3 = vcmask (!%p248_p3), 1031168  }
   0xb   : > { %2089 = vmatprep.mubr.msk.bf16.mxu0 (!%p248_p3), %vm2348_vm0, %v2347_v0  ;;  %2095 = vmatprep.mubr.msk.bf16.mxu1 (!%p248_p3), %vm2348_vm0, %v2347_v0  ;;  %s311_s12 = sadd.s32 (!%p248_p3), 1, %s2329_s18  ;;  %s2351_s13 = smov (!%p248_p3), 124   ;;  %v1813_v13 = vld [vmem:[%s2765_s4] sm:$0xf] (!%p248_p3)  ;;  %vm356_vm4 = vcmask (!%p248_p3), 1039360   ;;  %vm513_vm5 = vcmask (!%p248_p3), 1014784  }
   0xc   : > { %p314_p7 = scmp.lt.s32.totalorder (!%p248_p3), %s311_s12, 3  ;;  %s2352_s14 = smov (!%p248_p3), 123   ;;  %2300 = vset.pattern.permute.xlu0 (!%p248_p3), %v2357_v14  ;;  %v1972_v22 = vld [vmem:[%s2764_s3 + $0x2] sm:$0x3] (!%p248_p3)  ;;  %vm568_vm6 = vcmask (!%p248_p3), 1006592   ;;  %vm623_vm7 = vcmask (!%p248_p3), 998400  }
   0xd   : > { %s2353_s16 = smov (!%p248_p3), 122   ;;  %s2355_s6 = smov (!%p248_p3), 119   ;;  %v1979_v28 = vld [vmem:[%s2764_s3 + $0x6] sm:$0x3] (!%p248_p3)  ;;  %v1977_v32 = vld [vmem:[%s2764_s3 + $0x4] sm:$0x3] (!%p248_p3) }
   0xe   : > { %s322_s8 = sadd.s32 (!%p248_p3), 2, %s2329_s18  ;;  %vm678_vm8 = vcmask (!%p248_p3), 982016   ;;  %v1983_v38 = vld [vmem:[%s2764_s3 + $0xa] sm:$0x3] (!%p248_p3)  ;;  %vm733_vm9 = vcmask (!%p248_p3), 973824   ;;  %vm788_vm10 = vcmask (!%p248_p3), 965632  }
   0xf   : > { %p325_p8 = scmp.lt.s32.totalorder (!%p248_p3), %s322_s8, 3  ;;  %v1981_v42 = vld [vmem:[%s2764_s3 + $0x8] sm:$0x3] (!%p248_p3)  ;;  %v1987_v49 = vld [vmem:[%s2764_s3 + $0xe] sm:$0x3] (!%p248_p3)  ;;  %p335_p9 = scmp.lt.s32.totalorder (!%p248_p3), %s2329_s18, 1 }
  0x10   : > { %s2778_s19 = smov (!%p302_p5, %s2333_s19), 3  ;;  %s2780_s12 = smov (!%p314_p7, %s311_s12), 3  ;;  %v1985_v54 = vld [vmem:[%s2764_s3 + $0xc] sm:$0x3]  ;;  %v1991_v58 = vld [vmem:[%s2764_s3 + $0x12] sm:$0x3] }
  0x11   : > { %s305_s25 = scalar_select %p304_p6, %s2329_s18, 3 }
  0x12   : > { %s2425_s26 = sshll.u32 %s2778_s19, 3  ;;  %s1964_s15 = sshll.u32 %s2780_s12, 1 }
  0x13   : > { %s1961_s27 = sshll.u32 %s305_s25, 1  ;;  %s318_s17 = sadd.s32 %s1964_s15, %s2425_s26 }
  0x14   : > { %s308_s28 = sadd.s32 %s2425_s26, %s1961_s27  ;;  %s1966_s25 = sshll.u32 %s318_s17, 2 }
  0x15   : > { %s1963_s29 = sshll.u32 %s308_s28, 2  ;;  %s2354_s27 = smov 120  }
  0x16   : > { %s310_s7 = scalar_lea.vmem %s2761_s0, %s1963_s29  ;;  %s2462_s30 = scalar_lea.vmem %s2762_s1, %s1966_s25 }
  0x17   : > { %v346_v1 = vld [vmem:[%s310_s7] sm:$0xff]  ;;  %s2782_s8 = smov (!%p325_p8, %s322_s8), 3  ;;  %s2784_s18 = smov (!%p335_p9, %s2329_s18), 1 }
  0x18   : > { %v343_v2 = vld [vmem:[%s310_s7] sm:$0xf]  ;;  %v1973_v3 = vcombine.low %v346_v1, %v346_v1  ;;  %v1974_v6 = vcombine.high %v346_v1, %v346_v1  ;;  %s2356_s7 = smov 118   ;;  %s1967_s9 = sshll.u32 %s2782_s8, 1  ;;  %v1989_v1 = vld [vmem:[%s2764_s3 + $0x10] sm:$0x3] }
  0x19   : > { %v410_v4 = vsel %vm362_vm1, %v343_v2, 0  ;;  %v889_v7 = vld [vmem:[%s2462_s30] sm:$0xff]  ;;  %s329_s12 = sadd.s32 %s1967_s9, %s2425_s26 }
  0x1a   : > { %2094 = vmatpush3.bf16.msra.mxu1 %v410_v4  ;;  %454 = vrot.lane.b32.xlu1 %v1973_v3, %s2349_s10  ;;  %v1995_v8 = vcombine.high %v889_v7, %v889_v7  ;;  %v1994_v9 = vcombine.low %v889_v7, %v889_v7  ;;  %s1969_s15 = sshll.u32 %s329_s12, 2  ;;  %v839_v47 = vld [vmem:[%s2462_s30] sm:$0xf] }
  0x1b   : > { %352 = vrot.lane.b32.xlu0 %v1973_v3, %s2350_s11  ;;  %2105 = vmatprep.subr.bf16.mxu1 %v2347_v0  ;;  %s2486_s28 = scalar_lea.vmem %s2763_s2, %s1969_s15  ;;  %v844_v52 = vsel %vm362_vm1, %v839_v47, 0 }
  0x1c   : > { %v1377_v10 = vld [vmem:[%s2486_s28] sm:$0xff] }
  0x1d   : > { %2096 = vmatmul.mubr.msk.bf16.vlgmr.msra.gmra.mrb[0].mxu1 %vm358_vm2, %v342_v5  ;;  %v2015_v11 = vcombine.high %v1377_v10, %v1377_v10  ;;  %v2014_v12 = vcombine.low %v1377_v10, %v1377_v10  ;;  %v1997_v5 = vld [vmem:[%s2764_s3 + $0x16] sm:$0x3] }
  0x1e   : > { %2107 = vmatprep.mubr.msk.bf16.mxu1 %vm2348_vm0, %v2347_v0  ;;  %456 = vrot.lane.b32.xlu1 %v1974_v6, %s2349_s10 }
  0x1f   : > { %354 = vrot.lane.b32.xlu0 %v1974_v6, %s2350_s11 }
  0x22   : > { %511 = vrot.lane.b32.xlu1 %v1974_v6, %s2351_s13 }
  0x23   : > { %509 = vrot.lane.b32.xlu0 %v1973_v3, %s2351_s13 }
  0x26   : > { %566 = vrot.lane.b32.xlu1 %v1974_v6, %s2352_s14 }
  0x27   : > { %564 = vrot.lane.b32.xlu0 %v1973_v3, %s2352_s14 }
  0x2a   : > { %621 = vrot.lane.b32.xlu1 %v1974_v6, %s2353_s16 }
  0x2b   : > { %619 = vrot.lane.b32.xlu0 %v1973_v3, %s2353_s16 }
  0x2e   : > { %676 = vrot.lane.b32.xlu1 %v1974_v6, %s2354_s27 }
  0x2f   : > { %674 = vrot.lane.b32.xlu0 %v1973_v3, %s2354_s27 }
  0x32   : > { %731 = vrot.lane.b32.xlu1 %v1974_v6, %s2355_s6 }
  0x33   : > { %729 = vrot.lane.b32.xlu0 %v1973_v3, %s2355_s6 }
  0x36   : > { %786 = vrot.lane.b32.xlu1 %v1974_v6, %s2356_s7 }
  0x37   : > { %784 = vrot.lane.b32.xlu0 %v1973_v3, %s2356_s7 }
  0x3a   : > { %897 = vrot.lane.b32.xlu1 %v1995_v8, %s2350_s11 }
  0x3b   : > { %895 = vrot.lane.b32.xlu0 %v1994_v9, %s2350_s11 }
  0x3e   : > { %951 = vrot.lane.b32.xlu1 %v1995_v8, %s2349_s10 }
  0x3f   : > { %949 = vrot.lane.b32.xlu0 %v1994_v9, %s2349_s10 }
  0x42   : > { %1005 = vrot.lane.b32.xlu1 %v1995_v8, %s2351_s13 }
  0x43   : > { %1003 = vrot.lane.b32.xlu0 %v1994_v9, %s2351_s13 }
  0x46   : > { %1059 = vrot.lane.b32.xlu1 %v1995_v8, %s2352_s14 }
  0x47   : > { %1057 = vrot.lane.b32.xlu0 %v1994_v9, %s2352_s14 }
  0x4a   : > { %1113 = vrot.lane.b32.xlu1 %v1995_v8, %s2353_s16 }
  0x4b   : > { %1111 = vrot.lane.b32.xlu0 %v1994_v9, %s2353_s16 }
  0x4e   : > { %1167 = vrot.lane.b32.xlu1 %v1995_v8, %s2354_s27 }
  0x4f   : > { %1165 = vrot.lane.b32.xlu0 %v1994_v9, %s2354_s27 }
  0x52   : > { %1221 = vrot.lane.b32.xlu1 %v1995_v8, %s2355_s6 }
  0x53   : > { %1219 = vrot.lane.b32.xlu0 %v1994_v9, %s2355_s6 }
  0x56   : > { %1275 = vrot.lane.b32.xlu1 %v1995_v8, %s2356_s7 }
  0x57   : > { %1273 = vrot.lane.b32.xlu0 %v1994_v9, %s2356_s7 }
  0x5a   : > { %1385 = vrot.lane.b32.xlu1 %v2015_v11, %s2350_s11 }
  0x5b   : > { %1383 = vrot.lane.b32.xlu0 %v2014_v12, %s2350_s11 }
  0x5e   : > { %1439 = vrot.lane.b32.xlu1 %v2015_v11, %s2349_s10 }
  0x5f   : > { %1437 = vrot.lane.b32.xlu0 %v2014_v12, %s2349_s10 }
  0x62   : > { %1493 = vrot.lane.b32.xlu1 %v2015_v11, %s2351_s13 }
  0x63   : > { %1491 = vrot.lane.b32.xlu0 %v2014_v12, %s2351_s13 }
  0x66   : > { %1547 = vrot.lane.b32.xlu1 %v2015_v11, %s2352_s14 }
  0x67   : > { %1545 = vrot.lane.b32.xlu0 %v2014_v12, %s2352_s14 }
  0x6a   : > { %1601 = vrot.lane.b32.xlu1 %v2015_v11, %s2353_s16 }
  0x6b   : > { %1599 = vrot.lane.b32.xlu0 %v2014_v12, %s2353_s16 }
  0x6e   : > { %1655 = vrot.lane.b32.xlu1 %v2015_v11, %s2354_s27 }
  0x6f   : > { %1653 = vrot.lane.b32.xlu0 %v2014_v12, %s2354_s27 }
  0x72   : > { %1709 = vrot.lane.b32.xlu1 %v2015_v11, %s2355_s6 }
  0x73   : > { %1707 = vrot.lane.b32.xlu0 %v2014_v12, %s2355_s6 }
  0x76   : > { %1763 = vrot.lane.b32.xlu1 %v2015_v11, %s2356_s7  ;;  %v1993_v11 = vld [vmem:[%s2764_s3 + $0x14] sm:$0x3] }
  0x77   : > { %1761 = vrot.lane.b32.xlu0 %v2014_v12, %s2356_s7 }
  0x7b   : > { %1816 = vperm.xlu0 %2300, %v1813_v13  }
  0x8c   : > { %v455_v15 = vpop.permute.xlu1 %454 }
  0x8d   : > { %v353_v16 = vpop.permute.xlu0 %352 }
  0x90   : > { %v457_v17 = vpop.permute.xlu1 %456 }
  0x91   : > { %v355_v18 = vpop.permute.xlu0 %354  ;;  %v459_v19 = vsel %vm458_vm3, %v455_v15, %v457_v17  ;;  %v2001_v15 = vld [vmem:[%s2764_s3 + $0x1a] sm:$0x3] }
  0x92   : > { %v357_v20 = vsel %vm356_vm4, %v353_v16, %v355_v18  ;;  %v464_v23 = vsel %vm362_vm1, %v459_v19, 0 }
  0x93   : > { %v364_v21 = vsel %vm362_vm1, %v357_v20, 0 }
  0x94   : > { %2088 = vmatpush3.bf16.msra.mxu0 %v364_v21  ;;  %v512_v24 = vpop.permute.xlu1 %511  ;;  %v1999_v21 = vld [vmem:[%s2764_s3 + $0x18] sm:$0x3] }
  0x95   : > { %2099 = vmatprep.subr.bf16.mxu0 %v2347_v0  ;;  %v510_v25 = vpop.permute.xlu0 %509 }
  0x96   : > { %v514_v26 = vsel %vm513_vm5, %v510_v25, %v512_v24  ;;  %v2005_v25 = vld [vmem:[%s2764_s3 + $0x1e] sm:$0x3] }
  0x97   : > { %2090 = vmatmul.mubr.msk.bf16.vlgmr.msra.gmra.mrb[0].mxu0 %vm358_vm2, %v1972_v22  ;;  %v519_v27 = vsel %vm362_vm1, %v514_v26, 0 }
  0x98   : > { %2100 = vmatpush3.bf16.msra.mxu0 %v464_v23  ;;  %2106 = vmatpush3.bf16.msra.mxu1 %v519_v27  ;;  %v567_v29 = vpop.permute.xlu1 %566 }
  0x99   : > { %v565_v30 = vpop.permute.xlu0 %564  ;;  %2101 = vmatprep.mubr.msk.bf16.mxu0 %vm2348_vm0, %v2347_v0  ;;  %2111 = vmatprep.subr.bf16.mxu0 %v2347_v0 }
  0x9a   : > { %v569_v31 = vsel %vm568_vm6, %v565_v30, %v567_v29  ;;  %2117 = vmatprep.subr.bf16.mxu1 %v2347_v0 }
  0x9b   : > { %2108 = vmatmul.mubr.msk.bf16.vlgmr.msra.gmra.mrb[4].mxu1 %vm358_vm2, %v1979_v28  ;;  %v574_v33 = vsel %vm362_vm1, %v569_v31, 0  ;;  %v2003_v31 = vld [vmem:[%s2764_s3 + $0x1c] sm:$0x3] }
  0x9c   : > { %2119 = vmatprep.mubr.msk.bf16.mxu1 %vm2348_vm0, %v2347_v0  ;;  %v622_v34 = vpop.permute.xlu1 %621 }
  0x9d   : > { %v620_v35 = vpop.permute.xlu0 %619 }
  0x9e   : > { %v624_v36 = vsel %vm623_vm7, %v620_v35, %v622_v34 }
  0x9f   : > { %2102 = vmatmul.mubr.msk.bf16.vlgmr.msra.gmra.mrb[4].mxu0 %vm358_vm2, %v1977_v32  ;;  %v629_v37 = vsel %vm362_vm1, %v624_v36, 0  ;;  %v2009_v36 = vld [vmem:[%s2764_s3 + $0x22] sm:$0x3] }
  0xa0   : > { %2112 = vmatpush3.bf16.msra.mxu0 %v574_v33  ;;  %2118 = vmatpush3.bf16.msra.mxu1 %v629_v37  ;;  %v677_v39 = vpop.permute.xlu1 %676 }
  0xa1   : > { %v675_v40 = vpop.permute.xlu0 %674  ;;  %2113 = vmatprep.mubr.msk.bf16.mxu0 %vm2348_vm0, %v2347_v0  ;;  %2123 = vmatprep.subr.bf16.mxu0 %v2347_v0 }
  0xa2   : > { %v679_v41 = vsel %vm678_vm8, %v675_v40, %v677_v39  ;;  %2129 = vmatprep.subr.bf16.mxu1 %v2347_v0  ;;  %v1327_v40 = vld [vmem:[%s2486_s28] sm:$0xf]  ;;  %s1970_s28 = sshll.u32 %s2778_s19, 1 }
  0xa3   : > { %2120 = vmatmul.mubr.msk.bf16.vlgmr.msra.gmra.mrb[8].mxu1 %vm358_vm2, %v1983_v38  ;;  %v684_v43 = vsel %vm362_vm1, %v679_v41, 0  ;;  %v2007_v41 = vld [vmem:[%s2764_s3 + $0x20] sm:$0x3]  ;;  %s338_s11 = sadd.s32 %s1970_s28, %s2784_s18 }
  0xa4   : > { %2131 = vmatprep.mubr.msk.bf16.mxu1 %vm2348_vm0, %v2347_v0  ;;  %v732_v44 = vpop.permute.xlu1 %731  ;;  %s1971_s13 = sshll.u32 %s338_s11, 1 }
  0xa5   : > { %v730_v45 = vpop.permute.xlu0 %729  ;;  %s340_s27 = scalar_lea.vmem %s2766_s5, %s1971_s13 }
  0xa6   : > { %v734_v46 = vsel %vm733_vm9, %v730_v45, %v732_v44 }
  0xa7   : > { %2114 = vmatmul.mubr.msk.bf16.vlgmr.msra.gmra.mrb[8].mxu0 %vm358_vm2, %v1981_v42  ;;  %v739_v48 = vsel %vm362_vm1, %v734_v46, 0  ;;  %v1332_v42 = vsel %vm362_vm1, %v1327_v40, 0  ;;  %v2013_v46 = vld [vmem:[%s2764_s3 + $0x26] sm:$0x3] }
  0xa8   : > { %2124 = vmatpush3.bf16.msra.mxu0 %v684_v43  ;;  %2130 = vmatpush3.bf16.msra.mxu1 %v739_v48  ;;  %v787_v50 = vpop.permute.xlu1 %786 }
  0xa9   : > { %v785_v51 = vpop.permute.xlu0 %784  ;;  %2125 = vmatprep.mubr.msk.bf16.mxu0 %vm2348_vm0, %v2347_v0  ;;  %2135 = vmatprep.subr.bf16.mxu0 %v2347_v0 }
  0xaa   : > { %v789_v53 = vsel %vm788_vm10, %v785_v51, %v787_v50  ;;  %2141 = vmatprep.subr.bf16.mxu1 %v2347_v0  ;;  %v2011_v51 = vld [vmem:[%s2764_s3 + $0x24] sm:$0x3] }
  0xab   : > { %2132 = vmatmul.mubr.msk.bf16.vlgmr.msra.gmra.mrb[12].mxu1 %vm358_vm2, %v1987_v49  ;;  %v794_v55 = vsel %vm362_vm1, %v789_v53, 0 }
  0xac   : > { %2142 = vmatpush3.bf16.msra.mxu1 %v844_v52  ;;  %2143 = vmatprep.mubr.msk.bf16.mxu1 %vm2348_vm0, %v2347_v0  ;;  %v898_v56 = vpop.permute.xlu1 %897 }
  0xad   : > { %v896_v57 = vpop.permute.xlu0 %895  ;;  %2153 = vmatprep.subr.bf16.mxu1 %v2347_v0 }
  0xae   : > { %v899_v61 = vsel %vm356_vm4, %v896_v57, %v898_v56  ;;  %v2019_v56 = vld [vmem:[%s2764_s3 + $0x2a] sm:$0x3] }
  0xaf   : > { %2126 = vmatmul.mubr.msk.bf16.vlgmr.msra.gmra.mrb[12].mxu0 %vm358_vm2, %v1985_v54  ;;  %v904_v2 = vsel %vm362_vm1, %v899_v61, 0  ;;  %v2017_v61 = vld [vmem:[%s2764_s3 + $0x28] sm:$0x3] }
  0xb0   : > { %2136 = vmatpush3.bf16.msra.mxu0 %v794_v55  ;;  %2137 = vmatprep.mubr.msk.bf16.mxu0 %vm2348_vm0, %v2347_v0  ;;  %v952_v59 = vpop.permute.xlu1 %951 }
  0xb1   : > { %2147 = vmatprep.subr.bf16.mxu0 %v2347_v0  ;;  %v950_v60 = vpop.permute.xlu0 %949 }
  0xb2   : > { %v953_v62 = vsel %vm458_vm3, %v950_v60, %v952_v59 }
  0xb3   : > { %v958_v63 = vsel %vm362_vm1, %v953_v62, 0  ;;  %2144 = vmatmul.mubr.msk.bf16.vlgmr.msra.gmra.mrb[16].mxu1 %vm358_vm2, %v1991_v58 }
  0xb4   : > { %2154 = vmatpush3.bf16.msra.mxu1 %v958_v63  ;;  %2155 = vmatprep.mubr.msk.bf16.mxu1 %vm2348_vm0, %v2347_v0  ;;  %v1006_v3 = vpop.permute.xlu1 %1005 }
  0xb5   : > { %v1004_v4 = vpop.permute.xlu0 %1003  ;;  %2165 = vmatprep.subr.bf16.mxu1 %v2347_v0 }
  0xb6   : > { %v1007_v8 = vsel %vm513_vm5, %v1004_v4, %v1006_v3  ;;  %v2023_v3 = vld [vmem:[%s2764_s3 + $0x2e] sm:$0x3] }
  0xb7   : > { %2138 = vmatmul.mubr.msk.bf16.vlgmr.msra.gmra.mrb[16].mxu0 %vm358_vm2, %v1989_v1  ;;  %v1012_v12 = vsel %vm362_vm1, %v1007_v8, 0 }
  0xb8   : > { %2148 = vmatpush3.bf16.msra.mxu0 %v904_v2  ;;  %2149 = vmatprep.mubr.msk.bf16.mxu0 %vm2348_vm0, %v2347_v0  ;;  %v1060_v6 = vpop.permute.xlu1 %1059 }
  0xb9   : > { %2159 = vmatprep.subr.bf16.mxu0 %v2347_v0  ;;  %v1058_v7 = vpop.permute.xlu0 %1057 }
  0xba   : > { %v1061_v9 = vsel %vm568_vm6, %v1058_v7, %v1060_v6  ;;  %v2021_v6 = vld [vmem:[%s2764_s3 + $0x2c] sm:$0x3] }
  0xbb   : > { %v1066_v10 = vsel %vm362_vm1, %v1061_v9, 0  ;;  %2156 = vmatmul.mubr.msk.bf16.vlgmr.msra.gmra.mrb[20].mxu1 %vm358_vm2, %v1997_v5 }
  0xbc   : > { %2166 = vmatpush3.bf16.msra.mxu1 %v1066_v10  ;;  %2167 = vmatprep.mubr.msk.bf16.mxu1 %vm2348_vm0, %v2347_v0  ;;  %v1114_v13 = vpop.permute.xlu1 %1113  ;;  %v2027_v10 = vld [vmem:[%s2764_s3 + $0x32] sm:$0x3] }
  0xbd   : > { %v1112_v14 = vpop.permute.xlu0 %1111  ;;  %2177 = vmatprep.subr.bf16.mxu1 %v2347_v0 }
  0xbe   : > { %v1115_v18 = vsel %vm623_vm7, %v1112_v14, %v1114_v13 }
  0xbf   : > { %2150 = vmatmul.mubr.msk.bf16.vlgmr.msra.gmra.mrb[20].mxu0 %vm358_vm2, %v1993_v11  ;;  %v1120_v22 = vsel %vm362_vm1, %v1115_v18, 0  ;;  %v2029_v18 = vld [vmem:[%s2764_s3 + $0x34] sm:$0x3] }
  0xc0   : > { %2160 = vmatpush3.bf16.msra.mxu0 %v1012_v12  ;;  %2161 = vmatprep.mubr.msk.bf16.mxu0 %vm2348_vm0, %v2347_v0  ;;  %v1168_v16 = vpop.permute.xlu1 %1167 }
  0xc1   : > { %2171 = vmatprep.subr.bf16.mxu0 %v2347_v0  ;;  %v1166_v17 = vpop.permute.xlu0 %1165 }
  0xc2   : > { %v1169_v19 = vsel %vm678_vm8, %v1166_v17, %v1168_v16  ;;  %v2025_v16 = vld [vmem:[%s2764_s3 + $0x30] sm:$0x3] }
  0xc3   : > { %v1174_v20 = vsel %vm362_vm1, %v1169_v19, 0  ;;  %2168 = vmatmul.mubr.msk.bf16.vlgmr.msra.gmra.mrb[24].mxu1 %vm358_vm2, %v2001_v15 }
  0xc4   : > { %2178 = vmatpush3.bf16.msra.mxu1 %v1174_v20  ;;  %2179 = vmatprep.mubr.msk.bf16.mxu1 %vm2348_vm0, %v2347_v0  ;;  %v1222_v23 = vpop.permute.xlu1 %1221 }
  0xc5   : > { %v1220_v24 = vpop.permute.xlu0 %1219  ;;  %2189 = vmatprep.subr.bf16.mxu1 %v2347_v0 }
  0xc6   : > { %v1223_v28 = vsel %vm733_vm9, %v1220_v24, %v1222_v23 }
  0xc7   : > { %2162 = vmatmul.mubr.msk.bf16.vlgmr.msra.gmra.mrb[24].mxu0 %vm358_vm2, %v1999_v21  ;;  %v1228_v32 = vsel %vm362_vm1, %v1223_v28, 0 }
  0xc8   : > { %2172 = vmatpush3.bf16.msra.mxu0 %v1120_v22  ;;  %2173 = vmatprep.mubr.msk.bf16.mxu0 %vm2348_vm0, %v2347_v0  ;;  %v1276_v26 = vpop.permute.xlu1 %1275 }
  0xc9   : > { %2183 = vmatprep.subr.bf16.mxu0 %v2347_v0  ;;  %v1274_v27 = vpop.permute.xlu0 %1273 }
  0xca   : > { %v1277_v29 = vsel %vm788_vm10, %v1274_v27, %v1276_v26 }
  0xcb   : > { %2180 = vmatmul.mubr.msk.bf16.vlgmr.msra.gmra.mrb[28].mxu1 %vm358_vm2, %v2005_v25  ;;  %v1282_v30 = vsel %vm362_vm1, %v1277_v29, 0 }
  0xcc   : > { %2190 = vmatpush3.bf16.msra.mxu1 %v1282_v30  ;;  %2191 = vmatprep.mubr.msk.bf16.mxu1 %vm2348_vm0, %v2347_v0  ;;  %v1386_v33 = vpop.permute.xlu1 %1385 }
  0xcd   : > { %v1384_v34 = vpop.permute.xlu0 %1383  ;;  %2201 = vmatprep.subr.bf16.mxu1 %v2347_v0 }
  0xce   : > { %v1387_v35 = vsel %vm356_vm4, %v1384_v34, %v1386_v33 }
  0xcf   : > { %2174 = vmatmul.mubr.msk.bf16.vlgmr.msra.gmra.mrb[28].mxu0 %vm358_vm2, %v2003_v31  ;;  %v1392_v37 = vsel %vm362_vm1, %v1387_v35, 0 }
  0xd0   : > { %2184 = vmatpush3.bf16.msra.mxu0 %v1228_v32  ;;  %2185 = vmatprep.mubr.msk.bf16.mxu0 %vm2348_vm0, %v2347_v0  ;;  %v1440_v38 = vpop.permute.xlu1 %1439 }
  0xd1   : > { %2195 = vmatprep.subr.bf16.mxu0 %v2347_v0  ;;  %v1438_v39 = vpop.permute.xlu0 %1437 }
  0xd2   : > { %v1441_v50 = vsel %vm458_vm3, %v1438_v39, %v1440_v38 }
  0xd3   : > { %2192 = vmatmul.mubr.msk.bf16.vlgmr.msra.gmra.mrb[32].mxu1 %vm358_vm2, %v2009_v36  ;;  %v1446_v52 = vsel %vm362_vm1, %v1441_v50, 0 }
  0xd4   : > { %2202 = vmatpush3.bf16.msra.mxu1 %v1392_v37  ;;  %2203 = vmatprep.mubr.msk.bf16.mxu1 %vm2348_vm0, %v2347_v0  ;;  %v1494_v43 = vpop.permute.xlu1 %1493 }
  0xd5   : > { %v1492_v44 = vpop.permute.xlu0 %1491  ;;  %2213 = vmatprep.subr.bf16.mxu1 %v2347_v0 }
  0xd6   : > { %v1495_v45 = vsel %vm513_vm5, %v1492_v44, %v1494_v43 }
  0xd7   : > { %2186 = vmatmul.mubr.msk.bf16.vlgmr.msra.gmra.mrb[32].mxu0 %vm358_vm2, %v2007_v41  ;;  %v1500_v47 = vsel %vm362_vm1, %v1495_v45, 0 }
  0xd8   : > { %2196 = vmatpush3.bf16.msra.mxu0 %v1332_v42  ;;  %2197 = vmatprep.mubr.msk.bf16.mxu0 %vm2348_vm0, %v2347_v0  ;;  %v1548_v48 = vpop.permute.xlu1 %1547 }
  0xd9   : > { %2207 = vmatprep.subr.bf16.mxu0 %v2347_v0  ;;  %v1546_v49 = vpop.permute.xlu0 %1545 }
  0xda   : > { %v1549_v60 = vsel %vm568_vm6, %v1546_v49, %v1548_v48 }
  0xdb   : > { %2204 = vmatmul.mubr.msk.bf16.vlgmr.msra.gmra.mrb[36].mxu1 %vm358_vm2, %v2013_v46  ;;  %v1554_v62 = vsel %vm362_vm1, %v1549_v60, 0 }
  0xdc   : > { %2214 = vmatpush3.bf16.msra.mxu1 %v1500_v47  ;;  %2215 = vmatprep.mubr.msk.bf16.mxu1 %vm2348_vm0, %v2347_v0  ;;  %v1602_v53 = vpop.permute.xlu1 %1601 }
  0xdd   : > { %v1600_v54 = vpop.permute.xlu0 %1599  ;;  %2225 = vmatprep.subr.bf16.mxu1 %v2347_v0 }
  0xde   : > { %v1603_v55 = vsel %vm623_vm7, %v1600_v54, %v1602_v53 }
  0xdf   : > { %2198 = vmatmul.mubr.msk.bf16.vlgmr.msra.gmra.mrb[36].mxu0 %vm358_vm2, %v2011_v51  ;;  %v1608_v57 = vsel %vm362_vm1, %v1603_v55, 0 }
  0xe0   : > { %2208 = vmatpush3.bf16.msra.mxu0 %v1446_v52  ;;  %2209 = vmatprep.mubr.msk.bf16.mxu0 %vm2348_vm0, %v2347_v0  ;;  %v1656_v58 = vpop.permute.xlu1 %1655 }
  0xe1   : > { %2219 = vmatprep.subr.bf16.mxu0 %v2347_v0  ;;  %v1654_v59 = vpop.permute.xlu0 %1653 }
  0xe2   : > { %v1657_v5 = vsel %vm678_vm8, %v1654_v59, %v1656_v58 }
  0xe3   : > { %2216 = vmatmul.mubr.msk.bf16.vlgmr.msra.gmra.mrb[40].mxu1 %vm358_vm2, %v2019_v56  ;;  %v1662_v7 = vsel %vm362_vm1, %v1657_v5, 0 }
  0xe4   : > { %2226 = vmatpush3.bf16.msra.mxu1 %v1608_v57  ;;  %2227 = vmatprep.mubr.msk.bf16.mxu1 %vm2348_vm0, %v2347_v0  ;;  %v1710_v63 = vpop.permute.xlu1 %1709 }
  0xe5   : > { %v1708_v1 = vpop.permute.xlu0 %1707  ;;  %2237 = vmatprep.subr.bf16.mxu1 %v2347_v0 }
  0xe6   : > { %v1711_v2 = vsel %vm733_vm9, %v1708_v1, %v1710_v63 }
  0xe7   : > { %2210 = vmatmul.mubr.msk.bf16.vlgmr.msra.gmra.mrb[40].mxu0 %vm358_vm2, %v2017_v61  ;;  %v1716_v4 = vsel %vm362_vm1, %v1711_v2, 0 }
  0xe8   : > { %2220 = vmatpush3.bf16.msra.mxu0 %v1554_v62  ;;  %2221 = vmatprep.mubr.msk.bf16.mxu0 %vm2348_vm0, %v2347_v0  ;;  %v1764_v8 = vpop.permute.xlu1 %1763 }
  0xe9   : > { %2231 = vmatprep.subr.bf16.mxu0 %v2347_v0  ;;  %v1762_v9 = vpop.permute.xlu0 %1761 }
  0xea   : > { %v1765_v13 = vsel %vm788_vm10, %v1762_v9, %v1764_v8 }
  0xeb   : > { %2228 = vmatmul.mubr.msk.bf16.vlgmr.msra.gmra.mrb[44].mxu1 %vm358_vm2, %v2023_v3  ;;  %v1770_v17 = vsel %vm362_vm1, %v1765_v13, 0 }
  0xec   : > { %2238 = vmatpush3.bf16.msra.mxu1 %v1716_v4  ;;  %2239 = vmatprep.mubr.msk.bf16.mxu1 %vm2348_vm0, %v2347_v0 }
  0xef   : > { %2222 = vmatmul.mubr.msk.bf16.vlgmr.msra.gmra.mrb[44].mxu0 %vm358_vm2, %v2021_v6 }
  0xf0   : > { %2232 = vmatpush3.bf16.msra.mxu0 %v1662_v7  ;;  %2233 = vmatprep.mubr.msk.bf16.mxu0 %vm2348_vm0, %v2347_v0  ;;  %v446_v11 = vpop.f32.mrb[0].mxu1 }
  0xf1   : > { %2243 = vmatprep.subr.bf16.mxu0 %v2347_v0  ;;  %v2097_v12 = vpop.f32.mrb[1].mxu1 }
  0xf2   : > { %v449_v14 = vpop.f32.mrb[2].mxu1 }
  0xf3   : > { %2240 = vmatmul.mubr.msk.bf16.vlgmr.msra.gmra.mrb[48].mxu1 %vm358_vm2, %v2027_v10  ;;  %v2098_v15 = vpop.f32.mrb[3].mxu1 }
  0xf7   : > { %2234 = vmatmul.mubr.msk.bf16.vlgmr.msra.gmra.mrb[48].mxu0 %vm358_vm2, %v2025_v16 }
  0xf8   : > { %2244 = vmatpush3.bf16.msra.mxu0 %v1770_v17  ;;  %2245 = vmatprep.mubr.msk.bf16.mxu0 %vm2348_vm0, %v2347_v0 }
  0xff   : > { %2246 = vmatmul.mubr.msk.bf16.vlgmr.msra.gmra.mrb[52].mxu0 %vm358_vm2, %v2029_v18 }
 0x16a   : > { %v400_v19 = vpop.f32.mrb[0].mxu0 }
 0x16b   : > { %v2091_v20 = vpop.f32.mrb[1].mxu0  ;;  %v447_v21 = vadd.f32 %v446_v11, %v400_v19 }
 0x16c   : > { %v403_v22 = vpop.f32.mrb[2].mxu0 }
 0x16d   : > { %v2092_v23 = vpop.f32.mrb[3].mxu0 }
 0x16e   : > { %v555_v24 = vpop.f32.mrb[4].mxu1 }
 0x16f   : > { %v2109_v25 = vpop.f32.mrb[5].mxu1 }
 0x170   : > { %v558_v26 = vpop.f32.mrb[6].mxu1 }
 0x171   : > { %v2110_v27 = vpop.f32.mrb[7].mxu1 }
 0x172   : > { %v500_v28 = vpop.f32.mrb[4].mxu0 }
 0x173   : > { %v506_v29 = vadd.f32 %v500_v28, %v447_v21  ;;  %v2103_v30 = vpop.f32.mrb[5].mxu0 }
 0x174   : > { %v503_v31 = vpop.f32.mrb[6].mxu0 }
 0x175   : > { %v561_v0 = vadd.f32 %v555_v24, %v506_v29  ;;  %v2104_v32 = vpop.f32.mrb[7].mxu0 }
 0x176   : > { %v665_v33 = vpop.f32.mrb[8].mxu1 }
 0x177   : > { %v2121_v34 = vpop.f32.mrb[9].mxu1 }
 0x178   : > { %v668_v35 = vpop.f32.mrb[10].mxu1 }
 0x179   : > { %v2122_v36 = vpop.f32.mrb[11].mxu1 }
 0x17a   : > { %v610_v37 = vpop.f32.mrb[8].mxu0 }
 0x17b   : > { %v616_v38 = vadd.f32 %v610_v37, %v561_v0  ;;  %v2115_v39 = vpop.f32.mrb[9].mxu0 }
 0x17c   : > { %v613_v40 = vpop.f32.mrb[10].mxu0 }
 0x17d   : > { %v671_v41 = vadd.f32 %v665_v33, %v616_v38  ;;  %v2116_v42 = vpop.f32.mrb[11].mxu0 }
 0x17e   : > { %v775_v43 = vpop.f32.mrb[12].mxu1 }
 0x17f   : > { %v2133_v44 = vpop.f32.mrb[13].mxu1 }
 0x180   : > { %v778_v45 = vpop.f32.mrb[14].mxu1 }
 0x181   : > { %v2134_v46 = vpop.f32.mrb[15].mxu1 }
 0x182   : > { %v720_v47 = vpop.f32.mrb[12].mxu0 }
 0x183   : > { %v726_v48 = vadd.f32 %v720_v47, %v671_v41  ;;  %v2127_v49 = vpop.f32.mrb[13].mxu0 }
 0x184   : > { %v723_v50 = vpop.f32.mrb[14].mxu0 }
 0x185   : > { %v781_v51 = vadd.f32 %v775_v43, %v726_v48  ;;  %v2128_v52 = vpop.f32.mrb[15].mxu0 }
 0x186   : > { %v880_v53 = vpop.f32.mrb[16].mxu1 }
 0x187   : > { %v2145_v54 = vpop.f32.mrb[17].mxu1 }
 0x188   : > { %v883_v55 = vpop.f32.mrb[18].mxu1 }
 0x189   : > { %v2146_v56 = vpop.f32.mrb[19].mxu1 }
 0x18a   : > { %v830_v57 = vpop.f32.mrb[16].mxu0 }
 0x18b   : > { %v836_v58 = vadd.f32 %v830_v57, %v781_v51  ;;  %v2139_v59 = vpop.f32.mrb[17].mxu0 }
 0x18c   : > { %v833_v60 = vpop.f32.mrb[18].mxu0 }
 0x18d   : > { %v886_v61 = vadd.f32 %v880_v53, %v836_v58  ;;  %v2140_v62 = vpop.f32.mrb[19].mxu0 }
 0x18e   : > { %v994_v63 = vpop.f32.mrb[20].mxu1 }
 0x18f   : > { %v2157_v1 = vpop.f32.mrb[21].mxu1 }
 0x190   : > { %v997_v2 = vpop.f32.mrb[22].mxu1 }
 0x191   : > { %v2158_v3 = vpop.f32.mrb[23].mxu1 }
 0x192   : > { %v940_v4 = vpop.f32.mrb[20].mxu0 }
 0x193   : > { %v946_v5 = vadd.f32 %v940_v4, %v886_v61  ;;  %v2151_v6 = vpop.f32.mrb[21].mxu0 }
 0x194   : > { %v943_v7 = vpop.f32.mrb[22].mxu0 }
 0x195   : > { %v1000_v8 = vadd.f32 %v994_v63, %v946_v5  ;;  %v2152_v9 = vpop.f32.mrb[23].mxu0 }
 0x196   : > { %v1102_v10 = vpop.f32.mrb[24].mxu1 }
 0x197   : > { %v2169_v11 = vpop.f32.mrb[25].mxu1 }
 0x198   : > { %v1105_v12 = vpop.f32.mrb[26].mxu1 }
 0x199   : > { %v2170_v13 = vpop.f32.mrb[27].mxu1 }
 0x19a   : > { %v1048_v14 = vpop.f32.mrb[24].mxu0 }
 0x19b   : > { %v1054_v15 = vadd.f32 %v1048_v14, %v1000_v8  ;;  %v2163_v16 = vpop.f32.mrb[25].mxu0 }
 0x19c   : > { %v1051_v17 = vpop.f32.mrb[26].mxu0 }
 0x19d   : > { %v1108_v18 = vadd.f32 %v1102_v10, %v1054_v15  ;;  %v2164_v19 = vpop.f32.mrb[27].mxu0  ;;  %v1817_v17 = vpop.permute.xlu0 %1816 }
 0x19e   : > { %v1210_v20 = vpop.f32.mrb[28].mxu1 }
 0x19f   : > { %v2181_v21 = vpop.f32.mrb[29].mxu1 }
 0x1a0   : > { %v1213_v22 = vpop.f32.mrb[30].mxu1 }
 0x1a1   : > { %v2182_v23 = vpop.f32.mrb[31].mxu1 }
 0x1a2   : > { %v1156_v24 = vpop.f32.mrb[28].mxu0 }
 0x1a3   : > { %v1162_v25 = vadd.f32 %v1156_v24, %v1108_v18  ;;  %v2175_v26 = vpop.f32.mrb[29].mxu0 }
 0x1a4   : > { %v1159_v27 = vpop.f32.mrb[30].mxu0 }
 0x1a5   : > { %v1216_v28 = vadd.f32 %v1210_v20, %v1162_v25  ;;  %v2176_v29 = vpop.f32.mrb[31].mxu0 }
 0x1a6   : > { %v1318_v30 = vpop.f32.mrb[32].mxu1 }
 0x1a7   : > { %v2193_v31 = vpop.f32.mrb[33].mxu1 }
 0x1a8   : > { %v1321_v0 = vpop.f32.mrb[34].mxu1 }
 0x1a9   : > { %v2194_v32 = vpop.f32.mrb[35].mxu1 }
 0x1aa   : > { %v1264_v33 = vpop.f32.mrb[32].mxu0 }
 0x1ab   : > { %v1270_v34 = vadd.f32 %v1264_v33, %v1216_v28  ;;  %v2187_v35 = vpop.f32.mrb[33].mxu0 }
 0x1ac   : > { %v1267_v36 = vpop.f32.mrb[34].mxu0 }
 0x1ad   : > { %v1324_v37 = vadd.f32 %v1318_v30, %v1270_v34  ;;  %v2188_v38 = vpop.f32.mrb[35].mxu0 }
 0x1ae   : > { %v1428_v39 = vpop.f32.mrb[36].mxu1 }
 0x1af   : > { %v2205_v40 = vpop.f32.mrb[37].mxu1 }
 0x1b0   : > { %v1431_v41 = vpop.f32.mrb[38].mxu1 }
 0x1b1   : > { %v2206_v42 = vpop.f32.mrb[39].mxu1 }
 0x1b2   : > { %v1368_v43 = vpop.f32.mrb[36].mxu0 }
 0x1b3   : > { %v1374_v44 = vadd.f32 %v1368_v43, %v1324_v37  ;;  %v2199_v45 = vpop.f32.mrb[37].mxu0 }
 0x1b4   : > { %v1371_v46 = vpop.f32.mrb[38].mxu0 }
 0x1b5   : > { %v1434_v47 = vadd.f32 %v1428_v39, %v1374_v44  ;;  %v2200_v48 = vpop.f32.mrb[39].mxu0 }
 0x1b6   : > { %v1536_v49 = vpop.f32.mrb[40].mxu1 }
 0x1b7   : > { %v2217_v50 = vpop.f32.mrb[41].mxu1 }
 0x1b8   : > { %v1539_v51 = vpop.f32.mrb[42].mxu1 }
 0x1b9   : > { %v2218_v52 = vpop.f32.mrb[43].mxu1 }
 0x1ba   : > { %v1482_v53 = vpop.f32.mrb[40].mxu0 }
 0x1bb   : > { %v1488_v54 = vadd.f32 %v1482_v53, %v1434_v47  ;;  %v2211_v55 = vpop.f32.mrb[41].mxu0 }
 0x1bc   : > { %v1485_v56 = vpop.f32.mrb[42].mxu0 }
 0x1bd   : > { %v1542_v57 = vadd.f32 %v1536_v49, %v1488_v54  ;;  %v2212_v58 = vpop.f32.mrb[43].mxu0 }
 0x1be   : > { %v1644_v59 = vpop.f32.mrb[44].mxu1 }
 0x1bf   : > { %v2229_v60 = vpop.f32.mrb[45].mxu1 }
 0x1c0   : > { %v1647_v61 = vpop.f32.mrb[46].mxu1 }
 0x1c1   : > { %v2230_v62 = vpop.f32.mrb[47].mxu1 }
 0x1c2   : > { %v1590_v63 = vpop.f32.mrb[44].mxu0 }
 0x1c3   : > { %v1596_v1 = vadd.f32 %v1590_v63, %v1542_v57  ;;  %v2223_v2 = vpop.f32.mrb[45].mxu0 }
 0x1c4   : > { %v1593_v3 = vpop.f32.mrb[46].mxu0 }
 0x1c5   : > { %v1650_v4 = vadd.f32 %v1644_v59, %v1596_v1  ;;  %v2224_v5 = vpop.f32.mrb[47].mxu0 }
 0x1c6   : > { %v1752_v6 = vpop.f32.mrb[48].mxu1 }
 0x1c7   : > { %v2241_v7 = vpop.f32.mrb[49].mxu1 }
 0x1c8   : > { %v1755_v8 = vpop.f32.mrb[50].mxu1 }
 0x1c9   : > { %v2242_v9 = vpop.f32.mrb[51].mxu1 }
 0x1ca   : > { %v1698_v10 = vpop.f32.mrb[48].mxu0 }
 0x1cb   : > { %v1704_v11 = vadd.f32 %v1698_v10, %v1650_v4  ;;  %v2235_v12 = vpop.f32.mrb[49].mxu0 }
 0x1cc   : > { %v1701_v13 = vpop.f32.mrb[50].mxu0 }
 0x1cd   : > { %v1758_v14 = vadd.f32 %v1752_v6, %v1704_v11  ;;  %v2236_v15 = vpop.f32.mrb[51].mxu0 }
 0x1d2   : > { %v1806_v16 = vpop.f32.mrb[52].mxu0 }
 0x1d3   : > { %v1812_v18 = vadd.f32 %v1806_v16, %v1758_v14  ;;  %v2247_v19 = vpop.f32.mrb[53].mxu0 }
 0x1d4   : > { %v1809_v20 = vpop.f32.mrb[54].mxu0 }
 0x1d5   : > { %v1819_v21 = vadd.f32 %v1817_v17, %v1812_v18  ;;  %v2248_v22 = vpop.f32.mrb[55].mxu0 }
 0x1d7   : > { %vm1820_vm11 = vcmp.ge.f32.partialorder %v1819_v21, 0.0  ;;  %v1821_v23 = vmul.f32 0.2, %v1819_v21 }
 0x1d9   : > { %v1822_v24 = vsel %vm1820_vm11, %v1819_v21, %v1821_v23 }
 0x1da   : > { %v1823_v25 = vpack.c.bf16 %v1822_v24, %v1822_v24 }
 0x1dc   : > { %1824 = vst [vmem:[%s340_s27] sm:$0x3] %v1823_v25 }
 0x1dd PF: > { %s15_s22 = sadd.s32 1, %s2345_s22   ;;  %s2767_s18 = smov %s2337_s20 }
 0x1de   : > { %p12_p10 = scmp.ge.s32.totalorder %s15_s22, 10   ;;  %s2768_s19 = smov %s2341_s21 }
 0x1df   : > { %s2769_s20 = smov %s2772_s23  ;;  %s2770_s21 = smov %s2776_s24 }
 0x1e0   :  { %14 = sbr.rel (!%p12_p10) target bundleno = 3 (0x3), region = 102 }

// kernel: dpconvlstm_forward.24
= control target key start
LH: loop header
LB: loop body
LE: loop exit
PB: predicated region body
PF: predicated region fallthrough
CT: control target
= control target key end

     0   :  { %s2620_s18 = smov 0   ;;  %s2622_s19 = smov 0   ;;  %s2993_s0 = inlined_call_operand.vmem [shape: bf16[4,6,4,256], index: 0, kind: input, shape index: {}, may-alias: {0,1,2}]   ;;  %s2994_s1 = inlined_call_operand.vmem [shape: bf16[4,6,4,256], index: 1, kind: input, shape index: {}, may-alias: {0,1,2}]   ;;  %s2995_s2 = inlined_call_operand.vmem [shape: bf16[4,6,4,256], index: 2, kind: input, shape index: {}, may-alias: {0,1,2}]   ;;  %s2996_s3 = inlined_call_operand.vmem [shape: bf16[27,8,4], index: 3, kind: input, shape index: {}]   ;;  %s2997_s4 = inlined_call_operand.vmem [shape: f32[8,1], index: 4, kind: input, shape index: {}]   ;;  %s2998_s5 = inlined_call_operand.vmem [shape: bf16[4,4,8,128], index: 5, kind: output, shape index: {}]  }
   0x1   :  { %s2624_s20 = smov 0   ;;  %s2626_s21 = smov 0  }
   0x2   :  { %s2628_s22 = smov 0  }
   0x3 LB: > { %s24_s23 = sadd.s32 1, %s2569_s20  ;;  %s27_s24 = sadd.s32 1, %s2573_s21  ;;  %s2577_s22 = sphi %s2628_s22, %s15_s22   ;;  %s2573_s21 = sphi %s2626_s21, %s3002_s21   ;;  %s2569_s20 = sphi %s2624_s20, %s3001_s20   ;;  %s2565_s19 = sphi %s2622_s19, %s3000_s19   ;;  %s2561_s18 = sphi %s2620_s18, %s2999_s18  }
   0x4   : > { %p25_p0 = scmp.ge.s32.totalorder %s24_s23, 4  ;;  %p2182_p1 = scmp.ge.s32.totalorder %s2577_s22, 1 }
   0x5   : > { %p247_p2 = scmp.lt.s32.totalorder %s2577_s22, 17 }
   0x6   : > { %s3004_s23 = smov (%p25_p0, %s24_s23), 0  ;;  %s3006_s24 = smov (!%p25_p0, %s27_s24), %s2573_s21 }
   0x7   : > { %p248_p3 = pnand %p2182_p1, %p247_p2  ;;  %p29_p4 = scmp.ge.s32.totalorder %s3006_s24, 4 }
   0x8   : > { %p302_p5 = scmp.lt.s32.totalorder (!%p248_p3), %s2565_s19, 3  ;;  %p304_p6 = scmp.lt.s32.totalorder (!%p248_p3), %s2561_s18, 5  ;;  %v2579_v0 = vmov (!%p248_p3), 0.0   ;;  %vm2580_vm0 = vmmov (!%p248_p3), 0   ;;  %vm366_vm1 = vcmask (!%p248_p3), 1041408   ;;  %vm362_vm2 = vcmask (!%p248_p3), 31744  }
   0x9   : > { %s3008_s24 = smov (%p29_p4, %s3006_s24), 0  ;;  %251 = sbr.rel (%p248_p3) target bundleno = 474 (0x1da), region = 40 }
   0xa   : > { %2324 = vmatprep.subr.bf16.mxu0 (!%p248_p3), %v2579_v0  ;;  %2330 = vmatprep.subr.bf16.mxu1 (!%p248_p3), %v2579_v0  ;;  %s2581_s8 = smov (!%p248_p3), 126   ;;  %s2582_s9 = smov (!%p248_p3), 127   ;;  %v342_v5 = vld [vmem:[%s2996_s3] sm:$0xf] (!%p248_p3)  ;;  %v2589_v11 = vmov (!%p248_p3), 0   ;;  %vm472_vm3 = vcmask (!%p248_p3), 1031168  }
   0xb   : > { %2326 = vmatprep.mubr.msk.bf16.mxu0 (!%p248_p3), %vm2580_vm0, %v2579_v0  ;;  %2332 = vmatprep.mubr.msk.bf16.mxu1 (!%p248_p3), %vm2580_vm0, %v2579_v0  ;;  %s311_s10 = sadd.s32 (!%p248_p3), 1, %s2561_s18  ;;  %s2583_s13 = smov (!%p248_p3), 122   ;;  %v2035_v10 = vld [vmem:[%s2997_s4] sm:$0xff] (!%p248_p3)  ;;  %vm360_vm4 = vcmask (!%p248_p3), 1039360   ;;  %vm537_vm5 = vcmask (!%p248_p3), 998400   ;;  %vm602_vm6 = vcmask (!%p248_p3), 990208  }
   0xc   : > { %p314_p7 = scmp.lt.s32.totalorder (!%p248_p3), %s311_s10, 5  ;;  %s2584_s14 = smov (!%p248_p3), 121   ;;  %2538 = vset.pattern.permute.xlu0 (!%p248_p3), %v2589_v11  ;;  %v2191_v19 = vld [vmem:[%s2996_s3 + $0x4] sm:$0xf] (!%p248_p3)  ;;  %v2198_v25 = vld [vmem:[%s2996_s3 + $0xc] sm:$0xf] (!%p248_p3) }
   0xd   : > { %s2585_s16 = smov (!%p248_p3), 120   ;;  %s2587_s6 = smov (!%p248_p3), 115   ;;  %vm667_vm7 = vcmask (!%p248_p3), 982016   ;;  %v2195_v29 = vld [vmem:[%s2996_s3 + $0x8] sm:$0xf] (!%p248_p3)  ;;  %vm732_vm8 = vcmask (!%p248_p3), 949248  }
   0xe   : > { %v2204_v35 = vld [vmem:[%s2996_s3 + $0x14] sm:$0xf] (!%p248_p3)  ;;  %vm797_vm9 = vcmask (!%p248_p3), 941056   ;;  %v2201_v39 = vld [vmem:[%s2996_s3 + $0x10] sm:$0xf] (!%p248_p3)  ;;  %vm862_vm10 = vcmask (!%p248_p3), 932864  }
   0xf   : > { %v2210_v46 = vld [vmem:[%s2996_s3 + $0x1c] sm:$0xf] (!%p248_p3)  ;;  %v2207_v51 = vld [vmem:[%s2996_s3 + $0x18] sm:$0xf] (!%p248_p3)  ;;  %v2216_v55 = vld [vmem:[%s2996_s3 + $0x24] sm:$0xf] (!%p248_p3) }
  0x10   : > { %s3010_s19 = smov (!%p302_p5, %s2565_s19), 3  ;;  %s3012_s10 = smov (!%p314_p7, %s311_s10), 5  ;;  %v2213_v61 = vld [vmem:[%s2996_s3 + $0x20] sm:$0xf] }
  0x11   : > { %s305_s25 = scalar_select %p304_p6, %s2561_s18, 5 }
  0x12   : > { %s2659_s26 = smul.u32 12, %s3010_s19  ;;  %s2185_s15 = sshll.u32 %s3012_s10, 1 }
  0x13   : > { %s2183_s27 = sshll.u32 %s305_s25, 1  ;;  %s322_s10 = sadd.s32 2, %s2561_s18 }
  0x14   : > { %s308_s28 = sadd.s32 %s2659_s26, %s2183_s27  ;;  %s318_s17 = sadd.s32 %s2659_s26, %s2185_s15 }
  0x15   : > { %s2184_s29 = sshll.u32 %s308_s28, 1  ;;  %s2186_s25 = sshll.u32 %s318_s17, 1 }
  0x16   : > { %s310_s7 = scalar_lea.vmem %s2993_s0, %s2184_s29  ;;  %s2586_s27 = smov 116  }
  0x17   : > { %v2196_v1 = vld.sshfl [vmem:[%s310_s7] sm:$0x33 pattern:$0x76325410]  ;;  %s2694_s30 = scalar_lea.vmem %s2994_s1, %s2186_s25  ;;  %p325_p8 = scmp.lt.s32.totalorder %s322_s10, 5 }
  0x18   : > { %468 = vrot.lane.b32.xlu1 %v2196_v1, %s2581_s8  ;;  %v467_v2 = vcombine.high %v2196_v1, %v2196_v1  ;;  %356 = vrot.lane.b32.xlu0 %v2196_v1, %s2582_s9  ;;  %v343_v3 = vld [vmem:[%s310_s7] sm:$0x3]  ;;  %s2588_s7 = smov 114   ;;  %p335_p9 = scmp.lt.s32.totalorder %s2561_s18, 3 }
  0x19   : > { %v414_v4 = vsel %vm366_vm1, %v343_v3, 0  ;;  %v2219_v6 = vld.sshfl [vmem:[%s2694_s30] sm:$0x33 pattern:$0x76325410]  ;;  %s3014_s10 = smov (!%p325_p8, %s322_s10), 5 }
  0x1a   : > { %2331 = vmatpush3.bf16.msra.mxu1 %v414_v4  ;;  %v972_v7 = vcombine.high %v2219_v6, %v2219_v6  ;;  %s2187_s11 = sshll.u32 %s3014_s10, 1  ;;  %v913_v44 = vld [vmem:[%s2694_s30] sm:$0x3]  ;;  %s3016_s18 = smov (!%p335_p9, %s2561_s18), 3 }
  0x1b   : > { %2342 = vmatprep.subr.bf16.mxu1 %v2579_v0  ;;  %s329_s12 = sadd.s32 %s2659_s26, %s2187_s11  ;;  %v918_v49 = vsel %vm366_vm1, %v913_v44, 0 }
  0x1c   : > { %470 = vrot.lane.b32.xlu1 %v467_v2, %s2581_s8  ;;  %358 = vrot.lane.b32.xlu0 %v467_v2, %s2582_s9  ;;  %s2188_s15 = sshll.u32 %s329_s12, 1 }
  0x1d   : > { %2333 = vmatmul.mubr.msk.bf16.vlgmr.msra.gmra.mrb[0].mxu1 %vm362_vm2, %v342_v5  ;;  %s2718_s28 = scalar_lea.vmem %s2995_s2, %s2188_s15 }
  0x1e   : > { %2344 = vmatprep.mubr.msk.bf16.mxu1 %vm2580_vm0, %v2579_v0  ;;  %v2245_v8 = vld.sshfl [vmem:[%s2718_s28] sm:$0x33 pattern:$0x76325410] }
  0x1f   : > { %v1534_v9 = vcombine.high %v2245_v8, %v2245_v8 }
  0x20   : > { %535 = vrot.lane.b32.xlu1 %v467_v2, %s2583_s13  ;;  %533 = vrot.lane.b32.xlu0 %v2196_v1, %s2583_s13 }
  0x24   : > { %600 = vrot.lane.b32.xlu1 %v467_v2, %s2584_s14  ;;  %598 = vrot.lane.b32.xlu0 %v2196_v1, %s2584_s14 }
  0x28   : > { %665 = vrot.lane.b32.xlu1 %v467_v2, %s2585_s16  ;;  %663 = vrot.lane.b32.xlu0 %v2196_v1, %s2585_s16 }
  0x2c   : > { %730 = vrot.lane.b32.xlu1 %v467_v2, %s2586_s27  ;;  %728 = vrot.lane.b32.xlu0 %v2196_v1, %s2586_s27 }
  0x30   : > { %795 = vrot.lane.b32.xlu1 %v467_v2, %s2587_s6  ;;  %793 = vrot.lane.b32.xlu0 %v2196_v1, %s2587_s6 }
  0x34   : > { %860 = vrot.lane.b32.xlu1 %v467_v2, %s2588_s7  ;;  %858 = vrot.lane.b32.xlu0 %v2196_v1, %s2588_s7  ;;  %v2221_v2 = vld [vmem:[%s2996_s3 + $0x2c] sm:$0xf] }
  0x38   : > { %975 = vrot.lane.b32.xlu1 %v972_v7, %s2582_s9  ;;  %973 = vrot.lane.b32.xlu0 %v2219_v6, %s2582_s9 }
  0x3c   : > { %1039 = vrot.lane.b32.xlu1 %v972_v7, %s2581_s8  ;;  %1037 = vrot.lane.b32.xlu0 %v2219_v6, %s2581_s8 }
  0x40   : > { %1103 = vrot.lane.b32.xlu1 %v972_v7, %s2583_s13  ;;  %1101 = vrot.lane.b32.xlu0 %v2219_v6, %s2583_s13 }
  0x44   : > { %1167 = vrot.lane.b32.xlu1 %v972_v7, %s2584_s14  ;;  %1165 = vrot.lane.b32.xlu0 %v2219_v6, %s2584_s14 }
  0x48   : > { %1231 = vrot.lane.b32.xlu1 %v972_v7, %s2585_s16  ;;  %1229 = vrot.lane.b32.xlu0 %v2219_v6, %s2585_s16 }
  0x4c   : > { %1295 = vrot.lane.b32.xlu1 %v972_v7, %s2586_s27  ;;  %1293 = vrot.lane.b32.xlu0 %v2219_v6, %s2586_s27 }
  0x50   : > { %1359 = vrot.lane.b32.xlu1 %v972_v7, %s2587_s6  ;;  %1357 = vrot.lane.b32.xlu0 %v2219_v6, %s2587_s6 }
  0x54   : > { %1423 = vrot.lane.b32.xlu1 %v972_v7, %s2588_s7  ;;  %1421 = vrot.lane.b32.xlu0 %v2219_v6, %s2588_s7 }
  0x58   : > { %1537 = vrot.lane.b32.xlu1 %v1534_v9, %s2582_s9  ;;  %1535 = vrot.lane.b32.xlu0 %v2245_v8, %s2582_s9 }
  0x5c   : > { %1601 = vrot.lane.b32.xlu1 %v1534_v9, %s2581_s8  ;;  %1599 = vrot.lane.b32.xlu0 %v2245_v8, %s2581_s8 }
  0x60   : > { %1665 = vrot.lane.b32.xlu1 %v1534_v9, %s2583_s13  ;;  %1663 = vrot.lane.b32.xlu0 %v2245_v8, %s2583_s13 }
  0x64   : > { %1729 = vrot.lane.b32.xlu1 %v1534_v9, %s2584_s14  ;;  %1727 = vrot.lane.b32.xlu0 %v2245_v8, %s2584_s14 }
  0x68   : > { %1793 = vrot.lane.b32.xlu1 %v1534_v9, %s2585_s16  ;;  %1791 = vrot.lane.b32.xlu0 %v2245_v8, %s2585_s16 }
  0x6c   : > { %1857 = vrot.lane.b32.xlu1 %v1534_v9, %s2586_s27  ;;  %1855 = vrot.lane.b32.xlu0 %v2245_v8, %s2586_s27 }
  0x70   : > { %1921 = vrot.lane.b32.xlu1 %v1534_v9, %s2587_s6  ;;  %1919 = vrot.lane.b32.xlu0 %v2245_v8, %s2587_s6 }
  0x74   : > { %1985 = vrot.lane.b32.xlu1 %v1534_v9, %s2588_s7  ;;  %1983 = vrot.lane.b32.xlu0 %v2245_v8, %s2588_s7  ;;  %v2218_v8 = vld [vmem:[%s2996_s3 + $0x28] sm:$0xf] }
  0x78   : > { %2038 = vperm.xlu0 %2538, %v2035_v10  }
  0x8a   : > { %v469_v12 = vpop.permute.xlu1 %468  ;;  %v357_v13 = vpop.permute.xlu0 %356 }
  0x8e   : > { %v471_v14 = vpop.permute.xlu1 %470  ;;  %v359_v15 = vpop.permute.xlu0 %358 }
  0x8f   : > { %v473_v16 = vsel %vm472_vm3, %v469_v12, %v471_v14  ;;  %v361_v17 = vsel %vm360_vm4, %v357_v13, %v359_v15  ;;  %v2227_v12 = vld [vmem:[%s2996_s3 + $0x34] sm:$0xf] }
  0x90   : > { %v368_v18 = vsel %vm366_vm1, %v361_v17, 0  ;;  %v478_v20 = vsel %vm366_vm1, %v473_v16, 0 }
  0x91   : > { %2325 = vmatpush3.bf16.msra.mxu0 %v368_v18  ;;  %v2224_v18 = vld [vmem:[%s2996_s3 + $0x30] sm:$0xf] }
  0x92   : > { %2336 = vmatprep.subr.bf16.mxu0 %v2579_v0  ;;  %v536_v21 = vpop.permute.xlu1 %535  ;;  %v534_v22 = vpop.permute.xlu0 %533 }
  0x93   : > { %v538_v23 = vsel %vm537_vm5, %v534_v22, %v536_v21  ;;  %v2233_v22 = vld [vmem:[%s2996_s3 + $0x3c] sm:$0xf] }
  0x94   : > { %2327 = vmatmul.mubr.msk.bf16.vlgmr.msra.gmra.mrb[0].mxu0 %vm362_vm2, %v2191_v19  ;;  %v543_v24 = vsel %vm366_vm1, %v538_v23, 0 }
  0x95   : > { %2337 = vmatpush3.bf16.msra.mxu0 %v478_v20  ;;  %2343 = vmatpush3.bf16.msra.mxu1 %v543_v24 }
  0x96   : > { %v601_v26 = vpop.permute.xlu1 %600  ;;  %v599_v27 = vpop.permute.xlu0 %598  ;;  %2338 = vmatprep.mubr.msk.bf16.mxu0 %vm2580_vm0, %v2579_v0  ;;  %2348 = vmatprep.subr.bf16.mxu0 %v2579_v0 }
  0x97   : > { %v603_v28 = vsel %vm602_vm6, %v599_v27, %v601_v26  ;;  %2354 = vmatprep.subr.bf16.mxu1 %v2579_v0 }
  0x98   : > { %2345 = vmatmul.mubr.msk.bf16.vlgmr.msra.gmra.mrb[4].mxu1 %vm362_vm2, %v2198_v25  ;;  %v608_v30 = vsel %vm366_vm1, %v603_v28, 0  ;;  %v2230_v28 = vld [vmem:[%s2996_s3 + $0x38] sm:$0xf] }
  0x99   : > { %2356 = vmatprep.mubr.msk.bf16.mxu1 %vm2580_vm0, %v2579_v0 }
  0x9a   : > { %v666_v31 = vpop.permute.xlu1 %665  ;;  %v664_v32 = vpop.permute.xlu0 %663 }
  0x9b   : > { %v668_v33 = vsel %vm667_vm7, %v664_v32, %v666_v31 }
  0x9c   : > { %2339 = vmatmul.mubr.msk.bf16.vlgmr.msra.gmra.mrb[4].mxu0 %vm362_vm2, %v2195_v29  ;;  %v673_v34 = vsel %vm366_vm1, %v668_v33, 0  ;;  %v2239_v33 = vld [vmem:[%s2996_s3 + $0x44] sm:$0xf] }
  0x9d   : > { %2349 = vmatpush3.bf16.msra.mxu0 %v608_v30  ;;  %2355 = vmatpush3.bf16.msra.mxu1 %v673_v34 }
  0x9e   : > { %v731_v36 = vpop.permute.xlu1 %730  ;;  %v729_v37 = vpop.permute.xlu0 %728  ;;  %2350 = vmatprep.mubr.msk.bf16.mxu0 %vm2580_vm0, %v2579_v0  ;;  %2360 = vmatprep.subr.bf16.mxu0 %v2579_v0 }
  0x9f   : > { %v733_v38 = vsel %vm732_vm8, %v729_v37, %v731_v36  ;;  %2366 = vmatprep.subr.bf16.mxu1 %v2579_v0  ;;  %v1475_v37 = vld [vmem:[%s2718_s28] sm:$0x3]  ;;  %s2189_s28 = sshll.u32 %s3010_s19, 2 }
  0xa0   : > { %2357 = vmatmul.mubr.msk.bf16.vlgmr.msra.gmra.mrb[8].mxu1 %vm362_vm2, %v2204_v35  ;;  %v738_v40 = vsel %vm366_vm1, %v733_v38, 0  ;;  %v2236_v38 = vld [vmem:[%s2996_s3 + $0x40] sm:$0xf]  ;;  %s338_s9 = sadd.s32 %s2189_s28, %s3016_s18 }
  0xa1   : > { %2368 = vmatprep.mubr.msk.bf16.mxu1 %vm2580_vm0, %v2579_v0  ;;  %s2190_s13 = sshll.u32 %s338_s9, 2 }
  0xa2   : > { %v796_v41 = vpop.permute.xlu1 %795  ;;  %v794_v42 = vpop.permute.xlu0 %793  ;;  %s340_s27 = scalar_lea.vmem %s2998_s5, %s2190_s13 }
  0xa3   : > { %v798_v43 = vsel %vm797_vm9, %v794_v42, %v796_v41 }
  0xa4   : > { %2351 = vmatmul.mubr.msk.bf16.vlgmr.msra.gmra.mrb[8].mxu0 %vm362_vm2, %v2201_v39  ;;  %v803_v45 = vsel %vm366_vm1, %v798_v43, 0  ;;  %v1480_v39 = vsel %vm366_vm1, %v1475_v37, 0  ;;  %v2244_v43 = vld [vmem:[%s2996_s3 + $0x4c] sm:$0xf] }
  0xa5   : > { %2361 = vmatpush3.bf16.msra.mxu0 %v738_v40  ;;  %2367 = vmatpush3.bf16.msra.mxu1 %v803_v45 }
  0xa6   : > { %v861_v47 = vpop.permute.xlu1 %860  ;;  %v859_v48 = vpop.permute.xlu0 %858  ;;  %2362 = vmatprep.mubr.msk.bf16.mxu0 %vm2580_vm0, %v2579_v0  ;;  %2372 = vmatprep.subr.bf16.mxu0 %v2579_v0 }
  0xa7   : > { %v863_v50 = vsel %vm862_vm10, %v859_v48, %v861_v47  ;;  %2378 = vmatprep.subr.bf16.mxu1 %v2579_v0  ;;  %v2242_v48 = vld [vmem:[%s2996_s3 + $0x48] sm:$0xf] }
  0xa8   : > { %2369 = vmatmul.mubr.msk.bf16.vlgmr.msra.gmra.mrb[12].mxu1 %vm362_vm2, %v2210_v46  ;;  %v868_v52 = vsel %vm366_vm1, %v863_v50, 0 }
  0xa9   : > { %2379 = vmatpush3.bf16.msra.mxu1 %v918_v49  ;;  %2380 = vmatprep.mubr.msk.bf16.mxu1 %vm2580_vm0, %v2579_v0 }
  0xaa   : > { %v976_v53 = vpop.permute.xlu1 %975  ;;  %v974_v54 = vpop.permute.xlu0 %973  ;;  %2390 = vmatprep.subr.bf16.mxu1 %v2579_v0 }
  0xab   : > { %v977_v58 = vsel %vm360_vm4, %v974_v54, %v976_v53  ;;  %v2250_v53 = vld [vmem:[%s2996_s3 + $0x54] sm:$0xf] }
  0xac   : > { %2363 = vmatmul.mubr.msk.bf16.vlgmr.msra.gmra.mrb[12].mxu0 %vm362_vm2, %v2207_v51  ;;  %v982_v62 = vsel %vm366_vm1, %v977_v58, 0  ;;  %v2247_v58 = vld [vmem:[%s2996_s3 + $0x50] sm:$0xf] }
  0xad   : > { %2373 = vmatpush3.bf16.msra.mxu0 %v868_v52  ;;  %2374 = vmatprep.mubr.msk.bf16.mxu0 %vm2580_vm0, %v2579_v0 }
  0xae   : > { %2384 = vmatprep.subr.bf16.mxu0 %v2579_v0  ;;  %v1040_v56 = vpop.permute.xlu1 %1039  ;;  %v1038_v57 = vpop.permute.xlu0 %1037 }
  0xaf   : > { %v1041_v59 = vsel %vm472_vm3, %v1038_v57, %v1040_v56 }
  0xb0   : > { %v1046_v60 = vsel %vm366_vm1, %v1041_v59, 0  ;;  %2381 = vmatmul.mubr.msk.bf16.vlgmr.msra.gmra.mrb[16].mxu1 %vm362_vm2, %v2216_v55 }
  0xb1   : > { %2391 = vmatpush3.bf16.msra.mxu1 %v1046_v60  ;;  %2392 = vmatprep.mubr.msk.bf16.mxu1 %vm2580_vm0, %v2579_v0 }
  0xb2   : > { %v1104_v63 = vpop.permute.xlu1 %1103  ;;  %v1102_v1 = vpop.permute.xlu0 %1101  ;;  %2402 = vmatprep.subr.bf16.mxu1 %v2579_v0 }
  0xb3   : > { %v1105_v5 = vsel %vm537_vm5, %v1102_v1, %v1104_v63  ;;  %v2256_v63 = vld [vmem:[%s2996_s3 + $0x5c] sm:$0xf] }
  0xb4   : > { %2375 = vmatmul.mubr.msk.bf16.vlgmr.msra.gmra.mrb[16].mxu0 %vm362_vm2, %v2213_v61  ;;  %v1110_v9 = vsel %vm366_vm1, %v1105_v5, 0 }
  0xb5   : > { %2385 = vmatpush3.bf16.msra.mxu0 %v982_v62  ;;  %2386 = vmatprep.mubr.msk.bf16.mxu0 %vm2580_vm0, %v2579_v0 }
  0xb6   : > { %2396 = vmatprep.subr.bf16.mxu0 %v2579_v0  ;;  %v1168_v3 = vpop.permute.xlu1 %1167  ;;  %v1166_v4 = vpop.permute.xlu0 %1165 }
  0xb7   : > { %v1169_v6 = vsel %vm602_vm6, %v1166_v4, %v1168_v3  ;;  %v2253_v3 = vld [vmem:[%s2996_s3 + $0x58] sm:$0xf] }
  0xb8   : > { %v1174_v7 = vsel %vm366_vm1, %v1169_v6, 0  ;;  %2393 = vmatmul.mubr.msk.bf16.vlgmr.msra.gmra.mrb[20].mxu1 %vm362_vm2, %v2221_v2 }
  0xb9   : > { %2403 = vmatpush3.bf16.msra.mxu1 %v1174_v7  ;;  %2404 = vmatprep.mubr.msk.bf16.mxu1 %vm2580_vm0, %v2579_v0  ;;  %v2262_v7 = vld [vmem:[%s2996_s3 + $0x64] sm:$0xf] }
  0xba   : > { %v1232_v10 = vpop.permute.xlu1 %1231  ;;  %v1230_v11 = vpop.permute.xlu0 %1229  ;;  %2414 = vmatprep.subr.bf16.mxu1 %v2579_v0 }
  0xbb   : > { %v1233_v15 = vsel %vm667_vm7, %v1230_v11, %v1232_v10  ;;  %v2259_v10 = vld [vmem:[%s2996_s3 + $0x60] sm:$0xf] }
  0xbc   : > { %2387 = vmatmul.mubr.msk.bf16.vlgmr.msra.gmra.mrb[20].mxu0 %vm362_vm2, %v2218_v8  ;;  %v1238_v19 = vsel %vm366_vm1, %v1233_v15, 0  ;;  %v2265_v15 = vld [vmem:[%s2996_s3 + $0x68] sm:$0xf] }
  0xbd   : > { %2397 = vmatpush3.bf16.msra.mxu0 %v1110_v9  ;;  %2398 = vmatprep.mubr.msk.bf16.mxu0 %vm2580_vm0, %v2579_v0 }
  0xbe   : > { %2408 = vmatprep.subr.bf16.mxu0 %v2579_v0  ;;  %v1296_v13 = vpop.permute.xlu1 %1295  ;;  %v1294_v14 = vpop.permute.xlu0 %1293 }
  0xbf   : > { %v1297_v16 = vsel %vm732_vm8, %v1294_v14, %v1296_v13 }
  0xc0   : > { %v1302_v17 = vsel %vm366_vm1, %v1297_v16, 0  ;;  %2405 = vmatmul.mubr.msk.bf16.vlgmr.msra.gmra.mrb[24].mxu1 %vm362_vm2, %v2227_v12 }
  0xc1   : > { %2415 = vmatpush3.bf16.msra.mxu1 %v1302_v17  ;;  %2416 = vmatprep.mubr.msk.bf16.mxu1 %vm2580_vm0, %v2579_v0 }
  0xc2   : > { %v1360_v20 = vpop.permute.xlu1 %1359  ;;  %v1358_v21 = vpop.permute.xlu0 %1357  ;;  %2426 = vmatprep.subr.bf16.mxu1 %v2579_v0 }
  0xc3   : > { %v1361_v25 = vsel %vm797_vm9, %v1358_v21, %v1360_v20 }
  0xc4   : > { %2399 = vmatmul.mubr.msk.bf16.vlgmr.msra.gmra.mrb[24].mxu0 %vm362_vm2, %v2224_v18  ;;  %v1366_v29 = vsel %vm366_vm1, %v1361_v25, 0 }
  0xc5   : > { %2409 = vmatpush3.bf16.msra.mxu0 %v1238_v19  ;;  %2410 = vmatprep.mubr.msk.bf16.mxu0 %vm2580_vm0, %v2579_v0 }
  0xc6   : > { %2420 = vmatprep.subr.bf16.mxu0 %v2579_v0  ;;  %v1424_v23 = vpop.permute.xlu1 %1423  ;;  %v1422_v24 = vpop.permute.xlu0 %1421 }
  0xc7   : > { %v1425_v26 = vsel %vm862_vm10, %v1422_v24, %v1424_v23 }
  0xc8   : > { %2417 = vmatmul.mubr.msk.bf16.vlgmr.msra.gmra.mrb[28].mxu1 %vm362_vm2, %v2233_v22  ;;  %v1430_v27 = vsel %vm366_vm1, %v1425_v26, 0 }
  0xc9   : > { %2427 = vmatpush3.bf16.msra.mxu1 %v1430_v27  ;;  %2428 = vmatprep.mubr.msk.bf16.mxu1 %vm2580_vm0, %v2579_v0 }
  0xca   : > { %v1538_v30 = vpop.permute.xlu1 %1537  ;;  %v1536_v31 = vpop.permute.xlu0 %1535  ;;  %2438 = vmatprep.subr.bf16.mxu1 %v2579_v0 }
  0xcb   : > { %v1539_v32 = vsel %vm360_vm4, %v1536_v31, %v1538_v30 }
  0xcc   : > { %2411 = vmatmul.mubr.msk.bf16.vlgmr.msra.gmra.mrb[28].mxu0 %vm362_vm2, %v2230_v28  ;;  %v1544_v34 = vsel %vm366_vm1, %v1539_v32, 0 }
  0xcd   : > { %2421 = vmatpush3.bf16.msra.mxu0 %v1366_v29  ;;  %2422 = vmatprep.mubr.msk.bf16.mxu0 %vm2580_vm0, %v2579_v0 }
  0xce   : > { %2432 = vmatprep.subr.bf16.mxu0 %v2579_v0  ;;  %v1602_v35 = vpop.permute.xlu1 %1601  ;;  %v1600_v36 = vpop.permute.xlu0 %1599 }
  0xcf   : > { %v1603_v47 = vsel %vm472_vm3, %v1600_v36, %v1602_v35 }
  0xd0   : > { %2429 = vmatmul.mubr.msk.bf16.vlgmr.msra.gmra.mrb[32].mxu1 %vm362_vm2, %v2239_v33  ;;  %v1608_v49 = vsel %vm366_vm1, %v1603_v47, 0 }
  0xd1   : > { %2439 = vmatpush3.bf16.msra.mxu1 %v1544_v34  ;;  %2440 = vmatprep.mubr.msk.bf16.mxu1 %vm2580_vm0, %v2579_v0 }
  0xd2   : > { %v1666_v40 = vpop.permute.xlu1 %1665  ;;  %v1664_v41 = vpop.permute.xlu0 %1663  ;;  %2450 = vmatprep.subr.bf16.mxu1 %v2579_v0 }
  0xd3   : > { %v1667_v42 = vsel %vm537_vm5, %v1664_v41, %v1666_v40 }
  0xd4   : > { %2423 = vmatmul.mubr.msk.bf16.vlgmr.msra.gmra.mrb[32].mxu0 %vm362_vm2, %v2236_v38  ;;  %v1672_v44 = vsel %vm366_vm1, %v1667_v42, 0 }
  0xd5   : > { %2433 = vmatpush3.bf16.msra.mxu0 %v1480_v39  ;;  %2434 = vmatprep.mubr.msk.bf16.mxu0 %vm2580_vm0, %v2579_v0 }
  0xd6   : > { %2444 = vmatprep.subr.bf16.mxu0 %v2579_v0  ;;  %v1730_v45 = vpop.permute.xlu1 %1729  ;;  %v1728_v46 = vpop.permute.xlu0 %1727 }
  0xd7   : > { %v1731_v57 = vsel %vm602_vm6, %v1728_v46, %v1730_v45 }
  0xd8   : > { %2441 = vmatmul.mubr.msk.bf16.vlgmr.msra.gmra.mrb[36].mxu1 %vm362_vm2, %v2244_v43  ;;  %v1736_v59 = vsel %vm366_vm1, %v1731_v57, 0 }
  0xd9   : > { %2451 = vmatpush3.bf16.msra.mxu1 %v1672_v44  ;;  %2452 = vmatprep.mubr.msk.bf16.mxu1 %vm2580_vm0, %v2579_v0 }
  0xda   : > { %v1794_v50 = vpop.permute.xlu1 %1793  ;;  %v1792_v51 = vpop.permute.xlu0 %1791  ;;  %2462 = vmatprep.subr.bf16.mxu1 %v2579_v0 }
  0xdb   : > { %v1795_v52 = vsel %vm667_vm7, %v1792_v51, %v1794_v50 }
  0xdc   : > { %2435 = vmatmul.mubr.msk.bf16.vlgmr.msra.gmra.mrb[36].mxu0 %vm362_vm2, %v2242_v48  ;;  %v1800_v54 = vsel %vm366_vm1, %v1795_v52, 0 }
  0xdd   : > { %2445 = vmatpush3.bf16.msra.mxu0 %v1608_v49  ;;  %2446 = vmatprep.mubr.msk.bf16.mxu0 %vm2580_vm0, %v2579_v0 }
  0xde   : > { %2456 = vmatprep.subr.bf16.mxu0 %v2579_v0  ;;  %v1858_v55 = vpop.permute.xlu1 %1857  ;;  %v1856_v56 = vpop.permute.xlu0 %1855 }
  0xdf   : > { %v1859_v2 = vsel %vm732_vm8, %v1856_v56, %v1858_v55 }
  0xe0   : > { %2453 = vmatmul.mubr.msk.bf16.vlgmr.msra.gmra.mrb[40].mxu1 %vm362_vm2, %v2250_v53  ;;  %v1864_v4 = vsel %vm366_vm1, %v1859_v2, 0 }
  0xe1   : > { %2463 = vmatpush3.bf16.msra.mxu1 %v1800_v54  ;;  %2464 = vmatprep.mubr.msk.bf16.mxu1 %vm2580_vm0, %v2579_v0 }
  0xe2   : > { %v1922_v60 = vpop.permute.xlu1 %1921  ;;  %v1920_v61 = vpop.permute.xlu0 %1919  ;;  %2474 = vmatprep.subr.bf16.mxu1 %v2579_v0 }
  0xe3   : > { %v1923_v62 = vsel %vm797_vm9, %v1920_v61, %v1922_v60 }
  0xe4   : > { %2447 = vmatmul.mubr.msk.bf16.vlgmr.msra.gmra.mrb[40].mxu0 %vm362_vm2, %v2247_v58  ;;  %v1928_v1 = vsel %vm366_vm1, %v1923_v62, 0 }
  0xe5   : > { %2457 = vmatpush3.bf16.msra.mxu0 %v1736_v59  ;;  %2458 = vmatprep.mubr.msk.bf16.mxu0 %vm2580_vm0, %v2579_v0 }
  0xe6   : > { %2468 = vmatprep.subr.bf16.mxu0 %v2579_v0  ;;  %v1986_v5 = vpop.permute.xlu1 %1985  ;;  %v1984_v6 = vpop.permute.xlu0 %1983 }
  0xe7   : > { %v1987_v8 = vsel %vm862_vm10, %v1984_v6, %v1986_v5 }
  0xe8   : > { %2465 = vmatmul.mubr.msk.bf16.vlgmr.msra.gmra.mrb[44].mxu1 %vm362_vm2, %v2256_v63  ;;  %v1992_v12 = vsel %vm366_vm1, %v1987_v8, 0 }
  0xe9   : > { %2475 = vmatpush3.bf16.msra.mxu1 %v1928_v1  ;;  %2476 = vmatprep.mubr.msk.bf16.mxu1 %vm2580_vm0, %v2579_v0 }
  0xec   : > { %2459 = vmatmul.mubr.msk.bf16.vlgmr.msra.gmra.mrb[44].mxu0 %vm362_vm2, %v2253_v3 }
  0xed   : > { %2469 = vmatpush3.bf16.msra.mxu0 %v1864_v4  ;;  %2470 = vmatprep.mubr.msk.bf16.mxu0 %vm2580_vm0, %v2579_v0 }
  0xee   : > { %2480 = vmatprep.subr.bf16.mxu0 %v2579_v0 }
  0xf0   : > { %2477 = vmatmul.mubr.msk.bf16.vlgmr.msra.gmra.mrb[48].mxu1 %vm362_vm2, %v2262_v7  ;;  %v450_v9 = vpop.f32.mrb[0].mxu1 }
  0xf1   : > { %v2334_v11 = vpop.f32.mrb[1].mxu1 }
  0xf2   : > { %v453_v13 = vpop.f32.mrb[2].mxu1 }
  0xf3   : > { %v2335_v14 = vpop.f32.mrb[3].mxu1 }
  0xf4   : > { %2471 = vmatmul.mubr.msk.bf16.vlgmr.msra.gmra.mrb[48].mxu0 %vm362_vm2, %v2259_v10 }
  0xf5   : > { %2481 = vmatpush3.bf16.msra.mxu0 %v1992_v12  ;;  %2482 = vmatprep.mubr.msk.bf16.mxu0 %vm2580_vm0, %v2579_v0 }
  0xfc   : > { %2483 = vmatmul.mubr.msk.bf16.vlgmr.msra.gmra.mrb[52].mxu0 %vm362_vm2, %v2265_v15 }
 0x167   : > { %v404_v16 = vpop.f32.mrb[0].mxu0 }
 0x168   : > { %v2328_v17 = vpop.f32.mrb[1].mxu0  ;;  %v451_v18 = vadd.f32 %v450_v9, %v404_v16 }
 0x169   : > { %v407_v19 = vpop.f32.mrb[2].mxu0 }
 0x16a   : > { %v2329_v20 = vpop.f32.mrb[3].mxu0 }
 0x16b   : > { %v579_v21 = vpop.f32.mrb[4].mxu1 }
 0x16c   : > { %v2346_v22 = vpop.f32.mrb[5].mxu1 }
 0x16d   : > { %v582_v23 = vpop.f32.mrb[6].mxu1 }
 0x16e   : > { %v2347_v24 = vpop.f32.mrb[7].mxu1 }
 0x16f   : > { %v514_v25 = vpop.f32.mrb[4].mxu0 }
 0x170   : > { %v520_v26 = vadd.f32 %v514_v25, %v451_v18  ;;  %v2340_v27 = vpop.f32.mrb[5].mxu0 }
 0x171   : > { %v517_v28 = vpop.f32.mrb[6].mxu0 }
 0x172   : > { %v585_v0 = vadd.f32 %v579_v21, %v520_v26  ;;  %v2341_v29 = vpop.f32.mrb[7].mxu0 }
 0x173   : > { %v709_v30 = vpop.f32.mrb[8].mxu1 }
 0x174   : > { %v2358_v31 = vpop.f32.mrb[9].mxu1 }
 0x175   : > { %v712_v32 = vpop.f32.mrb[10].mxu1 }
 0x176   : > { %v2359_v33 = vpop.f32.mrb[11].mxu1 }
 0x177   : > { %v644_v34 = vpop.f32.mrb[8].mxu0 }
 0x178   : > { %v650_v35 = vadd.f32 %v644_v34, %v585_v0  ;;  %v2352_v36 = vpop.f32.mrb[9].mxu0 }
 0x179   : > { %v647_v37 = vpop.f32.mrb[10].mxu0 }
 0x17a   : > { %v715_v38 = vadd.f32 %v709_v30, %v650_v35  ;;  %v2353_v39 = vpop.f32.mrb[11].mxu0 }
 0x17b   : > { %v839_v40 = vpop.f32.mrb[12].mxu1 }
 0x17c   : > { %v2370_v41 = vpop.f32.mrb[13].mxu1 }
 0x17d   : > { %v842_v42 = vpop.f32.mrb[14].mxu1 }
 0x17e   : > { %v2371_v43 = vpop.f32.mrb[15].mxu1 }
 0x17f   : > { %v774_v44 = vpop.f32.mrb[12].mxu0 }
 0x180   : > { %v780_v45 = vadd.f32 %v774_v44, %v715_v38  ;;  %v2364_v46 = vpop.f32.mrb[13].mxu0 }
 0x181   : > { %v777_v47 = vpop.f32.mrb[14].mxu0 }
 0x182   : > { %v845_v48 = vadd.f32 %v839_v40, %v780_v45  ;;  %v2365_v49 = vpop.f32.mrb[15].mxu0 }
 0x183   : > { %v954_v50 = vpop.f32.mrb[16].mxu1 }
 0x184   : > { %v2382_v51 = vpop.f32.mrb[17].mxu1 }
 0x185   : > { %v957_v52 = vpop.f32.mrb[18].mxu1 }
 0x186   : > { %v2383_v53 = vpop.f32.mrb[19].mxu1 }
 0x187   : > { %v904_v54 = vpop.f32.mrb[16].mxu0 }
 0x188   : > { %v910_v55 = vadd.f32 %v904_v54, %v845_v48  ;;  %v2376_v56 = vpop.f32.mrb[17].mxu0 }
 0x189   : > { %v907_v57 = vpop.f32.mrb[18].mxu0 }
 0x18a   : > { %v960_v58 = vadd.f32 %v954_v50, %v910_v55  ;;  %v2377_v59 = vpop.f32.mrb[19].mxu0 }
 0x18b   : > { %v1082_v60 = vpop.f32.mrb[20].mxu1 }
 0x18c   : > { %v2394_v61 = vpop.f32.mrb[21].mxu1 }
 0x18d   : > { %v1085_v62 = vpop.f32.mrb[22].mxu1 }
 0x18e   : > { %v2395_v63 = vpop.f32.mrb[23].mxu1 }
 0x18f   : > { %v1018_v1 = vpop.f32.mrb[20].mxu0 }
 0x190   : > { %v1024_v2 = vadd.f32 %v1018_v1, %v960_v58  ;;  %v2388_v3 = vpop.f32.mrb[21].mxu0 }
 0x191   : > { %v1021_v4 = vpop.f32.mrb[22].mxu0 }
 0x192   : > { %v1088_v5 = vadd.f32 %v1082_v60, %v1024_v2  ;;  %v2389_v6 = vpop.f32.mrb[23].mxu0 }
 0x193   : > { %v1210_v7 = vpop.f32.mrb[24].mxu1 }
 0x194   : > { %v2406_v8 = vpop.f32.mrb[25].mxu1 }
 0x195   : > { %v1213_v9 = vpop.f32.mrb[26].mxu1 }
 0x196   : > { %v2407_v10 = vpop.f32.mrb[27].mxu1 }
 0x197   : > { %v1146_v11 = vpop.f32.mrb[24].mxu0 }
 0x198   : > { %v1152_v12 = vadd.f32 %v1146_v11, %v1088_v5  ;;  %v2400_v13 = vpop.f32.mrb[25].mxu0 }
 0x199   : > { %v1149_v14 = vpop.f32.mrb[26].mxu0 }
 0x19a   : > { %v1216_v15 = vadd.f32 %v1210_v7, %v1152_v12  ;;  %v2401_v16 = vpop.f32.mrb[27].mxu0  ;;  %v2039_v14 = vpop.permute.xlu0 %2038 }
 0x19b   : > { %v1338_v17 = vpop.f32.mrb[28].mxu1 }
 0x19c   : > { %v2418_v18 = vpop.f32.mrb[29].mxu1 }
 0x19d   : > { %v1341_v19 = vpop.f32.mrb[30].mxu1 }
 0x19e   : > { %v2419_v20 = vpop.f32.mrb[31].mxu1 }
 0x19f   : > { %v1274_v21 = vpop.f32.mrb[28].mxu0 }
 0x1a0   : > { %v1280_v22 = vadd.f32 %v1274_v21, %v1216_v15  ;;  %v2412_v23 = vpop.f32.mrb[29].mxu0 }
 0x1a1   : > { %v1277_v24 = vpop.f32.mrb[30].mxu0 }
 0x1a2   : > { %v1344_v25 = vadd.f32 %v1338_v17, %v1280_v22  ;;  %v2413_v26 = vpop.f32.mrb[31].mxu0 }
 0x1a3   : > { %v1466_v27 = vpop.f32.mrb[32].mxu1 }
 0x1a4   : > { %v2430_v28 = vpop.f32.mrb[33].mxu1 }
 0x1a5   : > { %v1469_v0 = vpop.f32.mrb[34].mxu1 }
 0x1a6   : > { %v2431_v29 = vpop.f32.mrb[35].mxu1 }
 0x1a7   : > { %v1402_v30 = vpop.f32.mrb[32].mxu0 }
 0x1a8   : > { %v1408_v31 = vadd.f32 %v1402_v30, %v1344_v25  ;;  %v2424_v32 = vpop.f32.mrb[33].mxu0 }
 0x1a9   : > { %v1405_v33 = vpop.f32.mrb[34].mxu0 }
 0x1aa   : > { %v1472_v34 = vadd.f32 %v1466_v27, %v1408_v31  ;;  %v2425_v35 = vpop.f32.mrb[35].mxu0 }
 0x1ab   : > { %v1580_v36 = vpop.f32.mrb[36].mxu1 }
 0x1ac   : > { %v2442_v37 = vpop.f32.mrb[37].mxu1 }
 0x1ad   : > { %v1583_v38 = vpop.f32.mrb[38].mxu1 }
 0x1ae   : > { %v2443_v39 = vpop.f32.mrb[39].mxu1 }
 0x1af   : > { %v1516_v40 = vpop.f32.mrb[36].mxu0 }
 0x1b0   : > { %v1522_v41 = vadd.f32 %v1516_v40, %v1472_v34  ;;  %v2436_v42 = vpop.f32.mrb[37].mxu0 }
 0x1b1   : > { %v1519_v43 = vpop.f32.mrb[38].mxu0 }
 0x1b2   : > { %v1586_v44 = vadd.f32 %v1580_v36, %v1522_v41  ;;  %v2437_v45 = vpop.f32.mrb[39].mxu0 }
 0x1b3   : > { %v1708_v46 = vpop.f32.mrb[40].mxu1 }
 0x1b4   : > { %v2454_v47 = vpop.f32.mrb[41].mxu1 }
 0x1b5   : > { %v1711_v48 = vpop.f32.mrb[42].mxu1 }
 0x1b6   : > { %v2455_v49 = vpop.f32.mrb[43].mxu1 }
 0x1b7   : > { %v1644_v50 = vpop.f32.mrb[40].mxu0 }
 0x1b8   : > { %v1650_v51 = vadd.f32 %v1644_v50, %v1586_v44  ;;  %v2448_v52 = vpop.f32.mrb[41].mxu0 }
 0x1b9   : > { %v1647_v53 = vpop.f32.mrb[42].mxu0 }
 0x1ba   : > { %v1714_v54 = vadd.f32 %v1708_v46, %v1650_v51  ;;  %v2449_v55 = vpop.f32.mrb[43].mxu0 }
 0x1bb   : > { %v1836_v56 = vpop.f32.mrb[44].mxu1 }
 0x1bc   : > { %v2466_v57 = vpop.f32.mrb[45].mxu1 }
 0x1bd   : > { %v1839_v58 = vpop.f32.mrb[46].mxu1 }
 0x1be   : > { %v2467_v59 = vpop.f32.mrb[47].mxu1 }
 0x1bf   : > { %v1772_v60 = vpop.f32.mrb[44].mxu0 }
 0x1c0   : > { %v1778_v61 = vadd.f32 %v1772_v60, %v1714_v54  ;;  %v2460_v62 = vpop.f32.mrb[45].mxu0 }
 0x1c1   : > { %v1775_v63 = vpop.f32.mrb[46].mxu0 }
 0x1c2   : > { %v1842_v1 = vadd.f32 %v1836_v56, %v1778_v61  ;;  %v2461_v2 = vpop.f32.mrb[47].mxu0 }
 0x1c3   : > { %v1964_v3 = vpop.f32.mrb[48].mxu1 }
 0x1c4   : > { %v2478_v4 = vpop.f32.mrb[49].mxu1 }
 0x1c5   : > { %v1967_v5 = vpop.f32.mrb[50].mxu1 }
 0x1c6   : > { %v2479_v6 = vpop.f32.mrb[51].mxu1 }
 0x1c7   : > { %v1900_v7 = vpop.f32.mrb[48].mxu0 }
 0x1c8   : > { %v1906_v8 = vadd.f32 %v1900_v7, %v1842_v1  ;;  %v2472_v9 = vpop.f32.mrb[49].mxu0 }
 0x1c9   : > { %v1903_v10 = vpop.f32.mrb[50].mxu0 }
 0x1ca   : > { %v1970_v11 = vadd.f32 %v1964_v3, %v1906_v8  ;;  %v2473_v12 = vpop.f32.mrb[51].mxu0 }
 0x1cf   : > { %v2028_v13 = vpop.f32.mrb[52].mxu0 }
 0x1d0   : > { %v2034_v15 = vadd.f32 %v2028_v13, %v1970_v11  ;;  %v2484_v16 = vpop.f32.mrb[53].mxu0 }
 0x1d1   : > { %v2031_v17 = vpop.f32.mrb[54].mxu0 }
 0x1d2   : > { %v2041_v18 = vadd.f32 %v2039_v14, %v2034_v15  ;;  %v2485_v19 = vpop.f32.mrb[55].mxu0 }
 0x1d4   : > { %vm2042_vm11 = vcmp.ge.f32.partialorder %v2041_v18, 0.0  ;;  %v2043_v20 = vmul.f32 0.2, %v2041_v18 }
 0x1d6   : > { %v2044_v21 = vsel %vm2042_vm11, %v2041_v18, %v2043_v20 }
 0x1d7   : > { %v2045_v22 = vpack.c.bf16 %v2044_v21, %v2044_v21 }
 0x1d9   : > { %2046 = vst [vmem:[%s340_s27] sm:$0xf] %v2045_v22 }
 0x1da PF: > { %s15_s22 = sadd.s32 1, %s2577_s22   ;;  %s2999_s18 = smov %s2569_s20 }
 0x1db   : > { %p12_p10 = scmp.ge.s32.totalorder %s15_s22, 18   ;;  %s3000_s19 = smov %s2573_s21 }
 0x1dc   : > { %s3001_s20 = smov %s3004_s23  ;;  %s3002_s21 = smov %s3008_s24 }
 0x1dd   :  { %14 = sbr.rel (!%p12_p10) target bundleno = 3 (0x3), region = 102 }

// kernel: dpconvlstm_forward.25
= control target key start
LH: loop header
LB: loop body
LE: loop exit
PB: predicated region body
PF: predicated region fallthrough
CT: control target
= control target key end

     0   :  { %s2386_s18 = smov 0   ;;  %s2388_s19 = smov 0   ;;  %s2759_s0 = inlined_call_operand.vmem [shape: bf16[4,10,8,256], index: 0, kind: input, shape index: {}, may-alias: {0,1,2}]   ;;  %s2760_s1 = inlined_call_operand.vmem [shape: bf16[4,10,8,256], index: 1, kind: input, shape index: {}, may-alias: {0,1,2}]   ;;  %s2761_s2 = inlined_call_operand.vmem [shape: bf16[4,10,8,256], index: 2, kind: input, shape index: {}, may-alias: {0,1,2}]   ;;  %s2762_s3 = inlined_call_operand.vmem [shape: bf16[27,4,8], index: 3, kind: input, shape index: {}]   ;;  %s2763_s4 = inlined_call_operand.vmem [shape: f32[4,1], index: 4, kind: input, shape index: {}]   ;;  %s2764_s5 = inlined_call_operand.vmem [shape: bf16[4,8,4,128], index: 5, kind: output, shape index: {}]  }
   0x1   :  { %s2390_s20 = smov 0   ;;  %s2392_s21 = smov 0  }
   0x2   :  { %s2394_s22 = smov 0  }
   0x3 LB: > { %s24_s23 = sadd.s32 1, %s2335_s20  ;;  %s27_s24 = sadd.s32 1, %s2339_s21  ;;  %s2343_s22 = sphi %s2394_s22, %s15_s22   ;;  %s2339_s21 = sphi %s2392_s21, %s2768_s21   ;;  %s2335_s20 = sphi %s2390_s20, %s2767_s20   ;;  %s2331_s19 = sphi %s2388_s19, %s2766_s19   ;;  %s2327_s18 = sphi %s2386_s18, %s2765_s18  }
   0x4   : > { %p25_p0 = scmp.ge.s32.totalorder %s24_s23, 8  ;;  %p1960_p1 = scmp.ge.s32.totalorder %s2343_s22, 1 }
   0x5   : > { %p247_p2 = scmp.lt.s32.totalorder %s2343_s22, 33 }
   0x6   : > { %s2770_s23 = smov (%p25_p0, %s24_s23), 0  ;;  %s2772_s24 = smov (!%p25_p0, %s27_s24), %s2339_s21 }
   0x7   : > { %p248_p3 = pnand %p1960_p1, %p247_p2  ;;  %p29_p4 = scmp.ge.s32.totalorder %s2772_s24, 4 }
   0x8   : > { %p302_p5 = scmp.lt.s32.totalorder (!%p248_p3), %s2331_s19, 3  ;;  %p304_p6 = scmp.lt.s32.totalorder (!%p248_p3), %s2327_s18, 9  ;;  %v2345_v0 = vmov (!%p248_p3), 0.0   ;;  %vm2346_vm0 = vmmov (!%p248_p3), 0   ;;  %vm362_vm1 = vcmask (!%p248_p3), 1043456   ;;  %vm358_vm2 = vcmask (!%p248_p3), 64512  }
   0x9   : > { %s2774_s24 = smov (%p29_p4, %s2772_s24), 0  ;;  %251 = sbr.rel (%p248_p3) target bundleno = 477 (0x1dd), region = 40 }
   0xa   : > { %2084 = vmatprep.subr.bf16.mxu0 (!%p248_p3), %v2345_v0  ;;  %2090 = vmatprep.subr.bf16.mxu1 (!%p248_p3), %v2345_v0  ;;  %v342_v5 = vld [vmem:[%s2762_s3] sm:$0x3] (!%p248_p3)  ;;  %s2347_s10 = smov (!%p248_p3), 126   ;;  %s2348_s11 = smov (!%p248_p3), 127   ;;  %v2355_v14 = vmov (!%p248_p3), 0   ;;  %vm458_vm3 = vcmask (!%p248_p3), 1031168  }
   0xb   : > { %2086 = vmatprep.mubr.msk.bf16.mxu0 (!%p248_p3), %vm2346_vm0, %v2345_v0  ;;  %2092 = vmatprep.mubr.msk.bf16.mxu1 (!%p248_p3), %vm2346_vm0, %v2345_v0  ;;  %s311_s12 = sadd.s32 (!%p248_p3), 1, %s2327_s18  ;;  %s2349_s13 = smov (!%p248_p3), 118   ;;  %v1813_v13 = vld [vmem:[%s2763_s4] sm:$0xf] (!%p248_p3)  ;;  %vm356_vm4 = vcmask (!%p248_p3), 1039360   ;;  %vm513_vm5 = vcmask (!%p248_p3), 965632  }
   0xc   : > { %p314_p7 = scmp.lt.s32.totalorder (!%p248_p3), %s311_s12, 9  ;;  %s2350_s14 = smov (!%p248_p3), 117   ;;  %2298 = vset.pattern.permute.xlu0 (!%p248_p3), %v2355_v14  ;;  %v1969_v22 = vld [vmem:[%s2762_s3 + $0x2] sm:$0x3] (!%p248_p3)  ;;  %vm568_vm6 = vcmask (!%p248_p3), 957440   ;;  %vm623_vm7 = vcmask (!%p248_p3), 949248  }
   0xd   : > { %s2351_s16 = smov (!%p248_p3), 116   ;;  %s2353_s6 = smov (!%p248_p3), 107   ;;  %v1976_v28 = vld [vmem:[%s2762_s3 + $0x6] sm:$0x3] (!%p248_p3)  ;;  %v1974_v32 = vld [vmem:[%s2762_s3 + $0x4] sm:$0x3] (!%p248_p3) }
   0xe   : > { %s322_s8 = sadd.s32 (!%p248_p3), 2, %s2327_s18  ;;  %vm678_vm8 = vcmask (!%p248_p3), 883712   ;;  %v1980_v38 = vld [vmem:[%s2762_s3 + $0xa] sm:$0x3] (!%p248_p3)  ;;  %vm733_vm9 = vcmask (!%p248_p3), 875520   ;;  %vm788_vm10 = vcmask (!%p248_p3), 867328  }
   0xf   : > { %p325_p8 = scmp.lt.s32.totalorder (!%p248_p3), %s322_s8, 9  ;;  %v1978_v42 = vld [vmem:[%s2762_s3 + $0x8] sm:$0x3] (!%p248_p3)  ;;  %v1984_v49 = vld [vmem:[%s2762_s3 + $0xe] sm:$0x3] (!%p248_p3)  ;;  %p335_p9 = scmp.lt.s32.totalorder (!%p248_p3), %s2327_s18, 7 }
  0x10   : > { %s2776_s19 = smov (!%p302_p5, %s2331_s19), 3  ;;  %s2778_s12 = smov (!%p314_p7, %s311_s12), 9  ;;  %v1982_v54 = vld [vmem:[%s2762_s3 + $0xc] sm:$0x3]  ;;  %v1988_v58 = vld [vmem:[%s2762_s3 + $0x12] sm:$0x3] }
  0x11   : > { %s305_s25 = scalar_select %p304_p6, %s2327_s18, 9 }
  0x12   : > { %s2423_s26 = smul.u32 20, %s2776_s19  ;;  %s1963_s15 = sshll.u32 %s2778_s12, 1 }
  0x13   : > { %s1961_s27 = sshll.u32 %s305_s25, 1  ;;  %s2780_s8 = smov (!%p325_p8, %s322_s8), 9 }
  0x14   : > { %s308_s28 = sadd.s32 %s2423_s26, %s1961_s27  ;;  %s318_s17 = sadd.s32 %s2423_s26, %s1963_s15 }
  0x15   : > { %s1962_s29 = sshll.u32 %s308_s28, 2  ;;  %s1964_s25 = sshll.u32 %s318_s17, 2 }
  0x16   : > { %s310_s7 = scalar_lea.vmem %s2759_s0, %s1962_s29  ;;  %s2352_s27 = smov 108  }
  0x17   : > { %v346_v1 = vld [vmem:[%s310_s7] sm:$0xff]  ;;  %s2460_s30 = scalar_lea.vmem %s2760_s1, %s1964_s25  ;;  %s1965_s9 = sshll.u32 %s2780_s8, 1 }
  0x18   : > { %v343_v2 = vld [vmem:[%s310_s7] sm:$0xf]  ;;  %v1970_v3 = vcombine.low %v346_v1, %v346_v1  ;;  %v1971_v6 = vcombine.high %v346_v1, %v346_v1  ;;  %s2354_s7 = smov 106   ;;  %s329_s12 = sadd.s32 %s2423_s26, %s1965_s9  ;;  %v1986_v1 = vld [vmem:[%s2762_s3 + $0x10] sm:$0x3] }
  0x19   : > { %v410_v4 = vsel %vm362_vm1, %v343_v2, 0  ;;  %v889_v7 = vld [vmem:[%s2460_s30] sm:$0xff]  ;;  %s1966_s15 = sshll.u32 %s329_s12, 2  ;;  %s2782_s18 = smov (!%p335_p9, %s2327_s18), 7 }
  0x1a   : > { %2091 = vmatpush3.bf16.msra.mxu1 %v410_v4  ;;  %454 = vrot.lane.b32.xlu1 %v1970_v3, %s2347_s10  ;;  %v1992_v8 = vcombine.high %v889_v7, %v889_v7  ;;  %v1991_v9 = vcombine.low %v889_v7, %v889_v7  ;;  %s2484_s28 = scalar_lea.vmem %s2761_s2, %s1966_s15  ;;  %v839_v47 = vld [vmem:[%s2460_s30] sm:$0xf] }
  0x1b   : > { %352 = vrot.lane.b32.xlu0 %v1970_v3, %s2348_s11  ;;  %2102 = vmatprep.subr.bf16.mxu1 %v2345_v0  ;;  %v1377_v10 = vld [vmem:[%s2484_s28] sm:$0xff]  ;;  %v844_v52 = vsel %vm362_vm1, %v839_v47, 0 }
  0x1c   : > { %v2012_v11 = vcombine.high %v1377_v10, %v1377_v10  ;;  %v2011_v12 = vcombine.low %v1377_v10, %v1377_v10 }
  0x1d   : > { %2093 = vmatmul.mubr.msk.bf16.vlgmr.msra.gmra.mrb[0].mxu1 %vm358_vm2, %v342_v5  ;;  %v1994_v5 = vld [vmem:[%s2762_s3 + $0x16] sm:$0x3] }
  0x1e   : > { %2104 = vmatprep.mubr.msk.bf16.mxu1 %vm2346_vm0, %v2345_v0  ;;  %456 = vrot.lane.b32.xlu1 %v1971_v6, %s2347_s10 }
  0x1f   : > { %354 = vrot.lane.b32.xlu0 %v1971_v6, %s2348_s11 }
  0x22   : > { %511 = vrot.lane.b32.xlu1 %v1971_v6, %s2349_s13 }
  0x23   : > { %509 = vrot.lane.b32.xlu0 %v1970_v3, %s2349_s13 }
  0x26   : > { %566 = vrot.lane.b32.xlu1 %v1971_v6, %s2350_s14 }
  0x27   : > { %564 = vrot.lane.b32.xlu0 %v1970_v3, %s2350_s14 }
  0x2a   : > { %621 = vrot.lane.b32.xlu1 %v1971_v6, %s2351_s16 }
  0x2b   : > { %619 = vrot.lane.b32.xlu0 %v1970_v3, %s2351_s16 }
  0x2e   : > { %676 = vrot.lane.b32.xlu1 %v1971_v6, %s2352_s27 }
  0x2f   : > { %674 = vrot.lane.b32.xlu0 %v1970_v3, %s2352_s27 }
  0x32   : > { %731 = vrot.lane.b32.xlu1 %v1971_v6, %s2353_s6 }
  0x33   : > { %729 = vrot.lane.b32.xlu0 %v1970_v3, %s2353_s6 }
  0x36   : > { %786 = vrot.lane.b32.xlu1 %v1971_v6, %s2354_s7 }
  0x37   : > { %784 = vrot.lane.b32.xlu0 %v1970_v3, %s2354_s7 }
  0x3a   : > { %897 = vrot.lane.b32.xlu1 %v1992_v8, %s2348_s11 }
  0x3b   : > { %895 = vrot.lane.b32.xlu0 %v1991_v9, %s2348_s11 }
  0x3e   : > { %951 = vrot.lane.b32.xlu1 %v1992_v8, %s2347_s10 }
  0x3f   : > { %949 = vrot.lane.b32.xlu0 %v1991_v9, %s2347_s10 }
  0x42   : > { %1005 = vrot.lane.b32.xlu1 %v1992_v8, %s2349_s13 }
  0x43   : > { %1003 = vrot.lane.b32.xlu0 %v1991_v9, %s2349_s13 }
  0x46   : > { %1059 = vrot.lane.b32.xlu1 %v1992_v8, %s2350_s14 }
  0x47   : > { %1057 = vrot.lane.b32.xlu0 %v1991_v9, %s2350_s14 }
  0x4a   : > { %1113 = vrot.lane.b32.xlu1 %v1992_v8, %s2351_s16 }
  0x4b   : > { %1111 = vrot.lane.b32.xlu0 %v1991_v9, %s2351_s16 }
  0x4e   : > { %1167 = vrot.lane.b32.xlu1 %v1992_v8, %s2352_s27 }
  0x4f   : > { %1165 = vrot.lane.b32.xlu0 %v1991_v9, %s2352_s27 }
  0x52   : > { %1221 = vrot.lane.b32.xlu1 %v1992_v8, %s2353_s6 }
  0x53   : > { %1219 = vrot.lane.b32.xlu0 %v1991_v9, %s2353_s6 }
  0x56   : > { %1275 = vrot.lane.b32.xlu1 %v1992_v8, %s2354_s7 }
  0x57   : > { %1273 = vrot.lane.b32.xlu0 %v1991_v9, %s2354_s7 }
  0x5a   : > { %1385 = vrot.lane.b32.xlu1 %v2012_v11, %s2348_s11 }
  0x5b   : > { %1383 = vrot.lane.b32.xlu0 %v2011_v12, %s2348_s11 }
  0x5e   : > { %1439 = vrot.lane.b32.xlu1 %v2012_v11, %s2347_s10 }
  0x5f   : > { %1437 = vrot.lane.b32.xlu0 %v2011_v12, %s2347_s10 }
  0x62   : > { %1493 = vrot.lane.b32.xlu1 %v2012_v11, %s2349_s13 }
  0x63   : > { %1491 = vrot.lane.b32.xlu0 %v2011_v12, %s2349_s13 }
  0x66   : > { %1547 = vrot.lane.b32.xlu1 %v2012_v11, %s2350_s14 }
  0x67   : > { %1545 = vrot.lane.b32.xlu0 %v2011_v12, %s2350_s14 }
  0x6a   : > { %1601 = vrot.lane.b32.xlu1 %v2012_v11, %s2351_s16 }
  0x6b   : > { %1599 = vrot.lane.b32.xlu0 %v2011_v12, %s2351_s16 }
  0x6e   : > { %1655 = vrot.lane.b32.xlu1 %v2012_v11, %s2352_s27 }
  0x6f   : > { %1653 = vrot.lane.b32.xlu0 %v2011_v12, %s2352_s27 }
  0x72   : > { %1709 = vrot.lane.b32.xlu1 %v2012_v11, %s2353_s6 }
  0x73   : > { %1707 = vrot.lane.b32.xlu0 %v2011_v12, %s2353_s6 }
  0x76   : > { %1763 = vrot.lane.b32.xlu1 %v2012_v11, %s2354_s7  ;;  %v1990_v11 = vld [vmem:[%s2762_s3 + $0x14] sm:$0x3] }
  0x77   : > { %1761 = vrot.lane.b32.xlu0 %v2011_v12, %s2354_s7 }
  0x7b   : > { %1816 = vperm.xlu0 %2298, %v1813_v13  }
  0x8c   : > { %v455_v15 = vpop.permute.xlu1 %454 }
  0x8d   : > { %v353_v16 = vpop.permute.xlu0 %352 }
  0x90   : > { %v457_v17 = vpop.permute.xlu1 %456 }
  0x91   : > { %v355_v18 = vpop.permute.xlu0 %354  ;;  %v459_v19 = vsel %vm458_vm3, %v455_v15, %v457_v17  ;;  %v1998_v15 = vld [vmem:[%s2762_s3 + $0x1a] sm:$0x3] }
  0x92   : > { %v357_v20 = vsel %vm356_vm4, %v353_v16, %v355_v18  ;;  %v464_v23 = vsel %vm362_vm1, %v459_v19, 0 }
  0x93   : > { %v364_v21 = vsel %vm362_vm1, %v357_v20, 0 }
  0x94   : > { %2085 = vmatpush3.bf16.msra.mxu0 %v364_v21  ;;  %v512_v24 = vpop.permute.xlu1 %511  ;;  %v1996_v21 = vld [vmem:[%s2762_s3 + $0x18] sm:$0x3] }
  0x95   : > { %2096 = vmatprep.subr.bf16.mxu0 %v2345_v0  ;;  %v510_v25 = vpop.permute.xlu0 %509 }
  0x96   : > { %v514_v26 = vsel %vm513_vm5, %v510_v25, %v512_v24  ;;  %v2002_v25 = vld [vmem:[%s2762_s3 + $0x1e] sm:$0x3] }
  0x97   : > { %2087 = vmatmul.mubr.msk.bf16.vlgmr.msra.gmra.mrb[0].mxu0 %vm358_vm2, %v1969_v22  ;;  %v519_v27 = vsel %vm362_vm1, %v514_v26, 0 }
  0x98   : > { %2097 = vmatpush3.bf16.msra.mxu0 %v464_v23  ;;  %2103 = vmatpush3.bf16.msra.mxu1 %v519_v27  ;;  %v567_v29 = vpop.permute.xlu1 %566 }
  0x99   : > { %v565_v30 = vpop.permute.xlu0 %564  ;;  %2098 = vmatprep.mubr.msk.bf16.mxu0 %vm2346_vm0, %v2345_v0  ;;  %2108 = vmatprep.subr.bf16.mxu0 %v2345_v0 }
  0x9a   : > { %v569_v31 = vsel %vm568_vm6, %v565_v30, %v567_v29  ;;  %2114 = vmatprep.subr.bf16.mxu1 %v2345_v0 }
  0x9b   : > { %2105 = vmatmul.mubr.msk.bf16.vlgmr.msra.gmra.mrb[4].mxu1 %vm358_vm2, %v1976_v28  ;;  %v574_v33 = vsel %vm362_vm1, %v569_v31, 0  ;;  %v2000_v31 = vld [vmem:[%s2762_s3 + $0x1c] sm:$0x3] }
  0x9c   : > { %2116 = vmatprep.mubr.msk.bf16.mxu1 %vm2346_vm0, %v2345_v0  ;;  %v622_v34 = vpop.permute.xlu1 %621 }
  0x9d   : > { %v620_v35 = vpop.permute.xlu0 %619 }
  0x9e   : > { %v624_v36 = vsel %vm623_vm7, %v620_v35, %v622_v34 }
  0x9f   : > { %2099 = vmatmul.mubr.msk.bf16.vlgmr.msra.gmra.mrb[4].mxu0 %vm358_vm2, %v1974_v32  ;;  %v629_v37 = vsel %vm362_vm1, %v624_v36, 0  ;;  %v2006_v36 = vld [vmem:[%s2762_s3 + $0x22] sm:$0x3] }
  0xa0   : > { %2109 = vmatpush3.bf16.msra.mxu0 %v574_v33  ;;  %2115 = vmatpush3.bf16.msra.mxu1 %v629_v37  ;;  %v677_v39 = vpop.permute.xlu1 %676 }
  0xa1   : > { %v675_v40 = vpop.permute.xlu0 %674  ;;  %2110 = vmatprep.mubr.msk.bf16.mxu0 %vm2346_vm0, %v2345_v0  ;;  %2120 = vmatprep.subr.bf16.mxu0 %v2345_v0 }
  0xa2   : > { %v679_v41 = vsel %vm678_vm8, %v675_v40, %v677_v39  ;;  %2126 = vmatprep.subr.bf16.mxu1 %v2345_v0  ;;  %v1327_v40 = vld [vmem:[%s2484_s28] sm:$0xf]  ;;  %s1967_s28 = sshll.u32 %s2776_s19, 3 }
  0xa3   : > { %2117 = vmatmul.mubr.msk.bf16.vlgmr.msra.gmra.mrb[8].mxu1 %vm358_vm2, %v1980_v38  ;;  %v684_v43 = vsel %vm362_vm1, %v679_v41, 0  ;;  %v2004_v41 = vld [vmem:[%s2762_s3 + $0x20] sm:$0x3]  ;;  %s338_s11 = sadd.s32 %s1967_s28, %s2782_s18 }
  0xa4   : > { %2128 = vmatprep.mubr.msk.bf16.mxu1 %vm2346_vm0, %v2345_v0  ;;  %v732_v44 = vpop.permute.xlu1 %731  ;;  %s1968_s13 = sshll.u32 %s338_s11, 1 }
  0xa5   : > { %v730_v45 = vpop.permute.xlu0 %729  ;;  %s340_s27 = scalar_lea.vmem %s2764_s5, %s1968_s13 }
  0xa6   : > { %v734_v46 = vsel %vm733_vm9, %v730_v45, %v732_v44 }
  0xa7   : > { %2111 = vmatmul.mubr.msk.bf16.vlgmr.msra.gmra.mrb[8].mxu0 %vm358_vm2, %v1978_v42  ;;  %v739_v48 = vsel %vm362_vm1, %v734_v46, 0  ;;  %v1332_v42 = vsel %vm362_vm1, %v1327_v40, 0  ;;  %v2010_v46 = vld [vmem:[%s2762_s3 + $0x26] sm:$0x3] }
  0xa8   : > { %2121 = vmatpush3.bf16.msra.mxu0 %v684_v43  ;;  %2127 = vmatpush3.bf16.msra.mxu1 %v739_v48  ;;  %v787_v50 = vpop.permute.xlu1 %786 }
  0xa9   : > { %v785_v51 = vpop.permute.xlu0 %784  ;;  %2122 = vmatprep.mubr.msk.bf16.mxu0 %vm2346_vm0, %v2345_v0  ;;  %2132 = vmatprep.subr.bf16.mxu0 %v2345_v0 }
  0xaa   : > { %v789_v53 = vsel %vm788_vm10, %v785_v51, %v787_v50  ;;  %2138 = vmatprep.subr.bf16.mxu1 %v2345_v0  ;;  %v2008_v51 = vld [vmem:[%s2762_s3 + $0x24] sm:$0x3] }
  0xab   : > { %2129 = vmatmul.mubr.msk.bf16.vlgmr.msra.gmra.mrb[12].mxu1 %vm358_vm2, %v1984_v49  ;;  %v794_v55 = vsel %vm362_vm1, %v789_v53, 0 }
  0xac   : > { %2139 = vmatpush3.bf16.msra.mxu1 %v844_v52  ;;  %2140 = vmatprep.mubr.msk.bf16.mxu1 %vm2346_vm0, %v2345_v0  ;;  %v898_v56 = vpop.permute.xlu1 %897 }
  0xad   : > { %v896_v57 = vpop.permute.xlu0 %895  ;;  %2150 = vmatprep.subr.bf16.mxu1 %v2345_v0 }
  0xae   : > { %v899_v61 = vsel %vm356_vm4, %v896_v57, %v898_v56  ;;  %v2016_v56 = vld [vmem:[%s2762_s3 + $0x2a] sm:$0x3] }
  0xaf   : > { %2123 = vmatmul.mubr.msk.bf16.vlgmr.msra.gmra.mrb[12].mxu0 %vm358_vm2, %v1982_v54  ;;  %v904_v2 = vsel %vm362_vm1, %v899_v61, 0  ;;  %v2014_v61 = vld [vmem:[%s2762_s3 + $0x28] sm:$0x3] }
  0xb0   : > { %2133 = vmatpush3.bf16.msra.mxu0 %v794_v55  ;;  %2134 = vmatprep.mubr.msk.bf16.mxu0 %vm2346_vm0, %v2345_v0  ;;  %v952_v59 = vpop.permute.xlu1 %951 }
  0xb1   : > { %2144 = vmatprep.subr.bf16.mxu0 %v2345_v0  ;;  %v950_v60 = vpop.permute.xlu0 %949 }
  0xb2   : > { %v953_v62 = vsel %vm458_vm3, %v950_v60, %v952_v59 }
  0xb3   : > { %v958_v63 = vsel %vm362_vm1, %v953_v62, 0  ;;  %2141 = vmatmul.mubr.msk.bf16.vlgmr.msra.gmra.mrb[16].mxu1 %vm358_vm2, %v1988_v58 }
  0xb4   : > { %2151 = vmatpush3.bf16.msra.mxu1 %v958_v63  ;;  %2152 = vmatprep.mubr.msk.bf16.mxu1 %vm2346_vm0, %v2345_v0  ;;  %v1006_v3 = vpop.permute.xlu1 %1005 }
  0xb5   : > { %v1004_v4 = vpop.permute.xlu0 %1003  ;;  %2162 = vmatprep.subr.bf16.mxu1 %v2345_v0 }
  0xb6   : > { %v1007_v8 = vsel %vm513_vm5, %v1004_v4, %v1006_v3  ;;  %v2020_v3 = vld [vmem:[%s2762_s3 + $0x2e] sm:$0x3] }
  0xb7   : > { %2135 = vmatmul.mubr.msk.bf16.vlgmr.msra.gmra.mrb[16].mxu0 %vm358_vm2, %v1986_v1  ;;  %v1012_v12 = vsel %vm362_vm1, %v1007_v8, 0 }
  0xb8   : > { %2145 = vmatpush3.bf16.msra.mxu0 %v904_v2  ;;  %2146 = vmatprep.mubr.msk.bf16.mxu0 %vm2346_vm0, %v2345_v0  ;;  %v1060_v6 = vpop.permute.xlu1 %1059 }
  0xb9   : > { %2156 = vmatprep.subr.bf16.mxu0 %v2345_v0  ;;  %v1058_v7 = vpop.permute.xlu0 %1057 }
  0xba   : > { %v1061_v9 = vsel %vm568_vm6, %v1058_v7, %v1060_v6  ;;  %v2018_v6 = vld [vmem:[%s2762_s3 + $0x2c] sm:$0x3] }
  0xbb   : > { %v1066_v10 = vsel %vm362_vm1, %v1061_v9, 0  ;;  %2153 = vmatmul.mubr.msk.bf16.vlgmr.msra.gmra.mrb[20].mxu1 %vm358_vm2, %v1994_v5 }
  0xbc   : > { %2163 = vmatpush3.bf16.msra.mxu1 %v1066_v10  ;;  %2164 = vmatprep.mubr.msk.bf16.mxu1 %vm2346_vm0, %v2345_v0  ;;  %v1114_v13 = vpop.permute.xlu1 %1113  ;;  %v2024_v10 = vld [vmem:[%s2762_s3 + $0x32] sm:$0x3] }
  0xbd   : > { %v1112_v14 = vpop.permute.xlu0 %1111  ;;  %2174 = vmatprep.subr.bf16.mxu1 %v2345_v0 }
  0xbe   : > { %v1115_v18 = vsel %vm623_vm7, %v1112_v14, %v1114_v13 }
  0xbf   : > { %2147 = vmatmul.mubr.msk.bf16.vlgmr.msra.gmra.mrb[20].mxu0 %vm358_vm2, %v1990_v11  ;;  %v1120_v22 = vsel %vm362_vm1, %v1115_v18, 0  ;;  %v2026_v18 = vld [vmem:[%s2762_s3 + $0x34] sm:$0x3] }
  0xc0   : > { %2157 = vmatpush3.bf16.msra.mxu0 %v1012_v12  ;;  %2158 = vmatprep.mubr.msk.bf16.mxu0 %vm2346_vm0, %v2345_v0  ;;  %v1168_v16 = vpop.permute.xlu1 %1167 }
  0xc1   : > { %2168 = vmatprep.subr.bf16.mxu0 %v2345_v0  ;;  %v1166_v17 = vpop.permute.xlu0 %1165 }
  0xc2   : > { %v1169_v19 = vsel %vm678_vm8, %v1166_v17, %v1168_v16  ;;  %v2022_v16 = vld [vmem:[%s2762_s3 + $0x30] sm:$0x3] }
  0xc3   : > { %v1174_v20 = vsel %vm362_vm1, %v1169_v19, 0  ;;  %2165 = vmatmul.mubr.msk.bf16.vlgmr.msra.gmra.mrb[24].mxu1 %vm358_vm2, %v1998_v15 }
  0xc4   : > { %2175 = vmatpush3.bf16.msra.mxu1 %v1174_v20  ;;  %2176 = vmatprep.mubr.msk.bf16.mxu1 %vm2346_vm0, %v2345_v0  ;;  %v1222_v23 = vpop.permute.xlu1 %1221 }
  0xc5   : > { %v1220_v24 = vpop.permute.xlu0 %1219  ;;  %2186 = vmatprep.subr.bf16.mxu1 %v2345_v0 }
  0xc6   : > { %v1223_v28 = vsel %vm733_vm9, %v1220_v24, %v1222_v23 }
  0xc7   : > { %2159 = vmatmul.mubr.msk.bf16.vlgmr.msra.gmra.mrb[24].mxu0 %vm358_vm2, %v1996_v21  ;;  %v1228_v32 = vsel %vm362_vm1, %v1223_v28, 0 }
  0xc8   : > { %2169 = vmatpush3.bf16.msra.mxu0 %v1120_v22  ;;  %2170 = vmatprep.mubr.msk.bf16.mxu0 %vm2346_vm0, %v2345_v0  ;;  %v1276_v26 = vpop.permute.xlu1 %1275 }
  0xc9   : > { %2180 = vmatprep.subr.bf16.mxu0 %v2345_v0  ;;  %v1274_v27 = vpop.permute.xlu0 %1273 }
  0xca   : > { %v1277_v29 = vsel %vm788_vm10, %v1274_v27, %v1276_v26 }
  0xcb   : > { %2177 = vmatmul.mubr.msk.bf16.vlgmr.msra.gmra.mrb[28].mxu1 %vm358_vm2, %v2002_v25  ;;  %v1282_v30 = vsel %vm362_vm1, %v1277_v29, 0 }
  0xcc   : > { %2187 = vmatpush3.bf16.msra.mxu1 %v1282_v30  ;;  %2188 = vmatprep.mubr.msk.bf16.mxu1 %vm2346_vm0, %v2345_v0  ;;  %v1386_v33 = vpop.permute.xlu1 %1385 }
  0xcd   : > { %v1384_v34 = vpop.permute.xlu0 %1383  ;;  %2198 = vmatprep.subr.bf16.mxu1 %v2345_v0 }
  0xce   : > { %v1387_v35 = vsel %vm356_vm4, %v1384_v34, %v1386_v33 }
  0xcf   : > { %2171 = vmatmul.mubr.msk.bf16.vlgmr.msra.gmra.mrb[28].mxu0 %vm358_vm2, %v2000_v31  ;;  %v1392_v37 = vsel %vm362_vm1, %v1387_v35, 0 }
  0xd0   : > { %2181 = vmatpush3.bf16.msra.mxu0 %v1228_v32  ;;  %2182 = vmatprep.mubr.msk.bf16.mxu0 %vm2346_vm0, %v2345_v0  ;;  %v1440_v38 = vpop.permute.xlu1 %1439 }
  0xd1   : > { %2192 = vmatprep.subr.bf16.mxu0 %v2345_v0  ;;  %v1438_v39 = vpop.permute.xlu0 %1437 }
  0xd2   : > { %v1441_v50 = vsel %vm458_vm3, %v1438_v39, %v1440_v38 }
  0xd3   : > { %2189 = vmatmul.mubr.msk.bf16.vlgmr.msra.gmra.mrb[32].mxu1 %vm358_vm2, %v2006_v36  ;;  %v1446_v52 = vsel %vm362_vm1, %v1441_v50, 0 }
  0xd4   : > { %2199 = vmatpush3.bf16.msra.mxu1 %v1392_v37  ;;  %2200 = vmatprep.mubr.msk.bf16.mxu1 %vm2346_vm0, %v2345_v0  ;;  %v1494_v43 = vpop.permute.xlu1 %1493 }
  0xd5   : > { %v1492_v44 = vpop.permute.xlu0 %1491  ;;  %2210 = vmatprep.subr.bf16.mxu1 %v2345_v0 }
  0xd6   : > { %v1495_v45 = vsel %vm513_vm5, %v1492_v44, %v1494_v43 }
  0xd7   : > { %2183 = vmatmul.mubr.msk.bf16.vlgmr.msra.gmra.mrb[32].mxu0 %vm358_vm2, %v2004_v41  ;;  %v1500_v47 = vsel %vm362_vm1, %v1495_v45, 0 }
  0xd8   : > { %2193 = vmatpush3.bf16.msra.mxu0 %v1332_v42  ;;  %2194 = vmatprep.mubr.msk.bf16.mxu0 %vm2346_vm0, %v2345_v0  ;;  %v1548_v48 = vpop.permute.xlu1 %1547 }
  0xd9   : > { %2204 = vmatprep.subr.bf16.mxu0 %v2345_v0  ;;  %v1546_v49 = vpop.permute.xlu0 %1545 }
  0xda   : > { %v1549_v60 = vsel %vm568_vm6, %v1546_v49, %v1548_v48 }
  0xdb   : > { %2201 = vmatmul.mubr.msk.bf16.vlgmr.msra.gmra.mrb[36].mxu1 %vm358_vm2, %v2010_v46  ;;  %v1554_v62 = vsel %vm362_vm1, %v1549_v60, 0 }
  0xdc   : > { %2211 = vmatpush3.bf16.msra.mxu1 %v1500_v47  ;;  %2212 = vmatprep.mubr.msk.bf16.mxu1 %vm2346_vm0, %v2345_v0  ;;  %v1602_v53 = vpop.permute.xlu1 %1601 }
  0xdd   : > { %v1600_v54 = vpop.permute.xlu0 %1599  ;;  %2222 = vmatprep.subr.bf16.mxu1 %v2345_v0 }
  0xde   : > { %v1603_v55 = vsel %vm623_vm7, %v1600_v54, %v1602_v53 }
  0xdf   : > { %2195 = vmatmul.mubr.msk.bf16.vlgmr.msra.gmra.mrb[36].mxu0 %vm358_vm2, %v2008_v51  ;;  %v1608_v57 = vsel %vm362_vm1, %v1603_v55, 0 }
  0xe0   : > { %2205 = vmatpush3.bf16.msra.mxu0 %v1446_v52  ;;  %2206 = vmatprep.mubr.msk.bf16.mxu0 %vm2346_vm0, %v2345_v0  ;;  %v1656_v58 = vpop.permute.xlu1 %1655 }
  0xe1   : > { %2216 = vmatprep.subr.bf16.mxu0 %v2345_v0  ;;  %v1654_v59 = vpop.permute.xlu0 %1653 }
  0xe2   : > { %v1657_v5 = vsel %vm678_vm8, %v1654_v59, %v1656_v58 }
  0xe3   : > { %2213 = vmatmul.mubr.msk.bf16.vlgmr.msra.gmra.mrb[40].mxu1 %vm358_vm2, %v2016_v56  ;;  %v1662_v7 = vsel %vm362_vm1, %v1657_v5, 0 }
  0xe4   : > { %2223 = vmatpush3.bf16.msra.mxu1 %v1608_v57  ;;  %2224 = vmatprep.mubr.msk.bf16.mxu1 %vm2346_vm0, %v2345_v0  ;;  %v1710_v63 = vpop.permute.xlu1 %1709 }
  0xe5   : > { %v1708_v1 = vpop.permute.xlu0 %1707  ;;  %2234 = vmatprep.subr.bf16.mxu1 %v2345_v0 }
  0xe6   : > { %v1711_v2 = vsel %vm733_vm9, %v1708_v1, %v1710_v63 }
  0xe7   : > { %2207 = vmatmul.mubr.msk.bf16.vlgmr.msra.gmra.mrb[40].mxu0 %vm358_vm2, %v2014_v61  ;;  %v1716_v4 = vsel %vm362_vm1, %v1711_v2, 0 }
  0xe8   : > { %2217 = vmatpush3.bf16.msra.mxu0 %v1554_v62  ;;  %2218 = vmatprep.mubr.msk.bf16.mxu0 %vm2346_vm0, %v2345_v0  ;;  %v1764_v8 = vpop.permute.xlu1 %1763 }
  0xe9   : > { %2228 = vmatprep.subr.bf16.mxu0 %v2345_v0  ;;  %v1762_v9 = vpop.permute.xlu0 %1761 }
  0xea   : > { %v1765_v13 = vsel %vm788_vm10, %v1762_v9, %v1764_v8 }
  0xeb   : > { %2225 = vmatmul.mubr.msk.bf16.vlgmr.msra.gmra.mrb[44].mxu1 %vm358_vm2, %v2020_v3  ;;  %v1770_v17 = vsel %vm362_vm1, %v1765_v13, 0 }
  0xec   : > { %2235 = vmatpush3.bf16.msra.mxu1 %v1716_v4  ;;  %2236 = vmatprep.mubr.msk.bf16.mxu1 %vm2346_vm0, %v2345_v0 }
  0xef   : > { %2219 = vmatmul.mubr.msk.bf16.vlgmr.msra.gmra.mrb[44].mxu0 %vm358_vm2, %v2018_v6 }
  0xf0   : > { %2229 = vmatpush3.bf16.msra.mxu0 %v1662_v7  ;;  %2230 = vmatprep.mubr.msk.bf16.mxu0 %vm2346_vm0, %v2345_v0  ;;  %v446_v11 = vpop.f32.mrb[0].mxu1 }
  0xf1   : > { %2240 = vmatprep.subr.bf16.mxu0 %v2345_v0  ;;  %v2094_v12 = vpop.f32.mrb[1].mxu1 }
  0xf2   : > { %v449_v14 = vpop.f32.mrb[2].mxu1 }
  0xf3   : > { %2237 = vmatmul.mubr.msk.bf16.vlgmr.msra.gmra.mrb[48].mxu1 %vm358_vm2, %v2024_v10  ;;  %v2095_v15 = vpop.f32.mrb[3].mxu1 }
  0xf7   : > { %2231 = vmatmul.mubr.msk.bf16.vlgmr.msra.gmra.mrb[48].mxu0 %vm358_vm2, %v2022_v16 }
  0xf8   : > { %2241 = vmatpush3.bf16.msra.mxu0 %v1770_v17  ;;  %2242 = vmatprep.mubr.msk.bf16.mxu0 %vm2346_vm0, %v2345_v0 }
  0xff   : > { %2243 = vmatmul.mubr.msk.bf16.vlgmr.msra.gmra.mrb[52].mxu0 %vm358_vm2, %v2026_v18 }
 0x16a   : > { %v400_v19 = vpop.f32.mrb[0].mxu0 }
 0x16b   : > { %v2088_v20 = vpop.f32.mrb[1].mxu0  ;;  %v447_v21 = vadd.f32 %v446_v11, %v400_v19 }
 0x16c   : > { %v403_v22 = vpop.f32.mrb[2].mxu0 }
 0x16d   : > { %v2089_v23 = vpop.f32.mrb[3].mxu0 }
 0x16e   : > { %v555_v24 = vpop.f32.mrb[4].mxu1 }
 0x16f   : > { %v2106_v25 = vpop.f32.mrb[5].mxu1 }
 0x170   : > { %v558_v26 = vpop.f32.mrb[6].mxu1 }
 0x171   : > { %v2107_v27 = vpop.f32.mrb[7].mxu1 }
 0x172   : > { %v500_v28 = vpop.f32.mrb[4].mxu0 }
 0x173   : > { %v506_v29 = vadd.f32 %v500_v28, %v447_v21  ;;  %v2100_v30 = vpop.f32.mrb[5].mxu0 }
 0x174   : > { %v503_v31 = vpop.f32.mrb[6].mxu0 }
 0x175   : > { %v561_v0 = vadd.f32 %v555_v24, %v506_v29  ;;  %v2101_v32 = vpop.f32.mrb[7].mxu0 }
 0x176   : > { %v665_v33 = vpop.f32.mrb[8].mxu1 }
 0x177   : > { %v2118_v34 = vpop.f32.mrb[9].mxu1 }
 0x178   : > { %v668_v35 = vpop.f32.mrb[10].mxu1 }
 0x179   : > { %v2119_v36 = vpop.f32.mrb[11].mxu1 }
 0x17a   : > { %v610_v37 = vpop.f32.mrb[8].mxu0 }
 0x17b   : > { %v616_v38 = vadd.f32 %v610_v37, %v561_v0  ;;  %v2112_v39 = vpop.f32.mrb[9].mxu0 }
 0x17c   : > { %v613_v40 = vpop.f32.mrb[10].mxu0 }
 0x17d   : > { %v671_v41 = vadd.f32 %v665_v33, %v616_v38  ;;  %v2113_v42 = vpop.f32.mrb[11].mxu0 }
 0x17e   : > { %v775_v43 = vpop.f32.mrb[12].mxu1 }
 0x17f   : > { %v2130_v44 = vpop.f32.mrb[13].mxu1 }
 0x180   : > { %v778_v45 = vpop.f32.mrb[14].mxu1 }
 0x181   : > { %v2131_v46 = vpop.f32.mrb[15].mxu1 }
 0x182   : > { %v720_v47 = vpop.f32.mrb[12].mxu0 }
 0x183   : > { %v726_v48 = vadd.f32 %v720_v47, %v671_v41  ;;  %v2124_v49 = vpop.f32.mrb[13].mxu0 }
 0x184   : > { %v723_v50 = vpop.f32.mrb[14].mxu0 }
 0x185   : > { %v781_v51 = vadd.f32 %v775_v43, %v726_v48  ;;  %v2125_v52 = vpop.f32.mrb[15].mxu0 }
 0x186   : > { %v880_v53 = vpop.f32.mrb[16].mxu1 }
 0x187   : > { %v2142_v54 = vpop.f32.mrb[17].mxu1 }
 0x188   : > { %v883_v55 = vpop.f32.mrb[18].mxu1 }
 0x189   : > { %v2143_v56 = vpop.f32.mrb[19].mxu1 }
 0x18a   : > { %v830_v57 = vpop.f32.mrb[16].mxu0 }
 0x18b   : > { %v836_v58 = vadd.f32 %v830_v57, %v781_v51  ;;  %v2136_v59 = vpop.f32.mrb[17].mxu0 }
 0x18c   : > { %v833_v60 = vpop.f32.mrb[18].mxu0 }
 0x18d   : > { %v886_v61 = vadd.f32 %v880_v53, %v836_v58  ;;  %v2137_v62 = vpop.f32.mrb[19].mxu0 }
 0x18e   : > { %v994_v63 = vpop.f32.mrb[20].mxu1 }
 0x18f   : > { %v2154_v1 = vpop.f32.mrb[21].mxu1 }
 0x190   : > { %v997_v2 = vpop.f32.mrb[22].mxu1 }
 0x191   : > { %v2155_v3 = vpop.f32.mrb[23].mxu1 }
 0x192   : > { %v940_v4 = vpop.f32.mrb[20].mxu0 }
 0x193   : > { %v946_v5 = vadd.f32 %v940_v4, %v886_v61  ;;  %v2148_v6 = vpop.f32.mrb[21].mxu0 }
 0x194   : > { %v943_v7 = vpop.f32.mrb[22].mxu0 }
 0x195   : > { %v1000_v8 = vadd.f32 %v994_v63, %v946_v5  ;;  %v2149_v9 = vpop.f32.mrb[23].mxu0 }
 0x196   : > { %v1102_v10 = vpop.f32.mrb[24].mxu1 }
 0x197   : > { %v2166_v11 = vpop.f32.mrb[25].mxu1 }
 0x198   : > { %v1105_v12 = vpop.f32.mrb[26].mxu1 }
 0x199   : > { %v2167_v13 = vpop.f32.mrb[27].mxu1 }
 0x19a   : > { %v1048_v14 = vpop.f32.mrb[24].mxu0 }
 0x19b   : > { %v1054_v15 = vadd.f32 %v1048_v14, %v1000_v8  ;;  %v2160_v16 = vpop.f32.mrb[25].mxu0 }
 0x19c   : > { %v1051_v17 = vpop.f32.mrb[26].mxu0 }
 0x19d   : > { %v1108_v18 = vadd.f32 %v1102_v10, %v1054_v15  ;;  %v2161_v19 = vpop.f32.mrb[27].mxu0  ;;  %v1817_v17 = vpop.permute.xlu0 %1816 }
 0x19e   : > { %v1210_v20 = vpop.f32.mrb[28].mxu1 }
 0x19f   : > { %v2178_v21 = vpop.f32.mrb[29].mxu1 }
 0x1a0   : > { %v1213_v22 = vpop.f32.mrb[30].mxu1 }
 0x1a1   : > { %v2179_v23 = vpop.f32.mrb[31].mxu1 }
 0x1a2   : > { %v1156_v24 = vpop.f32.mrb[28].mxu0 }
 0x1a3   : > { %v1162_v25 = vadd.f32 %v1156_v24, %v1108_v18  ;;  %v2172_v26 = vpop.f32.mrb[29].mxu0 }
 0x1a4   : > { %v1159_v27 = vpop.f32.mrb[30].mxu0 }
 0x1a5   : > { %v1216_v28 = vadd.f32 %v1210_v20, %v1162_v25  ;;  %v2173_v29 = vpop.f32.mrb[31].mxu0 }
 0x1a6   : > { %v1318_v30 = vpop.f32.mrb[32].mxu1 }
 0x1a7   : > { %v2190_v31 = vpop.f32.mrb[33].mxu1 }
 0x1a8   : > { %v1321_v0 = vpop.f32.mrb[34].mxu1 }
 0x1a9   : > { %v2191_v32 = vpop.f32.mrb[35].mxu1 }
 0x1aa   : > { %v1264_v33 = vpop.f32.mrb[32].mxu0 }
 0x1ab   : > { %v1270_v34 = vadd.f32 %v1264_v33, %v1216_v28  ;;  %v2184_v35 = vpop.f32.mrb[33].mxu0 }
 0x1ac   : > { %v1267_v36 = vpop.f32.mrb[34].mxu0 }
 0x1ad   : > { %v1324_v37 = vadd.f32 %v1318_v30, %v1270_v34  ;;  %v2185_v38 = vpop.f32.mrb[35].mxu0 }
 0x1ae   : > { %v1428_v39 = vpop.f32.mrb[36].mxu1 }
 0x1af   : > { %v2202_v40 = vpop.f32.mrb[37].mxu1 }
 0x1b0   : > { %v1431_v41 = vpop.f32.mrb[38].mxu1 }
 0x1b1   : > { %v2203_v42 = vpop.f32.mrb[39].mxu1 }
 0x1b2   : > { %v1368_v43 = vpop.f32.mrb[36].mxu0 }
 0x1b3   : > { %v1374_v44 = vadd.f32 %v1368_v43, %v1324_v37  ;;  %v2196_v45 = vpop.f32.mrb[37].mxu0 }
 0x1b4   : > { %v1371_v46 = vpop.f32.mrb[38].mxu0 }
 0x1b5   : > { %v1434_v47 = vadd.f32 %v1428_v39, %v1374_v44  ;;  %v2197_v48 = vpop.f32.mrb[39].mxu0 }
 0x1b6   : > { %v1536_v49 = vpop.f32.mrb[40].mxu1 }
 0x1b7   : > { %v2214_v50 = vpop.f32.mrb[41].mxu1 }
 0x1b8   : > { %v1539_v51 = vpop.f32.mrb[42].mxu1 }
 0x1b9   : > { %v2215_v52 = vpop.f32.mrb[43].mxu1 }
 0x1ba   : > { %v1482_v53 = vpop.f32.mrb[40].mxu0 }
 0x1bb   : > { %v1488_v54 = vadd.f32 %v1482_v53, %v1434_v47  ;;  %v2208_v55 = vpop.f32.mrb[41].mxu0 }
 0x1bc   : > { %v1485_v56 = vpop.f32.mrb[42].mxu0 }
 0x1bd   : > { %v1542_v57 = vadd.f32 %v1536_v49, %v1488_v54  ;;  %v2209_v58 = vpop.f32.mrb[43].mxu0 }
 0x1be   : > { %v1644_v59 = vpop.f32.mrb[44].mxu1 }
 0x1bf   : > { %v2226_v60 = vpop.f32.mrb[45].mxu1 }
 0x1c0   : > { %v1647_v61 = vpop.f32.mrb[46].mxu1 }
 0x1c1   : > { %v2227_v62 = vpop.f32.mrb[47].mxu1 }
 0x1c2   : > { %v1590_v63 = vpop.f32.mrb[44].mxu0 }
 0x1c3   : > { %v1596_v1 = vadd.f32 %v1590_v63, %v1542_v57  ;;  %v2220_v2 = vpop.f32.mrb[45].mxu0 }
 0x1c4   : > { %v1593_v3 = vpop.f32.mrb[46].mxu0 }
 0x1c5   : > { %v1650_v4 = vadd.f32 %v1644_v59, %v1596_v1  ;;  %v2221_v5 = vpop.f32.mrb[47].mxu0 }
 0x1c6   : > { %v1752_v6 = vpop.f32.mrb[48].mxu1 }
 0x1c7   : > { %v2238_v7 = vpop.f32.mrb[49].mxu1 }
 0x1c8   : > { %v1755_v8 = vpop.f32.mrb[50].mxu1 }
 0x1c9   : > { %v2239_v9 = vpop.f32.mrb[51].mxu1 }
 0x1ca   : > { %v1698_v10 = vpop.f32.mrb[48].mxu0 }
 0x1cb   : > { %v1704_v11 = vadd.f32 %v1698_v10, %v1650_v4  ;;  %v2232_v12 = vpop.f32.mrb[49].mxu0 }
 0x1cc   : > { %v1701_v13 = vpop.f32.mrb[50].mxu0 }
 0x1cd   : > { %v1758_v14 = vadd.f32 %v1752_v6, %v1704_v11  ;;  %v2233_v15 = vpop.f32.mrb[51].mxu0 }
 0x1d2   : > { %v1806_v16 = vpop.f32.mrb[52].mxu0 }
 0x1d3   : > { %v1812_v18 = vadd.f32 %v1806_v16, %v1758_v14  ;;  %v2244_v19 = vpop.f32.mrb[53].mxu0 }
 0x1d4   : > { %v1809_v20 = vpop.f32.mrb[54].mxu0 }
 0x1d5   : > { %v1819_v21 = vadd.f32 %v1817_v17, %v1812_v18  ;;  %v2245_v22 = vpop.f32.mrb[55].mxu0 }
 0x1d7   : > { %vm1820_vm11 = vcmp.ge.f32.partialorder %v1819_v21, 0.0  ;;  %v1821_v23 = vmul.f32 0.2, %v1819_v21 }
 0x1d9   : > { %v1822_v24 = vsel %vm1820_vm11, %v1819_v21, %v1821_v23 }
 0x1da   : > { %v1823_v25 = vpack.c.bf16 %v1822_v24, %v1822_v24 }
 0x1dc   : > { %1824 = vst [vmem:[%s340_s27] sm:$0x3] %v1823_v25 }
 0x1dd PF: > { %s15_s22 = sadd.s32 1, %s2343_s22   ;;  %s2765_s18 = smov %s2335_s20 }
 0x1de   : > { %p12_p10 = scmp.ge.s32.totalorder %s15_s22, 34   ;;  %s2766_s19 = smov %s2339_s21 }
 0x1df   : > { %s2767_s20 = smov %s2770_s23  ;;  %s2768_s21 = smov %s2774_s24 }
 0x1e0   :  { %14 = sbr.rel (!%p12_p10) target bundleno = 3 (0x3), region = 102 }

// kernel: dpconvlstm_forward.19
= control target key start
LH: loop header
LB: loop body
LE: loop exit
PB: predicated region body
PF: predicated region fallthrough
CT: control target
= control target key end

     0   :  { %s344_s14 = smov 0   ;;  %s364_s0 = inlined_call_operand.vmem [shape: bf16[32,5,64], index: 0, kind: input, shape index: {}]   ;;  %s365_s1 = inlined_call_operand.vmem [shape: bf16[1,5], index: 1, kind: input, shape index: {}]   ;;  %s366_s2 = inlined_call_operand.<no memory space> [shape: f32[1,1], index: 2, kind: input, shape index: {}]   ;;  %s367_s3 = inlined_call_operand.vmem [shape: f32[32,1,64], index: 3, kind: output, shape index: {}]  }
   0x1   :  { %v8_v0 = vstv %s366_s2 }
   0x2   :  { %9 = vst [vmem:[#allocation2] sm:$0x1] %v8_v0 }
   0x3 LB: > { %s279_s15 = sadd.s32 4294967295, %s315_s14   ;;  %p283_p0 = scmp.ge.s32.totalorder %s315_s14, 1  ;;  %s315_s14 = sphi %s344_s14, %s15_s14  }
   0x4   : > { %p138_p1 = scmp.lt.s32.totalorder %s315_s14, 33 }
   0x6   : > { %p139_p2 = pnand %p283_p0, %p138_p1 }
   0x7   : > { %p159_p3 = scmp.lt.s32.totalorder (!%p139_p2), %s279_s15, 31  ;;  %vm183_vm0 = vcmask (!%p139_p2), 1041408   ;;  %v317_v1 = vmov (!%p139_p2), 0.0   ;;  %vm184_vm1 = vcmask (!%p139_p2), 1042432   ;;  %v318_v2 = vmov (!%p139_p2), 65535  }
   0x8   : > { %142 = sbr.rel (%p139_p2) target bundleno = 239 (0xef), region = 32  ;;  %290 = vmatprep.subr.bf16.mxu0 (!%p139_p2), %v317_v1  ;;  %v185_v3 = vsel (!%p139_p2), %vm183_vm0, 4294967295, %v318_v2  ;;  %vm319_vm2 = vmmov (!%p139_p2), 0   ;;  %v320_v4 = vmov (!%p139_p2), 0   ;;  %v167_v9 = vld [vmem:[%s365_s1] sm:$0x1] (!%p139_p2)  ;;  %v175_v10 = vlaneseq (!%p139_p2) }
   0x9   : > { %292 = vmatprep.mubr.msk.bf16.mxu0 (!%p139_p2), %vm319_vm2, %v317_v1  ;;  %308 = vset.pattern.permute.xlu0 (!%p139_p2), %v320_v4  ;;  %v169_v5 = vld [vmem:[#allocation2] sm:$0x1] (!%p139_p2)  ;;  %v186_v6 = vsel (!%p139_p2), %vm184_vm1, %v185_v3, 0  ;;  %vm179_vm3 = vcmask (!%p139_p2), 39936   ;;  %vm230_vm4 = vcmask (!%p139_p2), 516096  }
   0xa   : > { %172 = vperm.xlu0 (!%p139_p2), %308, %v169_v5   ;;  %v176_v11 = vshrl.u32 (!%p139_p2), %v175_v10, 7 }
   0xc   : > { %v177_v12 = vsub.s32 (!%p139_p2), 0, %v176_v11 }
   0xf   : > { %s369_s15 = smov (!%p159_p3, %s279_s15), 31 }
  0x10   : > { %s284_s2 = sshll.u32 %s369_s15, 2  ;;  %s165_s23 = scalar_lea.vmem %s367_s3, %s369_s15 }
  0x11   : > { %s162_s18 = scalar_lea.vmem %s364_s0, %s284_s2 }
  0x12   : > { %v168_v7 = vld [vmem:[%s162_s18] sm:$0x7] }
  0x13   : > { %v188_v8 = vand.u32 %v186_v6, %v168_v7 }
  0x15   : > { %291 = vmatpush3.bf16.msra.mxu0 %v188_v8 }
  0x18   : > { %293 = vmatmul.mubr.msk.bf16.vlgmr.msra.gmra.mrb[0].mxu0 %vm179_vm3, %v167_v9 }
  0x89   : > { %v173_v13 = vpop.permute.xlu0 %172 }
  0x8a   : > { %v178_v14 = vrot.slane %v173_v13, %v177_v12 }
  0xeb   : > { %v224_v15 = vpop.f32.mrb[0].mxu0 }
  0xec   : > { %v225_v16 = vadd.f32 %v224_v15, %v178_v14  ;;  %v294_v17 = vpop.f32.mrb[1].mxu0 }
  0xed   : > { %v227_v18 = vpop.f32.mrb[2].mxu0 }
  0xee   : > { %231 = vst.msk [vmem:[%s165_s23] sm:$0x1] %vm230_vm4, %v225_v16  ;;  %v295_v19 = vpop.f32.mrb[3].mxu0 }
  0xef PF: > { %s15_s14 = sadd.s32 1, %s315_s14  }
  0xf0   : > { %p12_p4 = scmp.ge.s32.totalorder %s15_s14, 34  }
  0xf2   :  { %14 = sbr.rel (!%p12_p4) target bundleno = 3 (0x3), region = 62 }

</bundles_post_ra>
